<compile_context>
chip_gen: v7x
topology: tpu7x:2x2x1
jax: 0.10.0
libtpu: 0.0.40
codegen_flags: <defaults>
</compile_context>

<pallas_src>
import functools

import jax
import jax.numpy as jnp
from jax.experimental import pallas as pl
from jax.experimental.pallas import tpu as pltpu


# ------------------------------ fused kernel --------------------------------

def _make_layer_kernel(nsegs, H):
    """Kernel factory: `nsegs` prior-feature segments, image height H.

    Ref order: for each segment k: [stripes(1,1,TH+2,W+2,Ck), s1(1,Ck),
    t1(1,Ck), w1(Ck,Fg) bf16], then b1(1,Fg) f32 (BN2+bias folded),
    w3(3,Fg,3G) bf16, b3(1,G) f32, out(1,TH,W,G) f32.
    """

    def kernel(*refs):
        o_ref = refs[-1]
        b1_ref, w3_ref, b3_ref = refs[4 * nsegs: 4 * nsegs + 3]
        TH, W, G = o_ref.shape[1], o_ref.shape[2], o_ref.shape[3]
        Fg = w3_ref.shape[1]
        row0 = pl.program_id(1) * TH          # padded-row index of local row 0
        npix = (TH + 2) * (W + 2)

        # ---- BN1 -> ReLU -> 1x1 conv (BN2 + bias already folded into w1/b1).
        # One matmul per prior feature segment (K split); memory-bound op, so
        # the extra MXU passes are free and we avoid a VMEM concat copy.
        a1 = None
        for k in range(nsegs):
            xk = refs[4 * k][0, 0]                         # (TH+2, W+2, Ck)
            s1 = refs[4 * k + 1][...]
            t1 = refs[4 * k + 2][...]
            w1 = refs[4 * k + 3][...]                      # bf16 (Ck, Fg)
            ck = xk.shape[-1]
            xr = jnp.maximum(xk.reshape(npix, ck) * s1 + t1, 0.0)
            d = jnp.dot(xr.astype(jnp.bfloat16), w1,
                        preferred_element_type=jnp.float32)
            a1 = d if a1 is None else a1 + d
        a2 = jnp.maximum(a1 + b1_ref[...], 0.0).reshape(TH + 2, W + 2, Fg)

        # ---- zero a2 at the 3x3 conv's zero-pad positions.  2-D iota mask
        # (broadcast over Fg) instead of full (TH+2,W+2,Fg) iotas.
        icol = jax.lax.broadcasted_iota(jnp.int32, (TH + 2, W + 2, 1), 1)
        irow = jax.lax.broadcasted_iota(jnp.int32, (TH + 2, W + 2, 1), 0) + row0
        oob = (icol == 0) | (icol == W + 1) | (irow == 0) | (irow == H + 1)
        a2 = jnp.where(oob, 0.0, a2).astype(jnp.bfloat16)

        # ---- 3x3 conv: 3 fat matmuls (one per kernel row, N = 3*G, bf16 in /
        # f32 acc).  The dw-tap reduction (lane-unaligned slices for G not a
        # multiple of 128) is deferred so it runs once, not once per dh.
        accw = None
        for dh in range(3):
            slab = a2[dh:dh + TH].reshape(TH * (W + 2), Fg)
            r = jnp.dot(slab, w3_ref[dh], preferred_element_type=jnp.float32)
            accw = r if accw is None else accw + r
        accw = accw.reshape(TH, W + 2, 3 * G)
        out = (accw[:, 0:W, 0:G] + accw[:, 1:W + 1, G:2 * G]
               + accw[:, 2:W + 2, 2 * G:3 * G] + b3_ref[...])
        # TODO(synk): Dropout2d(0.3) is identity in eval mode; training-mode
        # stochastic channel dropout is not implemented here.
        o_ref[0] = out.astype(o_ref.dtype)

    return kernel


# --------------------------- tiling / VMEM sizing ----------------------------

def _vmem_bytes_estimate(th, W, seg_ch, Fg, G):
    pix = (th + 2) * (W + 2)
    ctot, cmax = sum(seg_ch), max(seg_ch)
    b = 2 * pix * ctot * 4                     # double-buffered input stripes
    b += 2 * th * W * G * 4                    # double-buffered output block
    b += pix * Fg * 4 + pix * Fg * 2           # a1 (f32) + a2 (bf16)
    b += pix * cmax * 6                        # xr temporaries
    b += 2 * th * (W + 2) * 3 * G * 4          # accw + tap-reduce temp
    b += 2 * (ctot * Fg + 9 * Fg * G) * 2      # bf16 weights (double-buffered)
    return b + (1 << 20)                       # misc slack


def _pick_row_stripe(H, W, seg_ch, Fg, G, target_rows, vmem_budget):
    """Largest divisor of H that is <= target_rows and fits the VMEM budget."""
    target = max(1, min(int(target_rows), H))
    best = 1
    for th in range(1, H + 1):
        if H % th:
            continue
        if th > target:
            break
        if _vmem_bytes_estimate(th, W, seg_ch, Fg, G) <= vmem_budget:
            best = th
    # TODO(synk): no W tiling -- very wide images may still need a W split.
    return best


def _stripes_with_halo(f, TH):
    """(N, H, W, C) -> (N, S, TH+2, W+2, C) overlapping row stripes, zero halo."""
    N, H, W, C = f.shape
    S = H // TH
    fp = jnp.pad(f, ((0, 0), (1, 1), (1, 1), (0, 0)))
    return jnp.stack([fp[:, s * TH:s * TH + TH + 2] for s in range(S)], axis=1)


# ------------------------------ layer wrapper --------------------------------

def dense_layer_forward(feat_stripes, params, *, image_h, vmem_limit_bytes):
    """One Dense_Layer.  feat_stripes: list of (N,S,TH+2,W+2,Ck) striped
    features in internal order [x0, out_1, ..., out_{i-1}].  Returns only the
    new G-channel feature, (N, H, W, G) f32 (pass-through is never rewritten).
    """
    nsegs = len(feat_stripes)
    N, S, thp2, wp2, _ = feat_stripes[0].shape
    TH, W, H = thp2 - 2, wp2 - 2, image_h
    Fg = params["w1"].shape[1]
    G = params["b3"].shape[1]
    seg_ch = [f.shape[-1] for f in feat_stripes]

    # Fold BN2 scale/bias and the 1x1-conv bias into the 1x1 weight (host side).
    s2 = params["bn2_scale"].reshape(Fg)
    t2 = params["bn2_bias"].reshape(Fg)
    w1f = (params["w1"] * s2[None, :]).astype(jnp.bfloat16)          # (Cin, Fg)
    b1f = (params["b1"].reshape(Fg) * s2 + t2).reshape(1, Fg)

    # PyTorch channel order for this layer is [out_{i-1},...,out_1,x0], i.e.
    # the reverse of the internal segment order: slice BN1 / w1 rows per seg.
    offs = [sum(seg_ch[j + 1:]) for j in range(nsegs)]

    inputs, in_specs = [], []
    for j in range(nsegs):
        ck, o = seg_ch[j], offs[j]
        inputs += [feat_stripes[j],
                   params["bn1_scale"][:, o:o + ck],
                   params["bn1_bias"][:, o:o + ck],
                   w1f[o:o + ck]]
        in_specs += [
            pl.BlockSpec((1, 1, TH + 2, W + 2, ck), lambda n, s: (n, s, 0, 0, 0)),
            pl.BlockSpec((1, ck), lambda n, s: (0, 0)),
            pl.BlockSpec((1, ck), lambda n, s: (0, 0)),
            pl.BlockSpec((ck, Fg), lambda n, s: (0, 0)),
        ]
    inputs += [b1f, params["w3"].astype(jnp.bfloat16), params["b3"]]
    in_specs += [
        pl.BlockSpec((1, Fg), lambda n, s: (0, 0)),
        pl.BlockSpec((3, Fg, 3 * G), lambda n, s: (0, 0, 0)),
        pl.BlockSpec((1, G), lambda n, s: (0, 0)),
    ]

    ctot = sum(seg_ch)
    flops = 2 * N * S * ((TH + 2) * (W + 2) * ctot * Fg
                         + 3 * TH * (W + 2) * Fg * 3 * G)
    bytes_acc = 4 * (N * S * (TH + 2) * (W + 2) * ctot + N * H * W * G) \
        + 2 * (ctot * Fg + 9 * Fg * G)

    return pl.pallas_call(
        _make_layer_kernel(nsegs, H),
        out_shape=jax.ShapeDtypeStruct((N, H, W, G), jnp.float32),
        grid=(N, S),
        in_specs=in_specs,
        out_specs=pl.BlockSpec((1, TH, W, G), lambda n, s: (n, s, 0, 0)),
        compiler_params=pltpu.CompilerParams(
            dimension_semantics=("parallel", "parallel"),
            vmem_limit_bytes=vmem_limit_bytes),
        cost_estimate=pl.CostEstimate(flops=int(flops), transcendentals=0,
                                      bytes_accessed=int(bytes_acc)),
    )(*inputs)


def dense_block_forward(x_nchw, layer_params, *, row_stripe=32,
                        vmem_budget_bytes=18 * (1 << 20)):
    """DenseBlock forward. x_nchw: (N, C, H, W). Returns NCHW."""
    x0 = jnp.transpose(x_nchw, (0, 2, 3, 1)).astype(jnp.float32)     # -> NHWC
    N, H, W, C0 = x0.shape
    L = len(layer_params)
    Fg = layer_params[0]["w1"].shape[1]
    G = layer_params[0]["b3"].shape[1]

    # Pick the row stripe against the *widest* (last) layer's working set so
    # one striping is shared by all layers; leave VMEM headroom for v7x.
    max_seg_ch = [C0] + [G] * max(L - 1, 0)
    TH = _pick_row_stripe(H, W, max_seg_ch, Fg, G, row_stripe, vmem_budget_bytes)
    est = _vmem_bytes_estimate(TH, W, max_seg_ch, Fg, G)
    vmem_limit = int(min(48 * (1 << 20), max(32 * (1 << 20), int(1.5 * est))))

    feats = [x0]                               # plain features, internal order
    feat_stripes = [_stripes_with_halo(x0, TH)]
    for i, p in enumerate(layer_params):
        out = dense_layer_forward(feat_stripes, p, image_h=H,
                                  vmem_limit_bytes=vmem_limit)
        feats.append(out)
        if i + 1 < L:                          # only needed by later layers
            feat_stripes.append(_stripes_with_halo(out, TH))

    # torch.cat((out, x), 1) order == [out_L, ..., out_1, x0]
    y = jnp.concatenate(feats[::-1], axis=-1)
    return jnp.transpose(y, (0, 3, 1, 2))                             # -> NCHW


# ---------------------------- parameter creation -----------------------------

def _fold_bn(gamma, beta, mean, var, eps=1e-5):
    scale = gamma / jnp.sqrt(var + eps)
    bias = beta - mean * scale
    return scale, bias


def make_dense_layer_params(key, in_channels, growth_rate, F=2):
    Fg = F * growth_rate
    ks = jax.random.split(key, 12)
    # BN1 (in_channels), folded to scale/bias (inference mode)
    g1 = 1.0 + 0.1 * jax.random.normal(ks[0], (in_channels,), jnp.float32)
    b1 = 0.1 * jax.random.normal(ks[1], (in_channels,), jnp.float32)
    m1 = 0.05 * jax.random.normal(ks[2], (in_channels,), jnp.float32)
    v1 = 1.0 + 0.1 * jax.random.uniform(ks[3], (in_channels,), jnp.float32)
    s1, t1 = _fold_bn(g1, b1, m1, v1)
    # Conv 1x1: torch weight (Fg, Cin, 1, 1) -> (Cin, Fg)
    w1 = 0.1 * jax.random.normal(ks[4], (in_channels, Fg), jnp.float32)
    cb1 = 0.05 * jax.random.normal(ks[5], (Fg,), jnp.float32)
    # BN2 (Fg)
    g2 = 1.0 + 0.1 * jax.random.normal(ks[6], (Fg,), jnp.float32)
    b2 = 0.1 * jax.random.normal(ks[7], (Fg,), jnp.float32)
    m2 = 0.05 * jax.random.normal(ks[8], (Fg,), jnp.float32)
    v2 = 1.0 + 0.1 * jax.random.uniform(ks[9], (Fg,), jnp.float32)
    s2, t2 = _fold_bn(g2, b2, m2, v2)
    # Conv 3x3: (dh, dw, Fg, G) packed per dh as (Fg, [dw0|dw1|dw2] * G)
    w3 = 0.05 * jax.random.normal(ks[10], (3, 3, Fg, growth_rate), jnp.float32)
    w3p = jnp.transpose(w3, (0, 2, 1, 3)).reshape(3, Fg, 3 * growth_rate)
    cb3 = 0.05 * jax.random.normal(ks[11], (growth_rate,), jnp.float32)
    return {
        "bn1_scale": s1.reshape(1, in_channels),
        "bn1_bias": t1.reshape(1, in_channels),
        "w1": w1,
        "b1": cb1.reshape(1, Fg),
        "bn2_scale": s2.reshape(1, Fg),
        "bn2_bias": t2.reshape(1, Fg),
        "w3": w3p,
        "b3": cb3.reshape(1, growth_rate),
    }


def make_dense_block_params(key, in_channel, num_layers, growth_rate):
    params = []
    channel = in_channel
    keys = jax.random.split(key, num_layers)
    for i in range(num_layers):
        params.append(make_dense_layer_params(keys[i], channel, growth_rate))
        channel += growth_rate
    return params, channel


# ---------------------------- pure-JAX reference -----------------------------

def _dense_layer_ref(x_nhwc, p):
    hi = jax.lax.Precision.HIGHEST
    a = x_nhwc * p["bn1_scale"][None, None] + p["bn1_bias"][None, None]
    a = jnp.maximum(a, 0.0)
    a = jnp.einsum("nhwc,cf->nhwf", a, p["w1"], precision=hi)
    a = a + p["b1"][None, None]
    a = jnp.maximum(a * p["bn2_scale"][None, None] + p["bn2_bias"][None, None],
                    0.0)
    Fg = p["w1"].shape[1]
    G = p["b3"].shape[1]
    w_hwio = p["w3"].reshape(3, Fg, 3, G).transpose(0, 2, 1, 3)   # (kh,kw,I,O)
    out = jax.lax.conv_general_dilated(
        a, w_hwio, window_strides=(1, 1), padding=((1, 1), (1, 1)),
        dimension_numbers=("NHWC", "HWIO", "NHWC"), precision=hi)
    return out + p["b3"][None, None]


def dense_block_ref(x_nchw, layer_params):
    x = jnp.transpose(x_nchw, (0, 2, 3, 1)).astype(jnp.float32)
    for p in layer_params:
        out = _dense_layer_ref(x, p)
        x = jnp.concatenate([out, x], axis=-1)
    return jnp.transpose(x, (0, 3, 1, 2))


# ---------------------------------- main -------------------------------------

if __name__ == "__main__":
    key = jax.random.PRNGKey(0)
    kx, kp = jax.random.split(key)

    N, C, H, W = 2, 4, 16, 16
    num_layers = 2
    growth_rate = 16   # small synthetic config (module default is 48)

    x = jax.random.normal(kx, (N, C, H, W), jnp.float32)
    layer_params, out_channels = make_dense_block_params(
        kp, C, num_layers, growth_rate)

    fwd = jax.jit(functools.partial(dense_block_forward,
                                    layer_params=layer_params,
                                    row_stripe=8))   # 2 stripes -> grid (2, 2)
    y = jax.block_until_ready(fwd(x))

    expected = (N, C + num_layers * growth_rate, H, W)
    assert y.shape == expected, (y.shape, expected)
    assert bool(jnp.all(jnp.isfinite(y)))

    # correctness vs. pure-JAX reference (eval-mode semantics; bf16-MXU tol)
    y_ref = dense_block_ref(x, layer_params)
    max_err = float(jnp.max(jnp.abs(y - y_ref)))
    assert max_err < 3e-2, max_err

    print("KERNEL_OK")
</pallas_src>

<mosaic_0001>
module attributes {stable_mosaic.version = 11 : i64} {
  func.func @kernel(%arg0: i32, %arg1: i32, %arg2: memref<1x1x10x18x4xf32, #tpu.memory_space<vmem>>, %arg3: memref<1x4xf32, #tpu.memory_space<vmem>>, %arg4: memref<1x4xf32, #tpu.memory_space<vmem>>, %arg5: memref<4x32xbf16, #tpu.memory_space<vmem>>, %arg6: memref<1x32xf32, #tpu.memory_space<vmem>>, %arg7: memref<3x32x48xbf16, #tpu.memory_space<vmem>>, %arg8: memref<1x16xf32, #tpu.memory_space<vmem>>, %arg9: memref<1x8x16x16xf32, #tpu.memory_space<vmem>>) attributes {dimension_semantics = [#tpu.dimension_semantics<parallel>, #tpu.dimension_semantics<parallel>], iteration_bounds = array<i64: 2, 2>, scalar_prefetch = 0 : i64, scratch_operands = 0 : i64, tpu.core_type = #tpu.core_type<tc>, window_params = [{transform_indices = @transform_0, window_bounds = array<i64: 1, 1, 10, 18, 4>}, {pipeline_mode = #tpu.pipeline_mode<synchronous>, transform_indices = @transform_1, window_bounds = array<i64: 1, 4>}, {pipeline_mode = #tpu.pipeline_mode<synchronous>, transform_indices = @transform_2, window_bounds = array<i64: 1, 4>}, {pipeline_mode = #tpu.pipeline_mode<synchronous>, transform_indices = @transform_3, window_bounds = array<i64: 4, 32>}, {pipeline_mode = #tpu.pipeline_mode<synchronous>, transform_indices = @transform_4, window_bounds = array<i64: 1, 32>}, {pipeline_mode = #tpu.pipeline_mode<synchronous>, transform_indices = @transform_5, window_bounds = array<i64: 3, 32, 48>}, {pipeline_mode = #tpu.pipeline_mode<synchronous>, transform_indices = @transform_6, window_bounds = array<i64: 1, 16>}, {transform_indices = @transform_7, window_bounds = array<i64: 1, 8, 16, 16>}]} {
    %c8_i32 = arith.constant 8 : i32
    %0 = arith.muli %arg1, %c8_i32 : i32
    %c0 = arith.constant 0 : index
    %c0_0 = arith.constant 0 : index
    %c0_1 = arith.constant 0 : index
    %c0_2 = arith.constant 0 : index
    %c0_3 = arith.constant 0 : index
    %1 = vector.load %arg2[%c0, %c0_0, %c0_1, %c0_2, %c0_3] : memref<1x1x10x18x4xf32, #tpu.memory_space<vmem>>, vector<1x1x10x18x4xf32>
    %2 = vector.shape_cast %1 : vector<1x1x10x18x4xf32> to vector<10x18x4xf32>
    %c0_4 = arith.constant 0 : index
    %c0_5 = arith.constant 0 : index
    %3 = vector.load %arg3[%c0_4, %c0_5] : memref<1x4xf32, #tpu.memory_space<vmem>>, vector<1x4xf32>
    %c0_6 = arith.constant 0 : index
    %c0_7 = arith.constant 0 : index
    %4 = vector.load %arg4[%c0_6, %c0_7] : memref<1x4xf32, #tpu.memory_space<vmem>>, vector<1x4xf32>
    %c0_8 = arith.constant 0 : index
    %c0_9 = arith.constant 0 : index
    %5 = vector.load %arg5[%c0_8, %c0_9] : memref<4x32xbf16, #tpu.memory_space<vmem>>, vector<4x32xbf16>
    %6 = vector.shape_cast %2 : vector<10x18x4xf32> to vector<180x4xf32>
    %7 = vector.broadcast %3 : vector<1x4xf32> to vector<180x4xf32>
    %8 = arith.mulf %6, %7 : vector<180x4xf32>
    %9 = vector.broadcast %4 : vector<1x4xf32> to vector<180x4xf32>
    %10 = arith.addf %8, %9 : vector<180x4xf32>
    %cst = arith.constant 0.000000e+00 : f32
    %11 = vector.broadcast %cst : f32 to vector<180x4xf32>
    %12 = arith.maximumf %10, %11 : vector<180x4xf32>
    %13 = arith.truncf %12 : vector<180x4xf32> to vector<180x4xbf16>
    %cst_10 = arith.constant dense<0.000000e+00> : vector<180x32xf32>
    %14 = tpu.matmul %13, %5, %cst_10 {dimension_numbers = #tpu.dot_dimension_numbers<[1], [0], [0], [1], [0, 0, 1, 1], [], []>} : vector<180x4xbf16>, vector<4x32xbf16>, vector<180x32xf32> -> vector<180x32xf32>
    %c0_11 = arith.constant 0 : index
    %c0_12 = arith.constant 0 : index
    %15 = vector.load %arg6[%c0_11, %c0_12] : memref<1x32xf32, #tpu.memory_space<vmem>>, vector<1x32xf32>
    %16 = vector.broadcast %15 : vector<1x32xf32> to vector<180x32xf32>
    %17 = arith.addf %14, %16 : vector<180x32xf32>
    %cst_13 = arith.constant 0.000000e+00 : f32
    %18 = vector.broadcast %cst_13 : f32 to vector<180x32xf32>
    %19 = arith.maximumf %17, %18 : vector<180x32xf32>
    %20 = vector.shape_cast %19 : vector<180x32xf32> to vector<10x18x32xf32>
    %21 = tpu.iota {dimensions = array<i32: 1>} : vector<10x18x1xi32>
    %22 = tpu.iota {dimensions = array<i32: 0>} : vector<10x18x1xi32>
    %23 = vector.broadcast %0 : i32 to vector<10x18x1xi32>
    %24 = arith.addi %22, %23 : vector<10x18x1xi32>
    %c0_i32 = arith.constant 0 : i32
    %25 = vector.broadcast %c0_i32 : i32 to vector<10x18x1xi32>
    %26 = arith.cmpi eq, %21, %25 : vector<10x18x1xi32>
    %c17_i32 = arith.constant 17 : i32
    %27 = vector.broadcast %c17_i32 : i32 to vector<10x18x1xi32>
    %28 = arith.cmpi eq, %21, %27 : vector<10x18x1xi32>
    %29 = arith.ori %26, %28 : vector<10x18x1xi1>
    %c0_i32_14 = arith.constant 0 : i32
    %30 = vector.broadcast %c0_i32_14 : i32 to vector<10x18x1xi32>
    %31 = arith.cmpi eq, %24, %30 : vector<10x18x1xi32>
    %32 = arith.ori %29, %31 : vector<10x18x1xi1>
    %c17_i32_15 = arith.constant 17 : i32
    %33 = vector.broadcast %c17_i32_15 : i32 to vector<10x18x1xi32>
    %34 = arith.cmpi eq, %24, %33 : vector<10x18x1xi32>
    %35 = arith.ori %32, %34 : vector<10x18x1xi1>
    %cst_16 = arith.constant 0.000000e+00 : f32
    %36 = vector.shape_cast %35 : vector<10x18x1xi1> to vector<10x18x1xi1>
    %37 = vector.broadcast %36 : vector<10x18x1xi1> to vector<10x18x32xi1>
    %38 = vector.broadcast %cst_16 : f32 to vector<10x18x32xf32>
    %39 = arith.select %37, %38, %20 : vector<10x18x32xi1>, vector<10x18x32xf32>
    %40 = arith.truncf %39 : vector<10x18x32xf32> to vector<10x18x32xbf16>
    %41 = vector.extract_strided_slice %40 {offsets = [0, 0, 0], sizes = [8, 18, 32], strides = [1, 1, 1]} : vector<10x18x32xbf16> to vector<8x18x32xbf16>
    %42 = vector.shape_cast %41 : vector<8x18x32xbf16> to vector<144x32xbf16>
    %c0_17 = arith.constant 0 : index
    %c0_18 = arith.constant 0 : index
    %c0_19 = arith.constant 0 : index
    %43 = vector.load %arg7[%c0_17, %c0_18, %c0_19] : memref<3x32x48xbf16, #tpu.memory_space<vmem>>, vector<1x32x48xbf16>
    %44 = vector.shape_cast %43 : vector<1x32x48xbf16> to vector<32x48xbf16>
    %cst_20 = arith.constant dense<0.000000e+00> : vector<144x48xf32>
    %45 = tpu.matmul %42, %44, %cst_20 {dimension_numbers = #tpu.dot_dimension_numbers<[1], [0], [0], [1], [0, 0, 1, 1], [], []>} : vector<144x32xbf16>, vector<32x48xbf16>, vector<144x48xf32> -> vector<144x48xf32>
    %46 = vector.extract_strided_slice %40 {offsets = [1, 0, 0], sizes = [8, 18, 32], strides = [1, 1, 1]} : vector<10x18x32xbf16> to vector<8x18x32xbf16>
    %47 = vector.shape_cast %46 : vector<8x18x32xbf16> to vector<144x32xbf16>
    %c1 = arith.constant 1 : index
    %c0_21 = arith.constant 0 : index
    %c0_22 = arith.constant 0 : index
    %48 = vector.load %arg7[%c1, %c0_21, %c0_22] : memref<3x32x48xbf16, #tpu.memory_space<vmem>>, vector<1x32x48xbf16>
    %49 = vector.shape_cast %48 : vector<1x32x48xbf16> to vector<32x48xbf16>
    %cst_23 = arith.constant dense<0.000000e+00> : vector<144x48xf32>
    %50 = tpu.matmul %47, %49, %cst_23 {dimension_numbers = #tpu.dot_dimension_numbers<[1], [0], [0], [1], [0, 0, 1, 1], [], []>} : vector<144x32xbf16>, vector<32x48xbf16>, vector<144x48xf32> -> vector<144x48xf32>
    %51 = arith.addf %45, %50 : vector<144x48xf32>
    %52 = vector.extract_strided_slice %40 {offsets = [2, 0, 0], sizes = [8, 18, 32], strides = [1, 1, 1]} : vector<10x18x32xbf16> to vector<8x18x32xbf16>
    %53 = vector.shape_cast %52 : vector<8x18x32xbf16> to vector<144x32xbf16>
    %c2 = arith.constant 2 : index
    %c0_24 = arith.constant 0 : index
    %c0_25 = arith.constant 0 : index
    %54 = vector.load %arg7[%c2, %c0_24, %c0_25] : memref<3x32x48xbf16, #tpu.memory_space<vmem>>, vector<1x32x48xbf16>
    %55 = vector.shape_cast %54 : vector<1x32x48xbf16> to vector<32x48xbf16>
    %cst_26 = arith.constant dense<0.000000e+00> : vector<144x48xf32>
    %56 = tpu.matmul %53, %55, %cst_26 {dimension_numbers = #tpu.dot_dimension_numbers<[1], [0], [0], [1], [0, 0, 1, 1], [], []>} : vector<144x32xbf16>, vector<32x48xbf16>, vector<144x48xf32> -> vector<144x48xf32>
    %57 = arith.addf %51, %56 : vector<144x48xf32>
    %58 = vector.shape_cast %57 : vector<144x48xf32> to vector<8x18x48xf32>
    %59 = vector.extract_strided_slice %58 {offsets = [0, 0, 0], sizes = [8, 16, 16], strides = [1, 1, 1]} : vector<8x18x48xf32> to vector<8x16x16xf32>
    %60 = vector.extract_strided_slice %58 {offsets = [0, 1, 16], sizes = [8, 16, 16], strides = [1, 1, 1]} : vector<8x18x48xf32> to vector<8x16x16xf32>
    %61 = arith.addf %59, %60 : vector<8x16x16xf32>
    %62 = vector.extract_strided_slice %58 {offsets = [0, 2, 32], sizes = [8, 16, 16], strides = [1, 1, 1]} : vector<8x18x48xf32> to vector<8x16x16xf32>
    %63 = arith.addf %61, %62 : vector<8x16x16xf32>
    %c0_27 = arith.constant 0 : index
    %c0_28 = arith.constant 0 : index
    %64 = vector.load %arg8[%c0_27, %c0_28] : memref<1x16xf32, #tpu.memory_space<vmem>>, vector<1x16xf32>
    %65 = vector.shape_cast %64 : vector<1x16xf32> to vector<1x1x16xf32>
    %66 = vector.broadcast %65 : vector<1x1x16xf32> to vector<8x16x16xf32>
    %67 = arith.addf %63, %66 : vector<8x16x16xf32>
    %c0_29 = arith.constant 0 : index
    %c0_30 = arith.constant 0 : index
    %c0_31 = arith.constant 0 : index
    %c0_32 = arith.constant 0 : index
    %68 = vector.load %arg9[%c0_29, %c0_30, %c0_31, %c0_32] : memref<1x8x16x16xf32, #tpu.memory_space<vmem>>, vector<1x8x16x16xf32>
    %69 = vector.shape_cast %68 : vector<1x8x16x16xf32> to vector<8x16x16xf32>
    %70 = vector.shape_cast %67 : vector<8x16x16xf32> to vector<1x8x16x16xf32>
    tpu.vector_store %arg9[%c0_29, %c0_30, %c0_31, %c0_32], %70 {strides = array<i32>} : memref<1x8x16x16xf32, #tpu.memory_space<vmem>>, vector<1x8x16x16xf32>,
    return
  }
  func.func @transform_0(%arg0: i32, %arg1: i32) -> (i32, i32, i32, i32, i32) {
    %c0_i32 = arith.constant 0 : i32
    %c0_i32_0 = arith.constant 0 : i32
    %c0_i32_1 = arith.constant 0 : i32
    %c0_i32_2 = arith.constant 0 : i32
    return %arg0, %arg1, %c0_i32, %c0_i32_0, %c0_i32_1 : i32, i32, i32, i32, i32
  }
  func.func @transform_1(%arg0: i32, %arg1: i32) -> (i32, i32) {
    %c0_i32 = arith.constant 0 : i32
    %c0_i32_0 = arith.constant 0 : i32
    %c0_i32_1 = arith.constant 0 : i32
    return %c0_i32, %c0_i32_0 : i32, i32
  }
  func.func @transform_2(%arg0: i32, %arg1: i32) -> (i32, i32) {
    %c0_i32 = arith.constant 0 : i32
    %c0_i32_0 = arith.constant 0 : i32
    %c0_i32_1 = arith.constant 0 : i32
    return %c0_i32, %c0_i32_0 : i32, i32
  }
  func.func @transform_3(%arg0: i32, %arg1: i32) -> (i32, i32) {
    %c0_i32 = arith.constant 0 : i32
    %c0_i32_0 = arith.constant 0 : i32
    %c0_i32_1 = arith.constant 0 : i32
    return %c0_i32, %c0_i32_0 : i32, i32
  }
  func.func @transform_4(%arg0: i32, %arg1: i32) -> (i32, i32) {
    %c0_i32 = arith.constant 0 : i32
    %c0_i32_0 = arith.constant 0 : i32
    %c0_i32_1 = arith.constant 0 : i32
    return %c0_i32, %c0_i32_0 : i32, i32
  }
  func.func @transform_5(%arg0: i32, %arg1: i32) -> (i32, i32, i32) {
    %c0_i32 = arith.constant 0 : i32
    %c0_i32_0 = arith.constant 0 : i32
    %c0_i32_1 = arith.constant 0 : i32
    %c0_i32_2 = arith.constant 0 : i32
    return %c0_i32, %c0_i32_0, %c0_i32_1 : i32, i32, i32
  }
  func.func @transform_6(%arg0: i32, %arg1: i32) -> (i32, i32) {
    %c0_i32 = arith.constant 0 : i32
    %c0_i32_0 = arith.constant 0 : i32
    %c0_i32_1 = arith.constant 0 : i32
    return %c0_i32, %c0_i32_0 : i32, i32
  }
  func.func @transform_7(%arg0: i32, %arg1: i32) -> (i32, i32, i32, i32) {
    %c0_i32 = arith.constant 0 : i32
    %c0_i32_0 = arith.constant 0 : i32
    %c0_i32_1 = arith.constant 0 : i32
    return %arg0, %arg1, %c0_i32, %c0_i32_0 : i32, i32, i32, i32
  }
}

module attributes {stable_mosaic.version = 11 : i64} {
  func.func @kernel(%arg0: i32, %arg1: i32, %arg2: memref<1x1x10x18x4xf32, #tpu.memory_space<vmem>>, %arg3: memref<1x4xf32, #tpu.memory_space<vmem>>, %arg4: memref<1x4xf32, #tpu.memory_space<vmem>>, %arg5: memref<4x32xbf16, #tpu.memory_space<vmem>>, %arg6: memref<1x1x10x18x16xf32, #tpu.memory_space<vmem>>, %arg7: memref<1x16xf32, #tpu.memory_space<vmem>>, %arg8: memref<1x16xf32, #tpu.memory_space<vmem>>, %arg9: memref<16x32xbf16, #tpu.memory_space<vmem>>, %arg10: memref<1x32xf32, #tpu.memory_space<vmem>>, %arg11: memref<3x32x48xbf16, #tpu.memory_space<vmem>>, %arg12: memref<1x16xf32, #tpu.memory_space<vmem>>, %arg13: memref<1x8x16x16xf32, #tpu.memory_space<vmem>>) attributes {dimension_semantics = [#tpu.dimension_semantics<parallel>, #tpu.dimension_semantics<parallel>], iteration_bounds = array<i64: 2, 2>, scalar_prefetch = 0 : i64, scratch_operands = 0 : i64, tpu.core_type = #tpu.core_type<tc>, window_params = [{transform_indices = @transform_0, window_bounds = array<i64: 1, 1, 10, 18, 4>}, {pipeline_mode = #tpu.pipeline_mode<synchronous>, transform_indices = @transform_1, window_bounds = array<i64: 1, 4>}, {pipeline_mode = #tpu.pipeline_mode<synchronous>, transform_indices = @transform_2, window_bounds = array<i64: 1, 4>}, {pipeline_mode = #tpu.pipeline_mode<synchronous>, transform_indices = @transform_3, window_bounds = array<i64: 4, 32>}, {transform_indices = @transform_4, window_bounds = array<i64: 1, 1, 10, 18, 16>}, {pipeline_mode = #tpu.pipeline_mode<synchronous>, transform_indices = @transform_5, window_bounds = array<i64: 1, 16>}, {pipeline_mode = #tpu.pipeline_mode<synchronous>, transform_indices = @transform_6, window_bounds = array<i64: 1, 16>}, {pipeline_mode = #tpu.pipeline_mode<synchronous>, transform_indices = @transform_7, window_bounds = array<i64: 16, 32>}, {pipeline_mode = #tpu.pipeline_mode<synchronous>, transform_indices = @transform_8, window_bounds = array<i64: 1, 32>}, {pipeline_mode = #tpu.pipeline_mode<synchronous>, transform_indices = @transform_9, window_bounds = array<i64: 3, 32, 48>}, {pipeline_mode = #tpu.pipeline_mode<synchronous>, transform_indices = @transform_10, window_bounds = array<i64: 1, 16>}, {transform_indices = @transform_11, window_bounds = array<i64: 1, 8, 16, 16>}]} {
    %c8_i32 = arith.constant 8 : i32
    %0 = arith.muli %arg1, %c8_i32 : i32
    %c0 = arith.constant 0 : index
    %c0_0 = arith.constant 0 : index
    %c0_1 = arith.constant 0 : index
    %c0_2 = arith.constant 0 : index
    %c0_3 = arith.constant 0 : index
    %1 = vector.load %arg2[%c0, %c0_0, %c0_1, %c0_2, %c0_3] : memref<1x1x10x18x4xf32, #tpu.memory_space<vmem>>, vector<1x1x10x18x4xf32>
    %2 = vector.shape_cast %1 : vector<1x1x10x18x4xf32> to vector<10x18x4xf32>
    %c0_4 = arith.constant 0 : index
    %c0_5 = arith.constant 0 : index
    %3 = vector.load %arg3[%c0_4, %c0_5] : memref<1x4xf32, #tpu.memory_space<vmem>>, vector<1x4xf32>
    %c0_6 = arith.constant 0 : index
    %c0_7 = arith.constant 0 : index
    %4 = vector.load %arg4[%c0_6, %c0_7] : memref<1x4xf32, #tpu.memory_space<vmem>>, vector<1x4xf32>
    %c0_8 = arith.constant 0 : index
    %c0_9 = arith.constant 0 : index
    %5 = vector.load %arg5[%c0_8, %c0_9] : memref<4x32xbf16, #tpu.memory_space<vmem>>, vector<4x32xbf16>
    %6 = vector.shape_cast %2 : vector<10x18x4xf32> to vector<180x4xf32>
    %7 = vector.broadcast %3 : vector<1x4xf32> to vector<180x4xf32>
    %8 = arith.mulf %6, %7 : vector<180x4xf32>
    %9 = vector.broadcast %4 : vector<1x4xf32> to vector<180x4xf32>
    %10 = arith.addf %8, %9 : vector<180x4xf32>
    %cst = arith.constant 0.000000e+00 : f32
    %11 = vector.broadcast %cst : f32 to vector<180x4xf32>
    %12 = arith.maximumf %10, %11 : vector<180x4xf32>
    %13 = arith.truncf %12 : vector<180x4xf32> to vector<180x4xbf16>
    %cst_10 = arith.constant dense<0.000000e+00> : vector<180x32xf32>
    %14 = tpu.matmul %13, %5, %cst_10 {dimension_numbers = #tpu.dot_dimension_numbers<[1], [0], [0], [1], [0, 0, 1, 1], [], []>} : vector<180x4xbf16>, vector<4x32xbf16>, vector<180x32xf32> -> vector<180x32xf32>
    %c0_11 = arith.constant 0 : index
    %c0_12 = arith.constant 0 : index
    %c0_13 = arith.constant 0 : index
    %c0_14 = arith.constant 0 : index
    %c0_15 = arith.constant 0 : index
    %15 = vector.load %arg6[%c0_11, %c0_12, %c0_13, %c0_14, %c0_15] : memref<1x1x10x18x16xf32, #tpu.memory_space<vmem>>, vector<1x1x10x18x16xf32>
    %16 = vector.shape_cast %15 : vector<1x1x10x18x16xf32> to vector<10x18x16xf32>
    %c0_16 = arith.constant 0 : index
    %c0_17 = arith.constant 0 : index
    %17 = vector.load %arg7[%c0_16, %c0_17] : memref<1x16xf32, #tpu.memory_space<vmem>>, vector<1x16xf32>
    %c0_18 = arith.constant 0 : index
    %c0_19 = arith.constant 0 : index
    %18 = vector.load %arg8[%c0_18, %c0_19] : memref<1x16xf32, #tpu.memory_space<vmem>>, vector<1x16xf32>
    %c0_20 = arith.constant 0 : index
    %c0_21 = arith.constant 0 : index
    %19 = vector.load %arg9[%c0_20, %c0_21] : memref<16x32xbf16, #tpu.memory_space<vmem>>, vector<16x32xbf16>
    %20 = vector.shape_cast %16 : vector<10x18x16xf32> to vector<180x16xf32>
    %21 = vector.broadcast %17 : vector<1x16xf32> to vector<180x16xf32>
    %22 = arith.mulf %20, %21 : vector<180x16xf32>
    %23 = vector.broadcast %18 : vector<1x16xf32> to vector<180x16xf32>
    %24 = arith.addf %22, %23 : vector<180x16xf32>
    %cst_22 = arith.constant 0.000000e+00 : f32
    %25 = vector.broadcast %cst_22 : f32 to vector<180x16xf32>
    %26 = arith.maximumf %24, %25 : vector<180x16xf32>
    %27 = arith.truncf %26 : vector<180x16xf32> to vector<180x16xbf16>
    %cst_23 = arith.constant dense<0.000000e+00> : vector<180x32xf32>
    %28 = tpu.matmul %27, %19, %cst_23 {dimension_numbers = #tpu.dot_dimension_numbers<[1], [0], [0], [1], [0, 0, 1, 1], [], []>} : vector<180x16xbf16>, vector<16x32xbf16>, vector<180x32xf32> -> vector<180x32xf32>
    %29 = arith.addf %14, %28 : vector<180x32xf32>
    %c0_24 = arith.constant 0 : index
    %c0_25 = arith.constant 0 : index
    %30 = vector.load %arg10[%c0_24, %c0_25] : memref<1x32xf32, #tpu.memory_space<vmem>>, vector<1x32xf32>
    %31 = vector.broadcast %30 : vector<1x32xf32> to vector<180x32xf32>
    %32 = arith.addf %29, %31 : vector<180x32xf32>
    %cst_26 = arith.constant 0.000000e+00 : f32
    %33 = vector.broadcast %cst_26 : f32 to vector<180x32xf32>
    %34 = arith.maximumf %32, %33 : vector<180x32xf32>
    %35 = vector.shape_cast %34 : vector<180x32xf32> to vector<10x18x32xf32>
    %36 = tpu.iota {dimensions = array<i32: 1>} : vector<10x18x1xi32>
    %37 = tpu.iota {dimensions = array<i32: 0>} : vector<10x18x1xi32>
    %38 = vector.broadcast %0 : i32 to vector<10x18x1xi32>
    %39 = arith.addi %37, %38 : vector<10x18x1xi32>
    %c0_i32 = arith.constant 0 : i32
    %40 = vector.broadcast %c0_i32 : i32 to vector<10x18x1xi32>
    %41 = arith.cmpi eq, %36, %40 : vector<10x18x1xi32>
    %c17_i32 = arith.constant 17 : i32
    %42 = vector.broadcast %c17_i32 : i32 to vector<10x18x1xi32>
    %43 = arith.cmpi eq, %36, %42 : vector<10x18x1xi32>
    %44 = arith.ori %41, %43 : vector<10x18x1xi1>
    %c0_i32_27 = arith.constant 0 : i32
    %45 = vector.broadcast %c0_i32_27 : i32 to vector<10x18x1xi32>
    %46 = arith.cmpi eq, %39, %45 : vector<10x18x1xi32>
    %47 = arith.ori %44, %46 : vector<10x18x1xi1>
    %c17_i32_28 = arith.constant 17 : i32
    %48 = vector.broadcast %c17_i32_28 : i32 to vector<10x18x1xi32>
    %49 = arith.cmpi eq, %39, %48 : vector<10x18x1xi32>
    %50 = arith.ori %47, %49 : vector<10x18x1xi1>
    %cst_29 = arith.constant 0.000000e+00 : f32
    %51 = vector.shape_cast %50 : vector<10x18x1xi1> to vector<10x18x1xi1>
    %52 = vector.broadcast %51 : vector<10x18x1xi1> to vector<10x18x32xi1>
    %53 = vector.broadcast %cst_29 : f32 to vector<10x18x32xf32>
    %54 = arith.select %52, %53, %35 : vector<10x18x32xi1>, vector<10x18x32xf32>
    %55 = arith.truncf %54 : vector<10x18x32xf32> to vector<10x18x32xbf16>
    %56 = vector.extract_strided_slice %55 {offsets = [0, 0, 0], sizes = [8, 18, 32], strides = [1, 1, 1]} : vector<10x18x32xbf16> to vector<8x18x32xbf16>
    %57 = vector.shape_cast %56 : vector<8x18x32xbf16> to vector<144x32xbf16>
    %c0_30 = arith.constant 0 : index
    %c0_31 = arith.constant 0 : index
    %c0_32 = arith.constant 0 : index
    %58 = vector.load %arg11[%c0_30, %c0_31, %c0_32] : memref<3x32x48xbf16, #tpu.memory_space<vmem>>, vector<1x32x48xbf16>
    %59 = vector.shape_cast %58 : vector<1x32x48xbf16> to vector<32x48xbf16>
    %cst_33 = arith.constant dense<0.000000e+00> : vector<144x48xf32>
    %60 = tpu.matmul %57, %59, %cst_33 {dimension_numbers = #tpu.dot_dimension_numbers<[1], [0], [0], [1], [0, 0, 1, 1], [], []>} : vector<144x32xbf16>, vector<32x48xbf16>, vector<144x48xf32> -> vector<144x48xf32>
    %61 = vector.extract_strided_slice %55 {offsets = [1, 0, 0], sizes = [8, 18, 32], strides = [1, 1, 1]} : vector<10x18x32xbf16> to vector<8x18x32xbf16>
    %62 = vector.shape_cast %61 : vector<8x18x32xbf16> to vector<144x32xbf16>
    %c1 = arith.constant 1 : index
    %c0_34 = arith.constant 0 : index
    %c0_35 = arith.constant 0 : index
    %63 = vector.load %arg11[%c1, %c0_34, %c0_35] : memref<3x32x48xbf16, #tpu.memory_space<vmem>>, vector<1x32x48xbf16>
    %64 = vector.shape_cast %63 : vector<1x32x48xbf16> to vector<32x48xbf16>
    %cst_36 = arith.constant dense<0.000000e+00> : vector<144x48xf32>
    %65 = tpu.matmul %62, %64, %cst_36 {dimension_numbers = #tpu.dot_dimension_numbers<[1], [0], [0], [1], [0, 0, 1, 1], [], []>} : vector<144x32xbf16>, vector<32x48xbf16>, vector<144x48xf32> -> vector<144x48xf32>
    %66 = arith.addf %60, %65 : vector<144x48xf32>
    %67 = vector.extract_strided_slice %55 {offsets = [2, 0, 0], sizes = [8, 18, 32], strides = [1, 1, 1]} : vector<10x18x32xbf16> to vector<8x18x32xbf16>
    %68 = vector.shape_cast %67 : vector<8x18x32xbf16> to vector<144x32xbf16>
    %c2 = arith.constant 2 : index
    %c0_37 = arith.constant 0 : index
    %c0_38 = arith.constant 0 : index
    %69 = vector.load %arg11[%c2, %c0_37, %c0_38] : memref<3x32x48xbf16, #tpu.memory_space<vmem>>, vector<1x32x48xbf16>
    %70 = vector.shape_cast %69 : vector<1x32x48xbf16> to vector<32x48xbf16>
    %cst_39 = arith.constant dense<0.000000e+00> : vector<144x48xf32>
    %71 = tpu.matmul %68, %70, %cst_39 {dimension_numbers = #tpu.dot_dimension_numbers<[1], [0], [0], [1], [0, 0, 1, 1], [], []>} : vector<144x32xbf16>, vector<32x48xbf16>, vector<144x48xf32> -> vector<144x48xf32>
    %72 = arith.addf %66, %71 : vector<144x48xf32>
    %73 = vector.shape_cast %72 : vector<144x48xf32> to vector<8x18x48xf32>
    %74 = vector.extract_strided_slice %73 {offsets = [0, 0, 0], sizes = [8, 16, 16], strides = [1, 1, 1]} : vector<8x18x48xf32> to vector<8x16x16xf32>
    %75 = vector.extract_strided_slice %73 {offsets = [0, 1, 16], sizes = [8, 16, 16], strides = [1, 1, 1]} : vector<8x18x48xf32> to vector<8x16x16xf32>
    %76 = arith.addf %74, %75 : vector<8x16x16xf32>
    %77 = vector.extract_strided_slice %73 {offsets = [0, 2, 32], sizes = [8, 16, 16], strides = [1, 1, 1]} : vector<8x18x48xf32> to vector<8x16x16xf32>
    %78 = arith.addf %76, %77 : vector<8x16x16xf32>
    %c0_40 = arith.constant 0 : index
    %c0_41 = arith.constant 0 : index
    %79 = vector.load %arg12[%c0_40, %c0_41] : memref<1x16xf32, #tpu.memory_space<vmem>>, vector<1x16xf32>
    %80 = vector.shape_cast %79 : vector<1x16xf32> to vector<1x1x16xf32>
    %81 = vector.broadcast %80 : vector<1x1x16xf32> to vector<8x16x16xf32>
    %82 = arith.addf %78, %81 : vector<8x16x16xf32>
    %c0_42 = arith.constant 0 : index
    %c0_43 = arith.constant 0 : index
    %c0_44 = arith.constant 0 : index
    %c0_45 = arith.constant 0 : index
    %83 = vector.load %arg13[%c0_42, %c0_43, %c0_44, %c0_45] : memref<1x8x16x16xf32, #tpu.memory_space<vmem>>, vector<1x8x16x16xf32>
    %84 = vector.shape_cast %83 : vector<1x8x16x16xf32> to vector<8x16x16xf32>
    %85 = vector.shape_cast %82 : vector<8x16x16xf32> to vector<1x8x16x16xf32>
    tpu.vector_store %arg13[%c0_42, %c0_43, %c0_44, %c0_45], %85 {strides = array<i32>} : memref<1x8x16x16xf32, #tpu.memory_space<vmem>>, vector<1x8x16x16xf32>,
    return
  }
  func.func @transform_0(%arg0: i32, %arg1: i32) -> (i32, i32, i32, i32, i32) {
    %c0_i32 = arith.constant 0 : i32
    %c0_i32_0 = arith.constant 0 : i32
    %c0_i32_1 = arith.constant 0 : i32
    %c0_i32_2 = arith.constant 0 : i32
    return %arg0, %arg1, %c0_i32, %c0_i32_0, %c0_i32_1 : i32, i32, i32, i32, i32
  }
  func.func @transform_1(%arg0: i32, %arg1: i32) -> (i32, i32) {
    %c0_i32 = arith.constant 0 : i32
    %c0_i32_0 = arith.constant 0 : i32
    %c0_i32_1 = arith.constant 0 : i32
    return %c0_i32, %c0_i32_0 : i32, i32
  }
  func.func @transform_2(%arg0: i32, %arg1: i32) -> (i32, i32) {
    %c0_i32 = arith.constant 0 : i32
    %c0_i32_0 = arith.constant 0 : i32
    %c0_i32_1 = arith.constant 0 : i32
    return %c0_i32, %c0_i32_0 : i32, i32
  }
  func.func @transform_3(%arg0: i32, %arg1: i32) -> (i32, i32) {
    %c0_i32 = arith.constant 0 : i32
    %c0_i32_0 = arith.constant 0 : i32
    %c0_i32_1 = arith.constant 0 : i32
    return %c0_i32, %c0_i32_0 : i32, i32
  }
  func.func @transform_4(%arg0: i32, %arg1: i32) -> (i32, i32, i32, i32, i32) {
    %c0_i32 = arith.constant 0 : i32
    %c0_i32_0 = arith.constant 0 : i32
    %c0_i32_1 = arith.constant 0 : i32
    %c0_i32_2 = arith.constant 0 : i32
    return %arg0, %arg1, %c0_i32, %c0_i32_0, %c0_i32_1 : i32, i32, i32, i32, i32
  }
  func.func @transform_5(%arg0: i32, %arg1: i32) -> (i32, i32) {
    %c0_i32 = arith.constant 0 : i32
    %c0_i32_0 = arith.constant 0 : i32
    %c0_i32_1 = arith.constant 0 : i32
    return %c0_i32, %c0_i32_0 : i32, i32
  }
  func.func @transform_6(%arg0: i32, %arg1: i32) -> (i32, i32) {
    %c0_i32 = arith.constant 0 : i32
    %c0_i32_0 = arith.constant 0 : i32
    %c0_i32_1 = arith.constant 0 : i32
    return %c0_i32, %c0_i32_0 : i32, i32
  }
  func.func @transform_7(%arg0: i32, %arg1: i32) -> (i32, i32) {
    %c0_i32 = arith.constant 0 : i32
    %c0_i32_0 = arith.constant 0 : i32
    %c0_i32_1 = arith.constant 0 : i32
    return %c0_i32, %c0_i32_0 : i32, i32
  }
  func.func @transform_8(%arg0: i32, %arg1: i32) -> (i32, i32) {
    %c0_i32 = arith.constant 0 : i32
    %c0_i32_0 = arith.constant 0 : i32
    %c0_i32_1 = arith.constant 0 : i32
    return %c0_i32, %c0_i32_0 : i32, i32
  }
  func.func @transform_9(%arg0: i32, %arg1: i32) -> (i32, i32, i32) {
    %c0_i32 = arith.constant 0 : i32
    %c0_i32_0 = arith.constant 0 : i32
    %c0_i32_1 = arith.constant 0 : i32
    %c0_i32_2 = arith.constant 0 : i32
    return %c0_i32, %c0_i32_0, %c0_i32_1 : i32, i32, i32
  }
  func.func @transform_10(%arg0: i32, %arg1: i32) -> (i32, i32) {
    %c0_i32 = arith.constant 0 : i32
    %c0_i32_0 = arith.constant 0 : i32
    %c0_i32_1 = arith.constant 0 : i32
    return %c0_i32, %c0_i32_0 : i32, i32
  }
  func.func @transform_11(%arg0: i32, %arg1: i32) -> (i32, i32, i32, i32) {
    %c0_i32 = arith.constant 0 : i32
    %c0_i32_0 = arith.constant 0 : i32
    %c0_i32_1 = arith.constant 0 : i32
    return %arg0, %arg1, %c0_i32, %c0_i32_0 : i32, i32, i32, i32
  }
}

</mosaic_0001>

<bundles_post_ra>
// kernel: dense_block_forward.3
= control target key start
LH: loop header
LB: loop body
LE: loop exit
PB: predicated region body
PF: predicated region fallthrough
CT: control target
= control target key end

     0   :  { %s9261_s17 = smov 0   ;;  %s9263_s18 = smov 0   ;;  %s12402_s0 = inlined_call_operand.vmem [shape: f32[2,2,10,18,4], index: 0, kind: input, shape index: {}]   ;;  %s12403_s1 = inlined_call_operand.vmem [shape: f32[1,4], index: 1, kind: input, shape index: {}]   ;;  %s12404_s2 = inlined_call_operand.vmem [shape: f32[1,4], index: 2, kind: input, shape index: {}]   ;;  %s12405_s3 = inlined_call_operand.vmem [shape: bf16[4,32], index: 3, kind: input, shape index: {}]   ;;  %s12406_s4 = inlined_call_operand.vmem [shape: f32[2,2,10,18,16], index: 4, kind: input, shape index: {}]   ;;  %s12407_s5 = inlined_call_operand.vmem [shape: f32[1,16], index: 5, kind: input, shape index: {}]   ;;  %s12408_s6 = inlined_call_operand.vmem [shape: f32[1,16], index: 6, kind: input, shape index: {}]   ;;  %s12409_s7 = inlined_call_operand.vmem [shape: bf16[16,32], index: 7, kind: input, shape index: {}]   ;;  %s12410_s8 = inlined_call_operand.vmem [shape: f32[1,32], index: 8, kind: input, shape index: {}]   ;;  %s12411_s9 = inlined_call_operand.vmem [shape: bf16[3,32,48], index: 9, kind: input, shape index: {}]   ;;  %s12412_s10 = inlined_call_operand.vmem [shape: f32[1,16], index: 10, kind: input, shape index: {}]   ;;  %s12413_s11 = inlined_call_operand.vmem [shape: f32[2,16,16,16], index: 11, kind: output, shape index: {}]  }
   0x1   :  { %s9265_s19 = smov 0   ;;  %s9267_s20 = smov 0  }
   0x2   :  { %s9269_s21 = smov 0  }
   0x3 LB: > { %s30_s22 = sadd.s32 1, %s9185_s19  ;;  %s33_s23 = sadd.s32 1, %s9189_s20  ;;  %s9193_s21 = sphi %s9269_s21, %s21_s21   ;;  %s9189_s20 = sphi %s9267_s20, %s12545_s20   ;;  %s9185_s19 = sphi %s9265_s19, %s12544_s19   ;;  %s9181_s18 = sphi %s9263_s18, %s12543_s18   ;;  %s9177_s17 = sphi %s9261_s17, %s12542_s17  }
   0x4   : > { %p31_p0 = scmp.ge.s32.totalorder %s30_s22, 2  ;;  %p8610_p1 = scmp.ge.s32.totalorder %s9193_s21, 1 }
   0x5   : > { %p373_p2 = scmp.lt.s32.totalorder %s9193_s21, 5 }
   0x6   : > { %s12547_s22 = smov (%p31_p0, %s30_s22), 0  ;;  %s12549_s23 = smov (!%p31_p0, %s33_s23), %s9189_s20 }
   0x7   : > { %p374_p3 = pnand %p8610_p1, %p373_p2  ;;  %p35_p4 = scmp.ge.s32.totalorder %s12549_s23, 2 }
   0x9   : > { %s12551_s23 = smov (%p35_p4, %s12549_s23), 0  ;;  %377 = sbr.rel (%p374_p3) target bundleno = 1216 (0x4c0), region = 64 }
  0x10   : > { %v9108_v0 = vld [vmem:[%s12409_s7] sm:$0xff]   ;;  %p431_p5 = scmp.lt.s32.totalorder %s9181_s18, 1  ;;  %v529_v1 = vlaneseq  ;;  %p433_p6 = scmp.lt.s32.totalorder %s9177_s17, 1  ;;  %v9195_v3 = vmov 1983009808   ;;  %vm3455_vm0 = vcmask 1041408  }
  0x11   : > { %v8640_v2 = vld [vmem:[%s12407_s5] ss:$0 sm:$0xff]  ;;  %8807 = vmatprep.subr.bf16.mxu0 %v9108_v0  ;;  %v527_v4 = vunpack.c.l.s4 %v9195_v3  ;;  %vm3253_vm1 = vcmask 130048   ;;  %vm3418_vm2 = vcmask 31744   ;;  %vm9197_vm3 = vmmov 0  }
  0x12   : > { %s12553_s18 = smov (!%p431_p5, %s9181_s18), 1  ;;  %v9302_v5 = vshrl.u32 %v529_v1, 7  ;;  %v8641_v6 = vld [vmem:[%s12408_s6] ss:$0 sm:$0xff]  ;;  %8808 = vmatpush3.bf16.msra.mxu0 %v9108_v0  ;;  %v2423_v11 = vcombine.high %v8640_v2, %v8640_v2 }
  0x13   : > { %v494_v7 = vld [vmem:[%s12405_s3] sm:$0x3]  ;;  %s434_s13 = scalar_select %p433_p6, %s9177_s17, 1  ;;  %v528_v10 = vunpack.c.0.s8 %v527_v4  ;;  %v2539_v12 = vcombine.high %v8641_v6, %v8641_v6 }
  0x14   : > { %v8628_v8 = vld [vmem:[%s12403_s1] ss:$0 sm:$0xff]  ;;  %s9061_s25 = smul.u32 60, %s12553_s18  ;;  %9059 = vmatprep.subr.msk.bf16.mxu0 %vm3455_vm0, %v494_v7  ;;  %v9318_v13 = vsel %vm3455_vm0, %v494_v7, 0  ;;  %vm4059_vm9 = vcmp.eq.s32.totalorder %v9302_v5, 0  ;;  %s8615_s30 = sshll.u32 %s12553_s18, 5 }
  0x15   : > { %v8629_v9 = vld [vmem:[%s12404_s2] ss:$0 sm:$0xff]  ;;  %s9060_s26 = smul.u32 30, %s434_s13  ;;  %v1030_v14 = vcombine.high %v8628_v8, %v8628_v8  ;;  %v9321_v15 = vsub.s32 %v528_v10, %v9302_v5 }
  0x16   : > { %v1146_v16 = vcombine.high %v8629_v9, %v8629_v9 }
  0x17   : > { %s9323_s27 = sadd.s32 %s9061_s25, %s9060_s26  ;;  %v9327_v17 = vrot.slane %v8640_v2, %v9321_v15  ;;  %v9330_v18 = vrot.slane %v2423_v11, %v9321_v15  ;;  %v9333_v19 = vrot.slane %v8641_v6, %v9321_v15  ;;  %v9336_v20 = vrot.slane %v2539_v12, %v9321_v15  ;;  %s9199_s25 = smov 96  }
  0x18   : > { %s8611_s28 = sshll.u32 %s9323_s27, 3  ;;  %v9346_v21 = vrot.slane %v8628_v8, %v9321_v15  ;;  %v9349_v22 = vrot.slane %v1030_v14, %v9321_v15  ;;  %v9352_v23 = vrot.slane %v8629_v9, %v9321_v15  ;;  %v9355_v24 = vrot.slane %v1146_v16, %v9321_v15  ;;  %s10063_s27 = sshll.u32 %s9177_s17, 3 }
  0x19   : > { %s9343_s12 = scalar_lea.vmem %s12406_s4, %s8611_s28  ;;  %v9361_v27 = vcombine.high %v9327_v17, %v9327_v17  ;;  %v9365_v28 = vcombine.high %v9330_v18, %v9330_v18  ;;  %v9369_v29 = vcombine.high %v9333_v19, %v9333_v19  ;;  %v9373_v30 = vcombine.high %v9336_v20, %v9336_v20  ;;  %s9682_s15 = scalar_lea.vmem %s12402_s0, %s8611_s28 }
  0x1a   : > { %v1854_v25 = vld [vmem:[%s9343_s12] sm:$0xff]  ;;  %v1855_v26 = vld [vmem:[%s9343_s12 + $0x8] sm:$0xff]  ;;  %v1857_v35 = vld [vmem:[%s9343_s12 + $0x18] sm:$0xff]  ;;  %s9200_s26 = smov 112   ;;  %p452_p7 = scmp.lt.s32.totalorder %s10063_s27, 15 }
  0x1b   : > { %v1918_v31 = vcombine.high %v1854_v25, %v1854_v25  ;;  %v1925_v32 = vrot.slane %v1854_v25, %v9321_v15  ;;  %v1935_v33 = vcombine.high %v1855_v26, %v1855_v26  ;;  %v1942_v34 = vrot.slane %v1855_v26, %v9321_v15  ;;  %v1858_v36 = vld [vmem:[%s9343_s12 + $0x20] sm:$0xff]  ;;  %v8630_v6 = vld.sshfl [vmem:[%s9343_s12 + $0x10] sm:$0x3 pattern:$0x76325410] }
  0x1c   : > { %v1959_v37 = vcombine.high %v1857_v35, %v1857_v35  ;;  %v1966_v38 = vrot.slane %v1857_v35, %v9321_v15  ;;  %v1976_v39 = vcombine.high %v1858_v36, %v1858_v36  ;;  %v1983_v40 = vrot.slane %v1858_v36, %v9321_v15 }
  0x1d   : > { %v1932_v41 = vrot.slane %v1918_v31, %v9321_v15  ;;  %v1933_v42 = vcombine.high %v1925_v32, %v1925_v32  ;;  %v1949_v43 = vrot.slane %v1935_v33, %v9321_v15  ;;  %v1950_v44 = vcombine.high %v1942_v34, %v1942_v34 }
  0x1e   : > { %v2444_v45 = vmul.f32 %v9327_v17, %v1925_v32  ;;  %v2448_v46 = vmul.f32 %v9327_v17, %v1942_v34  ;;  %v1973_v47 = vrot.slane %v1959_v37, %v9321_v15  ;;  %v1974_v48 = vcombine.high %v1966_v38, %v1966_v38 }
  0x1f   : > { %v1934_v49 = vcombine.high %v1932_v41, %v1932_v41  ;;  %v1951_v50 = vcombine.high %v1949_v43, %v1949_v43  ;;  %v2445_v51 = vmul.f32 %v9361_v27, %v1933_v42  ;;  %v2446_v52 = vmul.f32 %v9330_v18, %v1932_v41 }
  0x20   : > { %v2449_v53 = vmul.f32 %v9361_v27, %v1950_v44  ;;  %v2450_v54 = vmul.f32 %v9330_v18, %v1949_v43  ;;  %v2560_v55 = vadd.f32 %v9333_v19, %v2444_v45  ;;  %v2564_v56 = vadd.f32 %v9333_v19, %v2448_v46 }
  0x21   : > { %v2447_v57 = vmul.f32 %v9365_v28, %v1934_v49  ;;  %v2451_v58 = vmul.f32 %v9365_v28, %v1951_v50  ;;  %v2561_v59 = vadd.f32 %v9369_v29, %v2445_v51  ;;  %v2562_v60 = vadd.f32 %v9336_v20, %v2446_v52 }
  0x22   : > { %v2565_v61 = vadd.f32 %v9369_v29, %v2449_v53  ;;  %v2566_v62 = vadd.f32 %v9336_v20, %v2450_v54  ;;  %v2650_v63 = vmax.f32 %v2560_v55, 0.0  ;;  %v2654_v0 = vmax.f32 %v2564_v56, 0.0 }
  0x23   : > { %v2563_v1 = vadd.f32 %v9373_v30, %v2447_v57  ;;  %v2567_v2 = vadd.f32 %v9373_v30, %v2451_v58  ;;  %v2651_v3 = vmax.f32 %v2561_v59, 0.0  ;;  %v2652_v4 = vmax.f32 %v2562_v60, 0.0  ;;  %v1860_v57 = vld [vmem:[%s9343_s12 + $0x30] sm:$0xff] }
  0x24   : > { %v2655_v7 = vmax.f32 %v2565_v61, 0.0  ;;  %v2656_v8 = vmax.f32 %v2566_v62, 0.0  ;;  %v1975_v9 = vcombine.high %v1973_v47, %v1973_v47  ;;  %v1990_v10 = vrot.slane %v1976_v39, %v9321_v15  ;;  %v9424_v62 = vld [vmem:[%s9343_s12 + $0x38] sm:$0xff] }
  0x25   : > { %v2653_v11 = vmax.f32 %v2563_v1, 0.0  ;;  %v2657_v12 = vmax.f32 %v2567_v2, 0.0  ;;  %v2830_v14 = vcombine.low %v2650_v63, %v2651_v3  ;;  %v1991_v16 = vcombine.high %v1983_v40, %v1983_v40 }
  0x26   : > { %v2847_v25 = vcombine.low %v2654_v0, %v2655_v7  ;;  %v2452_v26 = vmul.f32 %v8630_v6, %v9327_v17  ;;  %v2453_v31 = vmul.f32 %v9361_v27, %v1966_v38  ;;  %v2454_v32 = vmul.f32 %v9330_v18, %v1974_v48  ;;  %v8631_v6 = vld.sshfl [vmem:[%s9343_s12 + $0x28] sm:$0x3 pattern:$0x76325410] }
  0x27   : > { %v2831_v33 = vcombine.low %v2652_v4, %v2653_v11  ;;  %v2838_v34 = vrot.slane %v2830_v14, %v9321_v15  ;;  %v2848_v35 = vcombine.low %v2656_v8, %v2657_v12  ;;  %v2455_v36 = vmul.f32 %v9365_v28, %v1973_v47 }
  0x28   : > { %v2855_v37 = vrot.slane %v2847_v25, %v9321_v15  ;;  %v2456_v39 = vmul.f32 %v9327_v17, %v1975_v9  ;;  %v2457_v41 = vmul.f32 %v9361_v27, %v1983_v40  ;;  %v2458_v42 = vmul.f32 %v9330_v18, %v1991_v16 }
  0x29   : > { %v2845_v43 = vrot.slane %v2831_v33, %v9321_v15  ;;  %v2862_v38 = vrot.slane %v2848_v35, %v9321_v15  ;;  %v2459_v44 = vmul.f32 %v9365_v28, %v1990_v10  ;;  %v2568_v45 = vadd.f32 %v9333_v19, %v2452_v26 }
  0x2a   : > { %v2569_v46 = vadd.f32 %v9369_v29, %v2453_v31  ;;  %v2570_v47 = vadd.f32 %v9336_v20, %v2454_v32  ;;  %v2571_v48 = vadd.f32 %v9373_v30, %v2455_v36  ;;  %v2572_v40 = vadd.f32 %v9333_v19, %v2456_v39 }
  0x2b   : > { %v2846_v49 = vcombine.low %v2838_v34, %v2845_v43  ;;  %v2863_v50 = vcombine.low %v2855_v37, %v2862_v38  ;;  %v2573_v51 = vadd.f32 %v9369_v29, %v2457_v41  ;;  %v2574_v52 = vadd.f32 %v9336_v20, %v2458_v42 }
  0x2c   : > { %v2575_v53 = vadd.f32 %v9373_v30, %v2459_v44  ;;  %v2658_v54 = vmax.f32 %v2568_v45, 0.0  ;;  %v2659_v55 = vmax.f32 %v2569_v46, 0.0  ;;  %v2660_v56 = vmax.f32 %v2570_v47, 0.0 }
  0x2d   : > { %v3235_v58 = vpack.c.bf16 %v2863_v50, %v2846_v49  ;;  %v2661_v59 = vmax.f32 %v2571_v48, 0.0  ;;  %v2662_v60 = vmax.f32 %v2572_v40, 0.0  ;;  %v2663_v61 = vmax.f32 %v2573_v51, 0.0  ;;  %v1863_v51 = vld [vmem:[%s9343_s12 + $0x48] sm:$0xff] }
  0x2e   : > { %v2664_v63 = vmax.f32 %v2574_v52, 0.0  ;;  %v2665_v0 = vmax.f32 %v2575_v53, 0.0  ;;  %v2864_v1 = vcombine.low %v2658_v54, %v2659_v55  ;;  %v1992_v2 = vcombine.high %v1990_v10, %v1990_v10 }
  0x2f   : > { %8809 = vmatprep.mubr.msk.bf16.mxu0 %vm3253_vm1, %v3235_v58  ;;  %v2865_v3 = vcombine.low %v2660_v56, %v2661_v59  ;;  %v2881_v4 = vcombine.low %v2662_v60, %v2663_v61  ;;  %v2000_v7 = vcombine.high %v1860_v57, %v1860_v57  ;;  %v2007_v8 = vrot.slane %v1860_v57, %v9321_v15  ;;  %v9454_v56 = vld [vmem:[%s9343_s12 + $0x50] sm:$0xff] }
  0x30   : > { %v2872_v9 = vrot.slane %v2864_v1, %v9321_v15  ;;  %v2882_v11 = vcombine.low %v2664_v63, %v2665_v0  ;;  %v2024_v12 = vrot.slane %v9424_v62, %v9321_v15  ;;  %v2460_v14 = vmul.f32 %v9327_v17, %v1992_v2  ;;  %v8632_v0 = vld.sshfl [vmem:[%s9343_s12 + $0x40] sm:$0x3 pattern:$0x76325410] }
  0x31   : > { %v2879_v16 = vrot.slane %v2865_v3, %v9321_v15  ;;  %v2889_v10 = vrot.slane %v2881_v4, %v9321_v15  ;;  %v2014_v25 = vrot.slane %v2000_v7, %v9321_v15  ;;  %v2015_v26 = vcombine.high %v2007_v8, %v2007_v8 }
  0x32   : > { %v2896_v31 = vrot.slane %v2882_v11, %v9321_v15  ;;  %v2032_v32 = vcombine.high %v2024_v12, %v2024_v12  ;;  %v2461_v33 = vmul.f32 %v8631_v6, %v9361_v27  ;;  %v2462_v34 = vmul.f32 %v9330_v18, %v2007_v8 }
  0x33   : > { %v2880_v35 = vcombine.low %v2872_v9, %v2879_v16  ;;  %v2016_v36 = vcombine.high %v2014_v25, %v2014_v25  ;;  %v2463_v37 = vmul.f32 %v9365_v28, %v2015_v26  ;;  %v2464_v39 = vmul.f32 %v9327_v17, %v2014_v25 }
  0x34   : > { %v2897_v41 = vcombine.low %v2889_v10, %v2896_v31  ;;  %v2466_v42 = vmul.f32 %v9330_v18, %v2024_v12  ;;  %v2467_v43 = vmul.f32 %v9365_v28, %v2032_v32  ;;  %v2576_v38 = vadd.f32 %v9333_v19, %v2460_v14 }
  0x35   : > { %v2465_v44 = vmul.f32 %v9361_v27, %v2016_v36  ;;  %v2577_v45 = vadd.f32 %v9369_v29, %v2461_v33  ;;  %v2578_v46 = vadd.f32 %v9336_v20, %v2462_v34  ;;  %v2579_v47 = vadd.f32 %v9373_v30, %v2463_v37 }
  0x36   : > { %v3236_v48 = vpack.c.bf16 %v2897_v41, %v2880_v35  ;;  %v2580_v40 = vadd.f32 %v9333_v19, %v2464_v39  ;;  %v2582_v49 = vadd.f32 %v9336_v20, %v2466_v42  ;;  %v2583_v50 = vadd.f32 %v9373_v30, %v2467_v43 }
  0x37   : > { %v2581_v52 = vadd.f32 %v9369_v29, %v2465_v44  ;;  %v2666_v53 = vmax.f32 %v2576_v38, 0.0  ;;  %v2667_v54 = vmax.f32 %v2577_v45, 0.0  ;;  %v2668_v55 = vmax.f32 %v2578_v46, 0.0 }
  0x38   : > { %8810 = vmatmul.mubr.msk.bf16.vlgmr.msra.gmra.mrb[0].mxu0 %vm3253_vm1, %v3236_v48  ;;  %v2669_v57 = vmax.f32 %v2579_v47, 0.0  ;;  %v2670_v58 = vmax.f32 %v2580_v40, 0.0  ;;  %v2672_v59 = vmax.f32 %v2582_v49, 0.0  ;;  %v2673_v60 = vmax.f32 %v2583_v50, 0.0 }
  0x39   : > { %8834 = vmatpush3.bf16.msra.mxu0 %v9318_v13  ;;  %v2671_v61 = vmax.f32 %v2581_v52, 0.0  ;;  %v2898_v63 = vcombine.low %v2666_v53, %v2667_v54  ;;  %v2017_v1 = vcombine.high %v9424_v62, %v9424_v62  ;;  %v2041_v2 = vcombine.high %v1863_v51, %v1863_v51  ;;  %v1866_v52 = vld [vmem:[%s9343_s12 + $0x60] sm:$0xff] }
  0x3a   : > { %v2899_v3 = vcombine.low %v2668_v55, %v2669_v57  ;;  %v2916_v4 = vcombine.low %v2672_v59, %v2673_v60  ;;  %v2048_v6 = vrot.slane %v1863_v51, %v9321_v15  ;;  %v2065_v7 = vrot.slane %v9454_v56, %v9321_v15 }
  0x3b   : > { %v2906_v8 = vrot.slane %v2898_v63, %v9321_v15  ;;  %v2915_v9 = vcombine.low %v2670_v58, %v2671_v61  ;;  %v2031_v11 = vrot.slane %v2017_v1, %v9321_v15  ;;  %v2055_v13 = vrot.slane %v2041_v2, %v9321_v15  ;;  %v8633_v1 = vld.sshfl [vmem:[%s9343_s12 + $0x58] sm:$0x3 pattern:$0x76325410] }
  0x3c   : > { %v2913_v12 = vrot.slane %v2899_v3, %v9321_v15  ;;  %v2930_v14 = vrot.slane %v2916_v4, %v9321_v15  ;;  %v2056_v62 = vcombine.high %v2048_v6, %v2048_v6  ;;  %v2470_v16 = vmul.f32 %v8632_v0, %v9330_v18 }
  0x3d   : > { %v2923_v10 = vrot.slane %v2915_v9, %v9321_v15  ;;  %v2033_v25 = vcombine.high %v2031_v11, %v2031_v11  ;;  %v2057_v26 = vcombine.high %v2055_v13, %v2055_v13  ;;  %v2468_v31 = vmul.f32 %v9327_v17, %v2031_v11 }
  0x3e   : > { %v2914_v32 = vcombine.low %v2906_v8, %v2913_v12  ;;  %v2471_v33 = vmul.f32 %v9365_v28, %v2048_v6  ;;  %v2472_v34 = vmul.f32 %v9327_v17, %v2056_v62  ;;  %v2473_v35 = vmul.f32 %v9361_v27, %v2055_v13 }
  0x3f   : > { %v2931_v36 = vcombine.low %v2923_v10, %v2930_v14  ;;  %v2469_v37 = vmul.f32 %v9361_v27, %v2033_v25  ;;  %v2474_v39 = vmul.f32 %v9330_v18, %v2057_v26  ;;  %v2475_v41 = vmul.f32 %v9365_v28, %v2065_v7 }
  0x40   : > { %v2584_v42 = vadd.f32 %v9333_v19, %v2468_v31  ;;  %v2586_v43 = vadd.f32 %v9336_v20, %v2470_v16  ;;  %v2587_v38 = vadd.f32 %v9373_v30, %v2471_v33  ;;  %v2588_v44 = vadd.f32 %v9333_v19, %v2472_v34 }
  0x41   : > { %v3237_v45 = vpack.c.bf16 %v2931_v36, %v2914_v32  ;;  %v2585_v46 = vadd.f32 %v9369_v29, %v2469_v37  ;;  %v2589_v47 = vadd.f32 %v9369_v29, %v2473_v35  ;;  %v2590_v48 = vadd.f32 %v9336_v20, %v2474_v39 }
  0x42   : > { %v2591_v40 = vadd.f32 %v9373_v30, %v2475_v41  ;;  %v2674_v49 = vmax.f32 %v2584_v42, 0.0  ;;  %v2676_v50 = vmax.f32 %v2586_v43, 0.0  ;;  %v2677_v51 = vmax.f32 %v2587_v38, 0.0 }
  0x43   : > { %8813 = vmatprep.mubr.msk.bf16.mxu0 %vm3253_vm1, %v3237_v45  ;;  %v2675_v53 = vmax.f32 %v2585_v46, 0.0  ;;  %v2678_v54 = vmax.f32 %v2588_v44, 0.0  ;;  %v2679_v55 = vmax.f32 %v2589_v47, 0.0  ;;  %v2680_v57 = vmax.f32 %v2590_v48, 0.0  ;;  %v1867_v45 = vld [vmem:[%s9343_s12 + $0x68] sm:$0xff] }
  0x44   : > { %v2681_v58 = vmax.f32 %v2591_v40, 0.0  ;;  %v2933_v59 = vcombine.low %v2676_v50, %v2677_v51  ;;  %v2058_v60 = vcombine.high %v9454_v56, %v9454_v56  ;;  %v2073_v61 = vcombine.high %v2065_v7, %v2065_v7 }
  0x45   : > { %v2932_v63 = vcombine.low %v2674_v49, %v2675_v53  ;;  %v2949_v0 = vcombine.low %v2678_v54, %v2679_v55  ;;  %v2082_v2 = vcombine.high %v1866_v52, %v1866_v52  ;;  %v2089_v3 = vrot.slane %v1866_v52, %v9321_v15  ;;  %v1869_v49 = vld [vmem:[%s9343_s12 + $0x78] sm:$0xff] }
  0x46   : > { %v2947_v4 = vrot.slane %v2933_v59, %v9321_v15  ;;  %v2950_v6 = vcombine.low %v2680_v57, %v2681_v58  ;;  %v2072_v8 = vrot.slane %v2058_v60, %v9321_v15  ;;  %v2476_v9 = vmul.f32 %v9327_v17, %v2073_v61 }
  0x47   : > { %v2940_v11 = vrot.slane %v2932_v63, %v9321_v15  ;;  %v2957_v13 = vrot.slane %v2949_v0, %v9321_v15  ;;  %v2096_v56 = vrot.slane %v2082_v2, %v9321_v15  ;;  %v2097_v7 = vcombine.high %v2089_v3, %v2089_v3  ;;  %v8634_v2 = vld.sshfl [vmem:[%s9343_s12 + $0x70] sm:$0x3 pattern:$0x76325410] }
  0x48   : > { %v2964_v12 = vrot.slane %v2950_v6, %v9321_v15  ;;  %v2074_v14 = vcombine.high %v2072_v8, %v2072_v8  ;;  %v2477_v62 = vmul.f32 %v9361_v27, %v2072_v8  ;;  %v2479_v16 = vmul.f32 %v8633_v1, %v9365_v28 }
  0x49   : > { %v2948_v10 = vcombine.low %v2940_v11, %v2947_v4  ;;  %v2098_v25 = vcombine.high %v2096_v56, %v2096_v56  ;;  %v2480_v26 = vmul.f32 %v9327_v17, %v2089_v3  ;;  %v2481_v31 = vmul.f32 %v9361_v27, %v2097_v7 }
  0x4a   : > { %v2965_v32 = vcombine.low %v2957_v13, %v2964_v12  ;;  %v2478_v33 = vmul.f32 %v9330_v18, %v2074_v14  ;;  %v2482_v34 = vmul.f32 %v9330_v18, %v2096_v56  ;;  %v2592_v35 = vadd.f32 %v9333_v19, %v2476_v9 }
  0x4b   : > { %v2483_v36 = vmul.f32 %v9365_v28, %v2098_v25  ;;  %v2593_v37 = vadd.f32 %v9369_v29, %v2477_v62  ;;  %v2595_v39 = vadd.f32 %v9373_v30, %v2479_v16  ;;  %v2596_v41 = vadd.f32 %v9333_v19, %v2480_v26 }
  0x4c   : > { %v3238_v42 = vpack.c.bf16 %v2965_v32, %v2948_v10  ;;  %v2594_v43 = vadd.f32 %v9336_v20, %v2478_v33  ;;  %v2597_v38 = vadd.f32 %v9369_v29, %v2481_v31  ;;  %v2598_v44 = vadd.f32 %v9336_v20, %v2482_v34 }
  0x4d   : > { %v2599_v46 = vadd.f32 %v9373_v30, %v2483_v36  ;;  %v2682_v47 = vmax.f32 %v2592_v35, 0.0  ;;  %v2683_v48 = vmax.f32 %v2593_v37, 0.0  ;;  %v2685_v40 = vmax.f32 %v2595_v39, 0.0 }
  0x4e   : > { %8814 = vmatmul.mubr.msk.bf16.gmra.mrb[4].mxu0 %vm3253_vm1, %v3238_v42  ;;  %v2684_v50 = vmax.f32 %v2594_v43, 0.0  ;;  %v2686_v51 = vmax.f32 %v2596_v41, 0.0  ;;  %v2687_v52 = vmax.f32 %v2597_v38, 0.0  ;;  %v2688_v53 = vmax.f32 %v2598_v44, 0.0  ;;  %v1870_v43 = vld [vmem:[%s9343_s12 + $0x80] sm:$0xff] }
  0x4f   : > { %v2689_v54 = vmax.f32 %v2599_v46, 0.0  ;;  %v2966_v55 = vcombine.low %v2682_v47, %v2683_v48  ;;  %v2099_v57 = vcombine.high %v1867_v45, %v1867_v45  ;;  %v2106_v58 = vrot.slane %v1867_v45, %v9321_v15  ;;  %v9544_v47 = vld [vmem:[%s9343_s12 + $0x90] sm:$0xff] }
  0x50   : > { %v2967_v59 = vcombine.low %v2684_v50, %v2685_v40  ;;  %v2983_v60 = vcombine.low %v2686_v51, %v2687_v52  ;;  %v2123_v61 = vcombine.high %v1869_v49, %v1869_v49  ;;  %v2130_v63 = vrot.slane %v1869_v49, %v9321_v15 }
  0x51   : > { %v2974_v0 = vrot.slane %v2966_v55, %v9321_v15  ;;  %v2984_v1 = vcombine.low %v2688_v53, %v2689_v54  ;;  %v2113_v3 = vrot.slane %v2099_v57, %v9321_v15  ;;  %v2114_v4 = vcombine.high %v2106_v58, %v2106_v58 }
  0x52   : > { %v2981_v6 = vrot.slane %v2967_v59, %v9321_v15  ;;  %v2991_v8 = vrot.slane %v2983_v60, %v9321_v15  ;;  %v2137_v9 = vrot.slane %v2123_v61, %v9321_v15  ;;  %v2138_v11 = vcombine.high %v2130_v63, %v2130_v63 }
  0x53   : > { %v2998_v13 = vrot.slane %v2984_v1, %v9321_v15  ;;  %v2115_v56 = vcombine.high %v2113_v3, %v2113_v3  ;;  %v2484_v7 = vmul.f32 %v9327_v17, %v2106_v58  ;;  %v2485_v12 = vmul.f32 %v9361_v27, %v2114_v4 }
  0x54   : > { %v2982_v14 = vcombine.low %v2974_v0, %v2981_v6  ;;  %v2486_v62 = vmul.f32 %v9330_v18, %v2113_v3  ;;  %v2488_v16 = vmul.f32 %v8634_v2, %v9327_v17  ;;  %v2489_v10 = vmul.f32 %v9361_v27, %v2130_v63  ;;  %v8635_v63 = vld.sshfl [vmem:[%s9343_s12 + $0x88] sm:$0x3 pattern:$0x76325410] }
  0x55   : > { %v2999_v25 = vcombine.low %v2991_v8, %v2998_v13  ;;  %v2487_v26 = vmul.f32 %v9365_v28, %v2115_v56  ;;  %v2490_v31 = vmul.f32 %v9330_v18, %v2138_v11  ;;  %v2491_v32 = vmul.f32 %v9365_v28, %v2137_v9 }
  0x56   : > { %v2600_v33 = vadd.f32 %v9333_v19, %v2484_v7  ;;  %v2601_v34 = vadd.f32 %v9369_v29, %v2485_v12  ;;  %v2602_v35 = vadd.f32 %v9336_v20, %v2486_v62  ;;  %v2604_v36 = vadd.f32 %v9333_v19, %v2488_v16 }
  0x57   : > { %v3239_v37 = vpack.c.bf16 %v2999_v25, %v2982_v14  ;;  %v2603_v39 = vadd.f32 %v9373_v30, %v2487_v26  ;;  %v2605_v41 = vadd.f32 %v9369_v29, %v2489_v10  ;;  %v2606_v42 = vadd.f32 %v9336_v20, %v2490_v31 }
  0x58   : > { %v2607_v38 = vadd.f32 %v9373_v30, %v2491_v32  ;;  %v2690_v44 = vmax.f32 %v2600_v33, 0.0  ;;  %v2691_v45 = vmax.f32 %v2601_v34, 0.0  ;;  %v2692_v46 = vmax.f32 %v2602_v35, 0.0 }
  0x59   : > { %8817 = vmatprep.mubr.msk.bf16.mxu0 %vm3253_vm1, %v3239_v37  ;;  %v2693_v48 = vmax.f32 %v2603_v39, 0.0  ;;  %v2694_v40 = vmax.f32 %v2604_v36, 0.0  ;;  %v2695_v49 = vmax.f32 %v2605_v41, 0.0  ;;  %v2696_v50 = vmax.f32 %v2606_v42, 0.0  ;;  %v1873_v39 = vld [vmem:[%s9343_s12 + $0x98] sm:$0xff] }
  0x5a   : > { %v2697_v51 = vmax.f32 %v2607_v38, 0.0  ;;  %v3000_v52 = vcombine.low %v2690_v44, %v2691_v45  ;;  %v2139_v53 = vcombine.high %v2137_v9, %v2137_v9  ;;  %v2140_v54 = vcombine.high %v1870_v43, %v1870_v43  ;;  %v9574_v44 = vld [vmem:[%s9343_s12 + $0xa8] sm:$0xff] }
  0x5b   : > { %v3001_v55 = vcombine.low %v2692_v46, %v2693_v48  ;;  %v3017_v57 = vcombine.low %v2694_v40, %v2695_v49  ;;  %v2147_v58 = vrot.slane %v1870_v43, %v9321_v15  ;;  %v2171_v59 = vrot.slane %v9544_v47, %v9321_v15 }
  0x5c   : > { %v3008_v60 = vrot.slane %v3000_v52, %v9321_v15  ;;  %v3018_v61 = vcombine.low %v2696_v50, %v2697_v51  ;;  %v2154_v0 = vrot.slane %v2140_v54, %v9321_v15  ;;  %v2492_v1 = vmul.f32 %v9327_v17, %v2139_v53 }
  0x5d   : > { %v3015_v2 = vrot.slane %v3001_v55, %v9321_v15  ;;  %v3025_v3 = vrot.slane %v3017_v57, %v9321_v15  ;;  %v2155_v4 = vcombine.high %v2147_v58, %v2147_v58  ;;  %v2179_v6 = vcombine.high %v2171_v59, %v2171_v59 }
  0x5e   : > { %v3032_v8 = vrot.slane %v3018_v61, %v9321_v15  ;;  %v2156_v9 = vcombine.high %v2154_v0, %v2154_v0  ;;  %v2493_v11 = vmul.f32 %v9361_v27, %v2147_v58  ;;  %v2495_v13 = vmul.f32 %v9365_v28, %v2154_v0 }
  0x5f   : > { %v3016_v56 = vcombine.low %v3008_v60, %v3015_v2  ;;  %v2494_v7 = vmul.f32 %v9330_v18, %v2155_v4  ;;  %v2497_v12 = vmul.f32 %v8635_v63, %v9361_v27  ;;  %v2498_v14 = vmul.f32 %v9330_v18, %v2171_v59  ;;  %v8636_v60 = vld.sshfl [vmem:[%s9343_s12 + $0xa0] sm:$0x3 pattern:$0x76325410] }
  0x60   : > { %v3033_v62 = vcombine.low %v3025_v3, %v3032_v8  ;;  %v2496_v16 = vmul.f32 %v9327_v17, %v2156_v9  ;;  %v2499_v10 = vmul.f32 %v9365_v28, %v2179_v6  ;;  %v2608_v25 = vadd.f32 %v9333_v19, %v2492_v1 }
  0x61   : > { %v2609_v26 = vadd.f32 %v9369_v29, %v2493_v11  ;;  %v2610_v31 = vadd.f32 %v9336_v20, %v2494_v7  ;;  %v2611_v32 = vadd.f32 %v9373_v30, %v2495_v13  ;;  %v2613_v33 = vadd.f32 %v9369_v29, %v2497_v12 }
  0x62   : > { %v3240_v34 = vpack.c.bf16 %v3033_v62, %v3016_v56  ;;  %v2612_v35 = vadd.f32 %v9333_v19, %v2496_v16  ;;  %v2614_v36 = vadd.f32 %v9336_v20, %v2498_v14  ;;  %v2615_v37 = vadd.f32 %v9373_v30, %v2499_v10 }
  0x63   : > { %v2698_v41 = vmax.f32 %v2608_v25, 0.0  ;;  %v2699_v42 = vmax.f32 %v2609_v26, 0.0  ;;  %v2700_v43 = vmax.f32 %v2610_v31, 0.0  ;;  %v2701_v38 = vmax.f32 %v2611_v32, 0.0 }
  0x64   : > { %8818 = vmatmul.mubr.msk.bf16.gmra.mrb[8].mxu0 %vm3253_vm1, %v3240_v34  ;;  %v2702_v45 = vmax.f32 %v2612_v35, 0.0  ;;  %v2703_v46 = vmax.f32 %v2613_v33, 0.0  ;;  %v2704_v48 = vmax.f32 %v2614_v36, 0.0  ;;  %v2705_v40 = vmax.f32 %v2615_v37, 0.0  ;;  %v1876_v35 = vld [vmem:[%s9343_s12 + $0xb0] sm:$0xff] }
  0x65   : > { %v3034_v49 = vcombine.low %v2698_v41, %v2699_v42  ;;  %v3035_v50 = vcombine.low %v2700_v43, %v2701_v38  ;;  %v2164_v51 = vcombine.high %v9544_v47, %v9544_v47  ;;  %v2181_v52 = vcombine.high %v1873_v39, %v1873_v39 }
  0x66   : > { %v3051_v53 = vcombine.low %v2702_v45, %v2703_v46  ;;  %v3052_v54 = vcombine.low %v2704_v48, %v2705_v40  ;;  %v2188_v55 = vrot.slane %v1873_v39, %v9321_v15  ;;  %v2212_v57 = vrot.slane %v9574_v44, %v9321_v15 }
  0x67   : > { %v3042_v58 = vrot.slane %v3034_v49, %v9321_v15  ;;  %v3049_v59 = vrot.slane %v3035_v50, %v9321_v15  ;;  %v2178_v61 = vrot.slane %v2164_v51, %v9321_v15  ;;  %v2195_v63 = vrot.slane %v2181_v52, %v9321_v15 }
  0x68   : > { %v3059_v0 = vrot.slane %v3051_v53, %v9321_v15  ;;  %v3066_v47 = vrot.slane %v3052_v54, %v9321_v15  ;;  %v2196_v1 = vcombine.high %v2188_v55, %v2188_v55  ;;  %v2502_v2 = vmul.f32 %v9330_v18, %v2188_v55 }
  0x69   : > { %v3050_v3 = vcombine.low %v3042_v58, %v3049_v59  ;;  %v2180_v4 = vcombine.high %v2178_v61, %v2178_v61  ;;  %v2197_v6 = vcombine.high %v2195_v63, %v2195_v63  ;;  %v2500_v8 = vmul.f32 %v9327_v17, %v2178_v61 }
  0x6a   : > { %v3067_v9 = vcombine.low %v3059_v0, %v3066_v47  ;;  %v2503_v11 = vmul.f32 %v9365_v28, %v2196_v1  ;;  %v2504_v13 = vmul.f32 %v9327_v17, %v2195_v63  ;;  %v2506_v56 = vmul.f32 %v8636_v60, %v9330_v18 }
  0x6b   : > { %v2501_v7 = vmul.f32 %v9361_v27, %v2180_v4  ;;  %v2505_v12 = vmul.f32 %v9361_v27, %v2197_v6  ;;  %v2507_v14 = vmul.f32 %v9365_v28, %v2212_v57  ;;  %v2616_v62 = vadd.f32 %v9333_v19, %v2500_v8 }
  0x6c   : > { %v3241_v16 = vpack.c.bf16 %v3067_v9, %v3050_v3  ;;  %v2618_v10 = vadd.f32 %v9336_v20, %v2502_v2  ;;  %v2619_v25 = vadd.f32 %v9373_v30, %v2503_v11  ;;  %v2620_v26 = vadd.f32 %v9333_v19, %v2504_v13 }
  0x6d   : > { %v2617_v31 = vadd.f32 %v9369_v29, %v2501_v7  ;;  %v2621_v32 = vadd.f32 %v9369_v29, %v2505_v12  ;;  %v2622_v33 = vadd.f32 %v9336_v20, %v2506_v56  ;;  %v2623_v34 = vadd.f32 %v9373_v30, %v2507_v14 }
  0x6e   : > { %8821 = vmatprep.mubr.msk.bf16.mxu0 %vm3253_vm1, %v3241_v16  ;;  %v2706_v36 = vmax.f32 %v2616_v62, 0.0  ;;  %v2708_v37 = vmax.f32 %v2618_v10, 0.0  ;;  %v2709_v39 = vmax.f32 %v2619_v25, 0.0  ;;  %v2710_v41 = vmax.f32 %v2620_v26, 0.0 }
  0x6f   : > { %v2707_v42 = vmax.f32 %v2617_v31, 0.0  ;;  %v2711_v43 = vmax.f32 %v2621_v32, 0.0  ;;  %v2712_v38 = vmax.f32 %v2622_v33, 0.0  ;;  %v2713_v45 = vmax.f32 %v2623_v34, 0.0  ;;  %v1878_v31 = vld [vmem:[%s9343_s12 + $0xc0] sm:$0xff]  ;;  %v1879_v32 = vld [vmem:[%s9343_s12 + $0xc8] sm:$0xff] }
  0x70   : > { %v3069_v46 = vcombine.low %v2708_v37, %v2709_v39  ;;  %v2205_v48 = vcombine.high %v9574_v44, %v9574_v44  ;;  %v2220_v40 = vcombine.high %v2212_v57, %v2212_v57  ;;  %v2222_v49 = vcombine.high %v1876_v35, %v1876_v35  ;;  %v8637_v57 = vld.sshfl [vmem:[%s9343_s12 + $0xb8] sm:$0x3 pattern:$0x76325410] }
  0x71   : > { %v3068_v50 = vcombine.low %v2706_v36, %v2707_v42  ;;  %v3085_v51 = vcombine.low %v2710_v41, %v2711_v43  ;;  %v3086_v52 = vcombine.low %v2712_v38, %v2713_v45  ;;  %v2229_v53 = vrot.slane %v1876_v35, %v9321_v15 }
  0x72   : > { %v3083_v54 = vrot.slane %v3069_v46, %v9321_v15  ;;  %v2219_v55 = vrot.slane %v2205_v48, %v9321_v15  ;;  %v2236_v58 = vrot.slane %v2222_v49, %v9321_v15  ;;  %v2508_v59 = vmul.f32 %v9327_v17, %v2220_v40 }
  0x73   : > { %v3076_v60 = vrot.slane %v3068_v50, %v9321_v15  ;;  %v3093_v61 = vrot.slane %v3085_v51, %v9321_v15  ;;  %v3100_v44 = vrot.slane %v3086_v52, %v9321_v15  ;;  %v2237_v63 = vcombine.high %v2229_v53, %v2229_v53 }
  0x74   : > { %v2221_v0 = vcombine.high %v2219_v55, %v2219_v55  ;;  %v2238_v47 = vcombine.high %v2236_v58, %v2236_v58  ;;  %v2509_v1 = vmul.f32 %v9361_v27, %v2219_v55  ;;  %v2511_v2 = vmul.f32 %v9365_v28, %v2229_v53 }
  0x75   : > { %v3084_v3 = vcombine.low %v3076_v60, %v3083_v54  ;;  %v3101_v4 = vcombine.low %v3093_v61, %v3100_v44  ;;  %v2512_v6 = vmul.f32 %v9327_v17, %v2237_v63  ;;  %v2513_v8 = vmul.f32 %v9361_v27, %v2236_v58 }
  0x76   : > { %v2510_v9 = vmul.f32 %v9330_v18, %v2221_v0  ;;  %v2514_v11 = vmul.f32 %v9330_v18, %v2238_v47  ;;  %v2515_v13 = vmul.f32 %v8637_v57, %v9365_v28  ;;  %v2624_v56 = vadd.f32 %v9333_v19, %v2508_v59 }
  0x77   : > { %v3242_v7 = vpack.c.bf16 %v3101_v4, %v3084_v3  ;;  %v2625_v12 = vadd.f32 %v9369_v29, %v2509_v1  ;;  %v2627_v14 = vadd.f32 %v9373_v30, %v2511_v2  ;;  %v2628_v62 = vadd.f32 %v9333_v19, %v2512_v6 }
  0x78   : > { %v2626_v16 = vadd.f32 %v9336_v20, %v2510_v9  ;;  %v2629_v10 = vadd.f32 %v9369_v29, %v2513_v8  ;;  %v2630_v25 = vadd.f32 %v9336_v20, %v2514_v11  ;;  %v2631_v26 = vadd.f32 %v9373_v30, %v2515_v13 }
  0x79   : > { %8822 = vmatmul.mubr.msk.bf16.gmra.mrb[12].mxu0 %vm3253_vm1, %v3242_v7  ;;  %v2714_v33 = vmax.f32 %v2624_v56, 0.0  ;;  %v2715_v34 = vmax.f32 %v2625_v12, 0.0  ;;  %v2717_v35 = vmax.f32 %v2627_v14, 0.0  ;;  %v2718_v36 = vmax.f32 %v2628_v62, 0.0 }
  0x7a   : > { %v2716_v37 = vmax.f32 %v2626_v16, 0.0  ;;  %v2719_v39 = vmax.f32 %v2629_v10, 0.0  ;;  %v2720_v41 = vmax.f32 %v2630_v25, 0.0  ;;  %v2721_v42 = vmax.f32 %v2631_v26, 0.0  ;;  %v1881_v16 = vld [vmem:[%s9343_s12 + $0xd8] sm:$0xff] }
  0x7b   : > { %v3102_v43 = vcombine.low %v2714_v33, %v2715_v34  ;;  %v2246_v38 = vcombine.high %v1878_v31, %v1878_v31  ;;  %v2253_v45 = vrot.slane %v1878_v31, %v9321_v15  ;;  %v2263_v46 = vcombine.high %v1879_v32, %v1879_v32 }
  0x7c   : > { %v3103_v48 = vcombine.low %v2716_v37, %v2717_v35  ;;  %v3119_v40 = vcombine.low %v2718_v36, %v2719_v39  ;;  %v3120_v49 = vcombine.low %v2720_v41, %v2721_v42  ;;  %v2270_v50 = vrot.slane %v1879_v32, %v9321_v15  ;;  %v1882_v32 = vld [vmem:[%s9343_s12 + $0xe0] sm:$0xff] }
  0x7d   : > { %v3110_v51 = vrot.slane %v3102_v43, %v9321_v15  ;;  %v2260_v52 = vrot.slane %v2246_v38, %v9321_v15  ;;  %v2261_v53 = vcombine.high %v2253_v45, %v2253_v45  ;;  %v2277_v54 = vrot.slane %v2263_v46, %v9321_v15 }
  0x7e   : > { %v3117_v55 = vrot.slane %v3103_v48, %v9321_v15  ;;  %v3127_v58 = vrot.slane %v3119_v40, %v9321_v15  ;;  %v3134_v59 = vrot.slane %v3120_v49, %v9321_v15  ;;  %v2278_v60 = vcombine.high %v2270_v50, %v2270_v50 }
  0x7f   : > { %v2262_v61 = vcombine.high %v2260_v52, %v2260_v52  ;;  %v2279_v44 = vcombine.high %v2277_v54, %v2277_v54  ;;  %v2516_v57 = vmul.f32 %v9327_v17, %v2253_v45  ;;  %v2517_v63 = vmul.f32 %v9361_v27, %v2261_v53  ;;  %v8638_v45 = vld.sshfl [vmem:[%s9343_s12 + $0xd0] sm:$0x3 pattern:$0x76325410] }
  0x80   : > { %v3118_v0 = vcombine.low %v3110_v51, %v3117_v55  ;;  %v3135_v47 = vcombine.low %v3127_v58, %v3134_v59  ;;  %v2518_v1 = vmul.f32 %v9330_v18, %v2260_v52  ;;  %v2520_v2 = vmul.f32 %v9327_v17, %v2270_v50 }
  0x81   : > { %v2519_v3 = vmul.f32 %v9365_v28, %v2262_v61  ;;  %v2521_v4 = vmul.f32 %v9361_v27, %v2278_v60  ;;  %v2522_v6 = vmul.f32 %v9330_v18, %v2277_v54  ;;  %v2523_v8 = vmul.f32 %v9365_v28, %v2279_v44 }
  0x82   : > { %v3243_v9 = vpack.c.bf16 %v3135_v47, %v3118_v0  ;;  %v2632_v11 = vadd.f32 %v9333_v19, %v2516_v57  ;;  %v2633_v13 = vadd.f32 %v9369_v29, %v2517_v63  ;;  %v2634_v56 = vadd.f32 %v9336_v20, %v2518_v1 }
  0x83   : > { %v2635_v7 = vadd.f32 %v9373_v30, %v2519_v3  ;;  %v2636_v12 = vadd.f32 %v9333_v19, %v2520_v2  ;;  %v2637_v14 = vadd.f32 %v9369_v29, %v2521_v4  ;;  %v2638_v62 = vadd.f32 %v9336_v20, %v2522_v6 }
  0x84   : > { %8825 = vmatprep.mubr.msk.bf16.mxu0 %vm3253_vm1, %v3243_v9  ;;  %v2639_v10 = vadd.f32 %v9373_v30, %v2523_v8  ;;  %v2722_v25 = vmax.f32 %v2632_v11, 0.0  ;;  %v2723_v26 = vmax.f32 %v2633_v13, 0.0  ;;  %v2724_v31 = vmax.f32 %v2634_v56, 0.0 }
  0x85   : > { %v2725_v33 = vmax.f32 %v2635_v7, 0.0  ;;  %v2726_v34 = vmax.f32 %v2636_v12, 0.0  ;;  %v2727_v35 = vmax.f32 %v2637_v14, 0.0  ;;  %v2728_v36 = vmax.f32 %v2638_v62, 0.0 }
  0x86   : > { %v2729_v37 = vmax.f32 %v2639_v10, 0.0  ;;  %v3136_v39 = vcombine.low %v2722_v25, %v2723_v26  ;;  %v2287_v41 = vcombine.high %v1881_v16, %v1881_v16  ;;  %v2294_v42 = vrot.slane %v1881_v16, %v9321_v15  ;;  %v8639_v12 = vld.sshfl [vmem:[%s9343_s12 + $0xe8] sm:$0x3 pattern:$0x76325410]  ;;  %v462_v16 = vld [vmem:[%s9682_s15] sm:$0xff] }
  0x87   : > { %v3137_v43 = vcombine.low %v2724_v31, %v2725_v33  ;;  %v3153_v38 = vcombine.low %v2726_v34, %v2727_v35  ;;  %v2304_v46 = vcombine.high %v1882_v32, %v1882_v32  ;;  %v2311_v48 = vrot.slane %v1882_v32, %v9321_v15 }
  0x88   : > { %v3144_v40 = vrot.slane %v3136_v39, %v9321_v15  ;;  %v3154_v49 = vcombine.low %v2728_v36, %v2729_v37  ;;  %v2301_v50 = vrot.slane %v2287_v41, %v9321_v15  ;;  %v2302_v51 = vcombine.high %v2294_v42, %v2294_v42  ;;  %v463_v37 = vld [vmem:[%s9682_s15 + $0x8] sm:$0xff] }
  0x89   : > { %v3151_v52 = vrot.slane %v3137_v43, %v9321_v15  ;;  %v3161_v53 = vrot.slane %v3153_v38, %v9321_v15  ;;  %v2318_v54 = vrot.slane %v2304_v46, %v9321_v15  ;;  %v2319_v55 = vcombine.high %v2311_v48, %v2311_v48 }
  0x8a   : > { %v3168_v58 = vrot.slane %v3154_v49, %v9321_v15  ;;  %v2303_v59 = vcombine.high %v2301_v50, %v2301_v50  ;;  %v2524_v60 = vmul.f32 %v8638_v45, %v9327_v17  ;;  %v2525_v61 = vmul.f32 %v9361_v27, %v2294_v42 }
  0x8b   : > { %v3152_v44 = vcombine.low %v3144_v40, %v3151_v52  ;;  %v2526_v57 = vmul.f32 %v9330_v18, %v2302_v51  ;;  %v2527_v63 = vmul.f32 %v9365_v28, %v2301_v50  ;;  %v2529_v0 = vmul.f32 %v9361_v27, %v2311_v48 }
  0x8c   : > { %v3169_v47 = vcombine.low %v3161_v53, %v3168_v58  ;;  %v2528_v1 = vmul.f32 %v9327_v17, %v2303_v59  ;;  %v2530_v2 = vmul.f32 %v9330_v18, %v2319_v55  ;;  %v2531_v3 = vmul.f32 %v9365_v28, %v2318_v54 }
  0x8d   : > { %v2640_v4 = vadd.f32 %v9333_v19, %v2524_v60  ;;  %v2641_v6 = vadd.f32 %v9369_v29, %v2525_v61  ;;  %v2642_v8 = vadd.f32 %v9336_v20, %v2526_v57  ;;  %v2643_v9 = vadd.f32 %v9373_v30, %v2527_v63 }
  0x8e   : > { %v3244_v11 = vpack.c.bf16 %v3169_v47, %v3152_v44  ;;  %v2644_v13 = vadd.f32 %v9333_v19, %v2528_v1  ;;  %v2645_v56 = vadd.f32 %v9369_v29, %v2529_v0  ;;  %v2646_v7 = vadd.f32 %v9336_v20, %v2530_v2 }
  0x8f   : > { %v2647_v18 = vadd.f32 %v9373_v30, %v2531_v3  ;;  %v2730_v28 = vmax.f32 %v2640_v4, 0.0  ;;  %v2731_v14 = vmax.f32 %v2641_v6, 0.0  ;;  %v2732_v62 = vmax.f32 %v2642_v8, 0.0 }
  0x90   : > { %8826 = vmatmul.mubr.msk.bf16.gmra.mrb[16].mxu0 %vm3253_vm1, %v3244_v11  ;;  %v2733_v10 = vmax.f32 %v2643_v9, 0.0  ;;  %v2734_v25 = vmax.f32 %v2644_v13, 0.0  ;;  %v2735_v26 = vmax.f32 %v2645_v56, 0.0  ;;  %v2736_v31 = vmax.f32 %v2646_v7, 0.0 }
  0x91   : > { %v2737_v32 = vmax.f32 %v2647_v18, 0.0  ;;  %v3170_v33 = vcombine.low %v2730_v28, %v2731_v14  ;;  %v2320_v34 = vcombine.high %v2318_v54, %v2318_v54  ;;  %v2533_v35 = vmul.f32 %v8639_v12, %v9361_v27 }
  0x92   : > { %v3171_v20 = vcombine.low %v2732_v62, %v2733_v10  ;;  %v3187_v36 = vcombine.low %v2734_v25, %v2735_v26  ;;  %v525_v30 = vcombine.high %v462_v16, %v462_v16  ;;  %v532_v39 = vrot.slane %v462_v16, %v9321_v15  ;;  %v465_v16 = vld [vmem:[%s9682_s15 + $0x18] sm:$0xff] }
  0x93   : > { %v3178_v41 = vrot.slane %v3170_v33, %v9321_v15  ;;  %v3188_v42 = vcombine.low %v2736_v31, %v2737_v32  ;;  %v2532_v43 = vmul.f32 %v9327_v17, %v2320_v34  ;;  %v2649_v38 = vadd.f32 %v9369_v29, %v2533_v35  ;;  %v466_v32 = vld [vmem:[%s9682_s15 + $0x20] sm:$0xff] }
  0x94   : > { %v3185_v45 = vrot.slane %v3171_v20, %v9321_v15  ;;  %v3195_v46 = vrot.slane %v3187_v36, %v9321_v15  ;;  %v539_v48 = vrot.slane %v525_v30, %v9321_v15  ;;  %v540_v27 = vcombine.high %v532_v39, %v532_v39 }
  0x95   : > { %v3202_v40 = vrot.slane %v3188_v42, %v9321_v15  ;;  %v2648_v49 = vadd.f32 %v9333_v19, %v2532_v43  ;;  %v2739_v50 = vmax.f32 %v2649_v38, 0.0  ;;  %v542_v51 = vcombine.high %v463_v37, %v463_v37  ;;  %v8618_v43 = vld.sshfl [vmem:[%s9682_s15 + $0x10] sm:$0x3 pattern:$0x76325410] }
  0x96   : > { %v3186_v52 = vcombine.low %v3178_v41, %v3185_v45  ;;  %v541_v53 = vcombine.high %v539_v48, %v539_v48  ;;  %v549_v54 = vrot.slane %v463_v37, %v9321_v15  ;;  %v9712_v17 = vcombine.high %v9346_v21, %v9346_v21 }
  0x97   : > { %v3203_v29 = vcombine.low %v3195_v46, %v3202_v40  ;;  %v2738_v55 = vmax.f32 %v2648_v49, 0.0  ;;  %v556_v58 = vrot.slane %v542_v51, %v9321_v15  ;;  %v9717_v59 = vcombine.high %v9349_v22, %v9349_v22 }
  0x98   : > { %v557_v60 = vcombine.high %v549_v54, %v549_v54  ;;  %v1051_v19 = vmul.f32 %v9346_v21, %v532_v39  ;;  %v1052_v61 = vmul.f32 %v9712_v17, %v540_v27  ;;  %v1053_v44 = vmul.f32 %v9349_v22, %v539_v48 }
  0x99   : > { %v3245_v57 = vpack.c.bf16 %v3203_v29, %v3186_v52  ;;  %v3204_v63 = vcombine.low %v2738_v55, %v2739_v50  ;;  %v558_v0 = vcombine.high %v556_v58, %v556_v58  ;;  %v1054_v47 = vmul.f32 %v9717_v59, %v541_v53 }
  0x9a   : > { %v1055_v1 = vmul.f32 %v9346_v21, %v549_v54  ;;  %v1056_v2 = vmul.f32 %v9712_v17, %v557_v60  ;;  %v1057_v3 = vmul.f32 %v9349_v22, %v556_v58  ;;  %v9728_v4 = vcombine.high %v9352_v23, %v9352_v23 }
  0x9b   : > { %8829 = vmatprep.mubr.msk.bf16.mxu0 %vm3253_vm1, %v3245_v57  ;;  %v3211_v6 = vrot.slane %v3204_v63, %v9321_v15  ;;  %v1058_v8 = vmul.f32 %v9717_v59, %v558_v0  ;;  %v9735_v9 = vcombine.high %v9355_v24, %v9355_v24  ;;  %v1167_v11 = vadd.f32 %v9352_v23, %v1051_v19 }
  0x9c   : > { %v1168_v13 = vadd.f32 %v9728_v4, %v1052_v61  ;;  %v1169_v56 = vadd.f32 %v9355_v24, %v1053_v44  ;;  %v1171_v7 = vadd.f32 %v9352_v23, %v1055_v1  ;;  %v1172_v12 = vadd.f32 %v9728_v4, %v1056_v2 }
  0x9d   : > { %v3246_v18 = vpack.c.bf16 %v3211_v6, %v3211_v6  ;;  %v1170_v28 = vadd.f32 %v9735_v9, %v1054_v47  ;;  %v1173_v14 = vadd.f32 %v9355_v24, %v1057_v3  ;;  %v1174_v62 = vadd.f32 %v9735_v9, %v1058_v8 }
  0x9e   : > { %v1257_v10 = vmax.f32 %v1167_v11, 0.0  ;;  %v1258_v25 = vmax.f32 %v1168_v13, 0.0  ;;  %v1259_v26 = vmax.f32 %v1169_v56, 0.0  ;;  %v1261_v31 = vmax.f32 %v1171_v7, 0.0  ;;  %v468_v13 = vld [vmem:[%s9682_s15 + $0x30] sm:$0xff] }
  0x9f   : > { %8830 = vmatmul.mubr.msk.bf16.gmra.mrb[20].mxu0 %vm3253_vm1, %v3246_v18  ;;  %v1260_v33 = vmax.f32 %v1170_v28, 0.0  ;;  %v1262_v34 = vmax.f32 %v1172_v12, 0.0  ;;  %v1263_v35 = vmax.f32 %v1173_v14, 0.0  ;;  %v1264_v20 = vmax.f32 %v1174_v62, 0.0  ;;  %v9776_v28 = vld [vmem:[%s9682_s15 + $0x38] sm:$0xff] }
  0xa0   : > { %v1437_v36 = vcombine.low %v1257_v10, %v1258_v25  ;;  %v566_v37 = vcombine.high %v465_v16, %v465_v16  ;;  %v573_v30 = vrot.slane %v465_v16, %v9321_v15  ;;  %v583_v38 = vcombine.high %v466_v32, %v466_v32 }
  0xa1   : > { %v1438_v39 = vcombine.low %v1259_v26, %v1260_v33  ;;  %v1454_v41 = vcombine.low %v1261_v31, %v1262_v34  ;;  %v1455_v42 = vcombine.low %v1263_v35, %v1264_v20  ;;  %v590_v27 = vrot.slane %v466_v32, %v9321_v15  ;;  %v8619_v35 = vld.sshfl [vmem:[%s9682_s15 + $0x28] sm:$0x3 pattern:$0x76325410] }
  0xa2   : > { %v1445_v45 = vrot.slane %v1437_v36, %v9321_v15  ;;  %v580_v46 = vrot.slane %v566_v37, %v9321_v15  ;;  %v581_v48 = vcombine.high %v573_v30, %v573_v30  ;;  %v597_v51 = vrot.slane %v583_v38, %v9321_v15 }
  0xa3   : > { %v1452_v40 = vrot.slane %v1438_v39, %v9321_v15  ;;  %v1462_v49 = vrot.slane %v1454_v41, %v9321_v15  ;;  %v1469_v50 = vrot.slane %v1455_v42, %v9321_v15  ;;  %v598_v53 = vcombine.high %v590_v27, %v590_v27 }
  0xa4   : > { %v582_v52 = vcombine.high %v580_v46, %v580_v46  ;;  %v1059_v54 = vmul.f32 %v8618_v43, %v9346_v21  ;;  %v1060_v29 = vmul.f32 %v9712_v17, %v573_v30  ;;  %v1061_v60 = vmul.f32 %v9349_v22, %v581_v48 }
  0xa5   : > { %v1453_v55 = vcombine.low %v1445_v45, %v1452_v40  ;;  %v1470_v58 = vcombine.low %v1462_v49, %v1469_v50  ;;  %v1062_v19 = vmul.f32 %v9717_v59, %v580_v46  ;;  %v1064_v44 = vmul.f32 %v9712_v17, %v590_v27 }
  0xa6   : > { %v1063_v61 = vmul.f32 %v9346_v21, %v582_v52  ;;  %v1065_v57 = vmul.f32 %v9349_v22, %v598_v53  ;;  %v1066_v63 = vmul.f32 %v9717_v59, %v597_v51  ;;  %v1175_v47 = vadd.f32 %v9352_v23, %v1059_v54 }
  0xa7   : > { %v1842_v0 = vpack.c.bf16 %v1470_v58, %v1453_v55  ;;  %v1176_v1 = vadd.f32 %v9728_v4, %v1060_v29  ;;  %v1177_v2 = vadd.f32 %v9355_v24, %v1061_v60  ;;  %v1178_v3 = vadd.f32 %v9735_v9, %v1062_v19 }
  0xa8   : > { %v1179_v6 = vadd.f32 %v9352_v23, %v1063_v61  ;;  %v1180_v8 = vadd.f32 %v9728_v4, %v1064_v44  ;;  %v1181_v11 = vadd.f32 %v9355_v24, %v1065_v57  ;;  %v1182_v56 = vadd.f32 %v9735_v9, %v1066_v63 }
  0xa9   : > { %8835 = vmatprep.mubr.msk.bf16.mxu0 %vm3418_vm2, %v1842_v0  ;;  %v1265_v7 = vmax.f32 %v1175_v47, 0.0  ;;  %v1266_v12 = vmax.f32 %v1176_v1, 0.0  ;;  %v1267_v18 = vmax.f32 %v1177_v2, 0.0  ;;  %v1268_v14 = vmax.f32 %v1178_v3, 0.0  ;;  %v471_v47 = vld [vmem:[%s9682_s15 + $0x48] sm:$0xff] }
  0xaa   : > { %v1269_v62 = vmax.f32 %v1179_v6, 0.0  ;;  %v1270_v16 = vmax.f32 %v1180_v8, 0.0  ;;  %v1271_v10 = vmax.f32 %v1181_v11, 0.0  ;;  %v1272_v25 = vmax.f32 %v1182_v56, 0.0  ;;  %v9805_v8 = vld [vmem:[%s9682_s15 + $0x50] sm:$0xff] }
  0xab   : > { %v1471_v26 = vcombine.low %v1265_v7, %v1266_v12  ;;  %v599_v31 = vcombine.high %v597_v51, %v597_v51  ;;  %v607_v32 = vcombine.high %v468_v13, %v468_v13  ;;  %v1472_v33 = vcombine.low %v1267_v18, %v1268_v14  ;;  %v8620_v14 = vld.sshfl [vmem:[%s9682_s15 + $0x40] sm:$0x3 pattern:$0x76325410] }
  0xac   : > { %v1488_v34 = vcombine.low %v1269_v62, %v1270_v16  ;;  %v614_v20 = vrot.slane %v468_v13, %v9321_v15  ;;  %v631_v36 = vrot.slane %v9776_v28, %v9321_v15  ;;  %v1489_v30 = vcombine.low %v1271_v10, %v1272_v25 }
  0xad   : > { %v1479_v37 = vrot.slane %v1471_v26, %v9321_v15  ;;  %v621_v39 = vrot.slane %v607_v32, %v9321_v15  ;;  %v1067_v41 = vmul.f32 %v9346_v21, %v599_v31  ;;  %v1486_v42 = vrot.slane %v1472_v33, %v9321_v15 }
  0xae   : > { %v1496_v43 = vrot.slane %v1488_v34, %v9321_v15  ;;  %v622_v38 = vcombine.high %v614_v20, %v614_v20  ;;  %v639_v45 = vcombine.high %v631_v36, %v631_v36  ;;  %v1503_v46 = vrot.slane %v1489_v30, %v9321_v15 }
  0xaf   : > { %v623_v48 = vcombine.high %v621_v39, %v621_v39  ;;  %v1068_v27 = vmul.f32 %v8619_v35, %v9712_v17  ;;  %v1069_v40 = vmul.f32 %v9349_v22, %v614_v20  ;;  %v1487_v49 = vcombine.low %v1479_v37, %v1486_v42 }
  0xb0   : > { %v1070_v50 = vmul.f32 %v9717_v59, %v622_v38  ;;  %v1071_v51 = vmul.f32 %v9346_v21, %v621_v39  ;;  %v1073_v52 = vmul.f32 %v9349_v22, %v631_v36  ;;  %v1504_v53 = vcombine.low %v1496_v43, %v1503_v46 }
  0xb1   : > { %v1072_v54 = vmul.f32 %v9712_v17, %v623_v48  ;;  %v1074_v29 = vmul.f32 %v9717_v59, %v639_v45  ;;  %v1183_v55 = vadd.f32 %v9352_v23, %v1067_v41  ;;  %v1184_v58 = vadd.f32 %v9728_v4, %v1068_v27 }
  0xb2   : > { %v1185_v60 = vadd.f32 %v9355_v24, %v1069_v40  ;;  %v1186_v19 = vadd.f32 %v9735_v9, %v1070_v50  ;;  %v1187_v61 = vadd.f32 %v9352_v23, %v1071_v51  ;;  %v1843_v44 = vpack.c.bf16 %v1504_v53, %v1487_v49 }
  0xb3   : > { %v1188_v57 = vadd.f32 %v9728_v4, %v1072_v54  ;;  %v1189_v63 = vadd.f32 %v9355_v24, %v1073_v52  ;;  %v1190_v0 = vadd.f32 %v9735_v9, %v1074_v29  ;;  %v1273_v1 = vmax.f32 %v1183_v55, 0.0 }
  0xb4   : > { %v1274_v2 = vmax.f32 %v1184_v58, 0.0  ;;  %v1275_v3 = vmax.f32 %v1185_v60, 0.0  ;;  %v1276_v6 = vmax.f32 %v1186_v19, 0.0  ;;  %8836 = vmatmul.mubr.msk.bf16.vlgmr.msra.gmra.mrb[0].mxu0 %vm3418_vm2, %v1843_v44  ;;  %v1277_v11 = vmax.f32 %v1187_v61, 0.0  ;;  %v474_v60 = vld [vmem:[%s9682_s15 + $0x60] sm:$0xff] }
  0xb5   : > { %v1278_v13 = vmax.f32 %v1188_v57, 0.0  ;;  %v1279_v56 = vmax.f32 %v1189_v63, 0.0  ;;  %v1280_v7 = vmax.f32 %v1190_v0, 0.0  ;;  %v624_v62 = vcombine.high %v9776_v28, %v9776_v28 }
  0xb6   : > { %v1505_v12 = vcombine.low %v1273_v1, %v1274_v2  ;;  %v1506_v18 = vcombine.low %v1275_v3, %v1276_v6  ;;  %v648_v16 = vcombine.high %v471_v47, %v471_v47  ;;  %v655_v26 = vrot.slane %v471_v47, %v9321_v15 }
  0xb7   : > { %v1522_v10 = vcombine.low %v1277_v11, %v1278_v13  ;;  %v1523_v25 = vcombine.low %v1279_v56, %v1280_v7  ;;  %v672_v31 = vrot.slane %v9805_v8, %v9321_v15  ;;  %v638_v34 = vrot.slane %v624_v62, %v9321_v15 }
  0xb8   : > { %v1513_v32 = vrot.slane %v1505_v12, %v9321_v15  ;;  %v1520_v33 = vrot.slane %v1506_v18, %v9321_v15  ;;  %v662_v35 = vrot.slane %v648_v16, %v9321_v15  ;;  %v663_v36 = vcombine.high %v655_v26, %v655_v26  ;;  %v8621_v12 = vld.sshfl [vmem:[%s9682_s15 + $0x58] sm:$0x3 pattern:$0x76325410] }
  0xb9   : > { %v1530_v20 = vrot.slane %v1522_v10, %v9321_v15  ;;  %v1537_v28 = vrot.slane %v1523_v25, %v9321_v15  ;;  %v1077_v37 = vmul.f32 %v8620_v14, %v9349_v22  ;;  %v640_v39 = vcombine.high %v638_v34, %v638_v34 }
  0xba   : > { %v1521_v30 = vcombine.low %v1513_v32, %v1520_v33  ;;  %v664_v41 = vcombine.high %v662_v35, %v662_v35  ;;  %v1075_v42 = vmul.f32 %v9346_v21, %v638_v34  ;;  %v1078_v38 = vmul.f32 %v9717_v59, %v655_v26 }
  0xbb   : > { %v1538_v43 = vcombine.low %v1530_v20, %v1537_v28  ;;  %v1079_v45 = vmul.f32 %v9346_v21, %v663_v36  ;;  %v1080_v46 = vmul.f32 %v9712_v17, %v662_v35  ;;  %v1076_v48 = vmul.f32 %v9712_v17, %v640_v39 }
  0xbc   : > { %v1081_v27 = vmul.f32 %v9349_v22, %v664_v41  ;;  %v1082_v40 = vmul.f32 %v9717_v59, %v672_v31  ;;  %v1191_v49 = vadd.f32 %v9352_v23, %v1075_v42  ;;  %v1193_v51 = vadd.f32 %v9355_v24, %v1077_v37 }
  0xbd   : > { %v1844_v50 = vpack.c.bf16 %v1538_v43, %v1521_v30  ;;  %v1194_v52 = vadd.f32 %v9735_v9, %v1078_v38  ;;  %v1195_v53 = vadd.f32 %v9352_v23, %v1079_v45  ;;  %v1192_v54 = vadd.f32 %v9728_v4, %v1076_v48 }
  0xbe   : > { %v1196_v29 = vadd.f32 %v9728_v4, %v1080_v46  ;;  %v1197_v55 = vadd.f32 %v9355_v24, %v1081_v27  ;;  %v1198_v58 = vadd.f32 %v9735_v9, %v1082_v40  ;;  %v1281_v19 = vmax.f32 %v1191_v49, 0.0 }
  0xbf   : > { %8839 = vmatprep.mubr.msk.bf16.mxu0 %vm3418_vm2, %v1844_v50  ;;  %v1283_v61 = vmax.f32 %v1193_v51, 0.0  ;;  %v1284_v44 = vmax.f32 %v1194_v52, 0.0  ;;  %v1285_v57 = vmax.f32 %v1195_v53, 0.0  ;;  %v1282_v63 = vmax.f32 %v1192_v54, 0.0  ;;  %v475_v50 = vld [vmem:[%s9682_s15 + $0x68] sm:$0xff]  ;;  %v477_v51 = vld [vmem:[%s9682_s15 + $0x78] sm:$0xff] }
  0xc0   : > { %v1286_v0 = vmax.f32 %v1196_v29, 0.0  ;;  %v1287_v47 = vmax.f32 %v1197_v55, 0.0  ;;  %v1288_v1 = vmax.f32 %v1198_v58, 0.0  ;;  %v665_v3 = vcombine.high %v9805_v8, %v9805_v8 }
  0xc1   : > { %v1540_v2 = vcombine.low %v1283_v61, %v1284_v44  ;;  %v680_v6 = vcombine.high %v672_v31, %v672_v31  ;;  %v689_v11 = vcombine.high %v474_v60, %v474_v60  ;;  %v1539_v13 = vcombine.low %v1281_v19, %v1282_v63 }
  0xc2   : > { %v1556_v56 = vcombine.low %v1285_v57, %v1286_v0  ;;  %v1557_v7 = vcombine.low %v1287_v47, %v1288_v1  ;;  %v696_v18 = vrot.slane %v474_v60, %v9321_v15  ;;  %v679_v62 = vrot.slane %v665_v3, %v9321_v15 }
  0xc3   : > { %v1554_v14 = vrot.slane %v1540_v2, %v9321_v15  ;;  %v703_v16 = vrot.slane %v689_v11, %v9321_v15  ;;  %v1083_v10 = vmul.f32 %v9346_v21, %v680_v6  ;;  %v1547_v25 = vrot.slane %v1539_v13, %v9321_v15  ;;  %v8622_v6 = vld.sshfl [vmem:[%s9682_s15 + $0x70] sm:$0x3 pattern:$0x76325410] }
  0xc4   : > { %v1564_v8 = vrot.slane %v1556_v56, %v9321_v15  ;;  %v1571_v26 = vrot.slane %v1557_v7, %v9321_v15  ;;  %v704_v31 = vcombine.high %v696_v18, %v696_v18  ;;  %v681_v32 = vcombine.high %v679_v62, %v679_v62 }
  0xc5   : > { %v705_v33 = vcombine.high %v703_v16, %v703_v16  ;;  %v1084_v34 = vmul.f32 %v9712_v17, %v679_v62  ;;  %v1086_v35 = vmul.f32 %v8621_v12, %v9717_v59  ;;  %v1555_v20 = vcombine.low %v1547_v25, %v1554_v14 }
  0xc6   : > { %v1572_v28 = vcombine.low %v1564_v8, %v1571_v26  ;;  %v1087_v36 = vmul.f32 %v9346_v21, %v696_v18  ;;  %v1088_v37 = vmul.f32 %v9712_v17, %v704_v31  ;;  %v1085_v30 = vmul.f32 %v9349_v22, %v681_v32 }
  0xc7   : > { %v1089_v39 = vmul.f32 %v9349_v22, %v703_v16  ;;  %v1090_v41 = vmul.f32 %v9717_v59, %v705_v33  ;;  %v1199_v42 = vadd.f32 %v9352_v23, %v1083_v10  ;;  %v1200_v38 = vadd.f32 %v9728_v4, %v1084_v34 }
  0xc8   : > { %v1845_v43 = vpack.c.bf16 %v1572_v28, %v1555_v20  ;;  %v1202_v45 = vadd.f32 %v9735_v9, %v1086_v35  ;;  %v1203_v46 = vadd.f32 %v9352_v23, %v1087_v36  ;;  %v1201_v48 = vadd.f32 %v9355_v24, %v1085_v30 }
  0xc9   : > { %v1204_v27 = vadd.f32 %v9728_v4, %v1088_v37  ;;  %v1205_v40 = vadd.f32 %v9355_v24, %v1089_v39  ;;  %v1206_v49 = vadd.f32 %v9735_v9, %v1090_v41  ;;  %v1289_v52 = vmax.f32 %v1199_v42, 0.0 }
  0xca   : > { %8840 = vmatmul.mubr.msk.bf16.gmra.mrb[4].mxu0 %vm3418_vm2, %v1845_v43  ;;  %v1290_v53 = vmax.f32 %v1200_v38, 0.0  ;;  %v1292_v54 = vmax.f32 %v1202_v45, 0.0  ;;  %v1293_v29 = vmax.f32 %v1203_v46, 0.0  ;;  %v1291_v55 = vmax.f32 %v1201_v48, 0.0  ;;  %v478_v38 = vld [vmem:[%s9682_s15 + $0x80] sm:$0xff] }
  0xcb   : > { %v1294_v58 = vmax.f32 %v1204_v27, 0.0  ;;  %v1295_v60 = vmax.f32 %v1205_v40, 0.0  ;;  %v1296_v19 = vmax.f32 %v1206_v49, 0.0  ;;  %v706_v44 = vcombine.high %v475_v50, %v475_v50  ;;  %v480_v40 = vld [vmem:[%s9682_s15 + $0x90] sm:$0xff] }
  0xcc   : > { %v1573_v61 = vcombine.low %v1289_v52, %v1290_v53  ;;  %v713_v57 = vrot.slane %v475_v50, %v9321_v15  ;;  %v730_v63 = vcombine.high %v477_v51, %v477_v51  ;;  %v1574_v0 = vcombine.low %v1291_v55, %v1292_v54 }
  0xcd   : > { %v1590_v47 = vcombine.low %v1293_v29, %v1294_v58  ;;  %v1591_v1 = vcombine.low %v1295_v60, %v1296_v19  ;;  %v737_v2 = vrot.slane %v477_v51, %v9321_v15  ;;  %v720_v11 = vrot.slane %v706_v44, %v9321_v15 }
  0xce   : > { %v1581_v3 = vrot.slane %v1573_v61, %v9321_v15  ;;  %v721_v13 = vcombine.high %v713_v57, %v713_v57  ;;  %v744_v56 = vrot.slane %v730_v63, %v9321_v15  ;;  %v1588_v7 = vrot.slane %v1574_v0, %v9321_v15 }
  0xcf   : > { %v1598_v12 = vrot.slane %v1590_v47, %v9321_v15  ;;  %v1605_v18 = vrot.slane %v1591_v1, %v9321_v15  ;;  %v745_v14 = vcombine.high %v737_v2, %v737_v2  ;;  %v722_v62 = vcombine.high %v720_v11, %v720_v11 }
  0xd0   : > { %v1091_v16 = vmul.f32 %v9346_v21, %v713_v57  ;;  %v1092_v10 = vmul.f32 %v9712_v17, %v721_v13  ;;  %v1093_v25 = vmul.f32 %v9349_v22, %v720_v11  ;;  %v1589_v8 = vcombine.low %v1581_v3, %v1588_v7  ;;  %v8623_v57 = vld.sshfl [vmem:[%s9682_s15 + $0x88] sm:$0x3 pattern:$0x76325410] }
  0xd1   : > { %v1606_v26 = vcombine.low %v1598_v12, %v1605_v18  ;;  %v1095_v31 = vmul.f32 %v8622_v6, %v9346_v21  ;;  %v1096_v32 = vmul.f32 %v9712_v17, %v737_v2  ;;  %v1094_v33 = vmul.f32 %v9717_v59, %v722_v62 }
  0xd2   : > { %v1097_v34 = vmul.f32 %v9349_v22, %v745_v14  ;;  %v1098_v35 = vmul.f32 %v9717_v59, %v744_v56  ;;  %v1207_v20 = vadd.f32 %v9352_v23, %v1091_v16  ;;  %v1208_v36 = vadd.f32 %v9728_v4, %v1092_v10 }
  0xd3   : > { %v1846_v28 = vpack.c.bf16 %v1606_v26, %v1589_v8  ;;  %v1209_v37 = vadd.f32 %v9355_v24, %v1093_v25  ;;  %v1211_v30 = vadd.f32 %v9352_v23, %v1095_v31  ;;  %v1210_v39 = vadd.f32 %v9735_v9, %v1094_v33 }
  0xd4   : > { %v1212_v41 = vadd.f32 %v9728_v4, %v1096_v32  ;;  %v1213_v42 = vadd.f32 %v9355_v24, %v1097_v34  ;;  %v1214_v43 = vadd.f32 %v9735_v9, %v1098_v35  ;;  %v1297_v45 = vmax.f32 %v1207_v20, 0.0 }
  0xd5   : > { %8843 = vmatprep.mubr.msk.bf16.mxu0 %vm3418_vm2, %v1846_v28  ;;  %v1298_v46 = vmax.f32 %v1208_v36, 0.0  ;;  %v1299_v48 = vmax.f32 %v1209_v37, 0.0  ;;  %v1301_v27 = vmax.f32 %v1211_v30, 0.0  ;;  %v1300_v49 = vmax.f32 %v1210_v39, 0.0  ;;  %v481_v36 = vld [vmem:[%s9682_s15 + $0x98] sm:$0xff] }
  0xd6   : > { %v1302_v50 = vmax.f32 %v1212_v41, 0.0  ;;  %v1303_v51 = vmax.f32 %v1213_v42, 0.0  ;;  %v1304_v52 = vmax.f32 %v1214_v43, 0.0  ;;  %v746_v54 = vcombine.high %v744_v56, %v744_v56  ;;  %v483_v42 = vld [vmem:[%s9682_s15 + $0xa8] sm:$0xff] }
  0xd7   : > { %v1607_v53 = vcombine.low %v1297_v45, %v1298_v46  ;;  %v747_v29 = vcombine.high %v478_v38, %v478_v38  ;;  %v754_v55 = vrot.slane %v478_v38, %v9321_v15  ;;  %v1608_v58 = vcombine.low %v1299_v48, %v1300_v49 }
  0xd8   : > { %v1624_v60 = vcombine.low %v1301_v27, %v1302_v50  ;;  %v1625_v19 = vcombine.low %v1303_v51, %v1304_v52  ;;  %v778_v61 = vrot.slane %v480_v40, %v9321_v15  ;;  %v1099_v47 = vmul.f32 %v9346_v21, %v746_v54 }
  0xd9   : > { %v1615_v44 = vrot.slane %v1607_v53, %v9321_v15  ;;  %v761_v63 = vrot.slane %v747_v29, %v9321_v15  ;;  %v762_v0 = vcombine.high %v754_v55, %v754_v55  ;;  %v1622_v1 = vrot.slane %v1608_v58, %v9321_v15  ;;  %v8624_v58 = vld.sshfl [vmem:[%s9682_s15 + $0xa0] sm:$0x3 pattern:$0x76325410] }
  0xda   : > { %v1632_v2 = vrot.slane %v1624_v60, %v9321_v15  ;;  %v1639_v3 = vrot.slane %v1625_v19, %v9321_v15  ;;  %v786_v6 = vcombine.high %v778_v61, %v778_v61  ;;  %v1100_v13 = vmul.f32 %v9712_v17, %v754_v55 }
  0xdb   : > { %v763_v11 = vcombine.high %v761_v63, %v761_v63  ;;  %v1101_v56 = vmul.f32 %v9349_v22, %v762_v0  ;;  %v1102_v7 = vmul.f32 %v9717_v59, %v761_v63  ;;  %v1623_v12 = vcombine.low %v1615_v44, %v1622_v1 }
  0xdc   : > { %v1640_v18 = vcombine.low %v1632_v2, %v1639_v3  ;;  %v1104_v14 = vmul.f32 %v8623_v57, %v9712_v17  ;;  %v1105_v62 = vmul.f32 %v9349_v22, %v778_v61  ;;  %v1106_v10 = vmul.f32 %v9717_v59, %v786_v6 }
  0xdd   : > { %v1103_v16 = vmul.f32 %v9346_v21, %v763_v11  ;;  %v1215_v25 = vadd.f32 %v9352_v23, %v1099_v47  ;;  %v1216_v8 = vadd.f32 %v9728_v4, %v1100_v13  ;;  %v1217_v31 = vadd.f32 %v9355_v24, %v1101_v56 }
  0xde   : > { %v1847_v26 = vpack.c.bf16 %v1640_v18, %v1623_v12  ;;  %v1218_v32 = vadd.f32 %v9735_v9, %v1102_v7  ;;  %v1220_v33 = vadd.f32 %v9728_v4, %v1104_v14  ;;  %v1221_v35 = vadd.f32 %v9355_v24, %v1105_v62 }
  0xdf   : > { %v1219_v34 = vadd.f32 %v9352_v23, %v1103_v16  ;;  %v1222_v20 = vadd.f32 %v9735_v9, %v1106_v10  ;;  %v1305_v28 = vmax.f32 %v1215_v25, 0.0  ;;  %v1306_v37 = vmax.f32 %v1216_v8, 0.0 }
  0xe0   : > { %8844 = vmatmul.mubr.msk.bf16.gmra.mrb[8].mxu0 %vm3418_vm2, %v1847_v26  ;;  %v1307_v30 = vmax.f32 %v1217_v31, 0.0  ;;  %v1308_v39 = vmax.f32 %v1218_v32, 0.0  ;;  %v1310_v41 = vmax.f32 %v1220_v33, 0.0  ;;  %v1311_v38 = vmax.f32 %v1221_v35, 0.0  ;;  %v484_v31 = vld [vmem:[%s9682_s15 + $0xb0] sm:$0xff] }
  0xe1   : > { %v1309_v43 = vmax.f32 %v1219_v34, 0.0  ;;  %v1312_v45 = vmax.f32 %v1222_v20, 0.0  ;;  %v771_v46 = vcombine.high %v480_v40, %v480_v40  ;;  %v1641_v48 = vcombine.low %v1305_v28, %v1306_v37 }
  0xe2   : > { %v1642_v27 = vcombine.low %v1307_v30, %v1308_v39  ;;  %v788_v49 = vcombine.high %v481_v36, %v481_v36  ;;  %v795_v50 = vrot.slane %v481_v36, %v9321_v15  ;;  %v819_v54 = vrot.slane %v483_v42, %v9321_v15 }
  0xe3   : > { %v1658_v51 = vcombine.low %v1309_v43, %v1310_v41  ;;  %v1659_v52 = vcombine.low %v1311_v38, %v1312_v45  ;;  %v785_v53 = vrot.slane %v771_v46, %v9321_v15  ;;  %v1649_v29 = vrot.slane %v1641_v48, %v9321_v15 }
  0xe4   : > { %v1656_v55 = vrot.slane %v1642_v27, %v9321_v15  ;;  %v802_v60 = vrot.slane %v788_v49, %v9321_v15  ;;  %v803_v19 = vcombine.high %v795_v50, %v795_v50  ;;  %v1109_v47 = vmul.f32 %v9349_v22, %v795_v50 }
  0xe5   : > { %v1666_v40 = vrot.slane %v1658_v51, %v9321_v15  ;;  %v1673_v61 = vrot.slane %v1659_v52, %v9321_v15  ;;  %v787_v44 = vcombine.high %v785_v53, %v785_v53  ;;  %v1107_v57 = vmul.f32 %v9346_v21, %v785_v53  ;;  %v8625_v53 = vld.sshfl [vmem:[%s9682_s15 + $0xb8] sm:$0x3 pattern:$0x76325410] }
  0xe6   : > { %v1657_v63 = vcombine.low %v1649_v29, %v1656_v55  ;;  %v804_v0 = vcombine.high %v802_v60, %v802_v60  ;;  %v1110_v1 = vmul.f32 %v9717_v59, %v803_v19  ;;  %v1111_v6 = vmul.f32 %v9346_v21, %v802_v60 }
  0xe7   : > { %v1674_v2 = vcombine.low %v1666_v40, %v1673_v61  ;;  %v1108_v3 = vmul.f32 %v9712_v17, %v787_v44  ;;  %v1113_v11 = vmul.f32 %v8624_v58, %v9349_v22  ;;  %v1114_v56 = vmul.f32 %v9717_v59, %v819_v54 }
  0xe8   : > { %v1112_v13 = vmul.f32 %v9712_v17, %v804_v0  ;;  %v1223_v7 = vadd.f32 %v9352_v23, %v1107_v57  ;;  %v1225_v12 = vadd.f32 %v9355_v24, %v1109_v47  ;;  %v1226_v62 = vadd.f32 %v9735_v9, %v1110_v1 }
  0xe9   : > { %v1848_v18 = vpack.c.bf16 %v1674_v2, %v1657_v63  ;;  %v1224_v14 = vadd.f32 %v9728_v4, %v1108_v3  ;;  %v1227_v16 = vadd.f32 %v9352_v23, %v1111_v6  ;;  %v1229_v25 = vadd.f32 %v9355_v24, %v1113_v11 }
  0xea   : > { %v1228_v10 = vadd.f32 %v9728_v4, %v1112_v13  ;;  %v1230_v8 = vadd.f32 %v9735_v9, %v1114_v56  ;;  %v1313_v26 = vmax.f32 %v1223_v7, 0.0  ;;  %v1315_v33 = vmax.f32 %v1225_v12, 0.0  ;;  %v486_v13 = vld [vmem:[%s9682_s15 + $0xc0] sm:$0xff] }
  0xeb   : > { %8847 = vmatprep.mubr.msk.bf16.mxu0 %vm3418_vm2, %v1848_v18  ;;  %v1314_v32 = vmax.f32 %v1224_v14, 0.0  ;;  %v1316_v34 = vmax.f32 %v1226_v62, 0.0  ;;  %v1317_v35 = vmax.f32 %v1227_v16, 0.0  ;;  %v1319_v28 = vmax.f32 %v1229_v25, 0.0  ;;  %v487_v14 = vld [vmem:[%s9682_s15 + $0xc8] sm:$0xff] }
  0xec   : > { %v1318_v20 = vmax.f32 %v1228_v10, 0.0  ;;  %v1320_v36 = vmax.f32 %v1230_v8, 0.0  ;;  %v812_v37 = vcombine.high %v483_v42, %v483_v42  ;;  %v827_v41 = vcombine.high %v819_v54, %v819_v54 }
  0xed   : > { %v1675_v30 = vcombine.low %v1313_v26, %v1314_v32  ;;  %v1676_v39 = vcombine.low %v1315_v33, %v1316_v34  ;;  %v829_v43 = vcombine.high %v484_v31, %v484_v31  ;;  %v836_v48 = vrot.slane %v484_v31, %v9321_v15 }
  0xee   : > { %v1692_v38 = vcombine.low %v1317_v35, %v1318_v20  ;;  %v1693_v45 = vcombine.low %v1319_v28, %v1320_v36  ;;  %v826_v46 = vrot.slane %v812_v37, %v9321_v15  ;;  %v1115_v51 = vmul.f32 %v9346_v21, %v827_v41 }
  0xef   : > { %v1683_v27 = vrot.slane %v1675_v30, %v9321_v15  ;;  %v1690_v49 = vrot.slane %v1676_v39, %v9321_v15  ;;  %v843_v50 = vrot.slane %v829_v43, %v9321_v15  ;;  %v844_v29 = vcombine.high %v836_v48, %v836_v48 }
  0xf0   : > { %v1700_v42 = vrot.slane %v1692_v38, %v9321_v15  ;;  %v1707_v52 = vrot.slane %v1693_v45, %v9321_v15  ;;  %v828_v54 = vcombine.high %v826_v46, %v826_v46  ;;  %v1116_v60 = vmul.f32 %v9712_v17, %v826_v46 }
  0xf1   : > { %v1691_v55 = vcombine.low %v1683_v27, %v1690_v49  ;;  %v845_v58 = vcombine.high %v843_v50, %v843_v50  ;;  %v1118_v19 = vmul.f32 %v9717_v59, %v836_v48  ;;  %v1119_v44 = vmul.f32 %v9346_v21, %v844_v29 }
  0xf2   : > { %v1708_v40 = vcombine.low %v1700_v42, %v1707_v52  ;;  %v1117_v61 = vmul.f32 %v9349_v22, %v828_v54  ;;  %v1120_v57 = vmul.f32 %v9712_v17, %v843_v50  ;;  %v1122_v0 = vmul.f32 %v8625_v53, %v9717_v59 }
  0xf3   : > { %v1121_v63 = vmul.f32 %v9349_v22, %v845_v58  ;;  %v1231_v47 = vadd.f32 %v9352_v23, %v1115_v51  ;;  %v1232_v1 = vadd.f32 %v9728_v4, %v1116_v60  ;;  %v1234_v6 = vadd.f32 %v9735_v9, %v1118_v19 }
  0xf4   : > { %v1849_v2 = vpack.c.bf16 %v1708_v40, %v1691_v55  ;;  %v1233_v3 = vadd.f32 %v9355_v24, %v1117_v61  ;;  %v1235_v11 = vadd.f32 %v9352_v23, %v1119_v44  ;;  %v1236_v56 = vadd.f32 %v9728_v4, %v1120_v57 }
  0xf5   : > { %v1237_v7 = vadd.f32 %v9355_v24, %v1121_v63  ;;  %v1238_v12 = vadd.f32 %v9735_v9, %v1122_v0  ;;  %v1321_v18 = vmax.f32 %v1231_v47, 0.0  ;;  %v1322_v62 = vmax.f32 %v1232_v1, 0.0 }
  0xf6   : > { %8848 = vmatmul.mubr.msk.bf16.gmra.mrb[12].mxu0 %vm3418_vm2, %v1849_v2  ;;  %v1323_v16 = vmax.f32 %v1233_v3, 0.0  ;;  %v1324_v10 = vmax.f32 %v1234_v6, 0.0  ;;  %v1325_v25 = vmax.f32 %v1235_v11, 0.0  ;;  %v1326_v8 = vmax.f32 %v1236_v56, 0.0  ;;  %v489_v2 = vld [vmem:[%s9682_s15 + $0xd8] sm:$0xff]  ;;  %v490_v56 = vld [vmem:[%s9682_s15 + $0xe0] sm:$0xff] }
  0xf7   : > { %v1327_v26 = vmax.f32 %v1237_v7, 0.0  ;;  %v1328_v31 = vmax.f32 %v1238_v12, 0.0  ;;  %v853_v32 = vcombine.high %v486_v13, %v486_v13  ;;  %v1709_v33 = vcombine.low %v1321_v18, %v1322_v62 }
  0xf8   : > { %v1710_v34 = vcombine.low %v1323_v16, %v1324_v10  ;;  %v860_v35 = vrot.slane %v486_v13, %v9321_v15  ;;  %v870_v20 = vcombine.high %v487_v14, %v487_v14  ;;  %v1726_v28 = vcombine.low %v1325_v25, %v1326_v8 }
  0xf9   : > { %v1727_v36 = vcombine.low %v1327_v26, %v1328_v31  ;;  %v867_v37 = vrot.slane %v853_v32, %v9321_v15  ;;  %v877_v30 = vrot.slane %v487_v14, %v9321_v15  ;;  %v1717_v39 = vrot.slane %v1709_v33, %v9321_v15  ;;  %v8626_v31 = vld.sshfl [vmem:[%s9682_s15 + $0xd0] sm:$0x3 pattern:$0x76325410] }
  0xfa   : > { %v1724_v41 = vrot.slane %v1710_v34, %v9321_v15  ;;  %v868_v43 = vcombine.high %v860_v35, %v860_v35  ;;  %v884_v38 = vrot.slane %v870_v20, %v9321_v15  ;;  %v1734_v45 = vrot.slane %v1726_v28, %v9321_v15 }
  0xfb   : > { %v1741_v46 = vrot.slane %v1727_v36, %v9321_v15  ;;  %v869_v48 = vcombine.high %v867_v37, %v867_v37  ;;  %v885_v27 = vcombine.high %v877_v30, %v877_v30  ;;  %v1123_v51 = vmul.f32 %v9346_v21, %v860_v35 }
  0xfc   : > { %v1725_v49 = vcombine.low %v1717_v39, %v1724_v41  ;;  %v886_v50 = vcombine.high %v884_v38, %v884_v38  ;;  %v1124_v42 = vmul.f32 %v9712_v17, %v868_v43  ;;  %v1125_v53 = vmul.f32 %v9349_v22, %v867_v37 }
  0xfd   : > { %v1742_v52 = vcombine.low %v1734_v45, %v1741_v46  ;;  %v1126_v54 = vmul.f32 %v9717_v59, %v869_v48  ;;  %v1127_v29 = vmul.f32 %v9346_v21, %v877_v30  ;;  %v1128_v55 = vmul.f32 %v9712_v17, %v885_v27 }
  0xfe   : > { %v1129_v58 = vmul.f32 %v9349_v22, %v884_v38  ;;  %v1130_v60 = vmul.f32 %v9717_v59, %v886_v50  ;;  %v1239_v19 = vadd.f32 %v9352_v23, %v1123_v51  ;;  %v1240_v61 = vadd.f32 %v9728_v4, %v1124_v42 }
  0xff   : > { %v1850_v40 = vpack.c.bf16 %v1742_v52, %v1725_v49  ;;  %v1241_v44 = vadd.f32 %v9355_v24, %v1125_v53  ;;  %v1242_v57 = vadd.f32 %v9735_v9, %v1126_v54  ;;  %v1243_v63 = vadd.f32 %v9352_v23, %v1127_v29 }
 0x100   : > { %v1244_v0 = vadd.f32 %v9728_v4, %v1128_v55  ;;  %v1245_v47 = vadd.f32 %v9355_v24, %v1129_v58  ;;  %v1246_v1 = vadd.f32 %v9735_v9, %v1130_v60  ;;  %v1329_v3 = vmax.f32 %v1239_v19, 0.0 }
 0x101   : > { %8851 = vmatprep.mubr.msk.bf16.mxu0 %vm3418_vm2, %v1850_v40  ;;  %v1330_v6 = vmax.f32 %v1240_v61, 0.0  ;;  %v1331_v11 = vmax.f32 %v1241_v44, 0.0  ;;  %v1332_v13 = vmax.f32 %v1242_v57, 0.0  ;;  %v1333_v7 = vmax.f32 %v1243_v63, 0.0 }
 0x102   : > { %v1334_v12 = vmax.f32 %v1244_v0, 0.0  ;;  %v1335_v18 = vmax.f32 %v1245_v47, 0.0  ;;  %v1336_v14 = vmax.f32 %v1246_v1, 0.0  ;;  %v894_v10 = vcombine.high %v489_v2, %v489_v2 }
 0x103   : > { %v1743_v62 = vcombine.low %v1329_v3, %v1330_v6  ;;  %v1744_v16 = vcombine.low %v1331_v11, %v1332_v13  ;;  %v901_v25 = vrot.slane %v489_v2, %v9321_v15  ;;  %v911_v32 = vcombine.high %v490_v56, %v490_v56 }
 0x104   : > { %v1760_v8 = vcombine.low %v1333_v7, %v1334_v12  ;;  %v1761_v26 = vcombine.low %v1335_v18, %v1336_v14  ;;  %v918_v33 = vrot.slane %v490_v56, %v9321_v15  ;;  %v908_v20 = vrot.slane %v894_v10, %v9321_v15 }
 0x105   : > { %v1751_v34 = vrot.slane %v1743_v62, %v9321_v15  ;;  %v1758_v35 = vrot.slane %v1744_v16, %v9321_v15  ;;  %v909_v28 = vcombine.high %v901_v25, %v901_v25  ;;  %v925_v30 = vrot.slane %v911_v32, %v9321_v15 }
 0x106   : > { %v1768_v36 = vrot.slane %v1760_v8, %v9321_v15  ;;  %v1775_v37 = vrot.slane %v1761_v26, %v9321_v15  ;;  %v926_v39 = vcombine.high %v918_v33, %v918_v33  ;;  %v910_v43 = vcombine.high %v908_v20, %v908_v20 }
 0x107   : > { %v1759_v41 = vcombine.low %v1751_v34, %v1758_v35  ;;  %v1131_v38 = vmul.f32 %v8626_v31, %v9346_v21  ;;  %v1132_v45 = vmul.f32 %v9712_v17, %v901_v25  ;;  %v1133_v48 = vmul.f32 %v9349_v22, %v909_v28  ;;  %v10068_v28 = vld [vmem:[%s12410_s8] ss:$0 sm:$0xff] }
 0x108   : > { %v1776_v46 = vcombine.low %v1768_v36, %v1775_v37  ;;  %v1134_v27 = vmul.f32 %v9717_v59, %v908_v20  ;;  %v1136_v49 = vmul.f32 %v9712_v17, %v918_v33  ;;  %v1135_v50 = vmul.f32 %v9346_v21, %v910_v43 }
 0x109   : > { %v1137_v51 = vmul.f32 %v9349_v22, %v926_v39  ;;  %v1138_v42 = vmul.f32 %v9717_v59, %v925_v30  ;;  %v1247_v52 = vadd.f32 %v9352_v23, %v1131_v38  ;;  %v1248_v54 = vadd.f32 %v9728_v4, %v1132_v45  ;;  %v8627_v22 = vld.sshfl [vmem:[%s9682_s15 + $0xe8] sm:$0x3 pattern:$0x76325410] }
 0x10a   : > { %v1851_v53 = vpack.c.bf16 %v1776_v46, %v1759_v41  ;;  %v1249_v29 = vadd.f32 %v9355_v24, %v1133_v48  ;;  %v1250_v55 = vadd.f32 %v9735_v9, %v1134_v27  ;;  %v1251_v58 = vadd.f32 %v9352_v23, %v1135_v50 }
 0x10b   : > { %v1252_v60 = vadd.f32 %v9728_v4, %v1136_v49  ;;  %v1253_v19 = vadd.f32 %v9355_v24, %v1137_v51  ;;  %v1254_v40 = vadd.f32 %v9735_v9, %v1138_v42  ;;  %v1337_v59 = vmax.f32 %v1247_v52, 0.0 }
 0x10c   : > { %8852 = vmatmul.mubr.msk.bf16.gmra.mrb[16].mxu0 %vm3418_vm2, %v1851_v53  ;;  %v1338_v61 = vmax.f32 %v1248_v54, 0.0  ;;  %v1339_v44 = vmax.f32 %v1249_v29, 0.0  ;;  %v1340_v57 = vmax.f32 %v1250_v55, 0.0  ;;  %v1341_v63 = vmax.f32 %v1251_v58, 0.0 }
 0x10d   : > { %v1342_v0 = vmax.f32 %v1252_v60, 0.0  ;;  %v1343_v47 = vmax.f32 %v1253_v19, 0.0  ;;  %v1344_v1 = vmax.f32 %v1254_v40, 0.0  ;;  %v927_v6 = vcombine.high %v925_v30, %v925_v30 }
 0x10e   : > { %v1777_v2 = vcombine.low %v1337_v59, %v1338_v61  ;;  %v1778_v3 = vcombine.low %v1339_v44, %v1340_v57  ;;  %v1140_v11 = vmul.f32 %v8627_v22, %v9712_v17  ;;  %v10071_v36 = vadd.s32 16, %v9302_v5 }
 0x10f   : > { %v1794_v13 = vcombine.low %v1341_v63, %v1342_v0  ;;  %v1795_v24 = vcombine.low %v1343_v47, %v1344_v1  ;;  %v1139_v7 = vmul.f32 %v9346_v21, %v927_v6  ;;  %v9149_v21 = vld [vmem:[%s12411_s9 + $0x10] sm:$0xff]   ;;  %v10074_v30 = vstv %s10063_s27  ;;  %s12555_s27 = smov (!%p452_p7, %s10063_s27), 15 }
 0x110   : > { %v1785_v9 = vrot.slane %v1777_v2, %v9321_v15  ;;  %v1792_v56 = vrot.slane %v1778_v3, %v9321_v15  ;;  %v1256_v12 = vadd.f32 %v9728_v4, %v1140_v11  ;;  %v12414_v4 = vmov 0.0   ;;  %s8614_s17 = sshll.u32 %s12555_s27, 1 }
 0x111   : > { %v1802_v18 = vrot.slane %v1794_v13, %v9321_v15  ;;  %v1809_v14 = vrot.slane %v1795_v24, %v9321_v15  ;;  %v1255_v16 = vadd.f32 %v9352_v23, %v1139_v7  ;;  %8859 = vmatprep.subr.bf16.mxu0 %v12414_v4  ;;  %8979 = vmatprep.subr.bf16.mxu1 %v12414_v4  ;;  %v9150_v23 = vld [vmem:[%s12411_s9 + $0x18] sm:$0xff]   ;;  %vm4064_vm4 = vcmp.eq.s32.totalorder %v10071_v36, 17  ;;  %s456_s18 = sadd.s32 %s8615_s30, %s8614_s17 }
 0x112   : > { %v1793_v62 = vcombine.low %v1785_v9, %v1792_v56  ;;  %v1346_v10 = vmax.f32 %v1256_v12, 0.0  ;;  %8860 = vmatpush3.bf16.msra.mxu0 %v9149_v21  ;;  %8981 = vmatpush3.bf16.msra.mxu1 %v9149_v21  ;;  %vm4068_vm5 = vcmp.eq.s32.totalorder %v10074_v30, 0  ;;  %vm4108_vm6 = vcmp.eq.s32.totalorder %v10074_v30, 17  ;;  %s8616_s27 = sshll.u32 %s456_s18, 3 }
 0x113   : > { %v1810_v25 = vcombine.low %v1802_v18, %v1809_v14  ;;  %v1345_v17 = vmax.f32 %v1255_v16, 0.0  ;;  %8861 = vmatprep.subr.bf16.mxu0 %v12414_v4  ;;  %8980 = vmatprep.subr.bf16.mxu1 %v12414_v4  ;;  %vm4080_vm7 = vmor %vm4064_vm4, %vm4068_vm5  ;;  %v9198_v52 = vmov 1966171168   ;;  %v10099_v24 = vadd.s32 1, %v10074_v30  ;;  %s11890_s14 = scalar_lea.vmem %s12413_s11, %s8616_s27 }
 0x114   : > { %8895 = vmatprep.mubr.msk.bf16.mxu1 %vm9197_vm3, %v12414_v4  ;;  %v4716_v53 = vunpack.c.l.s4 %v9198_v52  ;;  %vm4120_vm8 = vmor %vm4080_vm7, %vm4108_vm6  ;;  %v10109_v14 = vadd.s32 2, %v10074_v30 }
 0x115   : > { %v1852_v8 = vpack.c.bf16 %v1810_v25, %v1793_v62  ;;  %v1811_v26 = vcombine.low %v1345_v17, %v1346_v10  ;;  %vm4078_vm10 = vmor %vm4059_vm9, %vm4068_vm5  ;;  %vm4069_vm11 = vcmp.eq.s32.totalorder %v10099_v24, 0  ;;  %vm4109_vm15 = vcmp.eq.s32.totalorder %v10099_v24, 17 }
 0x116   : > { %8862 = vmatpush3.bf16.msra.mxu0 %v9150_v23  ;;  %8982 = vmatpush3.bf16.msra.mxu1 %v9150_v23  ;;  %v4717_v63 = vunpack.c.0.s8 %v4716_v53  ;;  %vm10123_vm12 = vmor %vm4078_vm10, %vm4108_vm6  ;;  %vm4070_vm0 = vcmp.eq.s32.totalorder %v10109_v14, 0 }
 0x117   : > { %8855 = vmatprep.mubr.msk.bf16.mxu0 %vm3418_vm2, %v1852_v8  ;;  %v1818_v31 = vrot.slane %v1811_v26, %v9321_v15  ;;  %8899 = vmatprep.subr.bf16.mxu1 %v12414_v4  ;;  %vm4119_vm13 = vmor %vm4068_vm5, %vm4108_vm6 }
 0x118   : > { %v10115_v8 = vsub.s32 %v4717_v63, %v9302_v5  ;;  %vm4081_vm14 = vmor %vm4059_vm9, %vm4069_vm11 }
 0x119   : > { %v1853_v32 = vpack.c.bf16 %v1818_v31, %v1818_v31  ;;  %vm10162_vm5 = vmor %vm4081_vm14, %vm4109_vm15 }
 0x11a   : > { %vm10198_vm6 = vmor %vm4064_vm4, %vm4070_vm0 }
 0x11b   : > { %8856 = vmatmul.mubr.msk.bf16.gmra.mrb[24].mxu0 %vm3418_vm2, %v1853_v32  ;;  %vm4110_vm2 = vcmp.eq.s32.totalorder %v10109_v14, 17  ;;  %vm4122_vm14 = vmor %vm4069_vm11, %vm4109_vm15 }
 0x11c   : > { %8863 = vmatprep.mubr.msk.bf16.mxu0 %vm9197_vm3, %v12414_v4  ;;  %vm4126_vm10 = vmor %vm10198_vm6, %vm4110_vm2 }
 0x172   : > { %v10052_v33 = vpop.f32.mrb[20].mxu0 }
 0x173   : > { %v10058_v34 = vpop.f32.mrb[21].mxu0 }
 0x174   : > { %v8832_v35 = vpop.f32.mrb[22].mxu0 }
 0x175   : > { %v10060_v20 = vpop.f32.mrb[23].mxu0 }
 0x187   : > { %v8837_v37 = vpop.f32.mrb[0].mxu0 }
 0x188   : > { %v3596_v39 = vadd.f32 %v8837_v37, %v10068_v28  ;;  %v3493_v41 = vpop.f32.mrb[1].mxu0 }
 0x189   : > { %v3594_v43 = vadd.f32 %v10068_v28, %v3493_v41  ;;  %v8838_v38 = vpop.f32.mrb[2].mxu0  ;;  %v10144_v41 = vadd.s32 4, %v10074_v30 }
 0x18a   : > { %v3619_v45 = vmax.f32 %v3596_v39, 0.0  ;;  %v3597_v46 = vadd.f32 %v8838_v38, %v10068_v28  ;;  %v3496_v48 = vpop.f32.mrb[3].mxu0  ;;  %v10141_v39 = vadd.s32 3, %v10074_v30  ;;  %v10150_v38 = vadd.s32 6, %v10074_v30 }
 0x18b   : > { %v3617_v27 = vmax.f32 %v3594_v43, 0.0  ;;  %v3595_v49 = vadd.f32 %v10068_v28, %v3496_v48  ;;  %v10147_v43 = vadd.s32 5, %v10074_v30  ;;  %vm4072_vm6 = vcmp.eq.s32.totalorder %v10144_v41, 0 }
 0x18c   : > { %v3697_v50 = vcombine.high %v3619_v45, %v3619_v45  ;;  %v3704_v51 = vrot.slane %v3619_v45, %v9321_v15  ;;  %v3620_v42 = vmax.f32 %v3597_v46, 0.0  ;;  %vm4071_vm7 = vcmp.eq.s32.totalorder %v10141_v39, 0 }
 0x18d   : > { %v3663_v54 = vcombine.high %v3617_v27, %v3617_v27  ;;  %v3670_v29 = vrot.slane %v3617_v27, %v9321_v15  ;;  %v3618_v55 = vmax.f32 %v3595_v49, 0.0 }
 0x18e   : > { %v3711_v58 = vrot.slane %v3697_v50, %v9321_v15  ;;  %v3712_v60 = vcombine.high %v3704_v51, %v3704_v51  ;;  %v4248_v19 = vrot.slane %v3704_v51, %v9321_v15  ;;  %v3721_v57 = vrot.slane %v3620_v42, %v9321_v15 }
 0x18f   : > { %v3677_v40 = vrot.slane %v3663_v54, %v9321_v15  ;;  %v3678_v22 = vcombine.high %v3670_v29, %v3670_v29  ;;  %v3680_v59 = vcombine.high %v3618_v55, %v3618_v55  ;;  %v3687_v2 = vrot.slane %v3618_v55, %v9321_v15 }
 0x190   : > { %v4249_v61 = vcombine.low %v3712_v60, %v3711_v58  ;;  %v3713_v44 = vcombine.high %v3711_v58, %v3711_v58  ;;  %v4650_v6 = vsel %vm4120_vm8, 0.0, %v4248_v19  ;;  %v3714_v13 = vcombine.high %v3620_v42, %v3620_v42  ;;  %vm10213_vm8 = vmor %vm4064_vm4, %vm4069_vm11 }
 0x191   : > { %v3679_v0 = vcombine.high %v3677_v40, %v3677_v40  ;;  %v4208_v47 = vcombine.low %v3670_v29, %v3678_v22  ;;  %v3694_v3 = vrot.slane %v3680_v59, %v9321_v15  ;;  %v3695_v7 = vcombine.high %v3687_v2, %v3687_v2  ;;  %vm4087_vm11 = vmor %vm4059_vm9, %vm4071_vm7 }
 0x192   : > { %v4250_v1 = vcombine.low %v3713_v44, %v3721_v57  ;;  %v4257_v9 = vrot.slane %v4249_v61, %v9321_v15  ;;  %v4679_v17 = vpack.c.bf16 %v4650_v6, %v4650_v6  ;;  %v10118_v26 = vrot.slane %v3714_v13, %v9321_v15 }
 0x193   : > { %v4209_v11 = vcombine.low %v3677_v40, %v3679_v0  ;;  %v3696_v12 = vcombine.high %v3694_v3, %v3694_v3  ;;  %v4216_v62 = vrot.slane %v4208_v47, %v9321_v15  ;;  %v4225_v10 = vcombine.low %v3687_v2, %v3695_v7 }
 0x194   : > { %v4264_v56 = vrot.slane %v4250_v1, %v9321_v15  ;;  %v3729_v21 = vcombine.high %v3721_v57, %v3721_v57  ;;  %v10153_v45 = vrot.slane %v4679_v17, %v10115_v8  ;;  %v10168_v54 = vadd.s32 8, %v10074_v30 }
 0x195   : > { %v4223_v18 = vrot.slane %v4209_v11, %v9321_v15  ;;  %v4226_v25 = vcombine.low %v3694_v3, %v3696_v12  ;;  %v4233_v23 = vrot.slane %v4225_v10, %v9321_v15  ;;  %v3730_v55 = vcombine.high %v10118_v26, %v10118_v26 }
 0x196   : > { %v10112_v16 = vcombine.low %v4257_v9, %v4264_v56  ;;  %12444 = vst [vmem:[#allocation2_spill] sm:$0xff] %v10153_v45  ;;  %v10158_v48 = vcombine.low %v3729_v21, %v10118_v26  ;;  %v10174_v60 = vadd.s32 7, %v10074_v30  ;;  %v10177_v19 = vadd.s32 9, %v10074_v30 }
 0x197   : > { %v4224_v32 = vcombine.low %v4216_v62, %v4223_v18  ;;  %v4240_v35 = vrot.slane %v4226_v25, %v9321_v15 }
 0x198   : > { %v4274_v63 = vrot.slane %v10158_v48, %v9321_v15  ;;  %v4651_v0 = vsel %vm10162_vm5, 0.0, %v10112_v16  ;;  %vm4084_vm5 = vmor %vm4059_vm9, %vm4070_vm0 }
 0x199   : > { %v4241_v37 = vcombine.low %v4233_v23, %v4240_v35  ;;  %v4648_v46 = vsel %vm10123_vm12, 0.0, %v4224_v32  ;;  %vm4111_vm12 = vcmp.eq.s32.totalorder %v10141_v39, 17 }
 0x19b   : > { %v4649_v27 = vsel %vm4119_vm13, 0.0, %v4241_v37  ;;  %vm4123_vm13 = vmor %vm10213_vm8, %vm4109_vm15 }
 0x19c   : > { %v4678_v51 = vpack.c.bf16 %v4649_v27, %v4648_v46  ;;  %v8668_v42 = vpack.c.bf16 %v4649_v27, %v4649_v27  ;;  %vm10272_vm15 = vmor %vm4087_vm11, %vm4111_vm12 }
 0x19d   : > { %v8841_v49 = vpop.f32.mrb[4].mxu0  ;;  %vm10309_vm8 = vmor %vm4084_vm5, %vm4110_vm2  ;;  %vm4074_vm5 = vcmp.eq.s32.totalorder %v10150_v38, 0 }
 0x19e   : > { %v3600_v52 = vadd.f32 %v8841_v49, %v10068_v28  ;;  %v3509_v53 = vpop.f32.mrb[5].mxu0  ;;  %v4721_v40 = vrot.slane %v4678_v51, %v10115_v8  ;;  %v4728_v22 = vrot.slane %v8668_v42, %v10115_v8 }
 0x19f   : > { %v3598_v29 = vadd.f32 %v10068_v28, %v3509_v53  ;;  %v8842_v58 = vpop.f32.mrb[6].mxu0 }
 0x1a0   : > { %v3623_v59 = vmax.f32 %v3600_v52, 0.0  ;;  %v3601_v61 = vadd.f32 %v8842_v58, %v10068_v28  ;;  %v3512_v44 = vpop.f32.mrb[7].mxu0  ;;  %v4729_v47 = vcombine.high %v4721_v40, %v4721_v40  ;;  %v4730_v1 = vcombine.high %v4728_v22, %v4728_v22 }
 0x1a1   : > { %v3621_v30 = vmax.f32 %v3598_v29, 0.0  ;;  %v10190_v2 = vrot.slane %v4721_v40, %v10115_v8  ;;  %v3599_v3 = vadd.f32 %v10068_v28, %v3512_v44  ;;  %v10205_v7 = vrot.slane %v4728_v22, %v10115_v8 }
 0x1a2   : > { %v3765_v6 = vcombine.high %v3623_v59, %v3623_v59  ;;  %v3772_v11 = vrot.slane %v3623_v59, %v9321_v15  ;;  %v4751_v12 = vrot.slane %v4729_v47, %v10115_v8  ;;  %v4758_v18 = vrot.slane %v4730_v1, %v10115_v8 }
 0x1a3   : > { %v3731_v9 = vcombine.high %v3621_v30, %v3621_v30  ;;  %v3738_v56 = vrot.slane %v3621_v30, %v9321_v15  ;;  %v3624_v16 = vmax.f32 %v3601_v61, 0.0  ;;  %v3622_v23 = vmax.f32 %v3599_v3, 0.0 }
 0x1a4   : > { %v3779_v10 = vrot.slane %v3765_v6, %v9321_v15  ;;  %v3780_v25 = vcombine.high %v3772_v11, %v3772_v11  ;;  %v5878_v31 = vcombine.low %v10190_v2, %v4751_v12  ;;  %v8700_v32 = vcombine.high %v10190_v2, %v4751_v12 }
 0x1a5   : > { %v3745_v17 = vrot.slane %v3731_v9, %v9321_v15  ;;  %v3746_v26 = vcombine.high %v3738_v56, %v3738_v56  ;;  %v5880_v21 = vcombine.low %v10205_v7, %v4758_v18  ;;  %v4267_v48 = vcombine.low %v3730_v55, %v3738_v56 }
 0x1a6   : > { %v10227_v35 = vcombine.low %v3772_v11, %v3780_v25  ;;  %v4330_v37 = vrot.slane %v3779_v10, %v9321_v15  ;;  %v3781_v49 = vcombine.high %v3779_v10, %v3779_v10  ;;  %v3782_v50 = vcombine.high %v3624_v16, %v3624_v16 }
 0x1a7   : > { %v3747_v46 = vcombine.high %v3745_v17, %v3745_v17  ;;  %v4289_v27 = vrot.slane %v3746_v26, %v9321_v15  ;;  %v3789_v51 = vrot.slane %v3624_v16, %v9321_v15  ;;  %v8701_v42 = vcombine.high %v10205_v7, %v4758_v18 }
 0x1a8   : > { %v4656_v52 = vsel %vm4126_vm10, 0.0, %v4330_v37  ;;  %v4281_v53 = vrot.slane %v4267_v48, %v9321_v15  ;;  %v10243_v55 = vrot.slane %v3782_v50, %v9321_v15  ;;  %v4322_v59 = vrot.slane %v10227_v35, %v9321_v15  ;;  %vm4125_vm10 = vmor %vm4070_vm0, %vm4110_vm2 }
 0x1a9   : > { %v4290_v29 = vcombine.low %v3745_v17, %v3747_v46  ;;  %v4683_v58 = vpack.c.bf16 %v4656_v52, %v4656_v52  ;;  %v4653_v40 = vsel %vm4123_vm13, 0.0, %v4289_v27  ;;  %v3797_v22 = vcombine.high %v3789_v51, %v3789_v51  ;;  %vm10355_vm0 = vmor %vm4064_vm4, %vm4071_vm7 }
 0x1aa   : > { %v4282_v61 = vcombine.low %v4274_v63, %v4281_v53  ;;  %v4681_v44 = vpack.c.bf16 %v4653_v40, %v4653_v40  ;;  %v4331_v30 = vcombine.low %v3781_v49, %v3789_v51  ;;  %v3748_v2 = vcombine.high %v3622_v23, %v3622_v23  ;;  %vm10369_vm2 = vmor %vm4064_vm4, %vm4072_vm6 }
 0x1ab   : > { %v4895_v47 = vrot.slane %v4683_v58, %v10115_v8  ;;  %v4332_v1 = vcombine.low %v3797_v22, %v10243_v55  ;;  %v3755_v3 = vrot.slane %v3622_v23, %v9321_v15  ;;  %v4298_v24 = vrot.slane %v4290_v29, %v9321_v15  ;;  %vm10392_vm11 = vmor %vm10355_vm0, %vm4111_vm12 }
 0x1ac   : > { %v4652_v6 = vsel %vm4122_vm14, 0.0, %v4282_v61  ;;  %v4832_v11 = vrot.slane %v4681_v44, %v10115_v8  ;;  %v4339_v13 = vrot.slane %v4331_v30, %v9321_v15  ;;  %v3798_v7 = vcombine.high %v10243_v55, %v10243_v55  ;;  %vm10380_vm14 = vmor %vm4071_vm7, %vm4111_vm12 }
 0x1ad   : > { %v4680_v9 = vpack.c.bf16 %v4652_v6, %v4651_v0  ;;  %v8669_v56 = vpack.c.bf16 %v4652_v6, %v4652_v6  ;;  %v4346_v63 = vrot.slane %v4332_v1, %v9321_v15  ;;  %v10261_v12 = vrot.slane %v4895_v47, %v10115_v8 }
 0x1ae   : > { %v3762_v18 = vrot.slane %v3748_v2, %v9321_v15  ;;  %v3763_v62 = vcombine.high %v3755_v3, %v3755_v3  ;;  %v5888_v16 = vrot.slane %v5878_v31, %v10115_v8  ;;  %v5895_v17 = vrot.slane %v8700_v32, %v10115_v8 }
 0x1af   : > { %v4784_v0 = vrot.slane %v4680_v9, %v10115_v8  ;;  %v4791_v10 = vrot.slane %v8669_v56, %v10115_v8  ;;  %v10267_v25 = vcombine.low %v4339_v13, %v4346_v63  ;;  %v10277_v37 = vrot.slane %v5880_v21, %v10115_v8 }
 0x1b0   : > { %v3764_v23 = vcombine.high %v3762_v18, %v3762_v18  ;;  %v4291_v35 = vcombine.low %v3755_v3, %v3763_v62  ;;  %v10280_v31 = vrot.slane %v8701_v42, %v10115_v8  ;;  %v10286_v32 = vrot.slane %v4832_v11, %v10115_v8 }
 0x1b1   : > { %v4792_v46 = vcombine.high %v4784_v0, %v4784_v0  ;;  %v4793_v48 = vcombine.high %v4791_v10, %v4791_v10  ;;  %v10283_v27 = vrot.slane %v4784_v0, %v10115_v8  ;;  %v10293_v49 = vrot.slane %v4791_v10, %v10115_v8 }
 0x1b2   : > { %v4305_v21 = vrot.slane %v4291_v35, %v9321_v15  ;;  %v4307_v50 = vcombine.low %v3762_v18, %v3764_v23  ;;  %v5910_v42 = vcombine.low %v5888_v16, %v5895_v17  ;;  %v4657_v29 = vsel %vm10272_vm15, 0.0, %v10267_v25 }
 0x1b3   : > { %12453 = vst [vmem:[#allocation3_spill] sm:$0xff] %v10283_v27  ;;  %12454 = vst [vmem:[#allocation4_spill] sm:$0xff] %v10293_v49  ;;  %v8845_v51 = vpop.f32.mrb[8].mxu0  ;;  %v10298_v52 = vrot.slane %v4792_v46, %v10115_v8  ;;  %v10301_v53 = vrot.slane %v4793_v48, %v10115_v8  ;;  %vm4112_vm13 = vcmp.eq.s32.totalorder %v10144_v41, 17  ;;  %vm4073_vm15 = vcmp.eq.s32.totalorder %v10147_v43, 0 }
 0x1b4   : > { %v3604_v58 = vadd.f32 %v8845_v51, %v10068_v28  ;;  %v3525_v40 = vpop.f32.mrb[9].mxu0  ;;  %v4306_v61 = vcombine.low %v4298_v24, %v4305_v21  ;;  %v4315_v44 = vrot.slane %v4307_v50, %v9321_v15  ;;  %v10329_v11 = vrot.slane %v5910_v42, %v10115_v8  ;;  %vm4132_vm7 = vmor %vm10369_vm2, %vm4112_vm13 }
 0x1b5   : > { %12455 = vst [vmem:[#allocation5_spill] sm:$0xff] %v10298_v52  ;;  %12456 = vst [vmem:[#allocation6_spill] sm:$0xff] %v10301_v53  ;;  %v3602_v30 = vadd.f32 %v10068_v28, %v3525_v40  ;;  %v8846_v47 = vpop.f32.mrb[10].mxu0  ;;  %v4825_v2 = vcombine.high %v10301_v53, %v10301_v53  ;;  %v5292_v3 = vcombine.low %v10283_v27, %v10298_v52 }
 0x1b6   : > { %v8681_v6 = vcombine.high %v10283_v27, %v10298_v52  ;;  %v3528_v24 = vpop.f32.mrb[11].mxu0  ;;  %v5294_v13 = vcombine.low %v10293_v49, %v10301_v53  ;;  %v8682_v9 = vcombine.high %v10293_v49, %v10301_v53  ;;  %v4323_v56 = vcombine.low %v4315_v44, %v4322_v59  ;;  %vm4131_vm12 = vmor %vm4072_vm6, %vm4112_vm13 }
 0x1b7   : > { %v3627_v63 = vmax.f32 %v3604_v58, 0.0  ;;  %v10336_v18 = vcombine.low %v4825_v2, %v10286_v32  ;;  %v4654_v14 = vsel %vm10309_vm8, 0.0, %v4306_v61  ;;  %v3625_v62 = vmax.f32 %v3602_v30, 0.0  ;;  %vm10450_vm8 = vmor %vm4059_vm9, %vm4072_vm6 }
 0x1b8   : > { %v3605_v16 = vadd.f32 %v8846_v47, %v10068_v28  ;;  %v4655_v0 = vsel %vm4125_vm10, 0.0, %v4323_v56  ;;  %v3603_v23 = vadd.f32 %v10068_v28, %v3528_v24  ;;  %v10346_v42 = vrot.slane %v5292_v3, %v10115_v8  ;;  %vm10481_vm0 = vmor %vm10450_vm8, %vm4112_vm13 }
 0x1b9   : > { %12459 = vst [vmem:[#allocation7_spill] sm:$0xff] %v10336_v18  ;;  %v3833_v10 = vcombine.high %v3627_v63, %v3627_v63  ;;  %v3840_v17 = vrot.slane %v3627_v63, %v9321_v15  ;;  %v4682_v35 = vpack.c.bf16 %v4655_v0, %v4654_v14  ;;  %v8670_v46 = vpack.c.bf16 %v4655_v0, %v4655_v0  ;;  %vm4098_vm13 = vmor %vm4064_vm4, %vm4074_vm5 }
 0x1ba   : > { %v3799_v48 = vcombine.high %v3625_v62, %v3625_v62  ;;  %v3806_v59 = vrot.slane %v3625_v62, %v9321_v15  ;;  %v3628_v51 = vmax.f32 %v3605_v16, 0.0  ;;  %v3626_v62 = vmax.f32 %v3603_v23, 0.0  ;;  %vm10521_vm2 = vmor %vm4059_vm9, %vm4073_vm15 }
 0x1bb   : > { %v3847_v21 = vrot.slane %v3833_v10, %v9321_v15  ;;  %v3848_v50 = vcombine.high %v3840_v17, %v3840_v17  ;;  %v4847_v58 = vrot.slane %v4682_v35, %v10115_v8  ;;  %v4854_v40 = vrot.slane %v8670_v46, %v10115_v8  ;;  %vm4095_vm8 = vmor %vm4064_vm4, %vm4073_vm15 }
 0x1bc   : > { %v3813_v22 = vrot.slane %v3799_v48, %v9321_v15  ;;  %v3814_v61 = vcombine.high %v3806_v59, %v3806_v59  ;;  %v4348_v2 = vcombine.low %v3798_v7, %v3806_v59  ;;  %v3850_v3 = vcombine.high %v3628_v51, %v3628_v51 }
 0x1bd   : > { %v3849_v44 = vcombine.high %v3847_v21, %v3847_v21  ;;  %v4389_v30 = vcombine.low %v3840_v17, %v3848_v50  ;;  %v4855_v24 = vcombine.high %v4847_v58, %v4847_v58  ;;  %v4856_v56 = vcombine.high %v4854_v40, %v4854_v40 }
 0x1be   : > { %v10363_v63 = vrot.slane %v4847_v58, %v10115_v8  ;;  %v10374_v16 = vrot.slane %v4854_v40, %v10115_v8  ;;  %v3815_v7 = vcombine.high %v3813_v22, %v3813_v22  ;;  %v4349_v10 = vcombine.low %v3814_v61, %v3813_v22 }
 0x1bf   : > { %v4390_v55 = vcombine.low %v3847_v21, %v3849_v44  ;;  %v10385_v17 = vrot.slane %v4855_v24, %v10115_v8  ;;  %v4397_v35 = vrot.slane %v4389_v30, %v9321_v15  ;;  %v4356_v46 = vrot.slane %v4348_v2, %v9321_v15 }
 0x1c0   : > { %12464 = vst [vmem:[#allocation8_spill] sm:$0xff] %v10374_v16  ;;  %v3857_v48 = vrot.slane %v3628_v51, %v9321_v15  ;;  %v4363_v21 = vrot.slane %v4349_v10, %v9321_v15  ;;  %v4371_v50 = vrot.slane %v3815_v7, %v9321_v15  ;;  %v10402_v58 = vrot.slane %v3850_v3, %v9321_v15 }
 0x1c1   : > { %12467 = vst [vmem:[#allocation9_spill] sm:$0xff] %v10385_v17  ;;  %v4404_v59 = vrot.slane %v4390_v55, %v9321_v15  ;;  %v3816_v40 = vcombine.high %v3626_v62, %v3626_v62  ;;  %v3823_v22 = vrot.slane %v3626_v62, %v9321_v15  ;;  %v10415_v61 = vrot.slane %v4856_v56, %v10115_v8 }
 0x1c2   : > { %v3865_v39 = vcombine.high %v3857_v48, %v3857_v48  ;;  %v4412_v51 = vrot.slane %v3857_v48, %v9321_v15  ;;  %v4364_v30 = vcombine.low %v4356_v46, %v4363_v21  ;;  %v4659_v47 = vsel %vm10392_vm11, 0.0, %v4371_v50 }
 0x1c3   : > { %v4405_v44 = vcombine.low %v4397_v35, %v4404_v59  ;;  %v4685_v2 = vpack.c.bf16 %v4659_v47, %v4659_v47  ;;  %v3830_v14 = vrot.slane %v3816_v40, %v9321_v15  ;;  %v3831_v10 = vcombine.high %v3823_v22, %v3823_v22 }
 0x1c4   : > { %v10420_v3 = vcombine.low %v3865_v39, %v10402_v58  ;;  %v4662_v24 = vsel %vm4132_vm7, 0.0, %v4412_v51  ;;  %v4658_v55 = vsel %vm10380_vm14, 0.0, %v4364_v30  ;;  %v3866_v46 = vcombine.high %v10402_v58, %v10402_v58 }
 0x1c5   : > { %v4661_v7 = vsel %vm4131_vm12, 0.0, %v4405_v44  ;;  %v4687_v62 = vpack.c.bf16 %v4662_v24, %v4662_v24  ;;  %v4684_v56 = vpack.c.bf16 %v4658_v55, %v4657_v29  ;;  %v8671_v35 = vpack.c.bf16 %v4658_v55, %v4658_v55 }
 0x1c6   : > { %v4958_v23 = vrot.slane %v4685_v2, %v10115_v8  ;;  %v8672_v48 = vpack.c.bf16 %v4661_v7, %v4661_v7  ;;  %v3832_v59 = vcombine.high %v3830_v14, %v3830_v14  ;;  %v4372_v21 = vcombine.low %v3823_v22, %v3831_v10 }
 0x1c7   : > { %v5021_v0 = vrot.slane %v4687_v62, %v10115_v8  ;;  %v4910_v50 = vrot.slane %v4684_v56, %v10115_v8  ;;  %v4917_v26 = vrot.slane %v8671_v35, %v10115_v8  ;;  %v4421_v29 = vrot.slane %v10420_v3, %v9321_v15 }
 0x1c8   : > { %v10437_v25 = vrot.slane %v4958_v23, %v10115_v8  ;;  %v4980_v58 = vrot.slane %v8672_v48, %v10115_v8  ;;  %v4373_v40 = vcombine.low %v3830_v14, %v3832_v59  ;;  %vm4114_vm10 = vcmp.eq.s32.totalorder %v10150_v38, 17 }
 0x1c9   : > { %v10444_v39 = vrot.slane %v5021_v0, %v10115_v8  ;;  %v8849_v22 = vpop.f32.mrb[12].mxu0  ;;  %v10459_v44 = vrot.slane %v8681_v6, %v10115_v8  ;;  %v4918_v30 = vcombine.high %v4910_v50, %v4910_v50  ;;  %v4919_v47 = vcombine.high %v4917_v26, %v4917_v26  ;;  %vm4138_vm14 = vmor %vm4098_vm13, %vm4114_vm10 }
 0x1ca   : > { %v10462_v2 = vrot.slane %v4910_v50, %v10115_v8  ;;  %v4380_v24 = vrot.slane %v4372_v21, %v9321_v15  ;;  %v3541_v55 = vpop.f32.mrb[13].mxu0  ;;  %v10466_v62 = vrot.slane %v4917_v26, %v10115_v8  ;;  %v4982_v14 = vcombine.high %v4980_v58, %v4980_v58  ;;  %vm4137_vm12 = vmor %vm4074_vm5, %vm4114_vm10 }
 0x1cb   : > { %12470 = vst [vmem:[#allocation10_spill] sm:$0xff] %v10444_v39  ;;  %v4387_v10 = vrot.slane %v4373_v40, %v9321_v15  ;;  %v3608_v56 = vadd.f32 %v8849_v22, %v10068_v28  ;;  %vm4113_vm6 = vcmp.eq.s32.totalorder %v10147_v43, 17  ;;  %v8850_v6 = vpop.f32.mrb[14].mxu0  ;;  %v10472_v35 = vrot.slane %v4918_v30, %v10115_v8 }
 0x1cc   : > { %v10475_v23 = vrot.slane %v4980_v58, %v10115_v8  ;;  %v3606_v0 = vadd.f32 %v10068_v28, %v3541_v55  ;;  %v3609_v59 = vadd.f32 %v8850_v6, %v10068_v28  ;;  %v3544_v21 = vpop.f32.mrb[15].mxu0  ;;  %v10488_v50 = vrot.slane %v4919_v47, %v10115_v8  ;;  %vm10549_vm7 = vmor %vm10521_vm2, %vm4113_vm6 }
 0x1cd   : > { %v10491_v26 = vrot.slane %v4982_v14, %v10115_v8  ;;  %v4388_v58 = vcombine.low %v4380_v24, %v4387_v10  ;;  %v3631_v40 = vmax.f32 %v3608_v56, 0.0  ;;  %v3607_v51 = vadd.f32 %v10068_v28, %v3544_v21  ;;  %vm10587_vm13 = vmor %vm4073_vm15, %vm4113_vm6 }
 0x1ce   : > { %v3629_v41 = vmax.f32 %v3606_v0, 0.0  ;;  %v3632_v22 = vmax.f32 %v3609_v59, 0.0  ;;  %v5316_v30 = vrot.slane %v5294_v13, %v10115_v8  ;;  %vm5745_vm11 = vcmask 261120   ;;  %vm10601_vm2 = vmor %vm4059_vm9, %vm4074_vm5 }
 0x1cf   : > { %v5014_v55 = vcombine.high %v10491_v26, %v10491_v26  ;;  %v4660_v47 = vsel %vm10481_vm0, 0.0, %v4388_v58  ;;  %v3901_v6 = vcombine.high %v3631_v40, %v3631_v40  ;;  %v3908_v14 = vrot.slane %v3631_v40, %v9321_v15  ;;  %vm4135_vm0 = vmor %vm4095_vm8, %vm4113_vm6 }
 0x1d0   : > { %v4686_v24 = vpack.c.bf16 %v4661_v7, %v4660_v47  ;;  %v3867_v10 = vcombine.high %v3629_v41, %v3629_v41  ;;  %v3874_v56 = vrot.slane %v3629_v41, %v9321_v15  ;;  %v3918_v0 = vcombine.high %v3632_v22, %v3632_v22  ;;  %vm10629_vm5 = vmor %vm10601_vm2, %vm4114_vm10 }
 0x1d1   : > { %v10505_v59 = vcombine.low %v5014_v55, %v10444_v39  ;;  %v3915_v21 = vrot.slane %v3901_v6, %v9321_v15  ;;  %v3916_v13 = vcombine.high %v3908_v14, %v3908_v14  ;;  %v3925_v57 = vrot.slane %v3632_v22, %v9321_v15 }
 0x1d2   : > { %v4973_v48 = vrot.slane %v4686_v24, %v10115_v8  ;;  %v3881_v7 = vrot.slane %v3867_v10, %v9321_v15  ;;  %v3882_v58 = vcombine.high %v3874_v56, %v3874_v56  ;;  %v4414_v40 = vcombine.low %v3866_v46, %v3874_v56 }
 0x1d3   : > { %v3917_v41 = vcombine.high %v3915_v21, %v3915_v21  ;;  %v10515_v47 = vcombine.low %v3908_v14, %v3916_v13  ;;  %v10526_v55 = vrot.slane %v3918_v0, %v9321_v15  ;;  %v3933_v6 = vcombine.high %v3925_v57, %v3925_v57 }
 0x1d4   : > { %v4981_v24 = vcombine.high %v4973_v48, %v4973_v48  ;;  %v4428_v10 = vrot.slane %v4414_v40, %v9321_v15  ;;  %v4430_v1 = vcombine.low %v3882_v58, %v3881_v7  ;;  %v5323_v46 = vrot.slane %v8682_v9, %v10115_v8 }
 0x1d5   : > { %v10536_v14 = vrot.slane %v4973_v48, %v10115_v8  ;;  %v4471_v56 = vcombine.low %v3915_v21, %v3917_v41  ;;  %v4472_v0 = vcombine.low %v3925_v57, %v3933_v6  ;;  %v4494_v13 = vrot.slane %v10526_v55, %v9321_v15 }
 0x1d6   : > { %v10541_v40 = vrot.slane %v4981_v24, %v10115_v8  ;;  %v4469_v58 = vrot.slane %v10515_v47, %v9321_v15  ;;  %v4429_v57 = vcombine.low %v4421_v29, %v4428_v10  ;;  %v3630_v21 = vmax.f32 %v3607_v51, 0.0 }
 0x1d7   : > { %v4479_v48 = vrot.slane %v4471_v56, %v9321_v15  ;;  %v4486_v41 = vrot.slane %v4472_v0, %v9321_v15  ;;  %v4668_v6 = vsel %vm4138_vm14, 0.0, %v4494_v13  ;;  %v3883_v24 = vcombine.high %v3881_v7, %v3881_v7 }
 0x1d8   : > { %v4438_v47 = vrot.slane %v4430_v1, %v9321_v15  ;;  %v4691_v22 = vpack.c.bf16 %v4668_v6, %v4668_v6  ;;  %v3884_v4 = vcombine.high %v3630_v21, %v3630_v21  ;;  %v3891_v39 = vrot.slane %v3630_v21, %v9321_v15 }
 0x1d9   : > { %v4663_v3 = vsel %vm10549_vm7, 0.0, %v4429_v57  ;;  %v4487_v29 = vcombine.low %v4479_v48, %v4486_v41  ;;  %v5324_v1 = vcombine.low %v10346_v42, %v10459_v44  ;;  %v5325_v51 = vcombine.low %v5316_v30, %v5323_v46 }
 0x1da   : > { %v5147_v7 = vrot.slane %v4691_v22, %v10115_v8  ;;  %v3898_v10 = vrot.slane %v3884_v4, %v9321_v15  ;;  %v3899_v56 = vcombine.high %v3891_v39, %v3891_v39  ;;  %v4431_v0 = vcombine.low %v3883_v24, %v3891_v39 }
 0x1db   : > { %v4667_v13 = vsel %vm4137_vm12, 0.0, %v4487_v29  ;;  %v5332_v9 = vrot.slane %v5324_v1, %v10115_v8  ;;  %v5339_v57 = vrot.slane %v5325_v51, %v10115_v8  ;;  %v4885_v21 = vcombine.high %v10363_v63, %v10363_v63 }
 0x1dc   : > { %v8674_v48 = vpack.c.bf16 %v4667_v13, %v4667_v13  ;;  %v3900_v41 = vcombine.high %v3898_v10, %v3898_v10  ;;  %v4445_v42 = vrot.slane %v4431_v0, %v9321_v15  ;;  %v4453_v44 = vrot.slane %v3899_v56, %v9321_v15 }
 0x1dd   : > { %v5340_v30 = vcombine.low %v5332_v9, %v5339_v57  ;;  %v4886_v46 = vcombine.high %v10374_v16, %v10374_v16  ;;  %v4887_v6 = vcombine.high %v10385_v17, %v10385_v17  ;;  %v10608_v51 = vrot.slane %v5147_v7, %v10115_v8 }
 0x1de   : > { %v5106_v24 = vrot.slane %v8674_v48, %v10115_v8  ;;  %v4446_v22 = vcombine.low %v4438_v47, %v4445_v42  ;;  %v4454_v29 = vcombine.low %v3898_v10, %v3900_v41  ;;  %v4665_v56 = vsel %vm4135_vm0, 0.0, %v4453_v44 }
 0x1df   : > { %12483 = vst [vmem:[#allocation11_spill] sm:$0xff] %v10608_v51  ;;  %v8853_v0 = vpop.f32.mrb[16].mxu0  ;;  %8864 = vmatmul.mubr.msk.bf16.vlgmr.msra.gmra.mrb[28].mxu0 %vm5745_vm11, %v5340_v30  ;;  %v10612_v9 = vcombine.low %v10385_v17, %v4885_v21  ;;  %v10615_v57 = vcombine.low %v4887_v6, %v10374_v16  ;;  %v12484_v42 = vmov 0.0   ;;  %v10623_v7 = vcombine.low %v10415_v61, %v4886_v46 }
 0x1e0   : > { %v5108_v48 = vcombine.high %v5106_v24, %v5106_v24  ;;  %v4462_v47 = vrot.slane %v4454_v29, %v9321_v15  ;;  %v4664_v10 = vsel %vm10587_vm13, 0.0, %v4446_v22  ;;  %v3557_v41 = vpop.f32.mrb[17].mxu0  ;;  %8867 = vmatprep.mubr.msk.bf16.mxu0 %vm9197_vm3, %v12484_v42  ;;  %v4689_v30 = vpack.c.bf16 %v4665_v56, %v4665_v56 }
 0x1e1   : > { %v4688_v44 = vpack.c.bf16 %v4664_v10, %v4663_v3  ;;  %v8673_v6 = vpack.c.bf16 %v4664_v10, %v4664_v10  ;;  %v3612_v39 = vadd.f32 %v8853_v0, %v10068_v28  ;;  %vm4076_vm15 = vcmp.eq.s32.totalorder %v10168_v54, 0  ;;  %v8854_v22 = vpop.f32.mrb[18].mxu0 }
 0x1e2   : > { %v10636_v29 = vrot.slane %v5108_v48, %v10115_v8  ;;  %v4470_v46 = vcombine.low %v4462_v47, %v4469_v58  ;;  %v3610_v38 = vadd.f32 %v10068_v28, %v3557_v41  ;;  %v3613_v43 = vadd.f32 %v8854_v22, %v10068_v28  ;;  %v3560_v1 = vpop.f32.mrb[19].mxu0  ;;  %vm4102_vm7 = vmor %vm4059_vm9, %vm4076_vm15 }
 0x1e3   : > { %v5036_v4 = vrot.slane %v4688_v44, %v10115_v8  ;;  %v5043_v3 = vrot.slane %v8673_v6, %v10115_v8  ;;  %v5084_v56 = vrot.slane %v4689_v30, %v10115_v8  ;;  %v3635_v10 = vmax.f32 %v3612_v39, 0.0 }
 0x1e4   : > { %12487 = vst [vmem:[#allocation12_spill] sm:$0xff] %v10636_v29  ;;  %v5140_v0 = vcombine.high %v10636_v29, %v10636_v29  ;;  %v4666_v48 = vsel %vm10629_vm5, 0.0, %v4470_v46  ;;  %vm4116_vm10 = vcmp.eq.s32.totalorder %v10168_v54, 17  ;;  %v3633_v58 = vmax.f32 %v3610_v38, 0.0 }
 0x1e5   : > { %v3636_v47 = vmax.f32 %v3613_v43, 0.0  ;;  %v10649_v41 = vrot.slane %v5106_v24, %v10115_v8  ;;  %v4690_v22 = vpack.c.bf16 %v4667_v13, %v4666_v48  ;;  %v5044_v44 = vcombine.high %v5036_v4, %v5036_v4  ;;  %vm10706_vm8 = vmor %vm4102_vm7, %vm4116_vm10 }
 0x1e6   : > { %v5045_v18 = vcombine.high %v5043_v3, %v5043_v3  ;;  %v10652_v6 = vcombine.low %v5140_v0, %v10608_v51  ;;  %v10655_v30 = vrot.slane %v5036_v4, %v10115_v8  ;;  %v10658_v39 = vrot.slane %v5043_v3, %v10115_v8  ;;  %vm4143_vm5 = vmor %vm4076_vm15, %vm4116_vm10 }
 0x1e7   : > { %12488 = vst [vmem:[#allocation13_spill] sm:$0xff] %v10649_v41  ;;  %v3969_v21 = vcombine.high %v3635_v10, %v3635_v10  ;;  %v10664_v38 = vrot.slane %v5084_v56, %v10115_v8  ;;  %v5099_v13 = vrot.slane %v4690_v22, %v10115_v8  ;;  %v3976_v24 = vrot.slane %v3635_v10, %v9321_v15 }
 0x1e8   : > { %12489 = vst [vmem:[#allocation14_spill] sm:$0xff] %v10652_v6  ;;  %v10661_v46 = vrot.slane %v5045_v18, %v10115_v8  ;;  %vm4075_vm6 = vcmp.eq.s32.totalorder %v10174_v60, 0  ;;  %v3935_v4 = vcombine.high %v3633_v58, %v3633_v58  ;;  %v3942_v0 = vrot.slane %v3633_v58, %v9321_v15 }
 0x1e9   : > { %v3983_v43 = vrot.slane %v3969_v21, %v9321_v15  ;;  %v3986_v3 = vcombine.high %v3636_v47, %v3636_v47  ;;  %v5107_v18 = vcombine.high %v5099_v13, %v5099_v13  ;;  %v10674_v51 = vrot.slane %v5099_v13, %v10115_v8  ;;  %vm10728_vm13 = vmor %vm4059_vm9, %vm4075_vm6 }
 0x1ea   : > { %v5077_v48 = vcombine.high %v10661_v46, %v10661_v46  ;;  %v3984_v56 = vcombine.high %v3976_v24, %v3976_v24  ;;  %v3949_v22 = vrot.slane %v3935_v4, %v9321_v15  ;;  %v3950_v10 = vcombine.high %v3942_v0, %v3942_v0  ;;  %vm4101_vm2 = vmor %vm4064_vm4, %vm4075_vm6 }
 0x1eb   : > { %v3985_v16 = vcombine.high %v3983_v43, %v3983_v43  ;;  %vm4115_vm14 = vcmp.eq.s32.totalorder %v10174_v60, 17  ;;  %v12490_v21 = vcombine.high %v10526_v55, %v10526_v55  ;;  %v10682_v58 = vrot.slane %v5044_v44, %v10115_v8 }
 0x1ec   : > { %v10687_v13 = vcombine.low %v5077_v48, %v10664_v38  ;;  %v4536_v29 = vcombine.low %v3976_v24, %v3984_v56  ;;  %v10690_v41 = vrot.slane %v5107_v18, %v10115_v8  ;;  %v4496_v4 = vcombine.low %v3950_v10, %v3949_v22  ;;  %vm10754_vm7 = vmor %vm10728_vm13, %vm4115_vm14 }
 0x1ed   : > { %v4495_v17 = vcombine.low %v12490_v21, %v3942_v0  ;;  %v4537_v55 = vcombine.low %v3983_v43, %v3985_v16  ;;  %v3993_v44 = vrot.slane %v3636_v47, %v9321_v15  ;;  %vm4077_vm12 = vcmp.eq.s32.totalorder %v10177_v19, 0 }
 0x1ee   : > { %12491 = vst [vmem:[#allocation15_spill] sm:$0xff] %v10687_v13  ;;  %v4544_v0 = vrot.slane %v4536_v29, %v9321_v15  ;;  %v4000_v24 = vrot.slane %v3986_v3, %v9321_v15  ;;  %v3611_v18 = vadd.f32 %v10068_v28, %v3560_v1  ;;  %v4510_v21 = vrot.slane %v4496_v4, %v9321_v15  ;;  %v8857_v43 = vpop.f32.mrb[24].mxu0  ;;  %vm10777_vm13 = vmor %vm4064_vm4, %vm4077_vm12 }
 0x1ef   : > { %v4503_v48 = vrot.slane %v4495_v17, %v9321_v15  ;;  %v4551_v56 = vrot.slane %v4537_v55, %v9321_v15  ;;  %v4001_v6 = vcombine.high %v3993_v44, %v3993_v44  ;;  %v3951_v13 = vcombine.high %v3949_v22, %v3949_v22  ;;  %v3573_v53 = vpop.f32.mrb[25].mxu0 }
 0x1f0   : > { %v4002_v47 = vcombine.high %v4000_v24, %v4000_v24  ;;  %v3634_v29 = vmax.f32 %v3611_v18, 0.0  ;;  %vm4117_vm0 = vcmp.eq.s32.totalorder %v10177_v19, 17  ;;  %v12494_v17 = vcombine.low %v10286_v32, %v10363_v63  ;;  %v8858_v27 = vpop.f32.mrb[26].mxu0 }
 0x1f1   : > { %v5358_v3 = vrot.slane %v10612_v9, %v10115_v8  ;;  %v4552_v22 = vcombine.low %v4544_v0, %v4551_v56  ;;  %v10717_v10 = vcombine.low %v4503_v48, %v4510_v21  ;;  %v4553_v55 = vcombine.low %v3993_v44, %v4001_v6  ;;  %v3576_v44 = vpop.f32.mrb[27].mxu0 }
 0x1f2   : > { %v5351_v1 = vrot.slane %v12494_v17, %v10115_v8  ;;  %v3582_v4 = vadd.f32 %v8857_v43, %v10052_v33  ;;  %v4554_v45 = vcombine.low %v4000_v24, %v4002_v47  ;;  %v3952_v18 = vcombine.high %v3634_v29, %v3634_v29 }
 0x1f3   : > { %v3959_v52 = vrot.slane %v3634_v29, %v9321_v15  ;;  %v3574_v49 = vadd.f32 %v3573_v53, %v10058_v34  ;;  %v4672_v32 = vsel %vm10706_vm8, 0.0, %v4552_v22  ;;  %v4561_v33 = vrot.slane %v4553_v55, %v9321_v15  ;;  %vm10761_vm8 = vmor %vm4101_vm2, %vm4115_vm14 }
 0x1f4   : > { %v3616_v6 = vadd.f32 %v10068_v28, %v3582_v4  ;;  %v5365_v34 = vrot.slane %v10615_v57, %v10115_v8  ;;  %v4568_v27 = vrot.slane %v4554_v45, %v9321_v15  ;;  %v3966_v53 = vrot.slane %v3952_v18, %v9321_v15  ;;  %vm4140_vm2 = vmor %vm4075_vm6, %vm4115_vm14 }
 0x1f5   : > { %v3967_v0 = vcombine.high %v3959_v52, %v3959_v52  ;;  %v4512_v48 = vcombine.low %v3951_v13, %v3959_v52  ;;  %v3614_v56 = vadd.f32 %v10068_v28, %v3574_v49  ;;  %v3577_v57 = vadd.f32 %v3576_v44, %v10060_v20  ;;  %vm4147_vm6 = vmor %vm10777_vm13, %vm4117_vm0 }
 0x1f6   : > { %v3639_v24 = vmax.f32 %v3616_v6, 0.0  ;;  %v5372_v45 = vrot.slane %v10623_v7, %v10115_v8  ;;  %v4569_v52 = vcombine.low %v4561_v33, %v4568_v27  ;;  %v3968_v13 = vcombine.high %v3966_v53, %v3966_v53 }
 0x1f7   : > { %v4513_v16 = vcombine.low %v3967_v0, %v3966_v53  ;;  %v4520_v47 = vrot.slane %v4512_v48, %v9321_v15  ;;  %v3637_v7 = vmax.f32 %v3614_v56, 0.0  ;;  %v3615_v29 = vadd.f32 %v10068_v28, %v3577_v57 }
 0x1f8   : > { %v10766_v49 = vrot.slane %v3639_v24, %v9321_v15  ;;  %v10769_v43 = vcombine.low %v5351_v1, %v5358_v3  ;;  %v4673_v17 = vsel %vm4143_vm5, 0.0, %v4569_v52  ;;  %v4535_v55 = vrot.slane %v3968_v13, %v9321_v15  ;;  %vm4104_vm5 = vmor %vm4064_vm4, %vm4076_vm15 }
 0x1f9   : > { %v4527_v22 = vrot.slane %v4513_v16, %v9321_v15  ;;  %v10781_v18 = vcombine.low %v5365_v34, %v5372_v45  ;;  %v4694_v9 = vpack.c.bf16 %v4673_v17, %v4672_v32  ;;  %v8676_v33 = vpack.c.bf16 %v4673_v17, %v4673_v17  ;;  %vm4144_vm4 = vmor %vm4104_vm5, %vm4116_vm10 }
 0x1fa   : > { %v4044_v28 = vcombine.high %v10766_v49, %v10766_v49  ;;  %v4003_v1 = vcombine.high %v3637_v7, %v3637_v7  ;;  %v4669_v3 = vsel %vm10754_vm7, 0.0, %v10717_v10  ;;  %v4671_v44 = vsel %vm10761_vm8, 0.0, %v4535_v55  ;;  %vm4105_vm15 = vmor %vm4059_vm9, %vm4077_vm12 }
 0x1fb   : > { %v4528_v6 = vcombine.low %v4520_v47, %v4527_v22  ;;  %v4010_v32 = vrot.slane %v3637_v7, %v9321_v15  ;;  %v5231_v60 = vrot.slane %v4694_v9, %v10115_v8  ;;  %v5238_v34 = vrot.slane %v8676_v33, %v10115_v8  ;;  %vm10876_vm9 = vmor %vm4105_vm15, %vm4117_vm0 }
 0x1fc   : > { %v4693_v27 = vpack.c.bf16 %v4671_v44, %v4671_v44  ;;  %v4617_v10 = vrot.slane %v4044_v28, %v9321_v15  ;;  %v4017_v0 = vrot.slane %v4003_v1, %v9321_v15  ;;  %v3638_v45 = vmax.f32 %v3615_v29, 0.0  ;;  %vm4146_vm10 = vmor %vm4077_vm12, %vm4117_vm0 }
 0x1fd   : > { %v4670_v53 = vsel %vm4140_vm2, 0.0, %v4528_v6  ;;  %v4018_v48 = vcombine.high %v4010_v32, %v4010_v32  ;;  %v4576_v24 = vrot.slane %v4010_v32, %v9321_v15  ;;  %v5239_v36 = vcombine.high %v5231_v60, %v5231_v60 }
 0x1fe   : > { %v5240_v56 = vcombine.high %v5238_v34, %v5238_v34  ;;  %v10809_v57 = vrot.slane %v5231_v60, %v10115_v8  ;;  %v4692_v21 = vpack.c.bf16 %v4670_v53, %v4669_v3  ;;  %v8675_v52 = vpack.c.bf16 %v4670_v53, %v4670_v53 }
 0x1ff   : > { %v5210_v13 = vrot.slane %v4693_v27, %v10115_v8  ;;  %v4677_v16 = vsel %vm4147_vm6, 0.0, %v4617_v10  ;;  %v10815_v47 = vrot.slane %v5238_v34, %v10115_v8  ;;  %v4577_v17 = vcombine.low %v4018_v48, %v4017_v0 }
 0x200   : > { %v10818_v20 = vrot.slane %v5240_v56, %v10115_v8  ;;  %v4697_v7 = vpack.c.bf16 %v4677_v16, %v4677_v16  ;;  %v10821_v22 = vrot.slane %v5239_v36, %v10115_v8  ;;  %v5162_v54 = vrot.slane %v4692_v21, %v10115_v8 }
 0x201   : > { %v5169_v29 = vrot.slane %v8675_v52, %v10115_v8  ;;  %v4674_v55 = vsel %vm4144_vm4, 0.0, %v4576_v24  ;;  %v10826_v4 = vrot.slane %v5210_v13, %v10115_v8  ;;  %v4585_v33 = vrot.slane %v4577_v17, %v9321_v15 }
 0x202   : > { %v10829_v9 = vrot.slane %v4697_v7, %v10115_v8  ;;  %v4695_v28 = vpack.c.bf16 %v4674_v55, %v4674_v55  ;;  %v5170_v1 = vcombine.high %v5162_v54, %v5162_v54  ;;  %v10833_v6 = vrot.slane %v5162_v54, %v10115_v8 }
 0x203   : > { %v5171_v3 = vcombine.high %v5169_v29, %v5169_v29  ;;  %v5272_v44 = vcombine.high %v10818_v20, %v10818_v20  ;;  %v10838_v32 = vrot.slane %v5169_v29, %v10115_v8  ;;  %v4019_v34 = vcombine.high %v4017_v0, %v4017_v0 }
 0x204   : > { %v5279_v60 = vrot.slane %v4695_v28, %v10115_v8  ;;  %v4020_v27 = vcombine.high %v3638_v45, %v3638_v45  ;;  %v10842_v10 = vrot.slane %v5170_v1, %v10115_v8  ;;  %v4027_v48 = vrot.slane %v3638_v45, %v9321_v15 }
 0x205   : > { %v10845_v53 = vrot.slane %v5171_v3, %v10115_v8  ;;  %v5381_v24 = vrot.slane %v10769_v43, %v10115_v8  ;;  %v5388_v0 = vrot.slane %v10781_v18, %v10115_v8  ;;  %v4888_v21 = vcombine.high %v10415_v61, %v10415_v61 }
 0x206   : > { %v10851_v36 = vrot.slane %v5279_v60, %v10115_v8  ;;  %v4034_v56 = vrot.slane %v4020_v27, %v9321_v15  ;;  %v4035_v52 = vcombine.high %v4027_v48, %v4027_v48  ;;  %v4578_v45 = vcombine.low %v4019_v34, %v4027_v48 }
 0x207   : > { %v5391_v43 = vcombine.low %v10462_v2, %v10472_v35  ;;  %v8683_v13 = vcombine.high %v10462_v2, %v10472_v35  ;;  %v5389_v7 = vcombine.low %v5381_v24, %v5388_v0  ;;  %v5390_v17 = vcombine.low %v4888_v21, %v10261_v12 }
 0x208   : > { %v10867_v16 = vcombine.low %v5272_v44, %v10851_v36  ;;  %v4036_v18 = vcombine.high %v4034_v56, %v4034_v56  ;;  %v4592_v54 = vrot.slane %v4578_v45, %v9321_v15  ;;  %v4594_v29 = vcombine.low %v4035_v52, %v4034_v56 }
 0x209   : > { %v5393_v5 = vcombine.low %v10466_v62, %v10488_v50  ;;  %v5407_v55 = vrot.slane %v5391_v43, %v10115_v8  ;;  %8868 = vmatmul.mubr.msk.bf16.gmra.mrb[32].mxu0 %vm5745_vm11, %v5389_v7  ;;  %v5400_v3 = vrot.slane %v5390_v17, %v10115_v8  ;;  %v5414_v44 = vrot.slane %v8683_v13, %v10115_v8 }
 0x20a   : > { %v4595_v1 = vcombine.low %v4036_v18, %v10766_v49  ;;  %v5011_v60 = vcombine.high %v10536_v14, %v10536_v14  ;;  %v4593_v34 = vcombine.low %v4585_v33, %v4592_v54  ;;  %v4602_v27 = vrot.slane %v4594_v29, %v9321_v15  ;;  %8871 = vmatprep.mubr.msk.bf16.mxu0 %vm9197_vm3, %v12484_v42 }
 0x20b   : > { %v5421_v48 = vrot.slane %v5393_v5, %v10115_v8  ;;  %v5013_v49 = vcombine.high %v10541_v40, %v10541_v40  ;;  %v5422_v56 = vcombine.low %v5400_v3, %v5407_v55  ;;  %v8684_v0 = vcombine.high %v10466_v62, %v10488_v50 }
 0x20c   : > { %v4609_v24 = vrot.slane %v4595_v1, %v9321_v15  ;;  %v5440_v21 = vcombine.low %v10437_v25, %v10536_v14  ;;  %v4675_v33 = vsel %vm10876_vm9, 0.0, %v4593_v34  ;;  %v5441_v45 = vcombine.low %v10541_v40, %v5011_v60 }
 0x20d   : > { %v5423_v52 = vcombine.low %v5414_v44, %v5421_v48  ;;  %v5442_v43 = vcombine.low %v5013_v49, %v10475_v23  ;;  %v5430_v18 = vrot.slane %v5422_v56, %v10115_v8  ;;  %v5449_v7 = vrot.slane %v8684_v0, %v10115_v8 }
 0x20e   : > { %v4610_v13 = vcombine.low %v4602_v27, %v4609_v24  ;;  %v5456_v17 = vrot.slane %v5440_v21, %v10115_v8  ;;  %v5463_v19 = vrot.slane %v5441_v45, %v10115_v8  ;;  %v5269_v5 = vcombine.high %v10809_v57, %v10809_v57 }
 0x20f   : > { %v5437_v54 = vrot.slane %v5423_v52, %v10115_v8  ;;  %v5470_v29 = vrot.slane %v5442_v43, %v10115_v8  ;;  %v5270_v1 = vcombine.high %v10815_v47, %v10815_v47  ;;  %v5271_v3 = vcombine.high %v10821_v22, %v10821_v22 }
 0x210   : > { %v4676_v55 = vsel %vm4146_vm10, 0.0, %v4610_v13  ;;  %v5471_v28 = vcombine.low %v5449_v7, %v5456_v17  ;;  %v5684_v49 = vcombine.low %v10821_v22, %v5269_v5  ;;  %v5715_v52 = vrot.slane %v10867_v16, %v10115_v8 }
 0x211   : > { %v4696_v44 = vpack.c.bf16 %v4676_v55, %v4675_v33  ;;  %v8719_v60 = vpack.c.bf16 %v4676_v55, %v4676_v55  ;;  %v5438_v34 = vcombine.low %v5430_v18, %v5437_v54  ;;  %v5472_v27 = vcombine.low %v5463_v19, %v5470_v29 }
 0x212   : > { %v5479_v48 = vrot.slane %v5471_v28, %v10115_v8  ;;  %v5685_v24 = vcombine.low %v5271_v3, %v10815_v47  ;;  %v5686_v56 = vcombine.low %v10818_v20, %v5270_v1  ;;  %v5694_v45 = vrot.slane %v5684_v49, %v10115_v8  ;;  %v9151_v49 = vld [vmem:[%s12411_s9] sm:$0xff]  }
 0x213   : > { %v10922_v0 = vrot.slane %v4696_v44, %v10115_v8  ;;  %v10925_v21 = vrot.slane %v8719_v60, %v10115_v8  ;;  %8872 = vmatmul.mubr.msk.bf16.gmra.mrb[36].mxu0 %vm5745_vm11, %v5438_v34  ;;  %v5486_v33 = vrot.slane %v5472_v27, %v10115_v8  ;;  %v5012_v18 = vcombine.high %v10475_v23, %v10475_v23 }
 0x214   : > { %8875 = vmatprep.mubr.msk.bf16.mxu0 %vm9197_vm3, %v12484_v42  ;;  %v5701_v43 = vrot.slane %v5685_v24, %v10115_v8  ;;  %v5708_v13 = vrot.slane %v5686_v56, %v10115_v8  ;;  %v5490_v54 = vcombine.low %v10655_v30, %v10682_v58  ;;  %v8685_v16 = vcombine.high %v10655_v30, %v10682_v58 }
 0x215   : > { %v6480_v7 = vcombine.high %v10922_v0, %v10922_v0  ;;  %v5487_v17 = vcombine.low %v5479_v48, %v5486_v33  ;;  %v5488_v5 = vcombine.low %v10491_v26, %v5012_v18  ;;  %v5505_v55 = vrot.slane %v10505_v59, %v10115_v8 }
 0x216   : > { %v5716_v19 = vcombine.low %v5694_v45, %v5701_v43  ;;  %v5717_v29 = vcombine.low %v5708_v13, %v5715_v52  ;;  %v5512_v28 = vrot.slane %v5490_v54, %v10115_v8  ;;  %v5519_v1 = vrot.slane %v8685_v16, %v10115_v8  ;;  %v12507_v16 = vld [vmem:[#allocation3_spill] sm:$0xff] }
 0x217   : > { %v12505_v3 = vcombine.low %v10277_v37, %v10280_v31  ;;  %v5137_v60 = vcombine.high %v10674_v51, %v10674_v51  ;;  %v5498_v48 = vrot.slane %v5488_v5, %v10115_v8  ;;  %v5537_v59 = vcombine.low %v10658_v39, %v10661_v46 }
 0x218   : > { %v5724_v34 = vrot.slane %v5716_v19, %v10115_v8  ;;  %v5731_v27 = vrot.slane %v5717_v29, %v10115_v8  ;;  %v5521_v24 = vcombine.low %v5512_v28, %v5519_v1  ;;  %v8686_v31 = vcombine.high %v10658_v39, %v10661_v46  ;;  %v9152_v28 = vld [vmem:[%s12411_s9 + $0x8] sm:$0xff]  }
 0x219   : > { %v5925_v44 = vrot.slane %v12505_v3, %v10115_v8  ;;  %v5540_v56 = vcombine.low %v10690_v41, %v5137_v60  ;;  %v5520_v52 = vcombine.low %v5498_v48, %v5505_v55  ;;  %v5547_v45 = vrot.slane %v5537_v59, %v10115_v8 }
 0x21a   : > { %v5732_v33 = vcombine.low %v5724_v34, %v5731_v27  ;;  %v12506_v43 = vcombine.low %v10664_v38, %v10674_v51  ;;  %v5535_v18 = vrot.slane %v5521_v24, %v10115_v8  ;;  %v4822_v19 = vcombine.high %v12507_v16, %v12507_v16  ;;  %v12508_v38 = vld [vmem:[#allocation4_spill] sm:$0xff] }
 0x21b   : > { %v5926_v37 = vcombine.low %v10329_v11, %v5925_v44  ;;  %8876 = vmatmul.mubr.msk.bf16.gmra.mrb[40].mxu0 %vm5745_vm11, %v5487_v17  ;;  %v5554_v11 = vrot.slane %v8686_v31, %v10115_v8  ;;  %v5568_v54 = vrot.slane %v5540_v56, %v10115_v8  ;;  %v5528_v29 = vrot.slane %v5520_v52, %v10115_v8  ;;  %v12509_v17 = vld [vmem:[#allocation5_spill] sm:$0xff]  ;;  %v12510_v44 = vld [vmem:[#allocation2_spill] sm:$0xff] }
 0x21c   : > { %v5561_v13 = vrot.slane %v12506_v43, %v10115_v8  ;;  %8879 = vmatprep.mubr.msk.bf16.mxu0 %vm9197_vm3, %v12484_v42  ;;  %8896 = vmatmul.mubr.msk.bf16.vlgmr.msra.gmra.mrb[0].mxu1 %vm5745_vm11, %v5732_v33  ;;  %v4823_v5 = vcombine.high %v12508_v38, %v12508_v38  ;;  %v4824_v55 = vcombine.high %v12509_v17, %v12509_v17  ;;  %v12513_v52 = vld [vmem:[#allocation13_spill] sm:$0xff]  ;;  %vm7311_vm14 = vcmask 1044484  }
 0x21d   : > { %8900 = vmatpush3.bf16.msra.mxu1 %v9151_v49  ;;  %8903 = vmatprep.mubr.msk.bf16.mxu1 %vm9197_vm3, %v12484_v42  ;;  %v5569_v1 = vcombine.low %v5547_v45, %v5554_v11  ;;  %v12511_v60 = vrot.slane %v12510_v44, %v10115_v8  ;;  %v5536_v27 = vcombine.low %v5528_v29, %v5535_v18  ;;  %v12512_v49 = vld [vmem:[#allocation6_spill] sm:$0xff]  ;;  %vm7313_vm7 = vcmask 1046534  }
 0x21e   : > { %v5570_v3 = vcombine.low %v5561_v13, %v5568_v54  ;;  %8901 = vmatprep.subr.bf16.mxu1 %v12484_v42  ;;  %v5928_v48 = vcombine.low %v12509_v17, %v4822_v19  ;;  %v5929_v59 = vcombine.low %v4824_v55, %v12508_v38  ;;  %v5930_v24 = vcombine.low %v12512_v49, %v4823_v5  ;;  %v9153_v54 = vld [vmem:[%s12411_s9 + $0x20] sm:$0xff]   ;;  %v12514_v19 = vld [vmem:[#allocation12_spill] sm:$0xff] }
 0x21f   : > { %v5927_v34 = vcombine.low %v12511_v60, %v12507_v16  ;;  %v5577_v31 = vrot.slane %v5569_v1, %v10115_v8  ;;  %v5138_v45 = vcombine.high %v12513_v52, %v12513_v52  ;;  %v5139_v11 = vcombine.high %v10690_v41, %v10690_v41  ;;  %v12515_v5 = vld [vmem:[#allocation14_spill] sm:$0xff] }
 0x220   : > { %v5584_v56 = vrot.slane %v5570_v3, %v10115_v8  ;;  %v5944_v43 = vrot.slane %v5928_v48, %v10115_v8  ;;  %v5951_v13 = vrot.slane %v5929_v59, %v10115_v8  ;;  %v5958_v18 = vrot.slane %v5930_v24, %v10115_v8  ;;  %v12517_v59 = vld [vmem:[#allocation8_spill] sm:$0xff] }
 0x221   : > { %v5937_v33 = vrot.slane %v5927_v34, %v10115_v8  ;;  %8902 = vmatpush3.bf16.msra.mxu1 %v9152_v28  ;;  %v5587_v29 = vcombine.low %v12514_v19, %v5138_v45  ;;  %v5589_v38 = vcombine.low %v10833_v6, %v10842_v10  ;;  %v5610_v17 = vrot.slane %v12515_v5, %v10115_v8  ;;  %v12516_v28 = vld [vmem:[#allocation9_spill] sm:$0xff] }
 0x222   : > { %v5585_v16 = vcombine.low %v5577_v31, %v5584_v56  ;;  %8939 = vmatprep.subr.bf16.mxu1 %v12484_v42  ;;  %v5960_v1 = vcombine.low %v5951_v13, %v5958_v18  ;;  %v5586_v3 = vcombine.low %v5139_v11, %v12513_v52  ;;  %v5977_v44 = vcombine.low %v10363_v63, %v12516_v28 }
 0x223   : > { %v5959_v55 = vcombine.low %v5937_v33, %v5944_v43  ;;  %8880 = vmatmul.mubr.msk.bf16.gmra.mrb[44].mxu0 %vm5745_vm11, %v5536_v27  ;;  %v5603_v60 = vrot.slane %v5587_v29, %v10115_v8  ;;  %v5617_v34 = vrot.slane %v5589_v38, %v10115_v8  ;;  %v8702_v48 = vcombine.high %v10363_v63, %v12516_v28  ;;  %v12518_v63 = vld [vmem:[#allocation7_spill] sm:$0xff] }
 0x224   : > { %v5979_v49 = vcombine.low %v12517_v59, %v10415_v61  ;;  %8883 = vmatprep.mubr.msk.bf16.mxu0 %vm9197_vm3, %v12484_v42  ;;  %8904 = vmatmul.mubr.msk.bf16.vlgmr.msra.gmra.mrb[4].mxu1 %vm5745_vm11, %v5926_v37  ;;  %v5974_v31 = vrot.slane %v5960_v1, %v10115_v8  ;;  %v5596_v27 = vrot.slane %v5586_v3, %v10115_v8  ;;  %v9154_v37 = vld [vmem:[%s12411_s9 + $0x28] sm:$0xff]  }
 0x225   : > { %v5967_v24 = vrot.slane %v5959_v55, %v10115_v8  ;;  %8940 = vmatpush3.bf16.msra.mxu1 %v9153_v54  ;;  %8907 = vmatprep.mubr.msk.bf16.mxu1 %vm9197_vm3, %v12484_v42  ;;  %v5619_v56 = vcombine.low %v5610_v17, %v5617_v34  ;;  %v5986_v33 = vrot.slane %v12518_v63, %v10115_v8 }
 0x226   : > { %v5993_v45 = vrot.slane %v5977_v44, %v10115_v8  ;;  %v5618_v13 = vcombine.low %v5596_v27, %v5603_v60  ;;  %v6000_v18 = vrot.slane %v8702_v48, %v10115_v8  ;;  %v6007_v11 = vrot.slane %v5979_v49, %v10115_v8  ;;  %8941 = vmatprep.subr.bf16.mxu1 %v12484_v42 }
 0x227   : > { %v5975_v43 = vcombine.low %v5967_v24, %v5974_v31  ;;  %v5633_v54 = vrot.slane %v5619_v56, %v10115_v8  ;;  %v8687_v38 = vcombine.high %v10833_v6, %v10842_v10  ;;  %v5636_v5 = vcombine.low %v10838_v32, %v10845_v53 }
 0x228   : > { %v6008_v29 = vcombine.low %v5986_v33, %v5993_v45  ;;  %v5626_v17 = vrot.slane %v5618_v13, %v10115_v8  ;;  %v6009_v55 = vcombine.low %v6000_v18, %v6007_v11  ;;  %v6533_v1 = vcombine.low %v5993_v45, %v6000_v18 }
 0x229   : > { %v8688_v3 = vcombine.high %v10838_v32, %v10845_v53  ;;  %v5638_v44 = vcombine.low %v10826_v4, %v10809_v57  ;;  %v5645_v60 = vrot.slane %v8687_v38, %v10115_v8  ;;  %v5652_v34 = vrot.slane %v5636_v5, %v10115_v8  ;;  %8942 = vmatpush3.bf16.msra.mxu1 %v9154_v37 }
 0x22a   : > { %v6016_v28 = vrot.slane %v6008_v29, %v10115_v8  ;;  %v5634_v48 = vcombine.low %v5626_v17, %v5633_v54  ;;  %v6023_v49 = vrot.slane %v6009_v55, %v10115_v8  ;;  %v11060_v24 = vrot.slane %v6533_v1, %v10115_v8 }
 0x22b   : > { %v5659_v31 = vrot.slane %v8688_v3, %v10115_v8  ;;  %8884 = vmatmul.mubr.msk.bf16.gmra.mrb[48].mxu0 %vm5745_vm11, %v5585_v16  ;;  %v5666_v27 = vrot.slane %v5638_v44, %v10115_v8  ;;  %v5667_v56 = vcombine.low %v5645_v60, %v5652_v34  ;;  %v4948_v63 = vcombine.high %v10462_v2, %v10462_v2 }
 0x22c   : > { %v4950_v33 = vcombine.high %v10472_v35, %v10472_v35  ;;  %8887 = vmatprep.mubr.msk.bf16.mxu0 %vm9197_vm3, %v12484_v42  ;;  %8908 = vmatmul.mubr.msk.bf16.gmra.mrb[8].mxu1 %vm5745_vm11, %v5975_v43  ;;  %v6024_v45 = vcombine.low %v6016_v28, %v6023_v49  ;;  %v8703_v37 = vcombine.high %v12517_v59, %v10415_v61 }
 0x22d   : > { %v6026_v16 = vcombine.low %v10261_v12, %v10462_v2  ;;  %8911 = vmatprep.mubr.msk.bf16.mxu1 %vm9197_vm3, %v12484_v42  ;;  %v5668_v13 = vcombine.low %v5659_v31, %v5666_v27  ;;  %v5675_v18 = vrot.slane %v5667_v56, %v10115_v8  ;;  %v6027_v54 = vcombine.low %v10472_v35, %v4948_v63  ;;  %v12519_v56 = vld [vmem:[#allocation10_spill] sm:$0xff] }
 0x22e   : > { %v6028_v29 = vcombine.low %v4950_v33, %v10466_v62  ;;  %v6035_v38 = vrot.slane %v8703_v37, %v10115_v8  ;;  %v4949_v61 = vcombine.high %v10466_v62, %v10466_v62  ;;  %v4951_v12 = vcombine.high %v10488_v50, %v10488_v50 }
 0x22f   : > { %v11083_v43 = vrot.slane %v6026_v16, %v10115_v8  ;;  %v5682_v2 = vrot.slane %v5668_v13, %v10115_v8  ;;  %v11091_v59 = vrot.slane %v6027_v54, %v10115_v8  ;;  %v6076_v5 = vcombine.low %v10536_v14, %v10541_v40 }
 0x230   : > { %v11094_v35 = vrot.slane %v6028_v29, %v10115_v8  ;;  %v6534_v55 = vcombine.low %v6007_v11, %v6035_v38  ;;  %v6074_v1 = vcombine.low %v10488_v50, %v4949_v61  ;;  %v6075_v62 = vcombine.low %v4951_v12, %v10437_v25 }
 0x231   : > { %v6057_v17 = vcombine.low %v6035_v38, %v11083_v43  ;;  %v5683_v3 = vcombine.low %v5675_v18, %v5682_v2  ;;  %v8704_v44 = vcombine.high %v10536_v14, %v10541_v40  ;;  %v11106_v60 = vrot.slane %v6076_v5, %v10115_v8  ;;  %v12520_v2 = vld [vmem:[#allocation15_spill] sm:$0xff] }
 0x232   : > { %v6058_v28 = vcombine.low %v11091_v59, %v11094_v35  ;;  %v11110_v49 = vrot.slane %v6534_v55, %v10115_v8  ;;  %v11113_v11 = vrot.slane %v6074_v1, %v10115_v8  ;;  %v11116_v25 = vrot.slane %v6075_v62, %v10115_v8 }
 0x233   : > { %v6065_v34 = vrot.slane %v6057_v17, %v10115_v8  ;;  %8888 = vmatmul.mubr.msk.bf16.gmra.mrb[52].mxu0 %vm5745_vm11, %v5634_v48  ;;  %v11121_v14 = vrot.slane %v8704_v44, %v10115_v8  ;;  %v5074_v40 = vcombine.high %v10655_v30, %v10655_v30  ;;  %v6123_v31 = vcombine.low %v10475_v23, %v10491_v26 }
 0x234   : > { %v6072_v50 = vrot.slane %v6058_v28, %v10115_v8  ;;  %8891 = vmatprep.mubr.msk.bf16.mxu0 %vm9197_vm3, %v12484_v42  ;;  %8912 = vmatmul.mubr.msk.bf16.gmra.mrb[12].mxu1 %vm5745_vm11, %v6024_v45  ;;  %v6106_v27 = vcombine.low %v11113_v11, %v11116_v25  ;;  %v8705_v48 = vcombine.high %v10475_v23, %v10491_v26 }
 0x235   : > { %v6125_v63 = vcombine.low %v12519_v56, %v10655_v30  ;;  %8915 = vmatprep.mubr.msk.bf16.mxu1 %vm9197_vm3, %v12484_v42  ;;  %v6107_v37 = vcombine.low %v11106_v60, %v11121_v14  ;;  %v6126_v16 = vcombine.low %v10682_v58, %v5074_v40  ;;  %v11142_v45 = vrot.slane %v6123_v31, %v10115_v8 }
 0x236   : > { %v6073_v33 = vcombine.low %v6065_v34, %v6072_v50  ;;  %v6114_v13 = vrot.slane %v6106_v27, %v10115_v8  ;;  %v11146_v18 = vrot.slane %v8705_v48, %v10115_v8  ;;  %v5075_v26 = vcombine.high %v10658_v39, %v10658_v39  ;;  %v12521_v50 = vld [vmem:[#allocation11_spill] sm:$0xff] }
 0x237   : > { %v11149_v23 = vrot.slane %v6125_v63, %v10115_v8  ;;  %v6121_v30 = vrot.slane %v6107_v37, %v10115_v8  ;;  %v11155_v54 = vrot.slane %v6126_v16, %v10115_v8  ;;  %v5076_v29 = vcombine.high %v10682_v58, %v10682_v58 }
 0x238   : > { %v6175_v38 = vcombine.low %v10674_v51, %v10690_v41  ;;  %v6155_v61 = vcombine.low %v11142_v45, %v11146_v18  ;;  %v6173_v12 = vcombine.low %v10661_v46, %v5075_v26  ;;  %v11166_v5 = vrot.slane %v12520_v2, %v10115_v8 }
 0x239   : > { %v8706_v17 = vcombine.high %v10674_v51, %v10690_v41  ;;  %v6122_v55 = vcombine.low %v6114_v13, %v6121_v30  ;;  %v6156_v1 = vcombine.low %v11149_v23, %v11155_v54  ;;  %v6172_v58 = vcombine.low %v5076_v29, %v10658_v39 }
 0x23a   : > { %v11174_v62 = vrot.slane %v6175_v38, %v10115_v8  ;;  %v11177_v28 = vrot.slane %v6155_v61, %v10115_v8  ;;  %v6189_v46 = vrot.slane %v6173_v12, %v10115_v8  ;;  %v6222_v44 = vcombine.low %v12513_v52, %v12514_v19 }
 0x23b   : > { %v8707_v51 = vcombine.high %v12513_v52, %v12514_v19  ;;  %8892 = vmatmul.mubr.msk.bf16.gmra.mrb[56].mxu0 %vm5745_vm11, %v5683_v3  ;;  %v11186_v41 = vrot.slane %v6156_v1, %v10115_v8  ;;  %v6182_v39 = vrot.slane %v6172_v58, %v10115_v8  ;;  %v6224_v40 = vcombine.low %v12521_v50, %v10833_v6 }
 0x23c   : > { %v6205_v34 = vcombine.low %v11166_v5, %v11174_v62  ;;  %8916 = vmatmul.mubr.msk.bf16.gmra.mrb[16].mxu1 %vm5745_vm11, %v6073_v33  ;;  %v6231_v31 = vrot.slane %v8706_v17, %v10115_v8  ;;  %v6238_v27 = vrot.slane %v6222_v44, %v10115_v8  ;;  %v5200_v19 = vcombine.high %v10833_v6, %v10833_v6 }
 0x23d   : > { %v6245_v52 = vrot.slane %v8707_v51, %v10115_v8  ;;  %8919 = vmatprep.mubr.msk.bf16.mxu1 %vm9197_vm3, %v12484_v42  ;;  %v6171_v3 = vcombine.low %v11177_v28, %v11186_v41  ;;  %v6204_v48 = vcombine.low %v6182_v39, %v6189_v46  ;;  %v6252_v63 = vrot.slane %v6224_v40, %v10115_v8 }
 0x23e   : > { %v11204_v56 = vrot.slane %v6205_v34, %v10115_v8  ;;  %v6253_v33 = vcombine.low %v6231_v31, %v6238_v27  ;;  %v5201_v37 = vcombine.high %v10838_v32, %v10838_v32  ;;  %v5202_v16 = vcombine.high %v10842_v10, %v10842_v10 }
 0x23f   : > { %v5203_v6 = vcombine.high %v10845_v53, %v10845_v53  ;;  %v11214_v13 = vrot.slane %v6204_v48, %v10115_v8  ;;  %v6254_v26 = vcombine.low %v6245_v52, %v6252_v63  ;;  %v6270_v30 = vcombine.low %v10842_v10, %v5200_v19 }
 0x240   : > { %v6549_v29 = vcombine.low %v11060_v24, %v11110_v49  ;;  %v11220_v38 = vrot.slane %v6253_v33, %v10115_v8  ;;  %v6271_v61 = vcombine.low %v5202_v16, %v10838_v32  ;;  %v6272_v12 = vcombine.low %v10845_v53, %v5201_v37 }
 0x241   : > { %v6273_v2 = vcombine.low %v5203_v6, %v10826_v4  ;;  %v6220_v17 = vcombine.low %v11214_v13, %v11204_v56  ;;  %v11228_v1 = vrot.slane %v6254_v26, %v10115_v8  ;;  %v6280_v10 = vrot.slane %v6270_v30, %v10115_v8 }
 0x242   : > { %v6550_v58 = vcombine.low %v11083_v43, %v11091_v59  ;;  %v6287_v28 = vrot.slane %v6271_v61, %v10115_v8  ;;  %v6294_v44 = vrot.slane %v6272_v12, %v10115_v8  ;;  %v6551_v4 = vcombine.low %v11094_v35, %v11113_v11 }
 0x243   : > { %v6301_v32 = vrot.slane %v6273_v2, %v10115_v8  ;;  %v6269_v53 = vcombine.low %v11220_v38, %v11228_v1  ;;  %v6567_v41 = vcombine.low %v11116_v25, %v11106_v60  ;;  %v6568_v43 = vcombine.low %v11121_v14, %v11142_v45 }
 0x244   : > { %v11241_v51 = vrot.slane %v6550_v58, %v10115_v8  ;;  %8920 = vmatmul.mubr.msk.bf16.gmra.mrb[20].mxu1 %vm5745_vm11, %v6122_v55  ;;  %v6302_v59 = vcombine.low %v6280_v10, %v6287_v28  ;;  %v11249_v50 = vrot.slane %v6551_v4, %v10115_v8  ;;  %v6584_v35 = vcombine.low %v11146_v18, %v11149_v23 }
 0x245   : > { %v6303_v34 = vcombine.low %v6294_v44, %v6301_v32  ;;  %8923 = vmatprep.mubr.msk.bf16.mxu1 %vm9197_vm3, %v12484_v42  ;;  %v11256_v11 = vrot.slane %v6567_v41, %v10115_v8  ;;  %v11259_v60 = vrot.slane %v6568_v43, %v10115_v8  ;;  %v6585_v25 = vcombine.low %v11155_v54, %v6182_v39 }
 0x246   : > { %v6601_v14 = vcombine.low %v6189_v46, %v11166_v5  ;;  %v11264_v45 = vrot.slane %v6302_v59, %v10115_v8  ;;  %v6566_v18 = vcombine.low %v11241_v51, %v11249_v50  ;;  %v11272_v23 = vrot.slane %v6584_v35, %v10115_v8 }
 0x247   : > { %v11267_v55 = vrot.slane %v6303_v34, %v10115_v8  ;;  %v6583_v40 = vcombine.low %v11256_v11, %v11259_v60  ;;  %v11277_v19 = vrot.slane %v6585_v25, %v10115_v8  ;;  %v6602_v54 = vcombine.low %v11174_v62, %v6231_v31 }
 0x248   : > { %v11281_v5 = vrot.slane %v6601_v14, %v10115_v8  ;;  %v6618_v39 = vcombine.low %v6238_v27, %v6245_v52  ;;  %v6619_v48 = vcombine.low %v6252_v63, %v6280_v10  ;;  %v6635_v33 = vcombine.low %v10809_v57, %v10821_v22 }
 0x249   : > { %v6318_v46 = vcombine.low %v11264_v45, %v11267_v55  ;;  %v6600_v37 = vcombine.low %v11272_v23, %v11277_v19  ;;  %v11290_v16 = vrot.slane %v6602_v54, %v10115_v8  ;;  %v6643_v6 = vcombine.low %v6287_v28, %v6294_v44 }
 0x24a   : > { %v6488_v62 = vrot.slane %v10922_v0, %v10115_v8  ;;  %v11295_v31 = vrot.slane %v6618_v39, %v10115_v8  ;;  %v6633_v26 = vrot.slane %v6619_v48, %v10115_v8  ;;  %v6642_v27 = vrot.slane %v6635_v33, %v10115_v8 }
 0x24b   : > { %v8724_v52 = vcombine.high %v10809_v57, %v10821_v22  ;;  %v6617_v63 = vcombine.low %v11281_v5, %v11290_v16  ;;  %v6651_v30 = vrot.slane %v6643_v6, %v10115_v8  ;;  %v6661_v61 = vcombine.low %v10815_v47, %v10818_v20 }
 0x24c   : > { %v8725_v12 = vcombine.high %v10815_v47, %v10818_v20  ;;  %8924 = vmatmul.mubr.msk.bf16.gmra.mrb[24].mxu1 %vm5745_vm11, %v6171_v3  ;;  %v6634_v2 = vcombine.low %v11295_v31, %v6633_v26  ;;  %v6644_v10 = vcombine.low %v6301_v32, %v6642_v27  ;;  %v6663_v58 = vcombine.low %v10851_v36, %v6488_v62 }
 0x24d   : > { %v6670_v57 = vrot.slane %v8724_v52, %v10115_v8  ;;  %8927 = vmatprep.mubr.msk.bf16.mxu1 %vm9197_vm3, %v12484_v42  ;;  %v6677_v22 = vrot.slane %v6661_v61, %v10115_v8  ;;  %v6481_v44 = vcombine.high %v10925_v21, %v10925_v21  ;;  %v6495_v47 = vrot.slane %v10925_v21, %v10115_v8 }
 0x24e   : > { %v6684_v28 = vrot.slane %v8725_v12, %v10115_v8  ;;  %v6658_v20 = vrot.slane %v6644_v10, %v10115_v8  ;;  %v6691_v3 = vrot.slane %v6663_v58, %v10115_v8  ;;  %v6502_v36 = vrot.slane %v6480_v7, %v10115_v8 }
 0x24f   : > { %v6510_v32 = vcombine.high %v6488_v62, %v6488_v62  ;;  %v6692_v4 = vcombine.low %v6670_v57, %v6677_v22  ;;  %v6509_v41 = vrot.slane %v6481_v44, %v10115_v8  ;;  %v6511_v43 = vcombine.high %v6495_v47, %v6495_v47 }
 0x250   : > { %v6659_v59 = vcombine.low %v6651_v30, %v6658_v20  ;;  %v6693_v34 = vcombine.low %v6684_v28, %v6691_v3  ;;  %v6512_v35 = vcombine.high %v6502_v36, %v6502_v36  ;;  %v6527_v21 = vrot.slane %v10829_v9, %v10115_v8 }
 0x251   : > { %v6709_v25 = vcombine.low %v6502_v36, %v6510_v32  ;;  %v6513_v14 = vcombine.high %v6509_v41, %v6509_v41  ;;  %v6711_v45 = vcombine.low %v6509_v41, %v6511_v43  ;;  %v6700_v55 = vrot.slane %v6692_v4, %v10115_v8 }
 0x252   : > { %v6707_v23 = vrot.slane %v6693_v34, %v10115_v8  ;;  %v6710_v0 = vcombine.low %v6512_v35, %v6495_v47 }
 0x253   : > { %v6712_v7 = vcombine.low %v6513_v14, %v6527_v21  ;;  %v6719_v54 = vrot.slane %v6709_v25, %v10115_v8  ;;  %v6733_v9 = vrot.slane %v6711_v45, %v10115_v8 }
 0x254   : > { %8928 = vmatmul.mubr.msk.bf16.gmra.mrb[28].mxu1 %vm5745_vm11, %v6220_v17  ;;  %v6708_v19 = vcombine.low %v6700_v55, %v6707_v23  ;;  %v6726_v5 = vrot.slane %v6710_v0, %v10115_v8 }
 0x255   : > { %8931 = vmatprep.mubr.msk.bf16.mxu1 %vm9197_vm3, %v12484_v42  ;;  %v6740_v39 = vrot.slane %v6712_v7, %v10115_v8 }
 0x256   : > { %v6741_v48 = vcombine.low %v6719_v54, %v6726_v5 }
 0x257   : > { %v6742_v33 = vcombine.low %v6733_v9, %v6740_v39 }
 0x258   : > { %v6749_v16 = vrot.slane %v6741_v48, %v10115_v8 }
 0x259   : > { %v6756_v56 = vrot.slane %v6742_v33, %v10115_v8 }
 0x25b   : > { %v6757_v13 = vcombine.low %v6749_v16, %v6756_v56 }
 0x25c   : > { %8932 = vmatmul.mubr.msk.bf16.gmra.mrb[32].mxu1 %vm5745_vm11, %v6269_v53 }
 0x25d   : > { %8935 = vmatprep.mubr.msk.bf16.mxu1 %vm9197_vm3, %v12484_v42 }
 0x264   : > { %8936 = vmatmul.mubr.msk.bf16.gmra.mrb[0].mxu1 %vm5745_vm11, %v6318_v46 }
 0x265   : > { %8943 = vmatprep.mubr.msk.bf16.mxu1 %vm9197_vm3, %v12484_v42 }
 0x26c   : > { %8944 = vmatmul.mubr.msk.bf16.vlgmr.msra.gmra.mrb[4].mxu1 %vm5745_vm11, %v6549_v29 }
 0x26d   : > { %8947 = vmatprep.mubr.msk.bf16.mxu1 %vm9197_vm3, %v12484_v42 }
 0x274   : > { %8948 = vmatmul.mubr.msk.bf16.gmra.mrb[8].mxu1 %vm5745_vm11, %v6566_v18 }
 0x275   : > { %8951 = vmatprep.mubr.msk.bf16.mxu1 %vm9197_vm3, %v12484_v42 }
 0x27c   : > { %8952 = vmatmul.mubr.msk.bf16.gmra.mrb[12].mxu1 %vm5745_vm11, %v6583_v40 }
 0x27d   : > { %8955 = vmatprep.mubr.msk.bf16.mxu1 %vm9197_vm3, %v12484_v42 }
 0x284   : > { %8956 = vmatmul.mubr.msk.bf16.gmra.mrb[16].mxu1 %vm5745_vm11, %v6600_v37 }
 0x285   : > { %8959 = vmatprep.mubr.msk.bf16.mxu1 %vm9197_vm3, %v12484_v42 }
 0x28c   : > { %8960 = vmatmul.mubr.msk.bf16.gmra.mrb[20].mxu1 %vm5745_vm11, %v6617_v63 }
 0x28d   : > { %8963 = vmatprep.mubr.msk.bf16.mxu1 %vm9197_vm3, %v12484_v42 }
 0x294   : > { %8964 = vmatmul.mubr.msk.bf16.gmra.mrb[24].mxu1 %vm5745_vm11, %v6634_v2 }
 0x295   : > { %8967 = vmatprep.mubr.msk.bf16.mxu1 %vm9197_vm3, %v12484_v42 }
 0x29c   : > { %8968 = vmatmul.mubr.msk.bf16.gmra.mrb[28].mxu1 %vm5745_vm11, %v6659_v59 }
 0x29d   : > { %8971 = vmatprep.mubr.msk.bf16.mxu1 %vm9197_vm3, %v12484_v42 }
 0x2a4   : > { %8972 = vmatmul.mubr.msk.bf16.gmra.mrb[32].mxu1 %vm5745_vm11, %v6708_v19 }
 0x2a5   : > { %8975 = vmatprep.mubr.msk.bf16.mxu1 %vm9197_vm3, %v12484_v42  ;;  %vm7308_vm3 = vcmask 1040384  }
 0x2ac   : > { %8976 = vmatmul.mubr.msk.bf16.gmra.mrb[0].mxu1 %vm5745_vm11, %v6757_v13  ;;  %vm7309_vm11 = vcmask 1042434  }
 0x2ad   : > { %vm7310_vm12 = vmor %vm7308_vm3, %vm7309_vm11 }
 0x2ae   : > { %vm7312_vm0 = vmor %vm7310_vm12, %vm7311_vm14 }
 0x2af   : > { %vm11453_vm8 = vmor %vm7312_vm0, %vm7313_vm7 }
 0x2b2   : > { %v5807_v8 = vpop.f32.mrb[28].mxu0 }
 0x2b3   : > { %v8865_v24 = vpop.f32.mrb[29].mxu0 }
 0x2b4   : > { %v5810_v49 = vpop.f32.mrb[30].mxu0 }
 0x2b5   : > { %v8866_v29 = vpop.f32.mrb[31].mxu0 }
 0x2dc   : > { %v5815_v38 = vpop.f32.mrb[32].mxu0 }
 0x2dd   : > { %v8869_v17 = vpop.f32.mrb[33].mxu0 }
 0x2de   : > { %v5818_v1 = vpop.f32.mrb[34].mxu0 }
 0x2df   : > { %v8870_v53 = vpop.f32.mrb[35].mxu0 }
 0x2e6   : > { %v11386_v51 = vpop.f32.mrb[36].mxu0 }
 0x2e7   : > { %v8873_v50 = vpop.f32.mrb[37].mxu0 }
 0x2e8   : > { %v11388_v11 = vpop.f32.mrb[38].mxu0 }
 0x2e9   : > { %v8874_v60 = vpop.f32.mrb[39].mxu0 }
 0x2ee   : > { %v11390_v18 = vpop.f32.mrb[40].mxu0 }
 0x2ef   : > { %v8877_v40 = vpop.f32.mrb[41].mxu0 }
 0x2f0   : > { %v11392_v42 = vpop.f32.mrb[42].mxu0 }
 0x2f1   : > { %v8878_v46 = vpop.f32.mrb[43].mxu0 }
 0x2f6   : > { %v11394_v37 = vpop.f32.mrb[44].mxu0 }
 0x2f7   : > { %v8881_v6 = vpop.f32.mrb[45].mxu0 }
 0x2f8   : > { %v11396_v62 = vpop.f32.mrb[46].mxu0 }
 0x2f9   : > { %v8882_v31 = vpop.f32.mrb[47].mxu0 }
 0x2fe   : > { %v11398_v26 = vpop.f32.mrb[48].mxu0 }
 0x2ff   : > { %v8885_v27 = vpop.f32.mrb[49].mxu0 }
 0x300   : > { %v11400_v52 = vpop.f32.mrb[50].mxu0 }
 0x301   : > { %v8886_v63 = vpop.f32.mrb[51].mxu0 }
 0x306   : > { %v11402_v30 = vpop.f32.mrb[52].mxu0 }
 0x307   : > { %v8889_v61 = vpop.f32.mrb[53].mxu0 }
 0x308   : > { %v11404_v12 = vpop.f32.mrb[54].mxu0 }
 0x309   : > { %v8890_v2 = vpop.f32.mrb[55].mxu0 }
 0x30e   : > { %v11406_v10 = vpop.f32.mrb[56].mxu0 }
 0x30f   : > { %v8893_v58 = vpop.f32.mrb[57].mxu0 }
 0x310   : > { %v11408_v57 = vpop.f32.mrb[58].mxu0 }
 0x311   : > { %v8894_v22 = vpop.f32.mrb[59].mxu0 }
 0x33f   : > { %v6831_v28 = vpop.f32.mrb[4].mxu1 }
 0x340   : > { %v8983_v44 = vadd.f32 %v6831_v28, %v5807_v8  ;;  %v8945_v47 = vpop.f32.mrb[5].mxu1 }
 0x341   : > { %v6834_v20 = vpop.f32.mrb[6].mxu1 }
 0x342   : > { %v6938_v3 = vcombine.high %v8983_v44, %v8983_v44  ;;  %v11411_v36 = vrot.slane %v8983_v44, %v9321_v15  ;;  %v8984_v32 = vadd.f32 %v6834_v20, %v5810_v49  ;;  %v8946_v4 = vpop.f32.mrb[7].mxu1 }
 0x344   : > { %v11414_v41 = vrot.slane %v6938_v3, %v9321_v15  ;;  %v11418_v43 = vcombine.high %v11411_v36, %v11411_v36  ;;  %v6955_v34 = vcombine.high %v8984_v32, %v8984_v32  ;;  %v11425_v35 = vrot.slane %v8984_v32, %v9321_v15 }
 0x345   : > { %v8737_v33 = vrot.slane %v11411_v36, 9 }
 0x346   : > { %7771 = vrot.lane.b32.xlu0 %v11418_v43, %s9199_s25  ;;  %7773 = vrot.lane.b32.xlu1 %v11414_v41, %s9199_s25  ;;  %v11431_v14 = vcombine.high %v11414_v41, %v11414_v41  ;;  %v7320_v55 = vrot.slane %v11414_v41, 7  ;;  %v11441_v7 = vrot.slane %v6955_v34, %v9321_v15  ;;  %v11445_v19 = vcombine.high %v11425_v35, %v11425_v35 }
 0x347   : > { %v6839_v59 = vpop.f32.mrb[8].mxu1  ;;  %v7317_v54 = vrot.slane %v11418_v43, 7  ;;  %v7326_v53 = vrot.slane %v11425_v35, 7 }
 0x348   : > { %v11427_v25 = vadd.f32 %v6839_v59, %v5815_v38  ;;  %v8949_v21 = vpop.f32.mrb[9].mxu1  ;;  %v7322_v5 = vrot.slane %v7320_v55, 2  ;;  %v7323_v9 = vrot.slane %v11431_v14, 7  ;;  %v11474_v17 = vcombine.high %v11441_v7, %v11441_v7 }
 0x349   : > { %v6842_v45 = vpop.f32.mrb[10].mxu1  ;;  %v7318_v8 = vsel %vm11453_vm8, %v8737_v33, %v7317_v54  ;;  %v7329_v50 = vrot.slane %v11445_v19, 7  ;;  %v7328_v6 = vrot.slane %v7326_v53, 2  ;;  %v7332_v61 = vrot.slane %v11441_v7, 7 }
 0x34a   : > { %v11434_v23 = vadd.f32 %v6842_v45, %v5818_v1  ;;  %7775 = vrot.lane.b32.xlu0 %v11431_v14, %s9199_s25  ;;  %7777 = vrot.lane.b32.xlu1 %v11425_v35, %s9199_s25  ;;  %v8950_v0 = vpop.f32.mrb[11].mxu1  ;;  %v7324_v24 = vsel %vm11453_vm8, %v7322_v5, %v7323_v9  ;;  %v6979_v38 = vrot.slane %v11427_v25, %v9321_v15  ;;  %v7319_v1 = vrot.slane %v7317_v54, 2 }
 0x34b   : > { %v7331_v63 = vrot.slane %v7329_v50, 2  ;;  %v7335_v2 = vrot.slane %v11474_v17, 7  ;;  %v6972_v22 = vcombine.high %v11427_v25, %v11427_v25  ;;  %v7330_v28 = vsel %vm11453_vm8, %v7328_v6, %v7329_v50 }
 0x34c   : > { %v7321_v46 = vsel %vm11453_vm8, %v7319_v1, %v7320_v55  ;;  %v7334_v47 = vrot.slane %v7332_v61, 2  ;;  %v7338_v3 = vrot.slane %v6979_v38, 7  ;;  %v11522_v0 = vrot.slane %v11434_v23, %v9321_v15 }
 0x34d   : > { %v7333_v44 = vsel %vm11453_vm8, %v7331_v63, %v7332_v61  ;;  %v7337_v20 = vrot.slane %v7335_v2, 2  ;;  %v11504_v32 = vrot.slane %v6972_v22, %v9321_v15  ;;  %v11532_v5 = vcombine.high %v6979_v38, %v6979_v38 }
 0x34e   : > { %7779 = vrot.lane.b32.xlu0 %v11445_v19, %s9199_s25  ;;  %7781 = vrot.lane.b32.xlu1 %v11441_v7, %s9199_s25  ;;  %v7336_v25 = vsel %vm11453_vm8, %v7334_v47, %v7335_v2  ;;  %v11542_v33 = vcombine.high %v11522_v0, %v11522_v0 }
 0x34f   : > { %v6847_v48 = vpop.f32.mrb[12].mxu1  ;;  %v7339_v21 = vsel %vm11453_vm8, %v7337_v20, %v7338_v3  ;;  %v11526_v54 = vcombine.high %v11504_v32, %v11504_v32 }
 0x350   : > { %v11459_v16 = vadd.f32 %v6847_v48, %v11386_v51  ;;  %v8953_v56 = vpop.f32.mrb[13].mxu1  ;;  %v7325_v51 = vrot.slane %v7323_v9, 2 }
 0x351   : > { %v6850_v13 = vpop.f32.mrb[14].mxu1  ;;  %v7345_v1 = vrot.slane %v11526_v54, 7 }
 0x352   : > { %v11466_v49 = vadd.f32 %v6850_v13, %v11388_v11  ;;  %7515 = vrot.lane.b32.xlu0 %v7318_v8, %s9200_s26  ;;  %7519 = vrot.lane.b32.xlu1 %v7324_v24, %s9200_s26  ;;  %v8954_v29 = vpop.f32.mrb[15].mxu1  ;;  %v7327_v27 = vsel %vm11453_vm8, %v7325_v51, %v7326_v53  ;;  %v7342_v13 = vrot.slane %v11504_v32, 7  ;;  %v7348_v53 = vrot.slane %v11522_v0, 7 }
 0x353   : > { %v8738_v29 = vrot.slane %v11532_v5, 9  ;;  %v11579_v61 = vrot.slane %v11459_v16, %v9321_v15 }
 0x354   : > { %v7350_v6 = vrot.slane %v7348_v53, 2 }
 0x356   : > { %7783 = vrot.lane.b32.xlu0 %v11474_v17, %s9199_s25  ;;  %7785 = vrot.lane.b32.xlu1 %v6979_v38, %s9199_s25  ;;  %v7344_v38 = vrot.slane %v7342_v13, 2 }
 0x357   : > { %v6855_v11 = vpop.f32.mrb[16].mxu1 }
 0x358   : > { %v11482_v60 = vadd.f32 %v6855_v11, %v11390_v18  ;;  %v8957_v40 = vpop.f32.mrb[17].mxu1  ;;  %v7343_v11 = vsel %vm11453_vm8, %v8738_v29, %v7342_v13 }
 0x359   : > { %v6858_v31 = vpop.f32.mrb[18].mxu1 }
 0x35a   : > { %v11491_v58 = vadd.f32 %v6858_v31, %v11392_v42  ;;  %7517 = vrot.lane.b32.xlu0 %v7321_v46, %s9200_s26  ;;  %7521 = vrot.lane.b32.xlu1 %v7327_v27, %s9200_s26  ;;  %v8958_v18 = vpop.f32.mrb[19].mxu1  ;;  %v7346_v46 = vsel %vm11453_vm8, %v7344_v38, %v7345_v1  ;;  %v7351_v31 = vrot.slane %v11542_v33, 7 }
 0x35c   : > { %v7352_v2 = vsel %vm11453_vm8, %v7350_v6, %v7351_v31 }
 0x35e   : > { %7523 = vrot.lane.b32.xlu0 %v7330_v28, %s9200_s26  ;;  %7525 = vrot.lane.b32.xlu1 %v7333_v44, %s9200_s26  ;;  %v7347_v28 = vrot.slane %v7345_v1, 2 }
 0x35f   : > { %v6863_v42 = vpop.f32.mrb[20].mxu1 }
 0x360   : > { %v11507_v4 = vadd.f32 %v6863_v42, %v11394_v37  ;;  %v8961_v59 = vpop.f32.mrb[21].mxu1  ;;  %v6989_v37 = vcombine.high %v11434_v23, %v11434_v23  ;;  %v7349_v42 = vsel %vm11453_vm8, %v7347_v28, %v7348_v53 }
 0x361   : > { %v6866_v34 = vpop.f32.mrb[22].mxu1  ;;  %v7353_v59 = vrot.slane %v7351_v31, 2 }
 0x362   : > { %v11514_v45 = vadd.f32 %v6866_v34, %v11396_v62  ;;  %7527 = vrot.lane.b32.xlu0 %v7336_v25, %s9200_s26  ;;  %7529 = vrot.lane.b32.xlu1 %v7339_v21, %s9200_s26  ;;  %v8962_v55 = vpop.f32.mrb[23].mxu1  ;;  %v11535_v9 = vrot.slane %v6989_v37, %v9321_v15  ;;  %v7021_v21 = vcombine.high %v11579_v61, %v11579_v61 }
 0x364   : > { %v7354_v27 = vrot.slane %v11535_v9, 7 }
 0x366   : > { %7787 = vrot.lane.b32.xlu0 %v11504_v32, %s9199_s25  ;;  %7789 = vrot.lane.b32.xlu1 %v11526_v54, %s9199_s25  ;;  %v7356_v18 = vrot.slane %v7354_v27, 2  ;;  %v7355_v55 = vsel %vm11453_vm8, %v7353_v59, %v7354_v27 }
 0x367   : > { %v6871_v62 = vpop.f32.mrb[24].mxu1 }
 0x368   : > { %v11538_v48 = vadd.f32 %v6871_v62, %v11398_v26  ;;  %v8965_v23 = vpop.f32.mrb[25].mxu1  ;;  %v11554_v26 = vcombine.high %v11535_v9, %v11535_v9  ;;  %v7360_v62 = vrot.slane %v11579_v61, 7 }
 0x369   : > { %v6874_v56 = vpop.f32.mrb[26].mxu1 }
 0x36a   : > { %v11546_v8 = vadd.f32 %v6874_v56, %v11400_v52  ;;  %7791 = vrot.lane.b32.xlu0 %v11522_v0, %s9199_s25  ;;  %7793 = vrot.lane.b32.xlu1 %v11542_v33, %s9199_s25  ;;  %v8966_v24 = vpop.f32.mrb[27].mxu1  ;;  %v7357_v22 = vrot.slane %v11554_v26, 7  ;;  %v11617_v56 = vrot.slane %v11466_v49, %v9321_v15 }
 0x36c   : > { %v7358_v3 = vsel %vm11453_vm8, %v7356_v18, %v7357_v22  ;;  %v7359_v37 = vrot.slane %v7357_v22, 2  ;;  %v7370_v27 = vrot.slane %v11617_v56, 7 }
 0x36e   : > { %7795 = vrot.lane.b32.xlu0 %v11535_v9, %s9199_s25  ;;  %7797 = vrot.lane.b32.xlu1 %v11554_v26, %s9199_s25  ;;  %v7361_v29 = vsel %vm11453_vm8, %v7359_v37, %v7360_v62  ;;  %v7372_v28 = vrot.slane %v7370_v27, 2  ;;  %v7057_v37 = vcombine.high %v11491_v58, %v11491_v58 }
 0x36f   : > { %v6879_v52 = vpop.f32.mrb[28].mxu1 }
 0x370   : > { %v11564_v51 = vadd.f32 %v6879_v52, %v11402_v30  ;;  %v8969_v50 = vpop.f32.mrb[29].mxu1  ;;  %v7362_v52 = vrot.slane %v7360_v62, 2  ;;  %v11688_v62 = vrot.slane %v11491_v58, %v9321_v15 }
 0x371   : > { %v6882_v40 = vpop.f32.mrb[30].mxu1  ;;  %v11639_v50 = vcombine.high %v11617_v56, %v11617_v56 }
 0x372   : > { %v11573_v63 = vadd.f32 %v6882_v40, %v11404_v12  ;;  %7531 = vrot.lane.b32.xlu0 %v7343_v11, %s9200_s26  ;;  %7533 = vrot.lane.b32.xlu1 %v7346_v46, %s9200_s26  ;;  %v8970_v30 = vpop.f32.mrb[31].mxu1  ;;  %v11649_v46 = vrot.slane %v11482_v60, %v9321_v15 }
 0x373   : > { %v7373_v30 = vrot.slane %v11639_v50, 7 }
 0x376   : > { %7537 = vrot.lane.b32.xlu1 %v7352_v2, %s9200_s26  ;;  %7799 = vrot.lane.b32.xlu0 %v11579_v61, %s9199_s25 }
 0x377   : > { %v6887_v12 = vpop.f32.mrb[32].mxu1 }
 0x378   : > { %v11588_v44 = vadd.f32 %v6887_v12, %v11406_v10  ;;  %v8973_v47 = vpop.f32.mrb[33].mxu1  ;;  %v7006_v10 = vcombine.high %v11459_v16, %v11459_v16  ;;  %v7023_v16 = vcombine.high %v11466_v49, %v11466_v49  ;;  %v7363_v49 = vrot.slane %v7021_v21, 7 }
 0x379   : > { %v6890_v20 = vpop.f32.mrb[34].mxu1  ;;  %v7375_v12 = vrot.slane %v7373_v30, 2 }
 0x37a   : > { %v11595_v34 = vadd.f32 %v6890_v20, %v11408_v57  ;;  %7541 = vrot.lane.b32.xlu1 %v7358_v3, %s9200_s26  ;;  %7535 = vrot.lane.b32.xlu0 %v7349_v42, %s9200_s26  ;;  %v8974_v25 = vpop.f32.mrb[35].mxu1  ;;  %v11611_v23 = vrot.slane %v7006_v10, %v9321_v15  ;;  %v11627_v1 = vrot.slane %v7023_v16, %v9321_v15 }
 0x37b   : > { %v7364_v11 = vsel %vm11453_vm8, %v7362_v52, %v7363_v49  ;;  %v7040_v20 = vcombine.high %v11482_v60, %v11482_v60  ;;  %v7374_v3 = vsel %vm11453_vm8, %v7372_v28, %v7373_v30  ;;  %v7382_v60 = vrot.slane %v11649_v46, 7 }
 0x37c   : > { %v11631_v53 = vcombine.high %v11611_v23, %v11611_v23  ;;  %v11653_v6 = vcombine.high %v11627_v1, %v11627_v1  ;;  %v8739_v2 = vrot.slane %v11611_v23, 9  ;;  %v7376_v47 = vrot.slane %v11627_v1, 7 }
 0x37d   : > { %v7054_v10 = vrot.slane %v7040_v20, %v9321_v15  ;;  %v11692_v16 = vcombine.high %v11649_v46, %v11649_v46  ;;  %v7384_v52 = vrot.slane %v7382_v60, 2 }
 0x37e   : > { %7539 = vrot.lane.b32.xlu0 %v7355_v55, %s9200_s26  ;;  %7801 = vrot.lane.b32.xlu1 %v7021_v21, %s9199_s25  ;;  %v7367_v40 = vrot.slane %v11631_v53, 7  ;;  %v7377_v42 = vsel %vm11453_vm8, %v7375_v12, %v7376_v47  ;;  %v7378_v59 = vrot.slane %v7376_v47, 2  ;;  %v7379_v25 = vrot.slane %v11653_v6, 7 }
 0x37f   : > { %v11608_v57 = vpop.f32.mrb[0].mxu1  ;;  %v7385_v58 = vrot.slane %v11692_v16, 7 }
 0x380   : > { %v8977_v13 = vpop.f32.mrb[1].mxu1  ;;  %v7369_v31 = vrot.slane %v7367_v40, 2  ;;  %v7368_v18 = vsel %vm11453_vm8, %v8739_v2, %v7367_v40  ;;  %v7380_v21 = vsel %vm11453_vm8, %v7378_v59, %v7379_v25  ;;  %v7381_v55 = vrot.slane %v7379_v25, 2 }
 0x381   : > { %v11619_v24 = vpop.f32.mrb[2].mxu1  ;;  %v7387_v40 = vrot.slane %v7385_v58, 2  ;;  %v7386_v30 = vsel %vm11453_vm8, %v7384_v52, %v7385_v58  ;;  %v7074_v59 = vcombine.high %v11507_v4, %v11507_v4  ;;  %v11742_v25 = vrot.slane %v11507_v4, %v9321_v15 }
 0x382   : > { %12524 = vst [vmem:[#allocation3_spill] sm:$0xff] %v11619_v24  ;;  %7543 = vrot.lane.b32.xlu0 %v7361_v29, %s9200_s26  ;;  %7805 = vrot.lane.b32.xlu1 %v11617_v56, %s9199_s25  ;;  %v8978_v38 = vpop.f32.mrb[3].mxu1  ;;  %v7371_v22 = vsel %vm11453_vm8, %v7369_v31, %v7370_v27  ;;  %v7383_v13 = vsel %vm11453_vm8, %v7381_v55, %v7382_v60  ;;  %v7392_v31 = vrot.slane %v11688_v62, 7  ;;  %v7388_v27 = vrot.slane %v7054_v10, 7 }
 0x383   : > { %v11700_v29 = vrot.slane %v7057_v37, %v9321_v15  ;;  %v11704_v38 = vcombine.high %v11688_v62, %v11688_v62  ;;  %12528 = vst [vmem:[#allocation6_spill] sm:$0xff] %v11742_v25  ;;  %v11750_v55 = vrot.slane %v7074_v59, %v9321_v15  ;;  %v11754_v60 = vcombine.high %v11742_v25, %v11742_v25 }
 0x384   : > { %v7091_v37 = vcombine.high %v11514_v45, %v11514_v45 }
 0x385   : > { %12525 = vst [vmem:[#allocation4_spill] sm:$0xff] %v11700_v29  ;;  %12526 = vst [vmem:[#allocation5_spill] sm:$0xff] %v11704_v38  ;;  %v11713_v49 = vcombine.high %v11700_v29, %v11700_v29  ;;  %v7395_v28 = vrot.slane %v11704_v38, 7  ;;  %v7398_v12 = vrot.slane %v11700_v29, 7  ;;  %v7090_v52 = vcombine.high %v11750_v55, %v11750_v55 }
 0x386   : > { %7803 = vrot.lane.b32.xlu0 %v11631_v53, %s9199_s25  ;;  %7809 = vrot.lane.b32.xlu1 %v11627_v1, %s9199_s25  ;;  %12529 = vst [vmem:[#allocation13_spill] sm:$0xff] %v11750_v55  ;;  %12530 = vst [vmem:[#allocation12_spill] sm:$0xff] %v11754_v60 }
 0x387   : > { %12527 = vst [vmem:[#allocation2_spill] sm:$0xff] %v11713_v49 }
 0x38a   : > { %7807 = vrot.lane.b32.xlu0 %v11639_v50, %s9199_s25  ;;  %7545 = vrot.lane.b32.xlu1 %v7364_v11, %s9200_s26  ;;  %v11715_v11 = vcombine.high %v7054_v10, %v7054_v10 }
 0x38c   : > { %v8740_v2 = vrot.slane %v11715_v11, 9 }
 0x38e   : > { %7811 = vrot.lane.b32.xlu0 %v11653_v6, %s9199_s25  ;;  %7813 = vrot.lane.b32.xlu1 %v11649_v46, %s9199_s25  ;;  %v7393_v47 = vsel %vm11453_vm8, %v8740_v2, %v7392_v31 }
 0x392   : > { %7547 = vrot.lane.b32.xlu0 %v7368_v18, %s9200_s26  ;;  %7549 = vrot.lane.b32.xlu1 %v7371_v22, %s9200_s26  ;;  %v7389_v18 = vsel %vm11453_vm8, %v7387_v40, %v7388_v27  ;;  %v7394_v22 = vrot.slane %v7392_v31, 2  ;;  %v7404_v31 = vrot.slane %v11742_v25, 7  ;;  %v11773_v27 = vrot.slane %v11514_v45, %v9321_v15 }
 0x394   : > { %v7396_v20 = vsel %vm11453_vm8, %v7394_v22, %v7395_v28 }
 0x396   : > { %7551 = vrot.lane.b32.xlu0 %v7374_v3, %s9200_s26  ;;  %7553 = vrot.lane.b32.xlu1 %v7377_v42, %s9200_s26  ;;  %v7400_v3 = vrot.slane %v7398_v12, 2  ;;  %v7401_v42 = vrot.slane %v11713_v49, 7 }
 0x398   : > { %v7403_v40 = vrot.slane %v7401_v42, 2 }
 0x39a   : > { %7555 = vrot.lane.b32.xlu0 %v7380_v21, %s9200_s26  ;;  %7817 = vrot.lane.b32.xlu1 %v7054_v10, %s9199_s25  ;;  %v7402_v10 = vsel %vm11453_vm8, %v7400_v3, %v7401_v42  ;;  %v7397_v21 = vrot.slane %v7395_v28, 2  ;;  %v7405_v22 = vsel %vm11453_vm8, %v7403_v40, %v7404_v31  ;;  %v7406_v28 = vrot.slane %v7404_v31, 2 }
 0x39b   : > { %v11791_v3 = vcombine.high %v11773_v27, %v11773_v27  ;;  %v7413_v42 = vrot.slane %v7090_v52, 7 }
 0x39c   : > { %v7399_v4 = vsel %vm11453_vm8, %v7397_v21, %v7398_v12  ;;  %v7407_v12 = vrot.slane %v11754_v60, 7  ;;  %v8745_v21 = vld [vmem:[%s12412_s10] ss:$0 sm:$0xff] }
 0x39d   : > { %12532 = vst [vmem:[#allocation9_spill] sm:$0xff] %v11791_v3 }
 0x39e   : > { %7815 = vrot.lane.b32.xlu0 %v11692_v16, %s9199_s25  ;;  %7557 = vrot.lane.b32.xlu1 %v7383_v13, %s9200_s26  ;;  %v7408_v59 = vsel %vm11453_vm8, %v7406_v28, %v7407_v12  ;;  %v7417_v28 = vrot.slane %v11791_v3, 7 }
 0x3a2   : > { %7819 = vrot.lane.b32.xlu0 %v11688_v62, %s9199_s25  ;;  %7821 = vrot.lane.b32.xlu1 %v11704_v38, %s9199_s25 }
 0x3a6   : > { %7823 = vrot.lane.b32.xlu0 %v11700_v29, %s9199_s25  ;;  %7825 = vrot.lane.b32.xlu1 %v11713_v49, %s9199_s25 }
 0x3aa   : > { %7559 = vrot.lane.b32.xlu0 %v7386_v30, %s9200_s26  ;;  %7561 = vrot.lane.b32.xlu1 %v7389_v18, %s9200_s26  ;;  %v11776_v30 = vrot.slane %v7091_v37, %v9321_v15 }
 0x3ac   : > { %12531 = vst [vmem:[#allocation14_spill] sm:$0xff] %v11776_v30  ;;  %v11803_v40 = vcombine.high %v11776_v30, %v11776_v30 }
 0x3ae   : > { %7563 = vrot.lane.b32.xlu0 %v7393_v47, %s9200_s26  ;;  %7565 = vrot.lane.b32.xlu1 %v7396_v20, %s9200_s26  ;;  %v7410_v47 = vrot.slane %v11750_v55, 7 }
 0x3b2   : > { %7569 = vrot.lane.b32.xlu1 %v7402_v10, %s9200_s26  ;;  %7827 = vrot.lane.b32.xlu0 %v11742_v25, %s9199_s25  ;;  %v7412_v10 = vrot.slane %v7410_v47, 2  ;;  %v7423_v25 = vrot.slane %v11803_v40, 7 }
 0x3b4   : > { %v7414_v31 = vsel %vm11453_vm8, %v7412_v10, %v7413_v42  ;;  %v11824_v10 = vrot.slane %v8745_v21, %v9321_v15 }
 0x3b6   : > { %7567 = vrot.lane.b32.xlu0 %v7399_v4, %s9200_s26  ;;  %7829 = vrot.lane.b32.xlu1 %v11754_v60, %s9199_s25 }
 0x3b8   : > { %v7772_v13 = vpop.permute.xlu0 %7771  ;;  %v11763_v58 = vpop.permute.xlu1 %7773 }
 0x3ba   : > { %7831 = vrot.lane.b32.xlu0 %v11750_v55, %s9199_s25  ;;  %7833 = vrot.lane.b32.xlu1 %v7090_v52, %s9199_s25  ;;  %v8033_v52 = vcombine.high %v8745_v21, %v8745_v21  ;;  %v11839_v21 = vcombine.high %v11824_v10, %v11824_v10 }
 0x3bc   : > { %v7776_v2 = vpop.permute.xlu0 %7775  ;;  %v7778_v18 = vpop.permute.xlu1 %7777 }
 0x3be   : > { %7571 = vrot.lane.b32.xlu0 %v7405_v22, %s9200_s26  ;;  %7837 = vrot.lane.b32.xlu1 %v11776_v30, %s9199_s25  ;;  %v7409_v22 = vrot.slane %v7407_v12, 2  ;;  %v7420_v12 = vrot.slane %v11776_v30, 7 }
 0x3c0   : > { %v11785_v45 = vpop.permute.xlu0 %7779  ;;  %v11787_v20 = vpop.permute.xlu1 %7781  ;;  %v7422_v30 = vrot.slane %v7420_v12, 2 }
 0x3c2   : > { %7835 = vrot.lane.b32.xlu0 %v11791_v3, %s9199_s25  ;;  %7573 = vrot.lane.b32.xlu1 %v7408_v59, %s9200_s26  ;;  %v11814_v59 = vrot.slane %v11538_v48, %v9321_v15  ;;  %v7411_v3 = vsel %vm11453_vm8, %v7409_v22, %v7410_v47  ;;  %v8741_v47 = vrot.slane %v11773_v27, 9 }
 0x3c4   : > { %v7516_v4 = vpop.permute.xlu0 %7515  ;;  %v7520_v37 = vpop.permute.xlu1 %7519  ;;  %v7418_v24 = vsel %vm11453_vm8, %v8741_v47, %v7417_v28  ;;  %v7125_v47 = vcombine.high %v11546_v8, %v11546_v8 }
 0x3c5   : > { %v7707_v60 = vadd.f32 %v7516_v4, %v11411_v36  ;;  %v7709_v55 = vadd.f32 %v7520_v37, %v11414_v41  ;;  %v7419_v36 = vrot.slane %v7417_v28, 2  ;;  %v7108_v41 = vcombine.high %v11538_v48, %v11538_v48 }
 0x3c6   : > { %7577 = vrot.lane.b32.xlu1 %v7414_v31, %s9200_s26  ;;  %7839 = vrot.lane.b32.xlu0 %v11803_v40, %s9199_s25  ;;  %v11827_v31 = vrot.slane %v8033_v52, %v9321_v15 }
 0x3c7   : > { %v7963_v37 = vadd.f32 %v7772_v13, %v7707_v60  ;;  %v7965_v52 = vadd.f32 %v7776_v2, %v7709_v55  ;;  %v7421_v29 = vsel %vm11453_vm8, %v7419_v36, %v7420_v12  ;;  %v11858_v13 = vrot.slane %v7108_v41, %v9321_v15 }
 0x3c8   : > { %v11818_v49 = vpop.permute.xlu0 %7783  ;;  %v11820_v42 = vpop.permute.xlu1 %7785  ;;  %v11843_v4 = vcombine.high %v11827_v31, %v11827_v31  ;;  %v7424_v12 = vsel %vm11453_vm8, %v7422_v30, %v7423_v25 }
 0x3ca   : > { %7575 = vrot.lane.b32.xlu0 %v7411_v3, %s9200_s26  ;;  %7841 = vrot.lane.b32.xlu1 %v11814_v59, %s9199_s25 }
 0x3cc   : > { %v7518_v22 = vpop.permute.xlu0 %7517  ;;  %v7522_v3 = vpop.permute.xlu1 %7521 }
 0x3cd   : > { %v7708_v38 = vadd.f32 %v7518_v22, %v11418_v43  ;;  %v7710_v48 = vadd.f32 %v7522_v3, %v11431_v14  ;;  %v8054_v43 = vadd.f32 %v11824_v10, %v7963_v37  ;;  %v8056_v14 = vadd.f32 %v11827_v31, %v7965_v52 }
 0x3ce   : > { %7579 = vrot.lane.b32.xlu0 %v7418_v24, %s9200_s26  ;;  %7581 = vrot.lane.b32.xlu1 %v7421_v29, %s9200_s26  ;;  %v11881_v52 = vcombine.high %v11814_v59, %v11814_v59  ;;  %v7426_v22 = vrot.slane %v11814_v59, 7 }
 0x3cf   : > { %v7964_v55 = vadd.f32 %v11763_v58, %v7708_v38  ;;  %v7966_v60 = vadd.f32 %v7778_v18, %v7710_v48  ;;  %v7425_v48 = vrot.slane %v7423_v25, 2  ;;  %v11900_v25 = vrot.slane %v7125_v47, %v9321_v15 }
 0x3d0   : > { %v7524_v2 = vpop.permute.xlu0 %7523  ;;  %v7526_v28 = vpop.permute.xlu1 %7525  ;;  %v7432_v47 = vrot.slane %v11858_v13, 7 }
 0x3d1   : > { %v8055_v24 = vadd.f32 %v11839_v21, %v7964_v55  ;;  %v8057_v29 = vadd.f32 %v11843_v4, %v7966_v60  ;;  %v7711_v38 = vadd.f32 %v7524_v2, %v11425_v35  ;;  %v7712_v58 = vadd.f32 %v7526_v28, %v11445_v19 }
 0x3d2   : > { %7583 = vrot.lane.b32.xlu0 %v7424_v12, %s9200_s26  ;;  %7845 = vrot.lane.b32.xlu1 %v11858_v13, %s9199_s25  ;;  %v11877_v35 = vrot.slane %v11546_v8, %v9321_v15 }
 0x3d3   : > { %v8182_v18 = vcombine.low %v8054_v43, %v8055_v24  ;;  %v8183_v36 = vcombine.low %v8056_v14, %v8057_v29  ;;  %v7967_v41 = vadd.f32 %v11785_v45, %v7711_v38  ;;  %v7968_v30 = vadd.f32 %v11787_v20, %v7712_v58 }
 0x3d4   : > { %v7528_v19 = vpop.permute.xlu0 %7527  ;;  %v7530_v37 = vpop.permute.xlu1 %7529  ;;  %v7429_v24 = vrot.slane %v11881_v52, 7 }
 0x3d5   : > { %v8190_v3 = vrot.slane %v8182_v18, %v9321_v15  ;;  %v8197_v45 = vrot.slane %v8183_v36, %v9321_v15  ;;  %v8058_v20 = vadd.f32 %v11824_v10, %v7967_v41  ;;  %v8059_v8 = vadd.f32 %v11839_v21, %v7968_v30 }
 0x3d6   : > { %v7713_v55 = vadd.f32 %v7528_v19, %v11441_v7  ;;  %v7714_v60 = vadd.f32 %v7530_v37, %v11474_v17  ;;  %7843 = vrot.lane.b32.xlu0 %v11881_v52, %s9199_s25  ;;  %7849 = vrot.lane.b32.xlu1 %v11877_v35, %s9199_s25  ;;  %v11906_v7 = vcombine.high %v11858_v13, %v11858_v13  ;;  %v7428_v41 = vrot.slane %v7426_v22, 2 }
 0x3d7   : > { %v8198_v43 = vcombine.low %v8190_v3, %v8197_v45  ;;  %v7427_v17 = vsel %vm11453_vm8, %v7425_v48, %v7426_v22  ;;  %v8199_v29 = vcombine.low %v8058_v20, %v8059_v8  ;;  %v11920_v36 = vcombine.high %v11900_v25, %v11900_v25 }
 0x3d8   : > { %v7969_v14 = vadd.f32 %v11818_v49, %v7713_v55  ;;  %v7970_v2 = vadd.f32 %v11820_v42, %v7714_v60  ;;  %v7788_v28 = vpop.permute.xlu0 %7787  ;;  %v7790_v12 = vpop.permute.xlu1 %7789  ;;  %v7431_v30 = vrot.slane %v7429_v24, 2  ;;  %v7435_v19 = vrot.slane %v11906_v7, 7 }
 0x3d9   : > { %8470 = vst.msk [vmem:[%s11890_s14] sm:$0xff] %vm3253_vm1, %v8198_v43  ;;  %v8207_v37 = vrot.slane %v8199_v29, %v9321_v15  ;;  %v11932_v45 = vcombine.high %v11877_v35, %v11877_v35  ;;  %v7442_v8 = vrot.slane %v11900_v25, 7  ;;  %v7430_v55 = vsel %vm11453_vm8, %v7428_v41, %v7429_v24 }
 0x3da   : > { %v8060_v38 = vadd.f32 %v11827_v31, %v7969_v14  ;;  %v8061_v49 = vadd.f32 %v11843_v4, %v7970_v2  ;;  %7847 = vrot.lane.b32.xlu0 %v11906_v7, %s9199_s25  ;;  %7585 = vrot.lane.b32.xlu1 %v7427_v17, %s9200_s26  ;;  %v7433_v60 = vsel %vm11453_vm8, %v7431_v30, %v7432_v47  ;;  %v7434_v43 = vrot.slane %v7432_v47, 2 }
 0x3db   : > { %v7437_v14 = vrot.slane %v7435_v19, 2  ;;  %v7438_v2 = vrot.slane %v11877_v35, 7  ;;  %v7445_v24 = vrot.slane %v11920_v36, 7  ;;  %v7142_v35 = vcombine.high %v11564_v51, %v11564_v51 }
 0x3dc   : > { %v8200_v42 = vcombine.low %v8060_v38, %v8061_v49  ;;  %v7792_v58 = vpop.permute.xlu0 %7791  ;;  %v7794_v18 = vpop.permute.xlu1 %7793  ;;  %v8742_v38 = vrot.slane %v11932_v45, 9  ;;  %v7444_v49 = vrot.slane %v7442_v8, 2  ;;  %v7436_v30 = vsel %vm11453_vm8, %v7434_v43, %v7435_v19 }
 0x3dd   : > { %v7439_v47 = vsel %vm11453_vm8, %v7437_v14, %v7438_v2 }
 0x3de   : > { %v8214_v3 = vrot.slane %v8200_v42, %v9321_v15  ;;  %7851 = vrot.lane.b32.xlu0 %v11900_v25, %s9199_s25  ;;  %7853 = vrot.lane.b32.xlu1 %v11920_v36, %s9199_s25 }
 0x3e0   : > { %v8215_v22 = vcombine.low %v8207_v37, %v8214_v3  ;;  %v11934_v20 = vpop.permute.xlu0 %7795  ;;  %v11936_v48 = vpop.permute.xlu1 %7797  ;;  %v11962_v37 = vrot.slane %v11564_v51, %v9321_v15  ;;  %v11974_v51 = vrot.slane %v7142_v35, %v9321_v15 }
 0x3e2   : > { %8471 = vst.msk [vmem:[%s11890_s14 + $0x8] sm:$0xff] %vm3253_vm1, %v8215_v22  ;;  %7587 = vrot.lane.b32.xlu0 %v7430_v55, %s9200_s26  ;;  %7589 = vrot.lane.b32.xlu1 %v7433_v60, %s9200_s26  ;;  %v7446_v60 = vsel %vm11453_vm8, %v7444_v49, %v7445_v24  ;;  %v11978_v2 = vcombine.high %v11962_v37, %v11962_v37 }
 0x3e4   : > { %v7532_v17 = vpop.permute.xlu0 %7531  ;;  %v7534_v29 = vpop.permute.xlu1 %7533 }
 0x3e5   : > { %v7715_v42 = vadd.f32 %v7532_v17, %v11532_v5  ;;  %v7716_v41 = vadd.f32 %v7534_v29, %v11504_v32  ;;  %v7443_v32 = vsel %vm11453_vm8, %v8742_v38, %v7442_v8  ;;  %v11989_v29 = vrot.slane %v11573_v63, %v9321_v15 }
 0x3e6   : > { %7591 = vrot.lane.b32.xlu0 %v7436_v30, %s9200_s26  ;;  %7593 = vrot.lane.b32.xlu1 %v7439_v47, %s9200_s26 }
 0x3e7   : > { %v7971_v19 = vadd.f32 %v7788_v28, %v7715_v42  ;;  %v7972_v22 = vadd.f32 %v7790_v12, %v7716_v41  ;;  %v11993_v42 = vcombine.high %v11974_v51, %v11974_v51 }
 0x3e8   : > { %v7538_v5 = vpop.permute.xlu1 %7537  ;;  %v11964_v3 = vpop.permute.xlu0 %7799 }
 0x3e9   : > { %v7718_v55 = vadd.f32 %v7538_v5, %v11522_v0  ;;  %v8062_v28 = vadd.f32 %v11824_v10, %v7971_v19  ;;  %v8063_v0 = vadd.f32 %v11839_v21, %v7972_v22  ;;  %v7447_v19 = vrot.slane %v7445_v24, 2 }
 0x3ea   : > { %7595 = vrot.lane.b32.xlu0 %v7443_v32, %s9200_s26  ;;  %7597 = vrot.lane.b32.xlu1 %v7446_v60, %s9200_s26  ;;  %v7174_v32 = vcombine.high %v11989_v29, %v11989_v29 }
 0x3eb   : > { %v7974_v12 = vadd.f32 %v7794_v18, %v7718_v55  ;;  %v7448_v18 = vrot.slane %v11962_v37, 7  ;;  %v7451_v55 = vrot.slane %v11978_v2, 7 }
 0x3ec   : > { %v7542_v43 = vpop.permute.xlu1 %7541  ;;  %v7536_v14 = vpop.permute.xlu0 %7535 }
 0x3ed   : > { %v7717_v8 = vadd.f32 %v7536_v14, %v11526_v54  ;;  %v8216_v54 = vcombine.low %v8062_v28, %v8063_v0  ;;  %v8065_v41 = vadd.f32 %v11843_v4, %v7974_v12  ;;  %v7450_v22 = vrot.slane %v7448_v18, 2 }
 0x3ee   : > { %7855 = vrot.lane.b32.xlu0 %v11962_v37, %s9199_s25  ;;  %7857 = vrot.lane.b32.xlu1 %v11978_v2, %s9199_s25  ;;  %v7720_v0 = vadd.f32 %v7542_v43, %v11535_v9 }
 0x3ef   : > { %v7973_v17 = vadd.f32 %v7792_v58, %v7717_v8  ;;  %v7159_v58 = vcombine.high %v11573_v63, %v11573_v63  ;;  %v8224_v60 = vrot.slane %v8216_v54, %v9321_v15  ;;  %v7454_v63 = vrot.slane %v11974_v51, 7 }
 0x3f0   : > { %v7540_v38 = vpop.permute.xlu0 %7539  ;;  %v7802_v49 = vpop.permute.xlu1 %7801  ;;  %v7449_v54 = vsel %vm11453_vm8, %v7447_v19, %v7448_v18  ;;  %v7976_v18 = vadd.f32 %v11936_v48, %v7720_v0 }
 0x3f1   : > { %v8064_v30 = vadd.f32 %v11827_v31, %v7973_v17  ;;  %v7719_v28 = vadd.f32 %v7540_v38, %v11542_v33  ;;  %v12018_v12 = vrot.slane %v7159_v58, %v9321_v15  ;;  %v7452_v33 = vsel %vm11453_vm8, %v7450_v22, %v7451_v55 }
 0x3f2   : > { %7859 = vrot.lane.b32.xlu0 %v11974_v51, %s9199_s25  ;;  %7861 = vrot.lane.b32.xlu1 %v11993_v42, %s9199_s25  ;;  %v7460_v38 = vrot.slane %v11989_v29, 7  ;;  %v7456_v43 = vrot.slane %v7454_v63, 2  ;;  %v7463_v58 = vrot.slane %v7174_v32, 7  ;;  %v8067_v48 = vadd.f32 %v11839_v21, %v7976_v18 }
 0x3f3   : > { %v8217_v47 = vcombine.low %v8064_v30, %v8065_v41  ;;  %v7975_v41 = vadd.f32 %v11934_v20, %v7719_v28  ;;  %v7457_v30 = vrot.slane %v11993_v42, 7  ;;  %v12037_v22 = vcombine.high %v12018_v12, %v12018_v12 }
 0x3f4   : > { %v7544_v35 = vpop.permute.xlu0 %7543  ;;  %v12004_v5 = vpop.permute.xlu1 %7805  ;;  %v7453_v20 = vrot.slane %v7451_v55, 2 }
 0x3f5   : > { %v8231_v14 = vrot.slane %v8217_v47, %v9321_v15  ;;  %v7721_v9 = vadd.f32 %v7544_v35, %v11554_v26  ;;  %v8066_v26 = vadd.f32 %v11824_v10, %v7975_v41  ;;  %v7458_v28 = vsel %vm11453_vm8, %v7456_v43, %v7457_v30 }
 0x3f6   : > { %7863 = vrot.lane.b32.xlu0 %v11989_v29, %s9199_s25  ;;  %7865 = vrot.lane.b32.xlu1 %v7174_v32, %s9199_s25  ;;  %v7455_v41 = vsel %vm11453_vm8, %v7453_v20, %v7454_v63  ;;  %v12064_v43 = vrot.slane %v11588_v44, %v9321_v15  ;;  %v7467_v63 = vrot.slane %v12037_v22, 7 }
 0x3f7   : > { %v8232_v24 = vcombine.low %v8224_v60, %v8231_v14  ;;  %v7462_v60 = vrot.slane %v7460_v38, 2  ;;  %v7977_v35 = vadd.f32 %v11964_v3, %v7721_v9  ;;  %v7176_v9 = vcombine.high %v11588_v44, %v11588_v44 }
 0x3f8   : > { %v7804_v8 = vpop.permute.xlu0 %7803  ;;  %v12020_v17 = vpop.permute.xlu1 %7809  ;;  %v8743_v44 = vrot.slane %v12018_v12, 9 }
 0x3f9   : > { %8472 = vst.msk [vmem:[%s11890_s14 + $0x10] sm:$0xff] %vm3253_vm1, %v8232_v24  ;;  %v7464_v3 = vsel %vm11453_vm8, %v7462_v60, %v7463_v58  ;;  %v7459_v24 = vrot.slane %v7457_v30, 2 }
 0x3fa   : > { %7599 = vrot.lane.b32.xlu0 %v7449_v54, %s9200_s26  ;;  %7601 = vrot.lane.b32.xlu1 %v7452_v33, %s9200_s26  ;;  %v8068_v54 = vadd.f32 %v11827_v31, %v7977_v35 }
 0x3fb   : > { %v7461_v58 = vsel %vm11453_vm8, %v7459_v24, %v7460_v38 }
 0x3fc   : > { %v7808_v47 = vpop.permute.xlu0 %7807  ;;  %v7546_v19 = vpop.permute.xlu1 %7545 }
 0x3fd   : > { %v7722_v14 = vadd.f32 %v7546_v19, %v11579_v61  ;;  %v8233_v61 = vcombine.low %v8066_v26, %v8067_v48 }
 0x3fe   : > { %7605 = vrot.lane.b32.xlu1 %v7458_v28, %s9200_s26  ;;  %7867 = vrot.lane.b32.xlu0 %v12037_v22, %s9199_s25  ;;  %v12079_v28 = vrot.slane %v7176_v9, %v9321_v15 }
 0x3ff   : > { %v7978_v32 = vadd.f32 %v7802_v49, %v7722_v14  ;;  %v8241_v19 = vrot.slane %v8233_v61, %v9321_v15 }
 0x400   : > { %v12048_v0 = vpop.permute.xlu0 %7811  ;;  %v12050_v55 = vpop.permute.xlu1 %7813 }
 0x401   : > { %v8069_v33 = vadd.f32 %v11843_v4, %v7978_v32 }
 0x402   : > { %7609 = vrot.lane.b32.xlu1 %v7464_v3, %s9200_s26  ;;  %7603 = vrot.lane.b32.xlu0 %v7455_v41, %s9200_s26 }
 0x403   : > { %v8234_v49 = vcombine.low %v8068_v54, %v8069_v33  ;;  %v12095_v54 = vrot.slane %v11595_v34, %v9321_v15 }
 0x404   : > { %v7548_v30 = vpop.permute.xlu0 %7547  ;;  %v7550_v18 = vpop.permute.xlu1 %7549 }
 0x405   : > { %v8248_v60 = vrot.slane %v8234_v49, %v9321_v15  ;;  %v7723_v20 = vadd.f32 %v7548_v30, %v11611_v23  ;;  %v7724_v26 = vadd.f32 %v7550_v18, %v11631_v53  ;;  %v7468_v23 = vsel %vm11453_vm8, %v8743_v44, %v7467_v63 }
 0x406   : > { %7607 = vrot.lane.b32.xlu0 %v7461_v58, %s9200_s26  ;;  %7869 = vrot.lane.b32.xlu1 %v12064_v43, %s9199_s25  ;;  %v12099_v49 = vcombine.high %v12064_v43, %v12064_v43  ;;  %v7193_v18 = vcombine.high %v11595_v34, %v11595_v34 }
 0x407   : > { %v8249_v35 = vcombine.low %v8241_v19, %v8248_v60  ;;  %v7979_v38 = vadd.f32 %v7804_v8, %v7723_v20  ;;  %v7980_v14 = vadd.f32 %v12004_v5, %v7724_v26  ;;  %v12112_v19 = vcombine.high %v12079_v28, %v12079_v28 }
 0x408   : > { %v7552_v48 = vpop.permute.xlu0 %7551  ;;  %v7554_v32 = vpop.permute.xlu1 %7553  ;;  %v7473_v44 = vrot.slane %v12099_v49, 7 }
 0x409   : > { %8473 = vst.msk [vmem:[%s11890_s14 + $0x18] sm:$0xff] %vm3253_vm1, %v8249_v35  ;;  %v8070_v53 = vadd.f32 %v11824_v10, %v7979_v38  ;;  %v8071_v3 = vadd.f32 %v11839_v21, %v7980_v14  ;;  %v7725_v24 = vadd.f32 %v7552_v48, %v11617_v56  ;;  %v7726_v8 = vadd.f32 %v7554_v32, %v11639_v50 }
 0x40a   : > { %7611 = vrot.lane.b32.xlu0 %v7468_v23, %s9200_s26  ;;  %7873 = vrot.lane.b32.xlu1 %v12079_v28, %s9199_s25  ;;  %v7469_v56 = vrot.slane %v7467_v63, 2  ;;  %v12123_v35 = vrot.slane %v7193_v18, %v9321_v15  ;;  %v12128_v32 = vcombine.high %v12095_v54, %v12095_v54 }
 0x40b   : > { %v7981_v5 = vadd.f32 %v7808_v47, %v7725_v24  ;;  %v7982_v61 = vadd.f32 %v12020_v17, %v7726_v8  ;;  %v8250_v50 = vcombine.low %v8070_v53, %v8071_v3  ;;  %v7470_v47 = vrot.slane %v12064_v43, 7 }
 0x40c   : > { %v7556_v33 = vpop.permute.xlu0 %7555  ;;  %v7818_v41 = vpop.permute.xlu1 %7817  ;;  %v7475_v53 = vrot.slane %v7473_v44, 2  ;;  %v7476_v24 = vrot.slane %v12079_v28, 7 }
 0x40d   : > { %v8072_v9 = vadd.f32 %v11827_v31, %v7981_v5  ;;  %v8073_v30 = vadd.f32 %v11843_v4, %v7982_v61  ;;  %v8258_v60 = vrot.slane %v8250_v50, %v9321_v15  ;;  %v7471_v26 = vsel %vm11453_vm8, %v7469_v56, %v7470_v47 }
 0x40e   : > { %7871 = vrot.lane.b32.xlu0 %v12099_v49, %s9199_s25  ;;  %7877 = vrot.lane.b32.xlu1 %v12095_v54, %s9199_s25  ;;  %v7472_v23 = vrot.slane %v7470_v47, 2  ;;  %v7727_v3 = vadd.f32 %v7556_v33, %v11627_v1  ;;  %v7479_v56 = vrot.slane %v12112_v19, 7  ;;  %v7477_v33 = vsel %vm11453_vm8, %v7475_v53, %v7476_v24 }
 0x40f   : > { %v8251_v17 = vcombine.low %v8072_v9, %v8073_v30  ;;  %v7482_v9 = vrot.slane %v12095_v54, 7  ;;  %v7478_v18 = vrot.slane %v7476_v24, 2 }
 0x410   : > { %v7816_v58 = vpop.permute.xlu0 %7815  ;;  %v7558_v63 = vpop.permute.xlu1 %7557  ;;  %v7474_v1 = vsel %vm11453_vm8, %v7472_v23, %v7473_v44  ;;  %v7983_v50 = vadd.f32 %v12048_v0, %v7727_v3  ;;  %v7210_v44 = vcombine.high %v11608_v57, %v11608_v57 }
 0x411   : > { %v8265_v20 = vrot.slane %v8251_v17, %v9321_v15  ;;  %v7728_v38 = vadd.f32 %v7558_v63, %v11653_v6  ;;  %v12139_v6 = vrot.slane %v11608_v57, %v9321_v15  ;;  %v7481_v63 = vrot.slane %v7479_v56, 2 }
 0x412   : > { %7875 = vrot.lane.b32.xlu0 %v12112_v19, %s9199_s25  ;;  %7613 = vrot.lane.b32.xlu1 %v7471_v26, %s9200_s26  ;;  %v8074_v26 = vadd.f32 %v11824_v10, %v7983_v50  ;;  %v7484_v23 = vrot.slane %v7482_v9, 2 }
 0x413   : > { %v8266_v34 = vcombine.low %v8258_v60, %v8265_v20  ;;  %v7984_v8 = vadd.f32 %v12050_v55, %v7728_v38  ;;  %v12155_v55 = vcombine.high %v12139_v6, %v12139_v6  ;;  %v7485_v60 = vrot.slane %v12128_v32, 7 }
 0x414   : > { %v7820_v14 = vpop.permute.xlu0 %7819  ;;  %v7822_v48 = vpop.permute.xlu1 %7821 }
 0x415   : > { %8474 = vst.msk [vmem:[%s11890_s14 + $0x20] sm:$0xff] %vm3253_vm1, %v8266_v34  ;;  %v8075_v30 = vadd.f32 %v11839_v21, %v7984_v8  ;;  %v7487_v8 = vrot.slane %v7485_v60, 2 }
 0x416   : > { %7879 = vrot.lane.b32.xlu0 %v12128_v32, %s9199_s25  ;;  %7881 = vrot.lane.b32.xlu1 %v12123_v35, %s9199_s25 }
 0x417   : > { %v8267_v53 = vcombine.low %v8074_v26, %v8075_v30 }
 0x418   : > { %v12143_v5 = vpop.permute.xlu0 %7823  ;;  %v7826_v61 = vpop.permute.xlu1 %7825 }
 0x41a   : > { %7615 = vrot.lane.b32.xlu0 %v7474_v1, %s9200_s26  ;;  %7617 = vrot.lane.b32.xlu1 %v7477_v33, %s9200_s26 }
 0x41c   : > { %v7560_v47 = vpop.permute.xlu0 %7559  ;;  %v7562_v17 = vpop.permute.xlu1 %7561 }
 0x41d   : > { %v7729_v0 = vadd.f32 %v7560_v47, %v11649_v46  ;;  %v7730_v20 = vadd.f32 %v7562_v17, %v11692_v16  ;;  %v7480_v46 = vsel %vm11453_vm8, %v7478_v18, %v7479_v56  ;;  %v7483_v16 = vsel %vm11453_vm8, %v7481_v63, %v7482_v9 }
 0x41e   : > { %7883 = vrot.lane.b32.xlu0 %v12139_v6, %s9199_s25  ;;  %7885 = vrot.lane.b32.xlu1 %v12155_v55, %s9199_s25  ;;  %v12181_v56 = vrot.slane %v7210_v44, %v9321_v15  ;;  %v8275_v9 = vrot.slane %v8267_v53, %v9321_v15  ;;  %v12196_v44 = vcombine.high %v12123_v35, %v12123_v35 }
 0x41f   : > { %v7985_v34 = vadd.f32 %v7816_v58, %v7729_v0  ;;  %v7986_v38 = vadd.f32 %v7818_v41, %v7730_v20  ;;  %v7488_v41 = vrot.slane %v12123_v35, 7  ;;  %v12533_v0 = vld [vmem:[#allocation4_spill] sm:$0xff] }
 0x420   : > { %v7564_v3 = vpop.permute.xlu0 %7563  ;;  %v7566_v24 = vpop.permute.xlu1 %7565 }
 0x421   : > { %v8076_v1 = vadd.f32 %v11827_v31, %v7985_v34  ;;  %v8077_v33 = vadd.f32 %v11843_v4, %v7986_v38  ;;  %v7731_v50 = vadd.f32 %v7564_v3, %v11715_v11  ;;  %v7732_v57 = vadd.f32 %v7566_v24, %v11688_v62  ;;  %v12535_v24 = vld [vmem:[#allocation5_spill] sm:$0xff] }
 0x422   : > { %7619 = vrot.lane.b32.xlu0 %v7480_v46, %s9200_s26  ;;  %7621 = vrot.lane.b32.xlu1 %v7483_v16, %s9200_s26  ;;  %v7486_v11 = vsel %vm11453_vm8, %v7484_v23, %v7485_v60  ;;  %v7489_v62 = vsel %vm11453_vm8, %v7487_v8, %v7488_v41  ;;  %v12534_v60 = vld [vmem:[#allocation3_spill] sm:$0xff]  ;;  %v7498_v41 = vrot.slane %v12181_v56, 7 }
 0x423   : > { %v8268_v58 = vcombine.low %v8076_v1, %v8077_v33  ;;  %v7987_v18 = vadd.f32 %v7820_v14, %v7731_v50  ;;  %v7988_v63 = vadd.f32 %v7822_v48, %v7732_v57  ;;  %v12200_v34 = vrot.slane %v12534_v60, %v9321_v15 }
 0x424   : > { %v7570_v30 = vpop.permute.xlu1 %7569  ;;  %v12184_v47 = vpop.permute.xlu0 %7827  ;;  %v12204_v14 = vcombine.high %v12181_v56, %v12181_v56  ;;  %v7492_v48 = vrot.slane %v12139_v6, 7  ;;  %v7227_v16 = vcombine.high %v12534_v60, %v12534_v60  ;;  %v7495_v57 = vrot.slane %v12155_v55, 7 }
 0x425   : > { %v8282_v17 = vrot.slane %v8268_v58, %v9321_v15  ;;  %v7734_v20 = vadd.f32 %v7570_v30, %v12533_v0  ;;  %v8078_v53 = vadd.f32 %v11824_v10, %v7987_v18  ;;  %v8079_v3 = vadd.f32 %v11839_v21, %v7988_v63 }
 0x426   : > { %7623 = vrot.lane.b32.xlu0 %v7486_v11, %s9200_s26  ;;  %7625 = vrot.lane.b32.xlu1 %v7489_v62, %s9200_s26  ;;  %v12223_v50 = vcombine.high %v12200_v34, %v12200_v34  ;;  %v7494_v11 = vrot.slane %v7492_v48, 2  ;;  %v7497_v0 = vrot.slane %v7495_v57, 2 }
 0x427   : > { %v8283_v26 = vcombine.low %v8275_v9, %v8282_v17  ;;  %v7990_v35 = vadd.f32 %v7826_v61, %v7734_v20  ;;  %v8744_v61 = vrot.slane %v12196_v44, 9  ;;  %v8284_v58 = vcombine.low %v8078_v53, %v8079_v3 }
 0x428   : > { %v7568_v38 = vpop.permute.xlu0 %7567  ;;  %v7830_v23 = vpop.permute.xlu1 %7829  ;;  %v7501_v20 = vrot.slane %v12204_v14, 7  ;;  %v7496_v53 = vsel %vm11453_vm8, %v7494_v11, %v7495_v57  ;;  %v7500_v3 = vrot.slane %v7498_v41, 2  ;;  %v7499_v57 = vsel %vm11453_vm8, %v7497_v0, %v7498_v41 }
 0x429   : > { %8475 = vst.msk [vmem:[%s11890_s14 + $0x28] sm:$0xff] %vm3253_vm1, %v8283_v26  ;;  %v7733_v46 = vadd.f32 %v7568_v38, %v12535_v24  ;;  %v8081_v9 = vadd.f32 %v11843_v4, %v7990_v35  ;;  %v7493_v63 = vsel %vm11453_vm8, %v8744_v61, %v7492_v48  ;;  %v7504_v26 = vrot.slane %v12200_v34, 7 }
 0x42a   : > { %7887 = vrot.lane.b32.xlu0 %v12181_v56, %s9199_s25  ;;  %7889 = vrot.lane.b32.xlu1 %v12204_v14, %s9199_s25  ;;  %v8292_v60 = vrot.slane %v8284_v58, %v9321_v15  ;;  %v12536_v58 = vld [vmem:[#allocation6_spill] sm:$0xff] }
 0x42b   : > { %v7989_v8 = vadd.f32 %v12143_v5, %v7733_v46  ;;  %v12235_v5 = vrot.slane %v7227_v16, %v9321_v15  ;;  %v7503_v46 = vrot.slane %v7501_v20, 2  ;;  %v7506_v16 = vrot.slane %v7504_v26, 2 }
 0x42c   : > { %v12219_v1 = vpop.permute.xlu0 %7831  ;;  %v7834_v33 = vpop.permute.xlu1 %7833 }
 0x42d   : > { %v8080_v30 = vadd.f32 %v11827_v31, %v7989_v8  ;;  %v7507_v8 = vrot.slane %v12223_v50, 7  ;;  %v7510_v61 = vrot.slane %v12235_v5, 7  ;;  %v7243_v11 = vcombine.high %v12235_v5, %v12235_v5 }
 0x42e   : > { %7891 = vrot.lane.b32.xlu0 %v12200_v34, %s9199_s25  ;;  %7893 = vrot.lane.b32.xlu1 %v12223_v50, %s9199_s25 }
 0x42f   : > { %v8285_v62 = vcombine.low %v8080_v30, %v8081_v9  ;;  %v7502_v30 = vsel %vm11453_vm8, %v7500_v3, %v7501_v20  ;;  %v7508_v41 = vsel %vm11453_vm8, %v7506_v16, %v7507_v8  ;;  %v7509_v0 = vrot.slane %v7507_v8, 2  ;;  %v12538_v20 = vld [vmem:[#allocation13_spill] sm:$0xff]  ;;  %v12539_v8 = vld [vmem:[#allocation12_spill] sm:$0xff] }
 0x430   : > { %v7572_v17 = vpop.permute.xlu0 %7571  ;;  %v12237_v18 = vpop.permute.xlu1 %7837 }
 0x431   : > { %v8299_v38 = vrot.slane %v8285_v62, %v9321_v15  ;;  %v12537_v62 = vld [vmem:[#allocation2_spill] sm:$0xff] }
 0x432   : > { %7627 = vrot.lane.b32.xlu0 %v7493_v63, %s9200_s26  ;;  %7629 = vrot.lane.b32.xlu1 %v7496_v53, %s9200_s26  ;;  %v7735_v63 = vadd.f32 %v7572_v17, %v12537_v62  ;;  %v7505_v53 = vsel %vm11453_vm8, %v7503_v46, %v7504_v26  ;;  %v7511_v26 = vsel %vm11453_vm8, %v7509_v0, %v7510_v61 }
 0x433   : > { %v8300_v35 = vcombine.low %v8292_v60, %v8299_v38 }
 0x434   : > { %v7836_v48 = vpop.permute.xlu0 %7835  ;;  %v7574_v24 = vpop.permute.xlu1 %7573  ;;  %v7991_v17 = vadd.f32 %v12184_v47, %v7735_v63 }
 0x435   : > { %8476 = vst.msk [vmem:[%s11890_s14 + $0x30] sm:$0xff] %vm3253_vm1, %v8300_v35  ;;  %v7736_v9 = vadd.f32 %v7574_v24, %v12536_v58  ;;  %v7512_v24 = vrot.slane %v7510_v61, 2  ;;  %v7513_v58 = vrot.slane %v7243_v11, 7 }
 0x436   : > { %7631 = vrot.lane.b32.xlu0 %v7499_v57, %s9200_s26  ;;  %7633 = vrot.lane.b32.xlu1 %v7502_v30, %s9200_s26  ;;  %v8082_v62 = vadd.f32 %v11824_v10, %v7991_v17 }
 0x437   : > { %v7992_v35 = vadd.f32 %v7830_v23, %v7736_v9  ;;  %v7514_v9 = vsel %vm11453_vm8, %v7512_v24, %v7513_v58 }
 0x438   : > { %v7578_v60 = vpop.permute.xlu1 %7577  ;;  %v7840_v38 = vpop.permute.xlu0 %7839 }
 0x439   : > { %v7738_v3 = vadd.f32 %v7578_v60, %v12538_v20  ;;  %v8083_v46 = vadd.f32 %v11839_v21, %v7992_v35 }
 0x43a   : > { %7635 = vrot.lane.b32.xlu0 %v7505_v53, %s9200_s26  ;;  %7637 = vrot.lane.b32.xlu1 %v7508_v41, %s9200_s26 }
 0x43b   : > { %v7994_v16 = vadd.f32 %v7834_v33, %v7738_v3  ;;  %v8301_v61 = vcombine.low %v8082_v62, %v8083_v46  ;;  %v12540_v3 = vld [vmem:[#allocation9_spill] sm:$0xff] }
 0x43c   : > { %v7576_v57 = vpop.permute.xlu0 %7575  ;;  %v7842_v30 = vpop.permute.xlu1 %7841 }
 0x43d   : > { %v7737_v23 = vadd.f32 %v7576_v57, %v12539_v8  ;;  %v8085_v53 = vadd.f32 %v11843_v4, %v7994_v16  ;;  %v8309_v35 = vrot.slane %v8301_v61, %v9321_v15 }
 0x43e   : > { %7639 = vrot.lane.b32.xlu0 %v7511_v26, %s9200_s26  ;;  %7641 = vrot.lane.b32.xlu1 %v7514_v9, %s9200_s26 }
 0x43f   : > { %v7993_v47 = vadd.f32 %v12219_v1, %v7737_v23 }
 0x440   : > { %v7580_v63 = vpop.permute.xlu0 %7579  ;;  %v7582_v60 = vpop.permute.xlu1 %7581 }
 0x441   : > { %v8084_v33 = vadd.f32 %v11827_v31, %v7993_v47  ;;  %v7739_v20 = vadd.f32 %v7580_v63, %v11773_v27  ;;  %v7740_v24 = vadd.f32 %v7582_v60, %v12540_v3 }
 0x442   : > { %7895 = vrot.lane.b32.xlu0 %v12235_v5, %s9199_s25  ;;  %7897 = vrot.lane.b32.xlu1 %v7243_v11, %s9199_s25  ;;  %v12541_v11 = vld [vmem:[#allocation14_spill] sm:$0xff] }
 0x443   : > { %v8302_v39 = vcombine.low %v8084_v33, %v8085_v53  ;;  %v7995_v26 = vadd.f32 %v7836_v48, %v7739_v20  ;;  %v7996_v46 = vadd.f32 %v12237_v18, %v7740_v24 }
 0x444   : > { %v7584_v41 = vpop.permute.xlu0 %7583  ;;  %v7846_v0 = vpop.permute.xlu1 %7845 }
 0x445   : > { %v8316_v1 = vrot.slane %v8302_v39, %v9321_v15  ;;  %v7741_v16 = vadd.f32 %v7584_v41, %v12541_v11  ;;  %v8086_v9 = vadd.f32 %v11824_v10, %v7995_v26  ;;  %v8087_v62 = vadd.f32 %v11839_v21, %v7996_v46 }
 0x447   : > { %v8317_v58 = vcombine.low %v8309_v35, %v8316_v1  ;;  %v7997_v47 = vadd.f32 %v7840_v38, %v7741_v16  ;;  %v8318_v53 = vcombine.low %v8086_v9, %v8087_v62 }
 0x448   : > { %v7844_v17 = vpop.permute.xlu0 %7843  ;;  %v7850_v57 = vpop.permute.xlu1 %7849 }
 0x449   : > { %8477 = vst.msk [vmem:[%s11890_s14 + $0x38] sm:$0xff] %vm3253_vm1, %v8317_v58  ;;  %v8088_v48 = vadd.f32 %v11827_v31, %v7997_v47  ;;  %v8326_v35 = vrot.slane %v8318_v53, %v9321_v15 }
 0x44c   : > { %v7848_v8 = vpop.permute.xlu0 %7847  ;;  %v7586_v23 = vpop.permute.xlu1 %7585 }
 0x44d   : > { %v7742_v27 = vadd.f32 %v7586_v23, %v11803_v40 }
 0x44f   : > { %v7998_v63 = vadd.f32 %v7842_v30, %v7742_v27 }
 0x450   : > { %v7852_v60 = vpop.permute.xlu0 %7851  ;;  %v7854_v61 = vpop.permute.xlu1 %7853 }
 0x451   : > { %v8089_v18 = vadd.f32 %v11843_v4, %v7998_v63 }
 0x453   : > { %v8319_v33 = vcombine.low %v8088_v48, %v8089_v18 }
 0x454   : > { %v7588_v39 = vpop.permute.xlu0 %7587  ;;  %v7590_v41 = vpop.permute.xlu1 %7589 }
 0x455   : > { %v8333_v1 = vrot.slane %v8319_v33, %v9321_v15  ;;  %v7743_v38 = vadd.f32 %v7588_v39, %v11814_v59  ;;  %v7744_v40 = vadd.f32 %v7590_v41, %v11881_v52 }
 0x457   : > { %v8334_v30 = vcombine.low %v8326_v35, %v8333_v1  ;;  %v7999_v20 = vadd.f32 %v7844_v17, %v7743_v38  ;;  %v8000_v3 = vadd.f32 %v7846_v0, %v7744_v40 }
 0x458   : > { %v7592_v24 = vpop.permute.xlu0 %7591  ;;  %v7594_v58 = vpop.permute.xlu1 %7593 }
 0x459   : > { %8478 = vst.msk [vmem:[%s11890_s14 + $0x40] sm:$0xff] %vm3253_vm1, %v8334_v30  ;;  %v8090_v26 = vadd.f32 %v11824_v10, %v7999_v20  ;;  %v8091_v46 = vadd.f32 %v11839_v21, %v8000_v3  ;;  %v7745_v11 = vadd.f32 %v7592_v24, %v11858_v13  ;;  %v7746_v16 = vadd.f32 %v7594_v58, %v11906_v7 }
 0x45b   : > { %v8001_v23 = vadd.f32 %v7848_v8, %v7745_v11  ;;  %v8002_v59 = vadd.f32 %v7850_v57, %v7746_v16  ;;  %v8335_v62 = vcombine.low %v8090_v26, %v8091_v46 }
 0x45c   : > { %v7596_v9 = vpop.permute.xlu0 %7595  ;;  %v7598_v52 = vpop.permute.xlu1 %7597 }
 0x45d   : > { %v8092_v0 = vadd.f32 %v11827_v31, %v8001_v23  ;;  %v8093_v17 = vadd.f32 %v11843_v4, %v8002_v59  ;;  %v8343_v53 = vrot.slane %v8335_v62, %v9321_v15  ;;  %v7747_v57 = vadd.f32 %v7596_v9, %v11932_v45 }
 0x45e   : > { %v7748_v8 = vadd.f32 %v7598_v52, %v11900_v25 }
 0x45f   : > { %v8336_v47 = vcombine.low %v8092_v0, %v8093_v17  ;;  %v8003_v41 = vadd.f32 %v7852_v60, %v7747_v57 }
 0x460   : > { %v7856_v27 = vpop.permute.xlu0 %7855  ;;  %v7858_v63 = vpop.permute.xlu1 %7857  ;;  %v8004_v35 = vadd.f32 %v7854_v61, %v7748_v8 }
 0x461   : > { %v8350_v48 = vrot.slane %v8336_v47, %v9321_v15  ;;  %v8094_v40 = vadd.f32 %v11824_v10, %v8003_v41 }
 0x462   : > { %v8095_v30 = vadd.f32 %v11839_v21, %v8004_v35 }
 0x463   : > { %v8351_v13 = vcombine.low %v8343_v53, %v8350_v48 }
 0x464   : > { %v7860_v18 = vpop.permute.xlu0 %7859  ;;  %v7862_v7 = vpop.permute.xlu1 %7861  ;;  %v8352_v46 = vcombine.low %v8094_v40, %v8095_v30 }
 0x465   : > { %8479 = vst.msk [vmem:[%s11890_s14 + $0x48] sm:$0xff] %vm3253_vm1, %v8351_v13 }
 0x466   : > { %v8360_v59 = vrot.slane %v8352_v46, %v9321_v15 }
 0x468   : > { %v7864_v33 = vpop.permute.xlu0 %7863  ;;  %v7866_v39 = vpop.permute.xlu1 %7865 }
 0x46c   : > { %v7600_v1 = vpop.permute.xlu0 %7599  ;;  %v7602_v38 = vpop.permute.xlu1 %7601 }
 0x46d   : > { %v7749_v20 = vadd.f32 %v7600_v1, %v11920_v36  ;;  %v7750_v3 = vadd.f32 %v7602_v38, %v11962_v37 }
 0x46f   : > { %v8005_v24 = vadd.f32 %v7856_v27, %v7749_v20  ;;  %v8006_v58 = vadd.f32 %v7858_v63, %v7750_v3 }
 0x470   : > { %v7606_v26 = vpop.permute.xlu1 %7605  ;;  %v7868_v45 = vpop.permute.xlu0 %7867 }
 0x471   : > { %v8096_v25 = vadd.f32 %v11827_v31, %v8005_v24  ;;  %v8097_v60 = vadd.f32 %v11843_v4, %v8006_v58  ;;  %v7752_v11 = vadd.f32 %v7606_v26, %v11974_v51 }
 0x473   : > { %v8353_v61 = vcombine.low %v8096_v25, %v8097_v60  ;;  %v8008_v62 = vadd.f32 %v7862_v7, %v7752_v11 }
 0x474   : > { %v7610_v16 = vpop.permute.xlu1 %7609  ;;  %v7604_v23 = vpop.permute.xlu0 %7603 }
 0x475   : > { %v8367_v36 = vrot.slane %v8353_v61, %v9321_v15  ;;  %v7754_v37 = vadd.f32 %v7610_v16, %v11989_v29  ;;  %v7751_v9 = vadd.f32 %v7604_v23, %v11978_v2  ;;  %v8099_v53 = vadd.f32 %v11839_v21, %v8008_v62 }
 0x477   : > { %v8368_v52 = vcombine.low %v8360_v59, %v8367_v36  ;;  %v8007_v0 = vadd.f32 %v7860_v18, %v7751_v9  ;;  %v8010_v27 = vadd.f32 %v7866_v39, %v7754_v37 }
 0x478   : > { %v7608_v17 = vpop.permute.xlu0 %7607  ;;  %v7870_v47 = vpop.permute.xlu1 %7869 }
 0x479   : > { %8480 = vst.msk [vmem:[%s11890_s14 + $0x50] sm:$0xff] %vm3253_vm1, %v8368_v52  ;;  %v8098_v51 = vadd.f32 %v11824_v10, %v8007_v0  ;;  %v7753_v63 = vadd.f32 %v7608_v17, %v11993_v42  ;;  %v8101_v2 = vadd.f32 %v11843_v4, %v8010_v27 }
 0x47b   : > { %v8009_v48 = vadd.f32 %v7864_v33, %v7753_v63  ;;  %v8369_v57 = vcombine.low %v8098_v51, %v8099_v53 }
 0x47c   : > { %v7612_v13 = vpop.permute.xlu0 %7611  ;;  %v7874_v29 = vpop.permute.xlu1 %7873 }
 0x47d   : > { %v8100_v18 = vadd.f32 %v11827_v31, %v8009_v48  ;;  %v8377_v39 = vrot.slane %v8369_v57, %v9321_v15  ;;  %v7755_v40 = vadd.f32 %v7612_v13, %v12018_v12 }
 0x47f   : > { %v8370_v7 = vcombine.low %v8100_v18, %v8101_v2  ;;  %v8011_v24 = vadd.f32 %v7868_v45, %v7755_v40 }
 0x480   : > { %v7872_v8 = vpop.permute.xlu0 %7871  ;;  %v7878_v41 = vpop.permute.xlu1 %7877 }
 0x481   : > { %v8384_v35 = vrot.slane %v8370_v7, %v9321_v15  ;;  %v8102_v61 = vadd.f32 %v11824_v10, %v8011_v24 }
 0x483   : > { %v8385_v1 = vcombine.low %v8377_v39, %v8384_v35 }
 0x484   : > { %v7876_v42 = vpop.permute.xlu0 %7875  ;;  %v7614_v38 = vpop.permute.xlu1 %7613 }
 0x485   : > { %8481 = vst.msk [vmem:[%s11890_s14 + $0x58] sm:$0xff] %vm3253_vm1, %v8385_v1  ;;  %v7756_v33 = vadd.f32 %v7614_v38, %v12037_v22 }
 0x487   : > { %v8012_v3 = vadd.f32 %v7870_v47, %v7756_v33 }
 0x488   : > { %v7880_v30 = vpop.permute.xlu0 %7879  ;;  %v7882_v20 = vpop.permute.xlu1 %7881 }
 0x489   : > { %v8103_v46 = vadd.f32 %v11839_v21, %v8012_v3 }
 0x48b   : > { %v8386_v12 = vcombine.low %v8102_v61, %v8103_v46 }
 0x48c   : > { %v7616_v58 = vpop.permute.xlu0 %7615  ;;  %v7618_v26 = vpop.permute.xlu1 %7617 }
 0x48d   : > { %v7757_v25 = vadd.f32 %v7616_v58, %v12064_v43  ;;  %v7758_v60 = vadd.f32 %v7618_v26, %v12099_v49  ;;  %v8394_v52 = vrot.slane %v8386_v12, %v9321_v15 }
 0x48f   : > { %v8013_v11 = vadd.f32 %v7872_v8, %v7757_v25  ;;  %v8014_v16 = vadd.f32 %v7874_v29, %v7758_v60 }
 0x490   : > { %v7884_v23 = vpop.permute.xlu0 %7883  ;;  %v7886_v22 = vpop.permute.xlu1 %7885 }
 0x491   : > { %v8104_v59 = vadd.f32 %v11827_v31, %v8013_v11  ;;  %v8105_v45 = vadd.f32 %v11843_v4, %v8014_v16 }
 0x493   : > { %v8387_v36 = vcombine.low %v8104_v59, %v8105_v45 }
 0x494   : > { %v7620_v37 = vpop.permute.xlu0 %7619  ;;  %v7622_v9 = vpop.permute.xlu1 %7621 }
 0x495   : > { %v8401_v43 = vrot.slane %v8387_v36, %v9321_v15  ;;  %v7759_v49 = vadd.f32 %v7620_v37, %v12079_v28  ;;  %v7760_v62 = vadd.f32 %v7622_v9, %v12112_v19 }
 0x497   : > { %v8402_v0 = vcombine.low %v8394_v52, %v8401_v43  ;;  %v8015_v17 = vadd.f32 %v7876_v42, %v7759_v49  ;;  %v8016_v47 = vadd.f32 %v7878_v41, %v7760_v62 }
 0x498   : > { %v7624_v27 = vpop.permute.xlu0 %7623  ;;  %v7626_v51 = vpop.permute.xlu1 %7625 }
 0x499   : > { %8482 = vst.msk [vmem:[%s11890_s14 + $0x60] sm:$0xff] %vm3253_vm1, %v8402_v0  ;;  %v8106_v63 = vadd.f32 %v11824_v10, %v8015_v17  ;;  %v8107_v53 = vadd.f32 %v11839_v21, %v8016_v47  ;;  %v7761_v48 = vadd.f32 %v7624_v27, %v12095_v54  ;;  %v7762_v13 = vadd.f32 %v7626_v51, %v12128_v32 }
 0x49b   : > { %v8017_v29 = vadd.f32 %v7880_v30, %v7761_v48  ;;  %v8018_v28 = vadd.f32 %v7882_v20, %v7762_v13  ;;  %v8403_v57 = vcombine.low %v8106_v63, %v8107_v53 }
 0x49c   : > { %v7888_v2 = vpop.permute.xlu0 %7887  ;;  %v7890_v19 = vpop.permute.xlu1 %7889 }
 0x49d   : > { %v8108_v18 = vadd.f32 %v11827_v31, %v8017_v29  ;;  %v8109_v7 = vadd.f32 %v11843_v4, %v8018_v28  ;;  %v8411_v35 = vrot.slane %v8403_v57, %v9321_v15 }
 0x49f   : > { %v8404_v8 = vcombine.low %v8108_v18, %v8109_v7 }
 0x4a0   : > { %v7892_v41 = vpop.permute.xlu0 %7891  ;;  %v7894_v39 = vpop.permute.xlu1 %7893 }
 0x4a1   : > { %v8418_v1 = vrot.slane %v8404_v8, %v9321_v15 }
 0x4a3   : > { %v8419_v54 = vcombine.low %v8411_v35, %v8418_v1 }
 0x4a4   : > { %v7628_v42 = vpop.permute.xlu0 %7627  ;;  %v7630_v32 = vpop.permute.xlu1 %7629 }
 0x4a5   : > { %8483 = vst.msk [vmem:[%s11890_s14 + $0x68] sm:$0xff] %vm3253_vm1, %v8419_v54  ;;  %v7763_v38 = vadd.f32 %v7628_v42, %v12196_v44  ;;  %v7764_v33 = vadd.f32 %v7630_v32, %v12139_v6 }
 0x4a7   : > { %v8019_v40 = vadd.f32 %v7884_v23, %v7763_v38  ;;  %v8020_v30 = vadd.f32 %v7886_v22, %v7764_v33 }
 0x4a8   : > { %v7632_v20 = vpop.permute.xlu0 %7631  ;;  %v7634_v3 = vpop.permute.xlu1 %7633 }
 0x4a9   : > { %v8110_v24 = vadd.f32 %v11824_v10, %v8019_v40  ;;  %v8111_v58 = vadd.f32 %v11839_v21, %v8020_v30  ;;  %v7765_v26 = vadd.f32 %v7632_v20, %v12155_v55  ;;  %v7766_v46 = vadd.f32 %v7634_v3, %v12181_v56 }
 0x4ab   : > { %v8021_v25 = vadd.f32 %v7888_v2, %v7765_v26  ;;  %v8022_v60 = vadd.f32 %v7890_v19, %v7766_v46  ;;  %v8420_v16 = vcombine.low %v8110_v24, %v8111_v58 }
 0x4ac   : > { %v7636_v61 = vpop.permute.xlu0 %7635  ;;  %v7638_v11 = vpop.permute.xlu1 %7637 }
 0x4ad   : > { %v8112_v44 = vadd.f32 %v11827_v31, %v8021_v25  ;;  %v8113_v6 = vadd.f32 %v11843_v4, %v8022_v60  ;;  %v7767_v23 = vadd.f32 %v7636_v61, %v12204_v14  ;;  %v7768_v22 = vadd.f32 %v7638_v11, %v12200_v34 }
 0x4ae   : > { %v8428_v56 = vrot.slane %v8420_v16, %v9321_v15 }
 0x4af   : > { %v8421_v12 = vcombine.low %v8112_v44, %v8113_v6  ;;  %v8023_v59 = vadd.f32 %v7892_v41, %v7767_v23  ;;  %v8024_v45 = vadd.f32 %v7894_v39, %v7768_v22 }
 0x4b0   : > { %v7640_v55 = vpop.permute.xlu0 %7639  ;;  %v7642_v36 = vpop.permute.xlu1 %7641 }
 0x4b1   : > { %v8435_v37 = vrot.slane %v8421_v12, %v9321_v15  ;;  %v8114_v9 = vadd.f32 %v11824_v10, %v8023_v59  ;;  %v8115_v43 = vadd.f32 %v11839_v21, %v8024_v45  ;;  %v7769_v14 = vadd.f32 %v7640_v55, %v12223_v50 }
 0x4b2   : > { %v7770_v49 = vadd.f32 %v7642_v36, %v12235_v5 }
 0x4b3   : > { %v8436_v52 = vcombine.low %v8428_v56, %v8435_v37  ;;  %v8437_v47 = vcombine.low %v8114_v9, %v8115_v43 }
 0x4b4   : > { %v7896_v34 = vpop.permute.xlu0 %7895  ;;  %v7898_v62 = vpop.permute.xlu1 %7897 }
 0x4b5   : > { %8484 = vst.msk [vmem:[%s11890_s14 + $0x70] sm:$0xff] %vm3253_vm1, %v8436_v52  ;;  %v8025_v0 = vadd.f32 %v7896_v34, %v7769_v14  ;;  %v8026_v17 = vadd.f32 %v7898_v62, %v7770_v49  ;;  %v8445_v63 = vrot.slane %v8437_v47, %v9321_v15 }
 0x4b7   : > { %v8116_v27 = vadd.f32 %v11827_v31, %v8025_v0  ;;  %v8117_v51 = vadd.f32 %v11843_v4, %v8026_v17 }
 0x4b9   : > { %v8438_v10 = vcombine.low %v8116_v27, %v8117_v51 }
 0x4bb   : > { %v8452_v21 = vrot.slane %v8438_v10, %v9321_v15 }
 0x4bd   : > { %v8453_v53 = vcombine.low %v8445_v63, %v8452_v21 }
 0x4bf   : > { %8485 = vst.msk [vmem:[%s11890_s14 + $0x78] sm:$0xff] %vm3253_vm1, %v8453_v53 }
 0x4c0 PF: > { %s21_s21 = sadd.s32 1, %s9193_s21   ;;  %s12542_s17 = smov %s9185_s19 }
 0x4c1   : > { %p18_p8 = scmp.ge.s32.totalorder %s21_s21, 6   ;;  %s12543_s18 = smov %s9189_s20 }
 0x4c2   : > { %s12544_s19 = smov %s12547_s22  ;;  %s12545_s20 = smov %s12551_s23 }
 0x4c3   :  { %20 = sbr.rel (!%p18_p8) target bundleno = 3 (0x3), region = 99 }

// kernel: dense_block_forward.2
= control target key start
LH: loop header
LB: loop body
LE: loop exit
PB: predicated region body
PF: predicated region fallthrough
CT: control target
= control target key end

     0   :  { %s7384_s24 = smov 0   ;;  %s7386_s25 = smov 0   ;;  %s10216_s0 = inlined_call_operand.vmem [shape: f32[2,2,10,18,4], index: 0, kind: input, shape index: {}]   ;;  %s10217_s1 = inlined_call_operand.vmem [shape: f32[1,4], index: 1, kind: input, shape index: {}]   ;;  %s10218_s2 = inlined_call_operand.vmem [shape: f32[1,4], index: 2, kind: input, shape index: {}]   ;;  %s10219_s3 = inlined_call_operand.vmem [shape: bf16[4,32], index: 3, kind: input, shape index: {}]   ;;  %s10220_s4 = inlined_call_operand.vmem [shape: f32[1,32], index: 4, kind: input, shape index: {}]   ;;  %s10221_s5 = inlined_call_operand.vmem [shape: bf16[3,32,48], index: 5, kind: input, shape index: {}]   ;;  %s10222_s6 = inlined_call_operand.vmem [shape: f32[1,16], index: 6, kind: input, shape index: {}]   ;;  %s10223_s7 = inlined_call_operand.vmem [shape: f32[2,16,16,16], index: 7, kind: output, shape index: {}]  }
   0x1   :  { %s7388_s26 = smov 0   ;;  %s7390_s27 = smov 0  }
   0x2   :  { %s7392_s28 = smov 0  }
   0x3 LB: > { %s26_s29 = sadd.s32 1, %s7328_s26  ;;  %s29_s30 = sadd.s32 1, %s7332_s27  ;;  %s7336_s28 = sphi %s7392_s28, %s17_s28   ;;  %s7332_s27 = sphi %s7390_s27, %s10366_s27   ;;  %s7328_s26 = sphi %s7388_s26, %s10365_s26   ;;  %s7324_s25 = sphi %s7386_s25, %s10364_s25   ;;  %s7320_s24 = sphi %s7384_s24, %s10363_s24  }
   0x4   : > { %p27_p0 = scmp.ge.s32.totalorder %s26_s29, 2  ;;  %p6861_p1 = scmp.ge.s32.totalorder %s7336_s28, 1 }
   0x5   : > { %p257_p2 = scmp.lt.s32.totalorder %s7336_s28, 5 }
   0x6   : > { %s10368_s29 = smov (%p27_p0, %s26_s29), 0  ;;  %s10370_s30 = smov (!%p27_p0, %s29_s30), %s7332_s27 }
   0x7   : > { %p258_p3 = pnand %p6861_p1, %p257_p2  ;;  %p31_p4 = scmp.ge.s32.totalorder %s10370_s30, 2 }
   0x9   : > { %s10372_s30 = smov (%p31_p4, %s10370_s30), 0  ;;  %261 = sbr.rel (%p258_p3) target bundleno = 1068 (0x42c), region = 48 }
  0x10   : > { %v352_v0 = vld [vmem:[%s10219_s3] sm:$0x3]  ;;  %vm1756_vm0 = vcmask 1041408   ;;  %p298_p5 = scmp.lt.s32.totalorder %s7324_s25, 1  ;;  %p300_p6 = scmp.lt.s32.totalorder %s7320_s24, 1  ;;  %v387_v1 = vlaneseq  ;;  %vm1719_vm1 = vcmask 31744  }
  0x11   : > { %7223 = vmatprep.subr.msk.bf16.mxu0 %vm1756_vm0, %v352_v0  ;;  %v1758_v2 = vsel %vm1756_vm0, %v352_v0, 0  ;;  %v6878_v3 = vld [vmem:[%s10217_s1] ss:$0 sm:$0xff]  ;;  %v7338_v5 = vmov 1983009808   ;;  %s7788_s8 = sshll.u32 %s7320_s24, 3 }
  0x12   : > { %v6879_v4 = vld [vmem:[%s10218_s2] ss:$0 sm:$0xff]  ;;  %7020 = vmatpush3.bf16.msra.mxu0 %v1758_v2  ;;  %s10374_s25 = smov (!%p298_p5, %s7324_s25), 1  ;;  %v385_v6 = vunpack.c.l.s4 %v7338_v5  ;;  %v7429_v7 = vshrl.u32 %v387_v1, 7  ;;  %v888_v9 = vcombine.high %v6878_v3, %v6878_v3  ;;  %vm7340_vm8 = vmmov 0   ;;  %s7342_s20 = smov 96  }
  0x13   : > { %s301_s14 = scalar_select %p300_p6, %s7320_s24, 1  ;;  %v1004_v10 = vcombine.high %v6879_v4, %v6879_v4 }
  0x14   : > { %s7225_s15 = smul.u32 60, %s10374_s25  ;;  %v386_v8 = vunpack.c.0.s8 %v385_v6  ;;  %vm2330_vm3 = vcmp.eq.s32.totalorder %v7429_v7, 0  ;;  %p310_p7 = scmp.lt.s32.totalorder %s7788_s8, 15 }
  0x15   : > { %s7224_s16 = smul.u32 30, %s301_s14  ;;  %s6865_s9 = sshll.u32 %s10374_s25, 5 }
  0x16   : > { %v7433_v11 = vsub.s32 %v386_v8, %v7429_v7 }
  0x17   : > { %s304_s17 = sadd.s32 %s7225_s15, %s7224_s16 }
  0x18   : > { %s6862_s18 = sshll.u32 %s304_s17, 3  ;;  %v7441_v12 = vrot.slane %v6878_v3, %v7433_v11  ;;  %v7444_v13 = vrot.slane %v888_v9, %v7433_v11  ;;  %v7447_v14 = vrot.slane %v6879_v4, %v7433_v11  ;;  %v7450_v15 = vrot.slane %v1004_v10, %v7433_v11 }
  0x19   : > { %s7438_s21 = scalar_lea.vmem %s10216_s0, %s6862_s18 }
  0x1a   : > { %v320_v16 = vld [vmem:[%s7438_s21] sm:$0xff]  ;;  %v321_v17 = vld [vmem:[%s7438_s21 + $0x8] sm:$0xff]  ;;  %v323_v22 = vld [vmem:[%s7438_s21 + $0x18] sm:$0xff]  ;;  %v7459_v23 = vcombine.high %v7441_v12, %v7441_v12  ;;  %v7463_v24 = vcombine.high %v7444_v13, %v7444_v13  ;;  %v7467_v25 = vcombine.high %v7447_v14, %v7447_v14  ;;  %v7471_v26 = vcombine.high %v7450_v15, %v7450_v15 }
  0x1b   : > { %v383_v18 = vcombine.high %v320_v16, %v320_v16  ;;  %v390_v19 = vrot.slane %v320_v16, %v7433_v11  ;;  %v400_v20 = vcombine.high %v321_v17, %v321_v17  ;;  %v407_v21 = vrot.slane %v321_v17, %v7433_v11  ;;  %v324_v51 = vld [vmem:[%s7438_s21 + $0x20] sm:$0xff]  ;;  %v6868_v56 = vld.sshfl [vmem:[%s7438_s21 + $0x10] sm:$0x3 pattern:$0x76325410] }
  0x1c   : > { %v424_v33 = vcombine.high %v323_v22, %v323_v22  ;;  %v431_v34 = vrot.slane %v323_v22, %v7433_v11  ;;  %v441_v0 = vcombine.high %v324_v51, %v324_v51  ;;  %v448_v3 = vrot.slane %v324_v51, %v7433_v11 }
  0x1d   : > { %v397_v27 = vrot.slane %v383_v18, %v7433_v11  ;;  %v398_v28 = vcombine.high %v390_v19, %v390_v19  ;;  %v414_v29 = vrot.slane %v400_v20, %v7433_v11  ;;  %v415_v30 = vcombine.high %v407_v21, %v407_v21 }
  0x1e   : > { %v909_v31 = vmul.f32 %v7441_v12, %v390_v19  ;;  %v913_v32 = vmul.f32 %v7441_v12, %v407_v21  ;;  %v438_v59 = vrot.slane %v424_v33, %v7433_v11  ;;  %v439_v60 = vcombine.high %v431_v34, %v431_v34 }
  0x1f   : > { %v399_v35 = vcombine.high %v397_v27, %v397_v27  ;;  %v416_v36 = vcombine.high %v414_v29, %v414_v29  ;;  %v910_v37 = vmul.f32 %v7459_v23, %v398_v28  ;;  %v911_v38 = vmul.f32 %v7444_v13, %v397_v27 }
  0x20   : > { %v914_v39 = vmul.f32 %v7459_v23, %v415_v30  ;;  %v915_v40 = vmul.f32 %v7444_v13, %v414_v29  ;;  %v1025_v41 = vadd.f32 %v7447_v14, %v909_v31  ;;  %v1029_v42 = vadd.f32 %v7447_v14, %v913_v32 }
  0x21   : > { %v912_v43 = vmul.f32 %v7463_v24, %v399_v35  ;;  %v916_v44 = vmul.f32 %v7463_v24, %v416_v36  ;;  %v1026_v45 = vadd.f32 %v7467_v25, %v910_v37  ;;  %v1027_v46 = vadd.f32 %v7450_v15, %v911_v38 }
  0x22   : > { %v1030_v47 = vadd.f32 %v7467_v25, %v914_v39  ;;  %v1031_v48 = vadd.f32 %v7450_v15, %v915_v40  ;;  %v1115_v49 = vmax.f32 %v1025_v41, 0.0  ;;  %v1119_v50 = vmax.f32 %v1029_v42, 0.0 }
  0x23   : > { %v1028_v52 = vadd.f32 %v7471_v26, %v912_v43  ;;  %v1032_v53 = vadd.f32 %v7471_v26, %v916_v44  ;;  %v1116_v54 = vmax.f32 %v1026_v45, 0.0  ;;  %v1117_v55 = vmax.f32 %v1027_v46, 0.0  ;;  %v326_v43 = vld [vmem:[%s7438_s21 + $0x30] sm:$0xff] }
  0x24   : > { %v1120_v57 = vmax.f32 %v1030_v47, 0.0  ;;  %v1121_v58 = vmax.f32 %v1031_v48, 0.0  ;;  %v440_v2 = vcombine.high %v438_v59, %v438_v59  ;;  %v917_v4 = vmul.f32 %v6868_v56, %v7441_v12  ;;  %v327_v48 = vld [vmem:[%s7438_s21 + $0x38] sm:$0xff] }
  0x25   : > { %v1118_v61 = vmax.f32 %v1028_v52, 0.0  ;;  %v1122_v62 = vmax.f32 %v1032_v53, 0.0  ;;  %v1295_v63 = vcombine.low %v1115_v49, %v1116_v54  ;;  %v455_v9 = vrot.slane %v441_v0, %v7433_v11 }
  0x26   : > { %v1312_v1 = vcombine.low %v1119_v50, %v1120_v57  ;;  %v456_v16 = vcombine.high %v448_v3, %v448_v3  ;;  %v918_v17 = vmul.f32 %v7459_v23, %v431_v34  ;;  %v919_v18 = vmul.f32 %v7444_v13, %v439_v60 }
  0x27   : > { %v1296_v5 = vcombine.low %v1117_v55, %v1118_v61  ;;  %v1303_v6 = vrot.slane %v1295_v63, %v7433_v11  ;;  %v1313_v8 = vcombine.low %v1121_v58, %v1122_v62  ;;  %v920_v21 = vmul.f32 %v7463_v24, %v438_v59  ;;  %v6869_v55 = vld.sshfl [vmem:[%s7438_s21 + $0x28] sm:$0x3 pattern:$0x76325410] }
  0x28   : > { %v1320_v10 = vrot.slane %v1312_v1, %v7433_v11  ;;  %v921_v22 = vmul.f32 %v7441_v12, %v440_v2  ;;  %v922_v27 = vmul.f32 %v7459_v23, %v448_v3  ;;  %v923_v28 = vmul.f32 %v7444_v13, %v456_v16 }
  0x29   : > { %v1310_v19 = vrot.slane %v1296_v5, %v7433_v11  ;;  %v1327_v20 = vrot.slane %v1313_v8, %v7433_v11  ;;  %v924_v29 = vmul.f32 %v7463_v24, %v455_v9  ;;  %v1033_v30 = vadd.f32 %v7447_v14, %v917_v4 }
  0x2a   : > { %v1034_v33 = vadd.f32 %v7467_v25, %v918_v17  ;;  %v1035_v34 = vadd.f32 %v7450_v15, %v919_v18  ;;  %v1036_v35 = vadd.f32 %v7471_v26, %v920_v21  ;;  %v1037_v36 = vadd.f32 %v7447_v14, %v921_v22 }
  0x2b   : > { %v1311_v31 = vcombine.low %v1303_v6, %v1310_v19  ;;  %v1328_v32 = vcombine.low %v1320_v10, %v1327_v20  ;;  %v1038_v37 = vadd.f32 %v7467_v25, %v922_v27  ;;  %v1039_v38 = vadd.f32 %v7450_v15, %v923_v28 }
  0x2c   : > { %v1040_v40 = vadd.f32 %v7471_v26, %v924_v29  ;;  %v1123_v41 = vmax.f32 %v1033_v30, 0.0  ;;  %v1124_v42 = vmax.f32 %v1034_v33, 0.0  ;;  %v1125_v44 = vmax.f32 %v1035_v34, 0.0 }
  0x2d   : > { %v1700_v39 = vpack.c.bf16 %v1328_v32, %v1311_v31  ;;  %v1126_v45 = vmax.f32 %v1036_v35, 0.0  ;;  %v1127_v46 = vmax.f32 %v1037_v36, 0.0  ;;  %v1128_v47 = vmax.f32 %v1038_v37, 0.0  ;;  %v329_v32 = vld [vmem:[%s7438_s21 + $0x48] sm:$0xff]  ;;  %v7546_v37 = vld [vmem:[%s7438_s21 + $0x50] sm:$0xff] }
  0x2e   : > { %v1129_v49 = vmax.f32 %v1039_v38, 0.0  ;;  %v1130_v50 = vmax.f32 %v1040_v40, 0.0  ;;  %v1329_v51 = vcombine.low %v1123_v41, %v1124_v42  ;;  %v457_v52 = vcombine.high %v455_v9, %v455_v9 }
  0x2f   : > { %7021 = vmatprep.mubr.msk.bf16.mxu0 %vm1719_vm1, %v1700_v39  ;;  %v1330_v53 = vcombine.low %v1125_v44, %v1126_v45  ;;  %v1346_v54 = vcombine.low %v1127_v46, %v1128_v47  ;;  %v465_v56 = vcombine.high %v326_v43, %v326_v43  ;;  %v472_v57 = vrot.slane %v326_v43, %v7433_v11  ;;  %v6870_v44 = vld.sshfl [vmem:[%s7438_s21 + $0x40] sm:$0x3 pattern:$0x76325410] }
  0x30   : > { %v1337_v58 = vrot.slane %v1329_v51, %v7433_v11  ;;  %v1347_v59 = vcombine.low %v1129_v49, %v1130_v50  ;;  %v489_v60 = vrot.slane %v327_v48, %v7433_v11  ;;  %v925_v61 = vmul.f32 %v7441_v12, %v457_v52 }
  0x31   : > { %v1344_v62 = vrot.slane %v1330_v53, %v7433_v11  ;;  %v1354_v63 = vrot.slane %v1346_v54, %v7433_v11  ;;  %v479_v0 = vrot.slane %v465_v56, %v7433_v11  ;;  %v480_v1 = vcombine.high %v472_v57, %v472_v57 }
  0x32   : > { %v1361_v2 = vrot.slane %v1347_v59, %v7433_v11  ;;  %v497_v3 = vcombine.high %v489_v60, %v489_v60  ;;  %v926_v4 = vmul.f32 %v6869_v55, %v7459_v23  ;;  %v927_v5 = vmul.f32 %v7444_v13, %v472_v57 }
  0x33   : > { %v1345_v6 = vcombine.low %v1337_v58, %v1344_v62  ;;  %v481_v8 = vcombine.high %v479_v0, %v479_v0  ;;  %v928_v9 = vmul.f32 %v7463_v24, %v480_v1  ;;  %v929_v10 = vmul.f32 %v7441_v12, %v479_v0 }
  0x34   : > { %v1362_v16 = vcombine.low %v1354_v63, %v1361_v2  ;;  %v931_v17 = vmul.f32 %v7444_v13, %v489_v60  ;;  %v932_v18 = vmul.f32 %v7463_v24, %v497_v3  ;;  %v1041_v19 = vadd.f32 %v7447_v14, %v925_v61 }
  0x35   : > { %v930_v20 = vmul.f32 %v7459_v23, %v481_v8  ;;  %v1042_v21 = vadd.f32 %v7467_v25, %v926_v4  ;;  %v1043_v22 = vadd.f32 %v7450_v15, %v927_v5  ;;  %v1044_v27 = vadd.f32 %v7471_v26, %v928_v9 }
  0x36   : > { %v1701_v28 = vpack.c.bf16 %v1362_v16, %v1345_v6  ;;  %v1045_v29 = vadd.f32 %v7447_v14, %v929_v10  ;;  %v1047_v30 = vadd.f32 %v7450_v15, %v931_v17  ;;  %v1048_v31 = vadd.f32 %v7471_v26, %v932_v18 }
  0x37   : > { %v1046_v33 = vadd.f32 %v7467_v25, %v930_v20  ;;  %v1131_v34 = vmax.f32 %v1041_v19, 0.0  ;;  %v1132_v35 = vmax.f32 %v1042_v21, 0.0  ;;  %v1133_v36 = vmax.f32 %v1043_v22, 0.0 }
  0x38   : > { %7022 = vmatmul.mubr.msk.bf16.vlgmr.msra.gmra.mrb[0].mxu0 %vm1719_vm1, %v1701_v28  ;;  %v1134_v38 = vmax.f32 %v1044_v27, 0.0  ;;  %v1135_v39 = vmax.f32 %v1045_v29, 0.0  ;;  %v1137_v40 = vmax.f32 %v1047_v30, 0.0  ;;  %v1138_v41 = vmax.f32 %v1048_v31, 0.0  ;;  %v332_v29 = vld [vmem:[%s7438_s21 + $0x60] sm:$0xff] }
  0x39   : > { %v1136_v42 = vmax.f32 %v1046_v33, 0.0  ;;  %v1363_v43 = vcombine.low %v1131_v34, %v1132_v35  ;;  %v482_v45 = vcombine.high %v327_v48, %v327_v48  ;;  %v506_v46 = vcombine.high %v329_v32, %v329_v32 }
  0x3a   : > { %v1364_v47 = vcombine.low %v1133_v36, %v1134_v38  ;;  %v1381_v49 = vcombine.low %v1137_v40, %v1138_v41  ;;  %v513_v50 = vrot.slane %v329_v32, %v7433_v11  ;;  %v530_v51 = vrot.slane %v7546_v37, %v7433_v11  ;;  %v6871_v41 = vld.sshfl [vmem:[%s7438_s21 + $0x58] sm:$0x3 pattern:$0x76325410] }
  0x3b   : > { %v1371_v52 = vrot.slane %v1363_v43, %v7433_v11  ;;  %v1380_v53 = vcombine.low %v1135_v39, %v1136_v42  ;;  %v496_v54 = vrot.slane %v482_v45, %v7433_v11  ;;  %v520_v55 = vrot.slane %v506_v46, %v7433_v11 }
  0x3c   : > { %v1378_v56 = vrot.slane %v1364_v47, %v7433_v11  ;;  %v1395_v57 = vrot.slane %v1381_v49, %v7433_v11  ;;  %v521_v48 = vcombine.high %v513_v50, %v513_v50  ;;  %v935_v58 = vmul.f32 %v6870_v44, %v7444_v13 }
  0x3d   : > { %v1388_v59 = vrot.slane %v1380_v53, %v7433_v11  ;;  %v498_v60 = vcombine.high %v496_v54, %v496_v54  ;;  %v522_v61 = vcombine.high %v520_v55, %v520_v55  ;;  %v933_v62 = vmul.f32 %v7441_v12, %v496_v54 }
  0x3e   : > { %v1379_v63 = vcombine.low %v1371_v52, %v1378_v56  ;;  %v936_v0 = vmul.f32 %v7463_v24, %v513_v50  ;;  %v937_v1 = vmul.f32 %v7441_v12, %v521_v48  ;;  %v938_v2 = vmul.f32 %v7459_v23, %v520_v55 }
  0x3f   : > { %v1396_v3 = vcombine.low %v1388_v59, %v1395_v57  ;;  %v934_v4 = vmul.f32 %v7459_v23, %v498_v60  ;;  %v939_v5 = vmul.f32 %v7444_v13, %v522_v61  ;;  %v940_v6 = vmul.f32 %v7463_v24, %v530_v51 }
  0x40   : > { %v1049_v8 = vadd.f32 %v7447_v14, %v933_v62  ;;  %v1051_v9 = vadd.f32 %v7450_v15, %v935_v58  ;;  %v1052_v10 = vadd.f32 %v7471_v26, %v936_v0  ;;  %v1053_v16 = vadd.f32 %v7447_v14, %v937_v1 }
  0x41   : > { %v1702_v17 = vpack.c.bf16 %v1396_v3, %v1379_v63  ;;  %v1050_v18 = vadd.f32 %v7467_v25, %v934_v4  ;;  %v1054_v19 = vadd.f32 %v7467_v25, %v938_v2  ;;  %v1055_v20 = vadd.f32 %v7450_v15, %v939_v5 }
  0x42   : > { %v1056_v21 = vadd.f32 %v7471_v26, %v940_v6  ;;  %v1139_v22 = vmax.f32 %v1049_v8, 0.0  ;;  %v1141_v27 = vmax.f32 %v1051_v9, 0.0  ;;  %v1142_v28 = vmax.f32 %v1052_v10, 0.0  ;;  %v333_v8 = vld [vmem:[%s7438_s21 + $0x68] sm:$0xff] }
  0x43   : > { %7025 = vmatprep.mubr.msk.bf16.mxu0 %vm1719_vm1, %v1702_v17  ;;  %v1140_v30 = vmax.f32 %v1050_v18, 0.0  ;;  %v1143_v31 = vmax.f32 %v1053_v16, 0.0  ;;  %v1144_v32 = vmax.f32 %v1054_v19, 0.0  ;;  %v1145_v33 = vmax.f32 %v1055_v20, 0.0  ;;  %v335_v18 = vld [vmem:[%s7438_s21 + $0x78] sm:$0xff] }
  0x44   : > { %v1146_v34 = vmax.f32 %v1056_v21, 0.0  ;;  %v1398_v35 = vcombine.low %v1141_v27, %v1142_v28  ;;  %v523_v36 = vcombine.high %v7546_v37, %v7546_v37  ;;  %v538_v38 = vcombine.high %v530_v51, %v530_v51 }
  0x45   : > { %v1397_v39 = vcombine.low %v1139_v22, %v1140_v30  ;;  %v1414_v40 = vcombine.low %v1143_v31, %v1144_v32  ;;  %v547_v42 = vcombine.high %v332_v29, %v332_v29  ;;  %v554_v43 = vrot.slane %v332_v29, %v7433_v11 }
  0x46   : > { %v1412_v44 = vrot.slane %v1398_v35, %v7433_v11  ;;  %v1415_v45 = vcombine.low %v1145_v33, %v1146_v34  ;;  %v537_v46 = vrot.slane %v523_v36, %v7433_v11  ;;  %v941_v47 = vmul.f32 %v7441_v12, %v538_v38  ;;  %v6872_v38 = vld.sshfl [vmem:[%s7438_s21 + $0x70] sm:$0x3 pattern:$0x76325410] }
  0x47   : > { %v1405_v49 = vrot.slane %v1397_v39, %v7433_v11  ;;  %v1422_v50 = vrot.slane %v1414_v40, %v7433_v11  ;;  %v561_v37 = vrot.slane %v547_v42, %v7433_v11  ;;  %v562_v51 = vcombine.high %v554_v43, %v554_v43 }
  0x48   : > { %v1429_v52 = vrot.slane %v1415_v45, %v7433_v11  ;;  %v539_v53 = vcombine.high %v537_v46, %v537_v46  ;;  %v942_v54 = vmul.f32 %v7459_v23, %v537_v46  ;;  %v944_v55 = vmul.f32 %v6871_v41, %v7463_v24 }
  0x49   : > { %v1413_v56 = vcombine.low %v1405_v49, %v1412_v44  ;;  %v563_v57 = vcombine.high %v561_v37, %v561_v37  ;;  %v945_v48 = vmul.f32 %v7441_v12, %v554_v43  ;;  %v946_v58 = vmul.f32 %v7459_v23, %v562_v51 }
  0x4a   : > { %v1430_v59 = vcombine.low %v1422_v50, %v1429_v52  ;;  %v943_v60 = vmul.f32 %v7444_v13, %v539_v53  ;;  %v947_v61 = vmul.f32 %v7444_v13, %v561_v37  ;;  %v1057_v62 = vadd.f32 %v7447_v14, %v941_v47 }
  0x4b   : > { %v948_v63 = vmul.f32 %v7463_v24, %v563_v57  ;;  %v1058_v0 = vadd.f32 %v7467_v25, %v942_v54  ;;  %v1060_v1 = vadd.f32 %v7471_v26, %v944_v55  ;;  %v1061_v2 = vadd.f32 %v7447_v14, %v945_v48 }
  0x4c   : > { %v1703_v3 = vpack.c.bf16 %v1430_v59, %v1413_v56  ;;  %v1059_v4 = vadd.f32 %v7450_v15, %v943_v60  ;;  %v1062_v5 = vadd.f32 %v7467_v25, %v946_v58  ;;  %v1063_v6 = vadd.f32 %v7450_v15, %v947_v61 }
  0x4d   : > { %v1064_v9 = vadd.f32 %v7471_v26, %v948_v63  ;;  %v1147_v10 = vmax.f32 %v1057_v62, 0.0  ;;  %v1148_v16 = vmax.f32 %v1058_v0, 0.0  ;;  %v1150_v17 = vmax.f32 %v1060_v1, 0.0  ;;  %v336_v0 = vld [vmem:[%s7438_s21 + $0x80] sm:$0xff] }
  0x4e   : > { %7026 = vmatmul.mubr.msk.bf16.gmra.mrb[4].mxu0 %vm1719_vm1, %v1703_v3  ;;  %v1149_v19 = vmax.f32 %v1059_v4, 0.0  ;;  %v1151_v20 = vmax.f32 %v1061_v2, 0.0  ;;  %v1152_v21 = vmax.f32 %v1062_v5, 0.0  ;;  %v1153_v22 = vmax.f32 %v1063_v6, 0.0  ;;  %v7633_v5 = vld [vmem:[%s7438_s21 + $0x90] sm:$0xff] }
  0x4f   : > { %v1154_v27 = vmax.f32 %v1064_v9, 0.0  ;;  %v1431_v28 = vcombine.low %v1147_v10, %v1148_v16  ;;  %v564_v29 = vcombine.high %v333_v8, %v333_v8  ;;  %v571_v30 = vrot.slane %v333_v8, %v7433_v11 }
  0x50   : > { %v1432_v31 = vcombine.low %v1149_v19, %v1150_v17  ;;  %v1448_v32 = vcombine.low %v1151_v20, %v1152_v21  ;;  %v588_v33 = vcombine.high %v335_v18, %v335_v18  ;;  %v595_v34 = vrot.slane %v335_v18, %v7433_v11 }
  0x51   : > { %v1439_v35 = vrot.slane %v1431_v28, %v7433_v11  ;;  %v1449_v36 = vcombine.low %v1153_v22, %v1154_v27  ;;  %v578_v39 = vrot.slane %v564_v29, %v7433_v11  ;;  %v579_v40 = vcombine.high %v571_v30, %v571_v30 }
  0x52   : > { %v1446_v41 = vrot.slane %v1432_v31, %v7433_v11  ;;  %v1456_v42 = vrot.slane %v1448_v32, %v7433_v11  ;;  %v602_v43 = vrot.slane %v588_v33, %v7433_v11  ;;  %v603_v44 = vcombine.high %v595_v34, %v595_v34 }
  0x53   : > { %v1463_v45 = vrot.slane %v1449_v36, %v7433_v11  ;;  %v580_v46 = vcombine.high %v578_v39, %v578_v39  ;;  %v949_v47 = vmul.f32 %v7441_v12, %v571_v30  ;;  %v950_v49 = vmul.f32 %v7459_v23, %v579_v40  ;;  %v6873_v30 = vld.sshfl [vmem:[%s7438_s21 + $0x88] sm:$0x3 pattern:$0x76325410] }
  0x54   : > { %v1447_v50 = vcombine.low %v1439_v35, %v1446_v41  ;;  %v951_v37 = vmul.f32 %v7444_v13, %v578_v39  ;;  %v953_v51 = vmul.f32 %v6872_v38, %v7441_v12  ;;  %v954_v52 = vmul.f32 %v7459_v23, %v595_v34 }
  0x55   : > { %v1464_v53 = vcombine.low %v1456_v42, %v1463_v45  ;;  %v952_v54 = vmul.f32 %v7463_v24, %v580_v46  ;;  %v955_v55 = vmul.f32 %v7444_v13, %v603_v44  ;;  %v956_v56 = vmul.f32 %v7463_v24, %v602_v43 }
  0x56   : > { %v1065_v57 = vadd.f32 %v7447_v14, %v949_v47  ;;  %v1066_v48 = vadd.f32 %v7467_v25, %v950_v49  ;;  %v1067_v58 = vadd.f32 %v7450_v15, %v951_v37  ;;  %v1069_v59 = vadd.f32 %v7447_v14, %v953_v51 }
  0x57   : > { %v1704_v60 = vpack.c.bf16 %v1464_v53, %v1447_v50  ;;  %v1068_v61 = vadd.f32 %v7471_v26, %v952_v54  ;;  %v1070_v62 = vadd.f32 %v7467_v25, %v954_v52  ;;  %v1071_v63 = vadd.f32 %v7450_v15, %v955_v55 }
  0x58   : > { %v1072_v1 = vadd.f32 %v7471_v26, %v956_v56  ;;  %v1155_v2 = vmax.f32 %v1065_v57, 0.0  ;;  %v1156_v3 = vmax.f32 %v1066_v48, 0.0  ;;  %v1157_v4 = vmax.f32 %v1067_v58, 0.0  ;;  %v339_v48 = vld [vmem:[%s7438_s21 + $0x98] sm:$0xff] }
  0x59   : > { %7029 = vmatprep.mubr.msk.bf16.mxu0 %vm1719_vm1, %v1704_v60  ;;  %v1158_v6 = vmax.f32 %v1068_v61, 0.0  ;;  %v1159_v8 = vmax.f32 %v1069_v59, 0.0  ;;  %v1160_v9 = vmax.f32 %v1070_v62, 0.0  ;;  %v1161_v10 = vmax.f32 %v1071_v63, 0.0  ;;  %v7663_v62 = vld [vmem:[%s7438_s21 + $0xa8] sm:$0xff] }
  0x5a   : > { %v1162_v16 = vmax.f32 %v1072_v1, 0.0  ;;  %v1465_v17 = vcombine.low %v1155_v2, %v1156_v3  ;;  %v604_v18 = vcombine.high %v602_v43, %v602_v43  ;;  %v605_v19 = vcombine.high %v336_v0, %v336_v0 }
  0x5b   : > { %v1466_v20 = vcombine.low %v1157_v4, %v1158_v6  ;;  %v1482_v21 = vcombine.low %v1159_v8, %v1160_v9  ;;  %v612_v22 = vrot.slane %v336_v0, %v7433_v11  ;;  %v636_v27 = vrot.slane %v7633_v5, %v7433_v11 }
  0x5c   : > { %v1473_v28 = vrot.slane %v1465_v17, %v7433_v11  ;;  %v1483_v29 = vcombine.low %v1161_v10, %v1162_v16  ;;  %v619_v31 = vrot.slane %v605_v19, %v7433_v11  ;;  %v957_v32 = vmul.f32 %v7441_v12, %v604_v18 }
  0x5d   : > { %v1480_v33 = vrot.slane %v1466_v20, %v7433_v11  ;;  %v1490_v34 = vrot.slane %v1482_v21, %v7433_v11  ;;  %v620_v35 = vcombine.high %v612_v22, %v612_v22  ;;  %v644_v36 = vcombine.high %v636_v27, %v636_v27  ;;  %v6874_v20 = vld.sshfl [vmem:[%s7438_s21 + $0xa0] sm:$0x3 pattern:$0x76325410] }
  0x5e   : > { %v1497_v38 = vrot.slane %v1483_v29, %v7433_v11  ;;  %v621_v39 = vcombine.high %v619_v31, %v619_v31  ;;  %v958_v40 = vmul.f32 %v7459_v23, %v612_v22  ;;  %v960_v41 = vmul.f32 %v7463_v24, %v619_v31 }
  0x5f   : > { %v1481_v42 = vcombine.low %v1473_v28, %v1480_v33  ;;  %v959_v43 = vmul.f32 %v7444_v13, %v620_v35  ;;  %v962_v44 = vmul.f32 %v6873_v30, %v7459_v23  ;;  %v963_v45 = vmul.f32 %v7444_v13, %v636_v27 }
  0x60   : > { %v1498_v46 = vcombine.low %v1490_v34, %v1497_v38  ;;  %v961_v47 = vmul.f32 %v7441_v12, %v621_v39  ;;  %v964_v49 = vmul.f32 %v7463_v24, %v644_v36  ;;  %v1073_v50 = vadd.f32 %v7447_v14, %v957_v32 }
  0x61   : > { %v1074_v37 = vadd.f32 %v7467_v25, %v958_v40  ;;  %v1075_v51 = vadd.f32 %v7450_v15, %v959_v43  ;;  %v1076_v52 = vadd.f32 %v7471_v26, %v960_v41  ;;  %v1078_v53 = vadd.f32 %v7467_v25, %v962_v44 }
  0x62   : > { %v1705_v54 = vpack.c.bf16 %v1498_v46, %v1481_v42  ;;  %v1077_v55 = vadd.f32 %v7447_v14, %v961_v47  ;;  %v1079_v56 = vadd.f32 %v7450_v15, %v963_v45  ;;  %v1080_v57 = vadd.f32 %v7471_v26, %v964_v49 }
  0x63   : > { %v1163_v58 = vmax.f32 %v1073_v50, 0.0  ;;  %v1164_v59 = vmax.f32 %v1074_v37, 0.0  ;;  %v1165_v60 = vmax.f32 %v1075_v51, 0.0  ;;  %v1166_v61 = vmax.f32 %v1076_v52, 0.0  ;;  %v342_v51 = vld [vmem:[%s7438_s21 + $0xb0] sm:$0xff] }
  0x64   : > { %7030 = vmatmul.mubr.msk.bf16.gmra.mrb[8].mxu0 %vm1719_vm1, %v1705_v54  ;;  %v1167_v63 = vmax.f32 %v1077_v55, 0.0  ;;  %v1168_v0 = vmax.f32 %v1078_v53, 0.0  ;;  %v1169_v1 = vmax.f32 %v1079_v56, 0.0  ;;  %v1170_v2 = vmax.f32 %v1080_v57, 0.0 }
  0x65   : > { %v1499_v3 = vcombine.low %v1163_v58, %v1164_v59  ;;  %v1500_v4 = vcombine.low %v1165_v60, %v1166_v61  ;;  %v629_v6 = vcombine.high %v7633_v5, %v7633_v5  ;;  %v646_v8 = vcombine.high %v339_v48, %v339_v48 }
  0x66   : > { %v1516_v9 = vcombine.low %v1167_v63, %v1168_v0  ;;  %v1517_v10 = vcombine.low %v1169_v1, %v1170_v2  ;;  %v653_v16 = vrot.slane %v339_v48, %v7433_v11  ;;  %v677_v17 = vrot.slane %v7663_v62, %v7433_v11 }
  0x67   : > { %v1507_v18 = vrot.slane %v1499_v3, %v7433_v11  ;;  %v1514_v19 = vrot.slane %v1500_v4, %v7433_v11  ;;  %v643_v21 = vrot.slane %v629_v6, %v7433_v11  ;;  %v660_v22 = vrot.slane %v646_v8, %v7433_v11 }
  0x68   : > { %v1524_v27 = vrot.slane %v1516_v9, %v7433_v11  ;;  %v1531_v5 = vrot.slane %v1517_v10, %v7433_v11  ;;  %v661_v28 = vcombine.high %v653_v16, %v653_v16  ;;  %v967_v29 = vmul.f32 %v7444_v13, %v653_v16 }
  0x69   : > { %v1515_v30 = vcombine.low %v1507_v18, %v1514_v19  ;;  %v645_v31 = vcombine.high %v643_v21, %v643_v21  ;;  %v662_v32 = vcombine.high %v660_v22, %v660_v22  ;;  %v965_v33 = vmul.f32 %v7441_v12, %v643_v21 }
  0x6a   : > { %v1532_v34 = vcombine.low %v1524_v27, %v1531_v5  ;;  %v968_v35 = vmul.f32 %v7463_v24, %v661_v28  ;;  %v969_v36 = vmul.f32 %v7441_v12, %v660_v22  ;;  %v971_v38 = vmul.f32 %v6874_v20, %v7444_v13 }
  0x6b   : > { %v966_v39 = vmul.f32 %v7459_v23, %v645_v31  ;;  %v970_v40 = vmul.f32 %v7459_v23, %v662_v32  ;;  %v972_v41 = vmul.f32 %v7463_v24, %v677_v17  ;;  %v1081_v42 = vadd.f32 %v7447_v14, %v965_v33 }
  0x6c   : > { %v1706_v43 = vpack.c.bf16 %v1532_v34, %v1515_v30  ;;  %v1083_v44 = vadd.f32 %v7450_v15, %v967_v29  ;;  %v1084_v45 = vadd.f32 %v7471_v26, %v968_v35  ;;  %v1085_v46 = vadd.f32 %v7447_v14, %v969_v36 }
  0x6d   : > { %v1082_v47 = vadd.f32 %v7467_v25, %v966_v39  ;;  %v1086_v49 = vadd.f32 %v7467_v25, %v970_v40  ;;  %v1087_v50 = vadd.f32 %v7450_v15, %v971_v38  ;;  %v1088_v37 = vadd.f32 %v7471_v26, %v972_v41 }
  0x6e   : > { %7033 = vmatprep.mubr.msk.bf16.mxu0 %vm1719_vm1, %v1706_v43  ;;  %v1171_v52 = vmax.f32 %v1081_v42, 0.0  ;;  %v1173_v53 = vmax.f32 %v1083_v44, 0.0  ;;  %v1174_v54 = vmax.f32 %v1084_v45, 0.0  ;;  %v1175_v55 = vmax.f32 %v1085_v46, 0.0  ;;  %v344_v43 = vld [vmem:[%s7438_s21 + $0xc0] sm:$0xff]  ;;  %v345_v44 = vld [vmem:[%s7438_s21 + $0xc8] sm:$0xff] }
  0x6f   : > { %v1172_v56 = vmax.f32 %v1082_v47, 0.0  ;;  %v1176_v57 = vmax.f32 %v1086_v49, 0.0  ;;  %v1177_v48 = vmax.f32 %v1087_v50, 0.0  ;;  %v1178_v58 = vmax.f32 %v1088_v37, 0.0 }
  0x70   : > { %v1534_v59 = vcombine.low %v1173_v53, %v1174_v54  ;;  %v670_v60 = vcombine.high %v7663_v62, %v7663_v62  ;;  %v685_v61 = vcombine.high %v677_v17, %v677_v17  ;;  %v687_v63 = vcombine.high %v342_v51, %v342_v51  ;;  %v6875_v17 = vld.sshfl [vmem:[%s7438_s21 + $0xb8] sm:$0x3 pattern:$0x76325410] }
  0x71   : > { %v1533_v0 = vcombine.low %v1171_v52, %v1172_v56  ;;  %v1550_v1 = vcombine.low %v1175_v55, %v1176_v57  ;;  %v1551_v2 = vcombine.low %v1177_v48, %v1178_v58  ;;  %v694_v3 = vrot.slane %v342_v51, %v7433_v11 }
  0x72   : > { %v1548_v4 = vrot.slane %v1534_v59, %v7433_v11  ;;  %v684_v6 = vrot.slane %v670_v60, %v7433_v11  ;;  %v701_v8 = vrot.slane %v687_v63, %v7433_v11  ;;  %v973_v9 = vmul.f32 %v7441_v12, %v685_v61 }
  0x73   : > { %v1541_v10 = vrot.slane %v1533_v0, %v7433_v11  ;;  %v1558_v16 = vrot.slane %v1550_v1, %v7433_v11  ;;  %v1565_v62 = vrot.slane %v1551_v2, %v7433_v11  ;;  %v702_v18 = vcombine.high %v694_v3, %v694_v3 }
  0x74   : > { %v686_v19 = vcombine.high %v684_v6, %v684_v6  ;;  %v703_v20 = vcombine.high %v701_v8, %v701_v8  ;;  %v974_v21 = vmul.f32 %v7459_v23, %v684_v6  ;;  %v976_v22 = vmul.f32 %v7463_v24, %v694_v3 }
  0x75   : > { %v1549_v27 = vcombine.low %v1541_v10, %v1548_v4  ;;  %v1566_v5 = vcombine.low %v1558_v16, %v1565_v62  ;;  %v977_v28 = vmul.f32 %v7441_v12, %v702_v18  ;;  %v978_v29 = vmul.f32 %v7459_v23, %v701_v8 }
  0x76   : > { %v975_v30 = vmul.f32 %v7444_v13, %v686_v19  ;;  %v979_v31 = vmul.f32 %v7444_v13, %v703_v20  ;;  %v980_v32 = vmul.f32 %v6875_v17, %v7463_v24  ;;  %v1089_v33 = vadd.f32 %v7447_v14, %v973_v9 }
  0x77   : > { %v1707_v34 = vpack.c.bf16 %v1566_v5, %v1549_v27  ;;  %v1090_v35 = vadd.f32 %v7467_v25, %v974_v21  ;;  %v1092_v36 = vadd.f32 %v7471_v26, %v976_v22  ;;  %v1093_v38 = vadd.f32 %v7447_v14, %v977_v28 }
  0x78   : > { %v1091_v39 = vadd.f32 %v7450_v15, %v975_v30  ;;  %v1094_v40 = vadd.f32 %v7467_v25, %v978_v29  ;;  %v1095_v41 = vadd.f32 %v7450_v15, %v979_v31  ;;  %v1096_v42 = vadd.f32 %v7471_v26, %v980_v32 }
  0x79   : > { %7034 = vmatmul.mubr.msk.bf16.gmra.mrb[12].mxu0 %vm1719_vm1, %v1707_v34  ;;  %v1179_v45 = vmax.f32 %v1089_v33, 0.0  ;;  %v1180_v46 = vmax.f32 %v1090_v35, 0.0  ;;  %v1182_v47 = vmax.f32 %v1092_v36, 0.0  ;;  %v1183_v49 = vmax.f32 %v1093_v38, 0.0  ;;  %v347_v34 = vld [vmem:[%s7438_s21 + $0xd8] sm:$0xff] }
  0x7a   : > { %v1181_v50 = vmax.f32 %v1091_v39, 0.0  ;;  %v1184_v37 = vmax.f32 %v1094_v40, 0.0  ;;  %v1185_v51 = vmax.f32 %v1095_v41, 0.0  ;;  %v1186_v52 = vmax.f32 %v1096_v42, 0.0  ;;  %v348_v40 = vld [vmem:[%s7438_s21 + $0xe0] sm:$0xff] }
  0x7b   : > { %v1567_v53 = vcombine.low %v1179_v45, %v1180_v46  ;;  %v711_v54 = vcombine.high %v344_v43, %v344_v43  ;;  %v718_v55 = vrot.slane %v344_v43, %v7433_v11  ;;  %v728_v56 = vcombine.high %v345_v44, %v345_v44 }
  0x7c   : > { %v1568_v57 = vcombine.low %v1181_v50, %v1182_v47  ;;  %v1584_v48 = vcombine.low %v1183_v49, %v1184_v37  ;;  %v1585_v58 = vcombine.low %v1185_v51, %v1186_v52  ;;  %v735_v59 = vrot.slane %v345_v44, %v7433_v11  ;;  %v6876_v51 = vld.sshfl [vmem:[%s7438_s21 + $0xd0] sm:$0x3 pattern:$0x76325410] }
  0x7d   : > { %v1575_v60 = vrot.slane %v1567_v53, %v7433_v11  ;;  %v725_v61 = vrot.slane %v711_v54, %v7433_v11  ;;  %v726_v63 = vcombine.high %v718_v55, %v718_v55  ;;  %v742_v0 = vrot.slane %v728_v56, %v7433_v11 }
  0x7e   : > { %v1582_v1 = vrot.slane %v1568_v57, %v7433_v11  ;;  %v1592_v2 = vrot.slane %v1584_v48, %v7433_v11  ;;  %v1599_v3 = vrot.slane %v1585_v58, %v7433_v11  ;;  %v743_v4 = vcombine.high %v735_v59, %v735_v59 }
  0x7f   : > { %v727_v6 = vcombine.high %v725_v61, %v725_v61  ;;  %v744_v8 = vcombine.high %v742_v0, %v742_v0  ;;  %v981_v9 = vmul.f32 %v7441_v12, %v718_v55  ;;  %v982_v10 = vmul.f32 %v7459_v23, %v726_v63 }
  0x80   : > { %v1583_v16 = vcombine.low %v1575_v60, %v1582_v1  ;;  %v1600_v62 = vcombine.low %v1592_v2, %v1599_v3  ;;  %v983_v17 = vmul.f32 %v7444_v13, %v725_v61  ;;  %v985_v18 = vmul.f32 %v7441_v12, %v735_v59 }
  0x81   : > { %v984_v19 = vmul.f32 %v7463_v24, %v727_v6  ;;  %v986_v20 = vmul.f32 %v7459_v23, %v743_v4  ;;  %v987_v21 = vmul.f32 %v7444_v13, %v742_v0  ;;  %v988_v22 = vmul.f32 %v7463_v24, %v744_v8 }
  0x82   : > { %v1708_v27 = vpack.c.bf16 %v1600_v62, %v1583_v16  ;;  %v1097_v5 = vadd.f32 %v7447_v14, %v981_v9  ;;  %v1098_v28 = vadd.f32 %v7467_v25, %v982_v10  ;;  %v1099_v29 = vadd.f32 %v7450_v15, %v983_v17 }
  0x83   : > { %v1100_v30 = vadd.f32 %v7471_v26, %v984_v19  ;;  %v1101_v31 = vadd.f32 %v7447_v14, %v985_v18  ;;  %v1102_v32 = vadd.f32 %v7467_v25, %v986_v20  ;;  %v1103_v33 = vadd.f32 %v7450_v15, %v987_v21 }
  0x84   : > { %7037 = vmatprep.mubr.msk.bf16.mxu0 %vm1719_vm1, %v1708_v27  ;;  %v1104_v35 = vadd.f32 %v7471_v26, %v988_v22  ;;  %v1187_v36 = vmax.f32 %v1097_v5, 0.0  ;;  %v1188_v38 = vmax.f32 %v1098_v28, 0.0  ;;  %v1189_v39 = vmax.f32 %v1099_v29, 0.0 }
  0x85   : > { %v1190_v41 = vmax.f32 %v1100_v30, 0.0  ;;  %v1191_v42 = vmax.f32 %v1101_v31, 0.0  ;;  %v1192_v43 = vmax.f32 %v1102_v32, 0.0  ;;  %v1193_v44 = vmax.f32 %v1103_v33, 0.0 }
  0x86   : > { %v1194_v45 = vmax.f32 %v1104_v35, 0.0  ;;  %v1601_v46 = vcombine.low %v1187_v36, %v1188_v38  ;;  %v752_v47 = vcombine.high %v347_v34, %v347_v34  ;;  %v759_v49 = vrot.slane %v347_v34, %v7433_v11  ;;  %v6877_v5 = vld.sshfl [vmem:[%s7438_s21 + $0xe8] sm:$0x3 pattern:$0x76325410]  ;;  %v7292_v34 = vld [vmem:[%s10221_s5 + $0x10] sm:$0xff]  }
  0x87   : > { %v1602_v50 = vcombine.low %v1189_v39, %v1190_v41  ;;  %v1618_v37 = vcombine.low %v1191_v42, %v1192_v43  ;;  %v769_v52 = vcombine.high %v348_v40, %v348_v40  ;;  %v776_v53 = vrot.slane %v348_v40, %v7433_v11  ;;  %s7343_s21 = smov 112  }
  0x88   : > { %v1609_v54 = vrot.slane %v1601_v46, %v7433_v11  ;;  %v1619_v55 = vcombine.low %v1193_v44, %v1194_v45  ;;  %v766_v56 = vrot.slane %v752_v47, %v7433_v11  ;;  %v767_v57 = vcombine.high %v759_v49, %v759_v49 }
  0x89   : > { %v1616_v48 = vrot.slane %v1602_v50, %v7433_v11  ;;  %v1626_v58 = vrot.slane %v1618_v37, %v7433_v11  ;;  %v783_v59 = vrot.slane %v769_v52, %v7433_v11  ;;  %v784_v60 = vcombine.high %v776_v53, %v776_v53 }
  0x8a   : > { %v1633_v61 = vrot.slane %v1619_v55, %v7433_v11  ;;  %v768_v63 = vcombine.high %v766_v56, %v766_v56  ;;  %v989_v0 = vmul.f32 %v6876_v51, %v7441_v12  ;;  %v990_v1 = vmul.f32 %v7459_v23, %v759_v49 }
  0x8b   : > { %v1617_v2 = vcombine.low %v1609_v54, %v1616_v48  ;;  %v991_v3 = vmul.f32 %v7444_v13, %v767_v57  ;;  %v992_v4 = vmul.f32 %v7463_v24, %v766_v56  ;;  %v994_v6 = vmul.f32 %v7459_v23, %v776_v53  ;;  %v7293_v56 = vld [vmem:[%s10221_s5 + $0x18] sm:$0xff]   ;;  %v7830_v57 = vld [vmem:[%s10221_s5] sm:$0xff]   ;;  %v7837_v48 = vld [vmem:[%s10221_s5 + $0x8] sm:$0xff]  }
  0x8c   : > { %v1634_v8 = vcombine.low %v1626_v58, %v1633_v61  ;;  %v993_v9 = vmul.f32 %v7441_v12, %v768_v63  ;;  %v995_v10 = vmul.f32 %v7444_v13, %v784_v60  ;;  %v996_v16 = vmul.f32 %v7463_v24, %v783_v59  ;;  %v7848_v58 = vld [vmem:[%s10220_s4] ss:$0 sm:$0xff] }
  0x8d   : > { %v1105_v62 = vadd.f32 %v7447_v14, %v989_v0  ;;  %v1106_v17 = vadd.f32 %v7467_v25, %v990_v1  ;;  %v1107_v18 = vadd.f32 %v7450_v15, %v991_v3  ;;  %v1108_v19 = vadd.f32 %v7471_v26, %v992_v4 }
  0x8e   : > { %v1709_v20 = vpack.c.bf16 %v1634_v8, %v1617_v2  ;;  %v1109_v21 = vadd.f32 %v7447_v14, %v993_v9  ;;  %v1110_v22 = vadd.f32 %v7467_v25, %v994_v6  ;;  %v1111_v27 = vadd.f32 %v7450_v15, %v995_v10 }
  0x8f   : > { %v1112_v13 = vadd.f32 %v7471_v26, %v996_v16  ;;  %v1195_v28 = vmax.f32 %v1105_v62, 0.0  ;;  %v1196_v24 = vmax.f32 %v1106_v17, 0.0  ;;  %v1197_v29 = vmax.f32 %v1107_v18, 0.0 }
  0x90   : > { %7038 = vmatmul.mubr.msk.bf16.gmra.mrb[16].mxu0 %vm1719_vm1, %v1709_v20  ;;  %v1198_v30 = vmax.f32 %v1108_v19, 0.0  ;;  %v1199_v31 = vmax.f32 %v1109_v21, 0.0  ;;  %v1200_v32 = vmax.f32 %v1110_v22, 0.0  ;;  %v1201_v33 = vmax.f32 %v1111_v27, 0.0 }
  0x91   : > { %v1202_v35 = vmax.f32 %v1112_v13, 0.0  ;;  %v1635_v36 = vcombine.low %v1195_v28, %v1196_v24  ;;  %v785_v15 = vcombine.high %v783_v59, %v783_v59  ;;  %v998_v38 = vmul.f32 %v6877_v5, %v7459_v23 }
  0x92   : > { %v1636_v26 = vcombine.low %v1197_v29, %v1198_v30  ;;  %v1652_v39 = vcombine.low %v1199_v31, %v1200_v32  ;;  %v10224_v44 = vmov 0.0   ;;  %v7797_v49 = vstv %s7788_s8  ;;  %s10376_s8 = smov (!%p310_p7, %s7788_s8), 15 }
  0x93   : > { %v1643_v40 = vrot.slane %v1635_v36, %v7433_v11  ;;  %v1653_v41 = vcombine.low %v1201_v33, %v1202_v35  ;;  %v997_v42 = vmul.f32 %v7441_v12, %v785_v15  ;;  %v1114_v43 = vadd.f32 %v7467_v25, %v998_v38  ;;  %7045 = vmatprep.subr.bf16.mxu0 %v10224_v44  ;;  %s6864_s24 = sshll.u32 %s10376_s8, 1 }
  0x94   : > { %v1650_v45 = vrot.slane %v1636_v26, %v7433_v11  ;;  %v1660_v46 = vrot.slane %v1652_v39, %v7433_v11  ;;  %7046 = vmatpush3.bf16.msra.mxu0 %v7292_v34  ;;  %7165 = vmatprep.subr.bf16.mxu1 %v10224_v44  ;;  %vm2339_vm2 = vcmp.eq.s32.totalorder %v7797_v49, 0  ;;  %vm2379_vm4 = vcmp.eq.s32.totalorder %v7797_v49, 17  ;;  %s9707_s10 = sadd.s32 %s6865_s9, %s6864_s24 }
  0x95   : > { %v1667_v23 = vrot.slane %v1653_v41, %v7433_v11  ;;  %v1113_v47 = vadd.f32 %v7447_v14, %v997_v42  ;;  %v1204_v12 = vmax.f32 %v1114_v43, 0.0  ;;  %7047 = vmatprep.subr.bf16.mxu0 %v10224_v44  ;;  %vm2349_vm5 = vmor %vm2330_vm3, %vm2339_vm2  ;;  %7167 = vmatpush3.bf16.msra.mxu1 %v7830_v57  ;;  %v7851_v60 = vadd.s32 16, %v7429_v7  ;;  %s6866_s25 = sshll.u32 %s9707_s10, 3 }
  0x96   : > { %v1651_v25 = vcombine.low %v1643_v40, %v1650_v45  ;;  %vm7810_vm6 = vmor %vm2349_vm5, %vm2379_vm4  ;;  %7166 = vmatprep.subr.bf16.mxu1 %v10224_v44  ;;  %7093 = vmatprep.mubr.msk.bf16.mxu1 %vm7340_vm8, %v10224_v44  ;;  %v7341_v21 = vmov 1966171168   ;;  %v7873_v38 = vadd.s32 1, %v7797_v49  ;;  %v7918_v55 = vadd.s32 5, %v7797_v49  ;;  %s9736_s12 = scalar_lea.vmem %s10223_s7, %s6866_s25 }
  0x97   : > { %v1668_v50 = vcombine.low %v1660_v46, %v1667_v23  ;;  %v1203_v37 = vmax.f32 %v1113_v47, 0.0  ;;  %vm7818_vm7 = vmor %vm2339_vm2, %vm2379_vm4  ;;  %vm2335_vm9 = vcmp.eq.s32.totalorder %v7851_v60, 17  ;;  %v2987_v22 = vunpack.c.l.s4 %v7341_v21 }
  0x98   : > { %7048 = vmatpush3.bf16.msra.mxu0 %v7293_v56  ;;  %vm2351_vm10 = vmor %vm2335_vm9, %vm2339_vm2  ;;  %vm2340_vm12 = vcmp.eq.s32.totalorder %v7873_v38, 0  ;;  %vm2380_vm13 = vcmp.eq.s32.totalorder %v7873_v38, 17  ;;  %v7936_v21 = vadd.s32 8, %v7797_v49 }
  0x99   : > { %v1710_v51 = vpack.c.bf16 %v1668_v50, %v1651_v25  ;;  %v1669_v52 = vcombine.low %v1203_v37, %v1204_v12  ;;  %7085 = vmatprep.subr.bf16.mxu0 %v10224_v44  ;;  %7168 = vmatpush3.bf16.msra.mxu1 %v7837_v48  ;;  %vm2391_vm11 = vmor %vm2351_vm10, %vm2379_vm4  ;;  %v2988_v36 = vunpack.c.0.s8 %v2987_v22  ;;  %v7882_v50 = vadd.s32 2, %v7797_v49 }
  0x9a   : > { %7125 = vmatprep.subr.bf16.mxu1 %v10224_v44  ;;  %vm2352_vm15 = vmor %vm2330_vm3, %vm2340_vm12 }
  0x9b   : > { %7041 = vmatprep.mubr.msk.bf16.mxu0 %vm1719_vm1, %v1710_v51  ;;  %v1676_v14 = vrot.slane %v1669_v52, %v7433_v11  ;;  %v7885_v51 = vsub.s32 %v2988_v36, %v7429_v7  ;;  %vm2341_vm14 = vcmp.eq.s32.totalorder %v7882_v50, 0  ;;  %vm2381_vm0 = vcmp.eq.s32.totalorder %v7882_v50, 17 }
  0x9c   : > { %vm2357_vm2 = vmor %vm2335_vm9, %vm2341_vm14 }
  0x9d   : > { %v1711_v54 = vpack.c.bf16 %v1676_v14, %v1676_v14  ;;  %vm7964_vm5 = vmor %vm2357_vm2, %vm2381_vm0 }
  0x9f   : > { %7042 = vmatmul.mubr.msk.bf16.gmra.mrb[20].mxu0 %vm1719_vm1, %v1711_v54  ;;  %vm7928_vm1 = vmor %vm2352_vm15, %vm2380_vm13 }
  0xa0   : > { %7049 = vmatprep.mubr.msk.bf16.mxu0 %vm7340_vm8, %v10224_v44  ;;  %vm8037_vm15 = vmor %vm2330_vm3, %vm2341_vm14 }
  0xa1   : > { %vm8068_vm2 = vmor %vm8037_vm15, %vm2381_vm0 }
 0x10b   : > { %v7023_v59 = vpop.f32.mrb[0].mxu0 }
 0x10c   : > { %v1803_v61 = vadd.f32 %v7023_v59, %v7848_v58  ;;  %v1794_v63 = vpop.f32.mrb[1].mxu0 }
 0x10d   : > { %v1795_v0 = vadd.f32 %v7848_v58, %v1794_v63  ;;  %v7024_v1 = vpop.f32.mrb[2].mxu0 }
 0x10e   : > { %v1890_v2 = vmax.f32 %v1803_v61, 0.0  ;;  %v1806_v3 = vadd.f32 %v7024_v1, %v7848_v58  ;;  %v1797_v4 = vpop.f32.mrb[3].mxu0 }
 0x10f   : > { %v1888_v6 = vmax.f32 %v1795_v0, 0.0  ;;  %v1798_v8 = vadd.f32 %v7848_v58, %v1797_v4  ;;  %v7908_v0 = vadd.s32 3, %v7797_v49 }
 0x110   : > { %v1968_v9 = vcombine.high %v1890_v2, %v1890_v2  ;;  %v1975_v10 = vrot.slane %v1890_v2, %v7433_v11  ;;  %v1891_v16 = vmax.f32 %v1806_v3, 0.0 }
 0x111   : > { %v1934_v62 = vcombine.high %v1888_v6, %v1888_v6  ;;  %v1941_v17 = vrot.slane %v1888_v6, %v7433_v11  ;;  %v1889_v18 = vmax.f32 %v1798_v8, 0.0  ;;  %v7914_v6 = vadd.s32 4, %v7797_v49 }
 0x112   : > { %v1982_v19 = vrot.slane %v1968_v9, %v7433_v11  ;;  %v1983_v20 = vcombine.high %v1975_v10, %v1975_v10  ;;  %v1992_v29 = vrot.slane %v1891_v16, %v7433_v11  ;;  %v2519_v30 = vrot.slane %v1975_v10, %v7433_v11 }
 0x113   : > { %v1948_v27 = vrot.slane %v1934_v62, %v7433_v11  ;;  %v1949_v5 = vcombine.high %v1941_v17, %v1941_v17  ;;  %v1951_v13 = vcombine.high %v1889_v18, %v1889_v18  ;;  %v1958_v34 = vrot.slane %v1889_v18, %v7433_v11 }
 0x114   : > { %v2520_v28 = vcombine.low %v1983_v20, %v1982_v19  ;;  %v1984_v24 = vcombine.high %v1982_v19, %v1982_v19  ;;  %v2921_v42 = vsel %vm2391_vm11, 0.0, %v2519_v30  ;;  %v1985_v46 = vcombine.high %v1891_v16, %v1891_v16  ;;  %vm2393_vm11 = vmor %vm2340_vm12, %vm2380_vm13 }
 0x115   : > { %v1950_v31 = vcombine.high %v1948_v27, %v1948_v27  ;;  %v2479_v32 = vcombine.low %v1941_v17, %v1949_v5  ;;  %v1965_v35 = vrot.slane %v1951_v13, %v7433_v11  ;;  %v1966_v40 = vcombine.high %v1958_v34, %v1958_v34 }
 0x116   : > { %v2521_v33 = vcombine.low %v1984_v24, %v1992_v29  ;;  %v2528_v26 = vrot.slane %v2520_v28, %v7433_v11  ;;  %v2950_v37 = vpack.c.bf16 %v2921_v42, %v2921_v42  ;;  %v7892_v56 = vrot.slane %v1985_v46, %v7433_v11 }
 0x117   : > { %v2480_v15 = vcombine.low %v1948_v27, %v1950_v31  ;;  %v1967_v41 = vcombine.high %v1965_v35, %v1965_v35  ;;  %v2487_v43 = vrot.slane %v2479_v32, %v7433_v11  ;;  %v2496_v47 = vcombine.low %v1958_v34, %v1966_v40 }
 0x118   : > { %v2535_v39 = vrot.slane %v2521_v33, %v7433_v11  ;;  %v2000_v59 = vcombine.high %v1992_v29, %v1992_v29  ;;  %v7898_v63 = vrot.slane %v2950_v37, %v7885_v51  ;;  %v7921_v10 = vadd.s32 6, %v7797_v49 }
 0x119   : > { %v2494_v45 = vrot.slane %v2480_v15, %v7433_v11  ;;  %v2497_v12 = vcombine.low %v1965_v35, %v1967_v41  ;;  %v2504_v52 = vrot.slane %v2496_v47, %v7433_v11  ;;  %v7924_v16 = vadd.s32 7, %v7797_v49 }
 0x11a   : > { %v7879_v23 = vcombine.low %v2528_v26, %v2535_v39  ;;  %v7911_v1 = vcombine.low %v2000_v59, %v7892_v56  ;;  %v3047_v22 = vrot.slane %v7898_v63, %v7885_v51  ;;  %v2001_v5 = vcombine.high %v7892_v56, %v7892_v56 }
 0x11b   : > { %v2495_v25 = vcombine.low %v2487_v43, %v2494_v45  ;;  %v2511_v14 = vrot.slane %v2497_v12, %v7433_v11  ;;  %v7943_v28 = vadd.s32 9, %v7797_v49  ;;  %vm2342_vm4 = vcmp.eq.s32.totalorder %v7908_v0, 0 }
 0x11c   : > { %v2545_v24 = vrot.slane %v7911_v1, %v7433_v11  ;;  %v2922_v32 = vsel %vm7928_vm1, 0.0, %v7879_v23  ;;  %vm2343_vm1 = vcmp.eq.s32.totalorder %v7914_v6, 0 }
 0x11d   : > { %v2919_v54 = vsel %vm7810_vm6, 0.0, %v2495_v25  ;;  %v2512_v61 = vcombine.low %v2504_v52, %v2511_v14  ;;  %vm2354_vm6 = vmor %vm2335_vm9, %vm2340_vm12 }
 0x11e   : > { %vm2394_vm10 = vmor %vm2354_vm6, %vm2380_vm13 }
 0x11f   : > { %v2920_v53 = vsel %vm7818_vm7, 0.0, %v2512_v61  ;;  %vm2382_vm7 = vcmp.eq.s32.totalorder %v7908_v0, 17  ;;  %vm2358_vm12 = vmor %vm2330_vm3, %vm2342_vm4 }
 0x120   : > { %v2949_v2 = vpack.c.bf16 %v2920_v53, %v2919_v54  ;;  %v6893_v3 = vpack.c.bf16 %v2920_v53, %v2920_v53  ;;  %vm8027_vm13 = vmor %vm2358_vm12, %vm2382_vm7 }
 0x121   : > { %v7027_v4 = vpop.f32.mrb[4].mxu0  ;;  %vm2396_vm6 = vmor %vm2341_vm14, %vm2381_vm0 }
 0x122   : > { %v1819_v8 = vadd.f32 %v7027_v4, %v7848_v58  ;;  %v1810_v9 = vpop.f32.mrb[5].mxu0  ;;  %v2992_v17 = vrot.slane %v2949_v2, %v7885_v51  ;;  %v2999_v18 = vrot.slane %v6893_v3, %v7885_v51  ;;  %vm8108_vm14 = vmor %vm2335_vm9, %vm2342_vm4 }
 0x123   : > { %v1811_v19 = vadd.f32 %v7848_v58, %v1810_v9  ;;  %v7028_v20 = vpop.f32.mrb[6].mxu0  ;;  %vm8126_vm0 = vmor %vm2335_vm9, %vm2343_vm1 }
 0x124   : > { %v1894_v27 = vmax.f32 %v1819_v8, 0.0  ;;  %v1813_v13 = vpop.f32.mrb[7].mxu0  ;;  %v3000_v29 = vcombine.high %v2992_v17, %v2992_v17  ;;  %v3001_v30 = vcombine.high %v2999_v18, %v2999_v18  ;;  %v1822_v31 = vadd.f32 %v7028_v20, %v7848_v58  ;;  %vm2399_vm15 = vmor %vm2342_vm4, %vm2382_vm7 }
 0x125   : > { %v1892_v34 = vmax.f32 %v1811_v19, 0.0  ;;  %v3008_v35 = vrot.slane %v2992_v17, %v7885_v51  ;;  %v3015_v36 = vrot.slane %v2999_v18, %v7885_v51  ;;  %v1814_v52 = vadd.f32 %v7848_v58, %v1813_v13 }
 0x126   : > { %v2036_v33 = vcombine.high %v1894_v27, %v1894_v27  ;;  %v2043_v49 = vrot.slane %v1894_v27, %v7433_v11  ;;  %v3022_v15 = vrot.slane %v3000_v29, %v7885_v51  ;;  %v3029_v26 = vrot.slane %v3001_v30, %v7885_v51 }
 0x127   : > { %v2002_v42 = vcombine.high %v1892_v34, %v1892_v34  ;;  %v2009_v43 = vrot.slane %v1892_v34, %v7433_v11  ;;  %v1895_v47 = vmax.f32 %v1822_v31, 0.0  ;;  %v1893_v19 = vmax.f32 %v1814_v52, 0.0 }
 0x128   : > { %v2050_v39 = vrot.slane %v2036_v33, %v7433_v11  ;;  %v2051_v40 = vcombine.high %v2043_v49, %v2043_v49  ;;  %v4149_v45 = vcombine.low %v3008_v35, %v3022_v15  ;;  %v6925_v46 = vcombine.high %v3008_v35, %v3022_v15 }
 0x129   : > { %v4151_v23 = vcombine.low %v3015_v36, %v3029_v26  ;;  %v2016_v25 = vrot.slane %v2002_v42, %v7433_v11  ;;  %v2017_v37 = vcombine.high %v2009_v43, %v2009_v43  ;;  %v6926_v14 = vcombine.high %v3015_v36, %v3029_v26 }
 0x12a   : > { %v2601_v12 = vrot.slane %v2050_v39, %v7433_v11  ;;  %v4159_v54 = vrot.slane %v4149_v45, %v7885_v51  ;;  %v4166_v56 = vrot.slane %v6925_v46, %v7885_v51  ;;  %v7979_v59 = vcombine.low %v2043_v49, %v2051_v40 }
 0x12b   : > { %v7982_v61 = vrot.slane %v4151_v23, %v7885_v51  ;;  %v2018_v1 = vcombine.high %v2016_v25, %v2016_v25  ;;  %v2538_v2 = vcombine.low %v2001_v5, %v2009_v43  ;;  %v2560_v4 = vrot.slane %v2017_v37, %v7433_v11 }
 0x12c   : > { %v2927_v53 = vsel %vm7964_vm5, 0.0, %v2601_v12  ;;  %v2052_v8 = vcombine.high %v2050_v39, %v2050_v39  ;;  %v2053_v9 = vcombine.high %v1895_v47, %v1895_v47  ;;  %v2060_v18 = vrot.slane %v1895_v47, %v7433_v11 }
 0x12d   : > { %10258 = vst [vmem:[#allocation2_spill] sm:$0xff] %v7982_v61  ;;  %v2954_v3 = vpack.c.bf16 %v2927_v53, %v2927_v53  ;;  %v2552_v62 = vrot.slane %v2538_v2, %v7433_v11  ;;  %v2561_v17 = vcombine.low %v2016_v25, %v2018_v1  ;;  %v7992_v20 = vrot.slane %v6926_v14, %v7885_v51 }
 0x12e   : > { %v2924_v5 = vsel %vm2394_vm10, 0.0, %v2560_v4  ;;  %v8000_v13 = vrot.slane %v2053_v9, %v7433_v11  ;;  %v2593_v29 = vrot.slane %v7979_v59, %v7433_v11  ;;  %v2068_v33 = vcombine.high %v2060_v18, %v2060_v18  ;;  %vm8140_vm10 = vmor %vm8108_vm14, %vm2382_vm7 }
 0x12f   : > { %10259 = vst [vmem:[#allocation3_spill] sm:$0xff] %v7992_v20  ;;  %v3166_v27 = vrot.slane %v2954_v3, %v7885_v51  ;;  %v2553_v30 = vcombine.low %v2545_v24, %v2552_v62  ;;  %v2952_v31 = vpack.c.bf16 %v2924_v5, %v2924_v5  ;;  %v2569_v49 = vrot.slane %v2561_v17, %v7433_v11 }
 0x130   : > { %v2602_v34 = vcombine.low %v2052_v8, %v2060_v18  ;;  %v2019_v35 = vcombine.high %v1893_v19, %v1893_v19  ;;  %v2026_v36 = vrot.slane %v1893_v19, %v7433_v11  ;;  %v2603_v24 = vcombine.low %v2068_v33, %v8000_v13 }
 0x131   : > { %v8007_v15 = vrot.slane %v3166_v27, %v7885_v51  ;;  %v2923_v38 = vsel %vm2393_vm11, 0.0, %v2553_v30  ;;  %v3103_v26 = vrot.slane %v2952_v31, %v7885_v51  ;;  %v2069_v46 = vcombine.high %v8000_v13, %v8000_v13 }
 0x132   : > { %v2951_v39 = vpack.c.bf16 %v2923_v38, %v2922_v32  ;;  %v6894_v40 = vpack.c.bf16 %v2923_v38, %v2923_v38  ;;  %v2610_v41 = vrot.slane %v2602_v34, %v7433_v11  ;;  %v2033_v42 = vrot.slane %v2019_v35, %v7433_v11 }
 0x133   : > { %v2617_v43 = vrot.slane %v2603_v24, %v7433_v11  ;;  %v2034_v45 = vcombine.high %v2026_v36, %v2026_v36  ;;  %v4181_v23 = vcombine.low %v4159_v54, %v4166_v56  ;;  %v8023_v25 = vrot.slane %v3103_v26, %v7885_v51 }
 0x134   : > { %v3055_v47 = vrot.slane %v2951_v39, %v7885_v51  ;;  %v3062_v12 = vrot.slane %v6894_v40, %v7885_v51  ;;  %v2035_v37 = vcombine.high %v2033_v42, %v2033_v42  ;;  %vm2383_vm5 = vcmp.eq.s32.totalorder %v7914_v6, 17 }
 0x135   : > { %v8031_v52 = vcombine.low %v2610_v41, %v2617_v43  ;;  %v2562_v54 = vcombine.low %v2026_v36, %v2034_v45  ;;  %v8044_v59 = vrot.slane %v4181_v23, %v7885_v51  ;;  %vm8150_vm11 = vmor %vm2343_vm1, %vm2383_vm5  ;;  %vm2344_vm4 = vcmp.eq.s32.totalorder %v7918_v55, 0 }
 0x136   : > { %v3063_v53 = vcombine.high %v3055_v47, %v3055_v47  ;;  %v3064_v1 = vcombine.high %v3062_v12, %v3062_v12  ;;  %v8047_v2 = vrot.slane %v3055_v47, %v7885_v51  ;;  %v8050_v3 = vrot.slane %v3062_v12, %v7885_v51  ;;  %vm2403_vm12 = vmor %vm8126_vm0, %vm2383_vm5 }
 0x137   : > { %10264 = vst [vmem:[#allocation4_spill] sm:$0xff] %v8044_v59  ;;  %v7031_v4 = vpop.f32.mrb[8].mxu0  ;;  %v2928_v8 = vsel %vm8027_vm13, 0.0, %v8031_v52  ;;  %v2576_v9 = vrot.slane %v2562_v54, %v7433_v11  ;;  %v2578_v62 = vcombine.low %v2033_v42, %v2035_v37  ;;  %vm2345_vm7 = vcmp.eq.s32.totalorder %v7921_v10, 0  ;;  %vm2364_vm14 = vmor %vm2330_vm3, %vm2344_vm4 }
 0x138   : > { %v1835_v17 = vadd.f32 %v7031_v4, %v7848_v58  ;;  %v1826_v18 = vpop.f32.mrb[9].mxu0  ;;  %v8059_v19 = vrot.slane %v3063_v53, %v7885_v51  ;;  %v8062_v27 = vrot.slane %v3064_v1, %v7885_v51  ;;  %vm2384_vm13 = vcmp.eq.s32.totalorder %v7918_v55, 17 }
 0x139   : > { %v1827_v30 = vadd.f32 %v7848_v58, %v1826_v18  ;;  %v7032_v31 = vpop.f32.mrb[10].mxu0  ;;  %v2577_v34 = vcombine.low %v2569_v49, %v2576_v9  ;;  %v2586_v35 = vrot.slane %v2578_v62, %v7433_v11 }
 0x13a   : > { %v1898_v36 = vmax.f32 %v1835_v17, 0.0  ;;  %v1838_v38 = vadd.f32 %v7032_v31, %v7848_v58  ;;  %v1829_v26 = vpop.f32.mrb[11].mxu0  ;;  %v3096_v24 = vcombine.high %v8062_v27, %v8062_v27  ;;  %v3563_v39 = vcombine.low %v8047_v2, %v8059_v19 }
 0x13b   : > { %v6906_v40 = vcombine.high %v8047_v2, %v8059_v19  ;;  %v3565_v49 = vcombine.low %v8050_v3, %v8062_v27  ;;  %v6907_v41 = vcombine.high %v8050_v3, %v8062_v27  ;;  %v2594_v42 = vcombine.low %v2586_v35, %v2593_v29 }
 0x13c   : > { %v2925_v43 = vsel %vm8068_vm2, 0.0, %v2577_v34  ;;  %v2104_v45 = vcombine.high %v1898_v36, %v1898_v36  ;;  %v8095_v23 = vcombine.low %v3096_v24, %v8023_v25  ;;  %v2111_v47 = vrot.slane %v1898_v36, %v7433_v11  ;;  %vm2361_vm2 = vmor %vm2330_vm3, %vm2343_vm1 }
 0x13d   : > { %v1896_v12 = vmax.f32 %v1827_v30, 0.0  ;;  %v1899_v37 = vmax.f32 %v1838_v38, 0.0  ;;  %v2926_v14 = vsel %vm2396_vm6, 0.0, %v2594_v42  ;;  %v1830_v50 = vadd.f32 %v7848_v58, %v1829_v26  ;;  %vm8255_vm1 = vmor %vm2361_vm2, %vm2383_vm5 }
 0x13e   : > { %v2118_v54 = vrot.slane %v2104_v45, %v7433_v11  ;;  %v8101_v53 = vrot.slane %v3563_v39, %v7885_v51  ;;  %v2953_v29 = vpack.c.bf16 %v2926_v14, %v2925_v43  ;;  %v6895_v1 = vpack.c.bf16 %v2926_v14, %v2926_v14  ;;  %vm2369_vm5 = vmor %vm2335_vm9, %vm2345_vm7 }
 0x13f   : > { %v2119_v4 = vcombine.high %v2111_v47, %v2111_v47  ;;  %v2070_v9 = vcombine.high %v1896_v12, %v1896_v12  ;;  %v2077_v17 = vrot.slane %v1896_v12, %v7433_v11  ;;  %v2121_v5 = vcombine.high %v1899_v37, %v1899_v37 }
 0x140   : > { %v2120_v62 = vcombine.high %v2118_v54, %v2118_v54  ;;  %v2128_v30 = vrot.slane %v1899_v37, %v7433_v11  ;;  %v3118_v31 = vrot.slane %v2953_v29, %v7885_v51  ;;  %v3125_v34 = vrot.slane %v6895_v1, %v7885_v51 }
 0x141   : > { %v2660_v35 = vcombine.low %v2111_v47, %v2119_v4  ;;  %v2084_v36 = vrot.slane %v2070_v9, %v7433_v11  ;;  %v2085_v26 = vcombine.high %v2077_v17, %v2077_v17  ;;  %v2619_v24 = vcombine.low %v2069_v46, %v2077_v17 }
 0x142   : > { %v2661_v38 = vcombine.low %v2118_v54, %v2120_v62  ;;  %v8120_v39 = vrot.slane %v2121_v5, %v7433_v11  ;;  %v3126_v43 = vcombine.high %v3118_v31, %v3118_v31  ;;  %v3127_v45 = vcombine.high %v3125_v34, %v3125_v34 }
 0x143   : > { %v8131_v47 = vrot.slane %v3118_v31, %v7885_v51  ;;  %v8134_v12 = vrot.slane %v3125_v34, %v7885_v51  ;;  %v2668_v46 = vrot.slane %v2660_v35, %v7433_v11  ;;  %v2086_v14 = vcombine.high %v2084_v36, %v2084_v36 }
 0x144   : > { %v2675_v37 = vrot.slane %v2661_v38, %v7433_v11  ;;  %v2620_v54 = vcombine.low %v2085_v26, %v2084_v36  ;;  %v8155_v1 = vrot.slane %v3126_v43, %v7885_v51  ;;  %v8158_v4 = vrot.slane %v3127_v45, %v7885_v51 }
 0x145   : > { %v2627_v9 = vrot.slane %v2619_v24, %v7433_v11  ;;  %v2136_v62 = vcombine.high %v2128_v30, %v2128_v30  ;;  %v2642_v5 = vrot.slane %v2086_v14, %v7433_v11  ;;  %v2683_v31 = vrot.slane %v2128_v30, %v7433_v11 }
 0x146   : > { %v2676_v17 = vcombine.low %v2668_v46, %v2675_v37  ;;  %v2634_v18 = vrot.slane %v2620_v54, %v7433_v11  ;;  %v1897_v35 = vmax.f32 %v1830_v50, 0.0  ;;  %v2137_v36 = vcombine.high %v8120_v39, %v8120_v39 }
 0x147   : > { %v8173_v34 = vcombine.low %v2136_v62, %v8120_v39  ;;  %v8178_v38 = vrot.slane %v6906_v40, %v7885_v51  ;;  %v2930_v24 = vsel %vm8140_vm10, 0.0, %v2642_v5  ;;  %v2933_v0 = vsel %vm2403_vm12, 0.0, %v2683_v31 }
 0x148   : > { %v2635_v26 = vcombine.low %v2627_v9, %v2634_v18  ;;  %v8184_v30 = vsel %vm8150_vm11, 0.0, %v2676_v17  ;;  %v2956_v42 = vpack.c.bf16 %v2930_v24, %v2930_v24  ;;  %v2958_v50 = vpack.c.bf16 %v2933_v0, %v2933_v0  ;;  %vm8298_vm11 = vmor %vm2364_vm14, %vm2384_vm13 }
 0x149   : > { %v2692_v43 = vrot.slane %v8173_v34, %v7433_v11  ;;  %v6897_v45 = vpack.c.bf16 %v8184_v30, %v8184_v30  ;;  %v2087_v40 = vcombine.high %v1897_v35, %v1897_v35  ;;  %v2094_v37 = vrot.slane %v1897_v35, %v7433_v11 }
 0x14a   : > { %v2929_v46 = vsel %vm2399_vm15, 0.0, %v2635_v26  ;;  %v8195_v13 = vrot.slane %v3565_v49, %v7885_v51  ;;  %v3229_v29 = vrot.slane %v2956_v42, %v7885_v51  ;;  %v3292_v62 = vrot.slane %v2958_v50, %v7885_v51  ;;  %vm2366_vm15 = vmor %vm2335_vm9, %vm2344_vm4 }
 0x14b   : > { %v2955_v14 = vpack.c.bf16 %v2929_v46, %v2928_v8  ;;  %v6896_v54 = vpack.c.bf16 %v2929_v46, %v2929_v46  ;;  %v3251_v9 = vrot.slane %v6897_v45, %v7885_v51  ;;  %v2101_v17 = vrot.slane %v2087_v40, %v7433_v11  ;;  %vm2406_vm2 = vmor %vm2366_vm15, %vm2384_vm13 }
 0x14c   : > { %v2102_v18 = vcombine.high %v2094_v37, %v2094_v37  ;;  %v7035_v5 = vpop.f32.mrb[12].mxu0  ;;  %v8210_v32 = vrot.slane %v6907_v41, %v7885_v51  ;;  %v8215_v49 = vrot.slane %v3229_v29, %v7885_v51  ;;  %v8222_v24 = vrot.slane %v3292_v62, %v7885_v51 }
 0x14d   : > { %v3181_v52 = vrot.slane %v2955_v14, %v7885_v51  ;;  %v3188_v8 = vrot.slane %v6896_v54, %v7885_v51  ;;  %v3253_v31 = vcombine.high %v3251_v9, %v3251_v9  ;;  %v1842_v35 = vpop.f32.mrb[13].mxu0  ;;  %v8219_v26 = vrot.slane %v3251_v9, %v7885_v51 }
 0x14e   : > { %v2103_v0 = vcombine.high %v2101_v17, %v2101_v17  ;;  %v2643_v41 = vcombine.low %v2094_v37, %v2102_v18  ;;  %v7036_v42 = vpop.f32.mrb[14].mxu0  ;;  %v1851_v9 = vadd.f32 %v7035_v5, %v7848_v58  ;;  %vm2385_vm6 = vcmp.eq.s32.totalorder %v7921_v10, 17 }
 0x14f   : > { %v3189_v50 = vcombine.high %v3181_v52, %v3181_v52  ;;  %v3190_v45 = vcombine.high %v3188_v8, %v3188_v8  ;;  %v8225_v46 = vrot.slane %v3181_v52, %v7885_v51  ;;  %v8228_v40 = vrot.slane %v3188_v8, %v7885_v51  ;;  %v1845_v14 = vpop.f32.mrb[15].mxu0  ;;  %vm2409_vm0 = vmor %vm2369_vm5, %vm2385_vm6 }
 0x150   : > { %v8232_v54 = vrot.slane %v3253_v31, %v7885_v51  ;;  %v2644_v37 = vcombine.low %v2101_v17, %v2103_v0  ;;  %v2651_v29 = vrot.slane %v2643_v41, %v7433_v11  ;;  %v1843_v52 = vadd.f32 %v7848_v58, %v1842_v35  ;;  %vm8316_vm12 = vmor %vm2345_vm7, %vm2385_vm6 }
 0x151   : > { %v8242_v62 = vrot.slane %v3189_v50, %v7885_v51  ;;  %v8245_v18 = vrot.slane %v3190_v45, %v7885_v51  ;;  %v1854_v8 = vadd.f32 %v7036_v42, %v7848_v58  ;;  %v1902_v0 = vmax.f32 %v1851_v9, 0.0  ;;  %vm8362_vm5 = vmor %vm2344_vm4, %vm2384_vm13 }
 0x152   : > { %v3285_v31 = vcombine.high %v8232_v54, %v8232_v54  ;;  %v2658_v17 = vrot.slane %v2644_v37, %v7433_v11  ;;  %v1846_v5 = vadd.f32 %v7848_v58, %v1845_v14  ;;  %v1900_v50 = vmax.f32 %v1843_v52, 0.0 }
 0x153   : > { %v1903_v45 = vmax.f32 %v1854_v8, 0.0  ;;  %v3595_v35 = vcombine.low %v8101_v53, %v8178_v38  ;;  %v3596_v42 = vcombine.low %v8195_v13, %v8210_v32  ;;  %v2172_v9 = vcombine.high %v1902_v0, %v1902_v0 }
 0x154   : > { %v8264_v56 = vcombine.low %v3285_v31, %v8222_v24  ;;  %v2659_v37 = vcombine.low %v2651_v29, %v2658_v17  ;;  %v2179_v14 = vrot.slane %v1902_v0, %v7433_v11  ;;  %v2138_v6 = vcombine.high %v1900_v50, %v1900_v50 }
 0x155   : > { %v2145_v44 = vrot.slane %v1900_v50, %v7433_v11  ;;  %v2189_v33 = vcombine.high %v1903_v45, %v1903_v45  ;;  %v2196_v52 = vrot.slane %v1903_v45, %v7433_v11  ;;  %v2186_v53 = vrot.slane %v2172_v9, %v7433_v11 }
 0x156   : > { %v2931_v8 = vsel %vm8255_vm1, 0.0, %v2659_v37  ;;  %v2187_v38 = vcombine.high %v2179_v14, %v2179_v14  ;;  %v1901_v13 = vmax.f32 %v1846_v5, 0.0  ;;  %v2152_v29 = vrot.slane %v2138_v6, %v7433_v11  ;;  %vm8352_vm1 = vmor %vm2330_vm3, %vm2345_vm7 }
 0x157   : > { %v2957_v32 = vpack.c.bf16 %v8184_v30, %v2931_v8  ;;  %v2153_v31 = vcombine.high %v2145_v44, %v2145_v44  ;;  %v2685_v17 = vcombine.low %v2137_v36, %v2145_v44  ;;  %v2188_v0 = vcombine.high %v2186_v53, %v2186_v53  ;;  %vm8395_vm4 = vmor %vm8352_vm1, %vm2385_vm6 }
 0x158   : > { %v8285_v41 = vcombine.low %v2179_v14, %v2187_v38  ;;  %v8288_v50 = vrot.slane %v2189_v33, %v7433_v11  ;;  %v2204_v5 = vcombine.high %v2196_v52, %v2196_v52  ;;  %v2154_v9 = vcombine.high %v2152_v29, %v2152_v29 }
 0x159   : > { %v3244_v30 = vrot.slane %v2957_v32, %v7885_v51  ;;  %v2699_v45 = vrot.slane %v2685_v17, %v7433_v11  ;;  %v2701_v37 = vcombine.low %v2153_v31, %v2152_v29  ;;  %vm4016_vm10 = vcmask 261120  }
 0x15a   : > { %v2740_v44 = vrot.slane %v8285_v41, %v7433_v11  ;;  %v2742_v39 = vcombine.low %v2186_v53, %v2188_v0  ;;  %v2743_v36 = vcombine.low %v2196_v52, %v2204_v5  ;;  %v2765_v14 = vrot.slane %v8288_v50, %v7433_v11 }
 0x15b   : > { %v3252_v6 = vcombine.high %v3244_v30, %v3244_v30  ;;  %v8305_v8 = vrot.slane %v3244_v30, %v7885_v51  ;;  %v2700_v38 = vcombine.low %v2692_v43, %v2699_v45  ;;  %v2709_v53 = vrot.slane %v2701_v37, %v7433_v11 }
 0x15c   : > { %v2750_v32 = vrot.slane %v2742_v39, %v7433_v11  ;;  %v2757_v29 = vrot.slane %v2743_v36, %v7433_v11  ;;  %v2939_v31 = vsel %vm2409_vm0, 0.0, %v2765_v14  ;;  %v2155_v17 = vcombine.high %v1901_v13, %v1901_v13 }
 0x15d   : > { %v8322_v0 = vrot.slane %v3252_v6, %v7885_v51  ;;  %v2934_v34 = vsel %vm8298_vm11, 0.0, %v2700_v38  ;;  %v2962_v43 = vpack.c.bf16 %v2939_v31, %v2939_v31  ;;  %v2162_v41 = vrot.slane %v1901_v13, %v7433_v11 }
 0x15e   : > { %v2758_v5 = vcombine.low %v2750_v32, %v2757_v29  ;;  %v2169_v30 = vrot.slane %v2155_v17, %v7433_v11  ;;  %v3603_v37 = vrot.slane %v3595_v35, %v7885_v51  ;;  %v3610_v14 = vrot.slane %v3596_v42, %v7885_v51 }
 0x15f   : > { %v3418_v39 = vrot.slane %v2962_v43, %v7885_v51  ;;  %v2170_v33 = vcombine.high %v2162_v41, %v2162_v41  ;;  %v2702_v36 = vcombine.low %v2154_v9, %v2162_v41  ;;  %v3094_v38 = vcombine.high %v8050_v3, %v8050_v3 }
 0x160   : > { %v2938_v13 = vsel %vm8316_vm12, 0.0, %v2758_v5  ;;  %v2171_v6 = vcombine.high %v2169_v30, %v2169_v30  ;;  %v3095_v32 = vcombine.high %v8059_v19, %v8059_v19  ;;  %v3611_v43 = vcombine.low %v3603_v37, %v3610_v14 }
 0x161   : > { %v6899_v35 = vpack.c.bf16 %v2938_v13, %v2938_v13  ;;  %v8346_v29 = vrot.slane %v3418_v39, %v7885_v51  ;;  %v2716_v9 = vrot.slane %v2702_v36, %v7433_v11  ;;  %v2724_v52 = vrot.slane %v2170_v33, %v7433_v11 }
 0x162   : > { %v2725_v17 = vcombine.low %v2169_v30, %v2171_v6  ;;  %v8370_v41 = vcombine.low %v3047_v22, %v8047_v2  ;;  %v10285_v5 = vcombine.high %v8047_v2, %v8047_v2  ;;  %v8380_v30 = vcombine.low %v3095_v32, %v8050_v3  ;;  %7050 = vmatmul.mubr.msk.bf16.vlgmr.msra.gmra.mrb[24].mxu0 %vm4016_vm10, %v3611_v43 }
 0x163   : > { %v3377_v55 = vrot.slane %v6899_v35, %v7885_v51  ;;  %v2717_v33 = vcombine.low %v2709_v53, %v2716_v9  ;;  %v2936_v36 = vsel %vm2406_vm2, 0.0, %v2724_v52  ;;  %v7039_v45 = vpop.f32.mrb[16].mxu0  ;;  %v8386_v2 = vcombine.low %v8062_v27, %v3094_v38  ;;  %7086 = vmatpush3.bf16.msra.mxu0 %v7830_v57 }
 0x164   : > { %v8376_v39 = vcombine.low %v8059_v19, %v10285_v5  ;;  %v2733_v37 = vrot.slane %v2725_v17, %v7433_v11  ;;  %v2960_v14 = vpack.c.bf16 %v2936_v36, %v2936_v36  ;;  %v1867_v63 = vadd.f32 %v7039_v45, %v7848_v58  ;;  %v1858_v22 = vpop.f32.mrb[17].mxu0 }
 0x165   : > { %v3379_v19 = vcombine.high %v3377_v55, %v3377_v55  ;;  %v8389_v6 = vrot.slane %v3377_v55, %v7885_v51  ;;  %v2935_v53 = vsel %vm8362_vm5, 0.0, %v2717_v33  ;;  %v1859_v45 = vadd.f32 %v7848_v58, %v1858_v22  ;;  %v7040_v27 = vpop.f32.mrb[18].mxu0 }
 0x166   : > { %vm2346_vm7 = vcmp.eq.s32.totalorder %v7924_v16, 0  ;;  %v10288_v38 = vmov 0.0   ;;  %v2741_v10 = vcombine.low %v2733_v37, %v2740_v44  ;;  %v2959_v32 = vpack.c.bf16 %v2935_v53, %v2934_v34  ;;  %v1861_v9 = vpop.f32.mrb[19].mxu0 }
 0x167   : > { %7053 = vmatprep.mubr.msk.bf16.mxu0 %vm7340_vm8, %v10288_v38  ;;  %v6898_v35 = vpack.c.bf16 %v2935_v53, %v2935_v53  ;;  %v3355_v42 = vrot.slane %v2960_v14, %v7885_v51  ;;  %7087 = vmatprep.subr.bf16.mxu0 %v10288_v38  ;;  %v8409_v52 = vrot.slane %v3379_v19, %v7885_v51  ;;  %v1906_v31 = vmax.f32 %v1867_v63, 0.0  ;;  %vm8466_vm0 = vmor %vm2330_vm3, %vm2346_vm7 }
 0x168   : > { %v1904_v17 = vmax.f32 %v1859_v45, 0.0  ;;  %v1870_v43 = vadd.f32 %v7040_v27, %v7848_v58  ;;  %v2937_v57 = vsel %vm8395_vm4, 0.0, %v2741_v10  ;;  %v3307_v5 = vrot.slane %v2959_v32, %v7885_v51  ;;  %7088 = vmatpush3.bf16.msra.mxu0 %v7837_v48  ;;  %vm2372_vm1 = vmor %vm2335_vm9, %vm2346_vm7 }
 0x169   : > { %v3314_v44 = vrot.slane %v6898_v35, %v7885_v51  ;;  %v8417_v34 = vrot.slane %v3355_v42, %v7885_v51  ;;  %vm2386_vm13 = vcmp.eq.s32.totalorder %v7924_v16, 17  ;;  %v3411_v55 = vcombine.high %v8409_v52, %v8409_v52 }
 0x16a   : > { %v2961_v33 = vpack.c.bf16 %v2938_v13, %v2937_v57  ;;  %v2240_v36 = vcombine.high %v1906_v31, %v1906_v31  ;;  %v2247_v37 = vrot.slane %v1906_v31, %v7433_v11  ;;  %vm2347_vm6 = vcmp.eq.s32.totalorder %v7936_v21, 0  ;;  %vm8486_vm12 = vmor %vm8466_vm0, %vm2386_vm13 }
 0x16b   : > { %v3315_v14 = vcombine.high %v3307_v5, %v3307_v5  ;;  %v3316_v63 = vcombine.high %v3314_v44, %v3314_v44  ;;  %v8426_v22 = vrot.slane %v3307_v5, %v7885_v51  ;;  %v8429_v19 = vrot.slane %v3314_v44, %v7885_v51  ;;  %vm8502_vm2 = vmor %vm2330_vm3, %vm2347_vm6 }
 0x16c   : > { %v8432_v3 = vcombine.low %v3411_v55, %v8346_v29  ;;  %v3370_v13 = vrot.slane %v2961_v33, %v7885_v51  ;;  %v2254_v53 = vrot.slane %v2240_v36, %v7433_v11  ;;  %v2255_v45 = vcombine.high %v2247_v37, %v2247_v37  ;;  %vm8531_vm4 = vmor %vm2346_vm7, %vm2386_vm13 }
 0x16d   : > { %v8437_v27 = vrot.slane %v3315_v14, %v7885_v51  ;;  %v8440_v48 = vrot.slane %v3316_v63, %v7885_v51  ;;  %v2206_v10 = vcombine.high %v1904_v17, %v1904_v17  ;;  %v2213_v32 = vrot.slane %v1904_v17, %v7433_v11  ;;  %vm8541_vm0 = vmor %vm2372_vm1, %vm2386_vm13 }
 0x16e   : > { %vm2387_vm14 = vcmp.eq.s32.totalorder %v7936_v21, 17  ;;  %v3378_v35 = vcombine.high %v3370_v13, %v3370_v13  ;;  %v8445_v42 = vrot.slane %v3370_v13, %v7885_v51  ;;  %v2256_v31 = vcombine.high %v2254_v53, %v2254_v53  ;;  %vm8568_vm13 = vmor %vm2335_vm9, %vm2347_vm6 }
 0x16f   : > { %v2807_v57 = vcombine.low %v2247_v37, %v2255_v45  ;;  %v3348_v5 = vcombine.high %v8440_v48, %v8440_v48  ;;  %v2220_v44 = vrot.slane %v2206_v10, %v7433_v11  ;;  %v2221_v55 = vcombine.high %v2213_v32, %v2213_v32  ;;  %vm8522_vm5 = vmor %vm8502_vm2, %vm2387_vm14 }
 0x170   : > { %v10289_v33 = vcombine.high %v8288_v50, %v8288_v50  ;;  %v8454_v17 = vrot.slane %v3378_v35, %v7885_v51  ;;  %v2808_v63 = vcombine.low %v2254_v53, %v2256_v31  ;;  %v1862_v53 = vadd.f32 %v7848_v58, %v1861_v9 }
 0x171   : > { %v2815_v13 = vrot.slane %v2807_v57, %v7433_v11  ;;  %v8460_v37 = vcombine.low %v3348_v5, %v8417_v34  ;;  %v2767_v50 = vcombine.low %v2221_v55, %v2220_v44  ;;  %v2222_v31 = vcombine.high %v2220_v44, %v2220_v44 }
 0x172   : > { %v2766_v36 = vcombine.low %v10289_v33, %v2213_v32  ;;  %v1907_v32 = vmax.f32 %v1870_v43, 0.0  ;;  %v2822_v35 = vrot.slane %v2808_v63, %v7433_v11  ;;  %v4208_v57 = vrot.slane %v8370_v41, %v7885_v51 }
 0x173   : > { %vm2348_vm11 = vcmp.eq.s32.totalorder %v7943_v28, 0  ;;  %v2781_v5 = vrot.slane %v2767_v50, %v7433_v11  ;;  %v4215_v55 = vrot.slane %v8376_v39, %v7885_v51  ;;  %v1905_v41 = vmax.f32 %v1862_v53, 0.0 }
 0x174   : > { %v2774_v10 = vrot.slane %v2766_v36, %v7433_v11  ;;  %v2257_v33 = vcombine.high %v1907_v32, %v1907_v32  ;;  %v2264_v14 = vrot.slane %v1907_v32, %v7433_v11  ;;  %v7043_v36 = vpop.f32.mrb[20].mxu0  ;;  %v8480_v43 = vcombine.low %v2815_v13, %v2822_v35  ;;  %vm8554_vm7 = vmor %vm2335_vm9, %vm2348_vm11 }
 0x175   : > { %v4222_v44 = vrot.slane %v8380_v30, %v7885_v51  ;;  %v4229_v63 = vrot.slane %v8386_v2, %v7885_v51  ;;  %v1874_v50 = vpop.f32.mrb[21].mxu0  ;;  %v4230_v35 = vcombine.low %v4208_v57, %v4215_v55  ;;  %vm2388_vm15 = vcmp.eq.s32.totalorder %v7943_v28, 17  ;;  %vm8582_vm9 = vmor %vm2347_vm6, %vm2387_vm14 }
 0x176   : > { %v8494_v39 = vcombine.low %v2774_v10, %v2781_v5  ;;  %v2271_v13 = vrot.slane %v2257_v33, %v7433_v11  ;;  %v2272_v32 = vcombine.high %v2264_v14, %v2264_v14  ;;  %v7044_v30 = vpop.f32.mrb[22].mxu0  ;;  %v2223_v53 = vcombine.high %v1905_v41, %v1905_v41  ;;  %vm2415_vm6 = vmor %vm8568_vm13, %vm2387_vm14 }
 0x177   : > { %v2230_v2 = vrot.slane %v1905_v41, %v7433_v11  ;;  %v4231_v10 = vcombine.low %v4222_v44, %v4229_v63  ;;  %v1883_v5 = vadd.f32 %v7043_v36, %v7848_v58  ;;  %v1877_v33 = vpop.f32.mrb[23].mxu0  ;;  %v4238_v30 = vrot.slane %v4230_v35, %v7885_v51  ;;  %v7296_v35 = vld [vmem:[%s10221_s5 + $0x20] sm:$0xff]   ;;  %vm2376_vm14 = vmor %vm2330_vm3, %vm2348_vm11 }
 0x178   : > { %v2940_v57 = vsel %vm8486_vm12, 0.0, %v8494_v39  ;;  %v2273_v55 = vcombine.high %v2271_v13, %v2271_v13  ;;  %v2824_v59 = vcombine.low %v2264_v14, %v2272_v32  ;;  %v2237_v20 = vrot.slane %v2223_v53, %v7433_v11  ;;  %vm8595_vm12 = vmor %vm8554_vm7, %vm2388_vm15 }
 0x179   : > { %v2238_v41 = vcombine.high %v2230_v2, %v2230_v2  ;;  %v2783_v44 = vcombine.low %v2222_v31, %v2230_v2  ;;  %v4245_v36 = vrot.slane %v4231_v10, %v7885_v51  ;;  %v1910_v31 = vmax.f32 %v1883_v5, 0.0  ;;  %vm8682_vm3 = vmor %vm2376_vm14, %vm2388_vm15 }
 0x17a   : > { %v2825_v14 = vcombine.low %v2271_v13, %v2273_v55  ;;  %v2832_v63 = vrot.slane %v2824_v59, %v7433_v11  ;;  %v1875_v32 = vadd.f32 %v7848_v58, %v1874_v50  ;;  %v2239_v45 = vcombine.high %v2237_v20, %v2237_v20  ;;  %vm2417_vm2 = vmor %vm2348_vm11, %vm2388_vm15 }
 0x17b   : > { %v2784_v13 = vcombine.low %v2238_v41, %v2237_v20  ;;  %v2791_v53 = vrot.slane %v2783_v44, %v7433_v11  ;;  %v4246_v2 = vcombine.low %v4238_v30, %v4245_v36  ;;  %v8548_v5 = vrot.slane %v1910_v31, %v7433_v11 }
 0x17c   : > { %v2839_v10 = vrot.slane %v2825_v14, %v7433_v11  ;;  %v1908_v16 = vmax.f32 %v1875_v32, 0.0  ;;  %v2943_v20 = vsel %vm8522_vm5, 0.0, %v8480_v43  ;;  %v2806_v30 = vrot.slane %v2239_v45, %v7433_v11 }
 0x17d   : > { %v2798_v55 = vrot.slane %v2784_v13, %v7433_v11  ;;  %7094 = vmatmul.mubr.msk.bf16.vlgmr.msra.gmra.mrb[0].mxu1 %vm4016_vm10, %v4246_v2  ;;  %v1878_v44 = vadd.f32 %v7848_v58, %v1877_v33  ;;  %v2315_v9 = vcombine.high %v8548_v5, %v8548_v5  ;;  %v7297_v58 = vld [vmem:[%s10221_s5 + $0x28] sm:$0xff]   ;;  %v3159_v28 = vcombine.high %v8158_v4, %v8158_v4 }
 0x17e   : > { %v2840_v43 = vcombine.low %v2832_v63, %v2839_v10  ;;  %v2274_v14 = vcombine.high %v1908_v16, %v1908_v16  ;;  %v2281_v31 = vrot.slane %v1908_v16, %v7433_v11  ;;  %7126 = vmatpush3.bf16.msra.mxu1 %v7296_v35  ;;  %v2942_v63 = vsel %vm8541_vm0, 0.0, %v2806_v30  ;;  %7097 = vmatprep.mubr.msk.bf16.mxu1 %vm7340_vm8, %v10288_v38 }
 0x17f   : > { %v2799_v33 = vcombine.low %v2791_v53, %v2798_v55  ;;  %v1909_v45 = vmax.f32 %v1878_v44, 0.0  ;;  %v3157_v35 = vcombine.high %v8134_v12, %v8134_v12  ;;  %7127 = vmatprep.subr.bf16.mxu1 %v10288_v38  ;;  %v2964_v13 = vpack.c.bf16 %v2942_v63, %v2942_v63 }
 0x180   : > { %v2888_v59 = vrot.slane %v2315_v9, %v7433_v11  ;;  %v2288_v53 = vrot.slane %v2274_v14, %v7433_v11  ;;  %v2289_v2 = vcombine.high %v2281_v31, %v2281_v31  ;;  %v2847_v50 = vrot.slane %v2281_v31, %v7433_v11 }
 0x181   : > { %v2941_v10 = vsel %vm8531_vm4, 0.0, %v2799_v33  ;;  %v2944_v16 = vsel %vm8582_vm9, 0.0, %v2840_v43  ;;  %v2291_v55 = vcombine.high %v1909_v45, %v1909_v45  ;;  %v3481_v9 = vrot.slane %v2964_v13, %v7885_v51 }
 0x182   : > { %v2963_v30 = vpack.c.bf16 %v2941_v10, %v2940_v57  ;;  %v6900_v44 = vpack.c.bf16 %v2941_v10, %v2941_v10  ;;  %v2948_v14 = vsel %vm8595_vm12, 0.0, %v2888_v59  ;;  %7128 = vmatpush3.bf16.msra.mxu1 %v7297_v58  ;;  %v2848_v41 = vcombine.low %v2289_v2, %v2288_v53 }
 0x183   : > { %v2968_v21 = vpack.c.bf16 %v2948_v14, %v2948_v14  ;;  %v2945_v63 = vsel %vm2415_vm6, 0.0, %v2847_v50  ;;  %v2965_v36 = vpack.c.bf16 %v2944_v16, %v2943_v20  ;;  %v8621_v60 = vrot.slane %v3481_v9, %v7885_v51 }
 0x184   : > { %v3433_v39 = vrot.slane %v2963_v30, %v7885_v51  ;;  %v3440_v31 = vrot.slane %v6900_v44, %v7885_v51  ;;  %v2966_v43 = vpack.c.bf16 %v2945_v63, %v2945_v63  ;;  %v2856_v33 = vrot.slane %v2848_v41, %v7433_v11 }
 0x185   : > { %v8624_v57 = vrot.slane %v2968_v21, %v7885_v51  ;;  %v6901_v32 = vpack.c.bf16 %v2944_v16, %v2944_v16  ;;  %v3502_v58 = vrot.slane %v2965_v36, %v7885_v51  ;;  %v2290_v14 = vcombine.high %v2288_v53, %v2288_v53 }
 0x186   : > { %v3441_v13 = vcombine.high %v3433_v39, %v3433_v39  ;;  %v3442_v59 = vcombine.high %v3440_v31, %v3440_v31  ;;  %v8629_v20 = vrot.slane %v3433_v39, %v7885_v51  ;;  %v8632_v2 = vrot.slane %v3440_v31, %v7885_v51 }
 0x187   : > { %10310 = vst [vmem:[#allocation5_spill] sm:$0xff] %v8624_v57  ;;  %v3509_v50 = vrot.slane %v6901_v32, %v7885_v51  ;;  %v3510_v30 = vcombine.high %v3502_v58, %v3502_v58  ;;  %v8638_v44 = vrot.slane %v3502_v58, %v7885_v51  ;;  %v3550_v9 = vrot.slane %v2966_v43, %v7885_v51 }
 0x188   : > { %v8641_v16 = vrot.slane %v3441_v13, %v7885_v51  ;;  %v8644_v36 = vrot.slane %v3442_v59, %v7885_v51  ;;  %v2298_v39 = vrot.slane %v1909_v45, %v7433_v11  ;;  %v2305_v32 = vrot.slane %v2291_v55, %v7433_v11 }
 0x189   : > { %v3511_v21 = vcombine.high %v3509_v50, %v3509_v50  ;;  %v8648_v41 = vrot.slane %v3509_v50, %v7885_v51  ;;  %v8651_v63 = vrot.slane %v3510_v30, %v7885_v51  ;;  %v8655_v31 = vrot.slane %v3550_v9, %v7885_v51 }
 0x18a   : > { %v3158_v58 = vcombine.high %v8155_v1, %v8155_v1  ;;  %v3612_v53 = vcombine.low %v8023_v25, %v8131_v47  ;;  %v2306_v13 = vcombine.high %v2298_v39, %v2298_v39  ;;  %v2849_v45 = vcombine.low %v2290_v14, %v2298_v39 }
 0x18b   : > { %v8663_v43 = vrot.slane %v3511_v21, %v7885_v51  ;;  %v10311_v59 = vcombine.high %v8131_v47, %v8131_v47  ;;  %v2307_v50 = vcombine.high %v2305_v32, %v2305_v32  ;;  %v3615_v25 = vcombine.low %v8158_v4, %v3157_v35 }
 0x18c   : > { %v3614_v30 = vcombine.low %v3158_v58, %v8134_v12  ;;  %v3622_v9 = vrot.slane %v3612_v53, %v7885_v51  ;;  %v2863_v10 = vrot.slane %v2849_v45, %v7433_v11  ;;  %v2865_v7 = vcombine.low %v2306_v13, %v2305_v32 }
 0x18d   : > { %v3613_v55 = vcombine.low %v8155_v1, %v10311_v59  ;;  %v3543_v21 = vcombine.high %v8663_v43, %v8663_v43  ;;  %v2866_v58 = vcombine.low %v2307_v50, %v8548_v5  ;;  %v3643_v53 = vrot.slane %v3615_v25, %v7885_v51 }
 0x18e   : > { %v3636_v35 = vrot.slane %v3614_v30, %v7885_v51  ;;  %v4248_v59 = vcombine.low %v8131_v47, %v8155_v1  ;;  %v2864_v32 = vcombine.low %v2856_v33, %v2863_v10  ;;  %v2873_v13 = vrot.slane %v2865_v7, %v7433_v11 }
 0x18f   : > { %v3629_v14 = vrot.slane %v3613_v55, %v7885_v51  ;;  %v8692_v45 = vcombine.low %v3543_v21, %v8655_v31  ;;  %v2880_v57 = vrot.slane %v2866_v58, %v7433_v11  ;;  %v6927_v5 = vcombine.high %v8131_v47, %v8155_v1 }
 0x190   : > { %v3645_v61 = vcombine.low %v3636_v35, %v3643_v53  ;;  %v4250_v50 = vcombine.low %v8134_v12, %v8158_v4  ;;  %v2946_v33 = vsel %vm8682_vm3, 0.0, %v2864_v32  ;;  %v4257_v30 = vrot.slane %v8095_v23, %v7885_v51 }
 0x191   : > { %v3644_v55 = vcombine.low %v3622_v9, %v3629_v14  ;;  %v4264_v25 = vrot.slane %v4248_v59, %v7885_v51  ;;  %v2881_v9 = vcombine.low %v2873_v13, %v2880_v57  ;;  %v4271_v1 = vrot.slane %v6927_v5, %v7885_v51 }
 0x192   : > { %v3659_v47 = vrot.slane %v3645_v61, %v7885_v51  ;;  %v4278_v21 = vrot.slane %v4250_v50, %v7885_v51  ;;  %v3662_v14 = vcombine.low %v8225_v46, %v8242_v62  ;;  %v6908_v39 = vcombine.high %v8225_v46, %v8242_v62 }
 0x193   : > { %v3652_v10 = vrot.slane %v3644_v55, %v7885_v51  ;;  %v4279_v7 = vcombine.low %v4257_v30, %v4264_v25  ;;  %v2947_v23 = vsel %vm2417_vm2, 0.0, %v2881_v9  ;;  %v4804_v57 = vcombine.low %v4264_v25, %v4271_v1 }
 0x194   : > { %v4280_v35 = vcombine.low %v4271_v1, %v4278_v21  ;;  %v2967_v53 = vpack.c.bf16 %v2947_v23, %v2946_v33  ;;  %v6944_v61 = vpack.c.bf16 %v2947_v23, %v2947_v23  ;;  %v3661_v32 = vcombine.low %v3159_v28, %v8007_v15 }
 0x195   : > { %v3660_v58 = vcombine.low %v3652_v10, %v3659_v47  ;;  %v4287_v59 = vrot.slane %v4279_v7, %v7885_v51  ;;  %v8724_v55 = vrot.slane %v4804_v57, %v7885_v51  ;;  %v3664_v5 = vcombine.low %v8228_v40, %v8245_v18 }
 0x196   : > { %v4294_v13 = vrot.slane %v4280_v35, %v7885_v51  ;;  %v3678_v50 = vrot.slane %v3662_v14, %v7885_v51  ;;  %v8730_v10 = vrot.slane %v2967_v53, %v7885_v51  ;;  %v8733_v33 = vrot.slane %v6944_v61, %v7885_v51 }
 0x197   : > { %7054 = vmatmul.mubr.msk.bf16.gmra.mrb[28].mxu0 %vm4016_vm10, %v3660_v58  ;;  %v3671_v30 = vrot.slane %v3661_v32, %v7885_v51  ;;  %v3685_v25 = vrot.slane %v6908_v39, %v7885_v51  ;;  %v3692_v47 = vrot.slane %v3664_v5, %v7885_v51  ;;  %v3219_v1 = vcombine.high %v8225_v46, %v8225_v46 }
 0x198   : > { %7057 = vmatprep.mubr.msk.bf16.mxu0 %vm7340_vm8, %v10288_v38  ;;  %v4295_v9 = vcombine.low %v4287_v59, %v4294_v13  ;;  %v3221_v7 = vcombine.high %v8242_v62, %v8242_v62  ;;  %v4751_v28 = vcombine.high %v8730_v10, %v8730_v10  ;;  %v4752_v14 = vcombine.high %v8733_v33, %v8733_v33 }
 0x199   : > { %v8750_v23 = vrot.slane %v8730_v10, %v7885_v51  ;;  %v3693_v39 = vcombine.low %v3671_v30, %v3678_v50  ;;  %v3694_v58 = vcombine.low %v3685_v25, %v3692_v47  ;;  %v6928_v35 = vcombine.high %v8134_v12, %v8158_v4 }
 0x19a   : > { %7098 = vmatmul.mubr.msk.bf16.gmra.mrb[4].mxu1 %vm4016_vm10, %v4295_v9  ;;  %v4297_v57 = vcombine.low %v8007_v15, %v8225_v46  ;;  %v4298_v53 = vcombine.low %v8242_v62, %v3219_v1  ;;  %v4299_v59 = vcombine.low %v3221_v7, %v8228_v40  ;;  %v3282_v32 = vcombine.high %v8305_v8, %v8305_v8 }
 0x19b   : > { %v3701_v61 = vrot.slane %v3693_v39, %v7885_v51  ;;  %7101 = vmatprep.mubr.msk.bf16.mxu1 %vm7340_vm8, %v10288_v38  ;;  %v3284_v13 = vcombine.high %v8322_v0, %v8322_v0  ;;  %v3708_v12 = vrot.slane %v3694_v58, %v7885_v51  ;;  %v4306_v4 = vrot.slane %v6928_v35, %v7885_v51 }
 0x19c   : > { %v8769_v15 = vrot.slane %v4297_v57, %v7885_v51  ;;  %v8772_v46 = vrot.slane %v4298_v53, %v7885_v51  ;;  %v8775_v62 = vrot.slane %v4299_v59, %v7885_v51  ;;  %v6909_v5 = vcombine.high %v8228_v40, %v8245_v18 }
 0x19d   : > { %v3711_v50 = vcombine.low %v8215_v49, %v8305_v8  ;;  %v3712_v30 = vcombine.low %v8322_v0, %v3282_v32  ;;  %v3709_v25 = vcombine.low %v3701_v61, %v3708_v12  ;;  %v4805_v47 = vcombine.low %v4278_v21, %v4306_v4 }
 0x19e   : > { %v4328_v9 = vcombine.low %v4306_v4, %v8769_v15  ;;  %v3713_v1 = vcombine.low %v3284_v13, %v8219_v26  ;;  %v4329_v7 = vcombine.low %v8772_v46, %v8775_v62  ;;  %v3720_v39 = vrot.slane %v6909_v5, %v7885_v51 }
 0x19f   : > { %v3727_v58 = vrot.slane %v3711_v50, %v7885_v51  ;;  %v3734_v35 = vrot.slane %v3712_v30, %v7885_v51  ;;  %7058 = vmatmul.mubr.msk.bf16.gmra.mrb[32].mxu0 %vm4016_vm10, %v3709_v25  ;;  %v8792_v53 = vrot.slane %v4805_v47, %v7885_v51  ;;  %v3220_v61 = vcombine.high %v8228_v40, %v8228_v40 }
 0x1a0   : > { %v4336_v57 = vrot.slane %v4328_v9, %v7885_v51  ;;  %v3741_v21 = vrot.slane %v3713_v1, %v7885_v51  ;;  %v4343_v59 = vrot.slane %v4329_v7, %v7885_v51  ;;  %7061 = vmatprep.mubr.msk.bf16.mxu0 %vm7340_vm8, %v10288_v38  ;;  %v3222_v13 = vcombine.high %v8245_v18, %v8245_v18 }
 0x1a1   : > { %v3742_v32 = vcombine.low %v3720_v39, %v3727_v58  ;;  %v4347_v12 = vcombine.low %v8305_v8, %v8322_v0  ;;  %v4345_v5 = vcombine.low %v8245_v18, %v3220_v61  ;;  %v6929_v50 = vcombine.high %v8305_v8, %v8322_v0 }
 0x1a2   : > { %v3743_v4 = vcombine.low %v3734_v35, %v3741_v21  ;;  %v3283_v40 = vcombine.high %v8219_v26, %v8219_v26  ;;  %v4344_v30 = vcombine.low %v4336_v57, %v4343_v59  ;;  %v4346_v9 = vcombine.low %v3222_v13, %v8215_v49 }
 0x1a3   : > { %v3750_v25 = vrot.slane %v3742_v32, %v7885_v51  ;;  %v8812_v47 = vrot.slane %v4347_v12, %v7885_v51  ;;  %v8816_v7 = vrot.slane %v4345_v5, %v7885_v51  ;;  %v8819_v18 = vrot.slane %v6929_v50, %v7885_v51 }
 0x1a4   : > { %v3757_v1 = vrot.slane %v3743_v4, %v7885_v51  ;;  %v3759_v8 = vcombine.low %v8232_v54, %v3283_v40  ;;  %7102 = vmatmul.mubr.msk.bf16.gmra.mrb[8].mxu1 %vm4016_vm10, %v4344_v30  ;;  %v8824_v0 = vrot.slane %v4346_v9, %v7885_v51  ;;  %v3761_v49 = vcombine.low %v8426_v22, %v8437_v27 }
 0x1a5   : > { %v6910_v39 = vcombine.high %v8426_v22, %v8437_v27  ;;  %v3776_v58 = vrot.slane %v8264_v56, %v7885_v51  ;;  %7105 = vmatprep.mubr.msk.bf16.mxu1 %vm7340_vm8, %v10288_v38  ;;  %v4378_v57 = vcombine.low %v8812_v47, %v8819_v18  ;;  %v3345_v61 = vcombine.high %v8426_v22, %v8426_v22 }
 0x1a6   : > { %v3758_v35 = vcombine.low %v3750_v25, %v3757_v1  ;;  %v3769_v21 = vrot.slane %v3759_v8, %v7885_v51  ;;  %v4377_v59 = vcombine.low %v8816_v7, %v8824_v0  ;;  %v3783_v32 = vrot.slane %v3761_v49, %v7885_v51 }
 0x1a7   : > { %v3790_v13 = vrot.slane %v6910_v39, %v7885_v51  ;;  %v4394_v56 = vcombine.low %v8219_v26, %v8232_v54  ;;  %v4392_v12 = vrot.slane %v4378_v57, %v7885_v51  ;;  %v6930_v5 = vcombine.high %v8219_v26, %v8232_v54 }
 0x1a8   : > { %7062 = vmatmul.mubr.msk.bf16.gmra.mrb[36].mxu0 %vm4016_vm10, %v3758_v35  ;;  %v3791_v4 = vcombine.low %v3769_v21, %v3776_v58  ;;  %v4396_v50 = vcombine.low %v8222_v24, %v8426_v22  ;;  %v4385_v40 = vrot.slane %v4377_v59, %v7885_v51  ;;  %v4397_v25 = vcombine.low %v8437_v27, %v3345_v61 }
 0x1a9   : > { %7065 = vmatprep.mubr.msk.bf16.mxu0 %vm7340_vm8, %v10288_v38  ;;  %v3792_v30 = vcombine.low %v3783_v32, %v3790_v13  ;;  %v8856_v9 = vrot.slane %v4394_v56, %v7885_v51  ;;  %v8860_v8 = vrot.slane %v6930_v5, %v7885_v51  ;;  %v3408_v24 = vcombine.high %v8445_v42, %v8445_v42 }
 0x1aa   : > { %v3799_v1 = vrot.slane %v3791_v4, %v7885_v51  ;;  %v8863_v26 = vrot.slane %v4396_v50, %v7885_v51  ;;  %v4393_v54 = vcombine.low %v4385_v40, %v4392_v12  ;;  %v8869_v49 = vrot.slane %v4397_v25, %v7885_v51 }
 0x1ab   : > { %v3806_v22 = vrot.slane %v3792_v30, %v7885_v51  ;;  %v3808_v39 = vcombine.low %v8429_v19, %v8440_v48  ;;  %v4426_v58 = vcombine.low %v8856_v9, %v8860_v8  ;;  %v6911_v35 = vcombine.high %v8429_v19, %v8440_v48 }
 0x1ac   : > { %v3811_v57 = vcombine.low %v8454_v17, %v3408_v24  ;;  %v10314_v21 = vcombine.low %v8417_v34, %v8445_v42  ;;  %7106 = vmatmul.mubr.msk.bf16.gmra.mrb[12].mxu1 %vm4016_vm10, %v4393_v54  ;;  %v4427_v32 = vcombine.low %v8863_v26, %v8869_v49  ;;  %v3346_v56 = vcombine.high %v8429_v19, %v8429_v19 }
 0x1ad   : > { %v3807_v59 = vcombine.low %v3799_v1, %v3806_v22  ;;  %v3818_v13 = vrot.slane %v3808_v39, %v7885_v51  ;;  %7109 = vmatprep.mubr.msk.bf16.mxu1 %vm7340_vm8, %v10288_v38  ;;  %v4434_v12 = vrot.slane %v4426_v58, %v7885_v51  ;;  %v3825_v4 = vrot.slane %v6911_v35, %v7885_v51 }
 0x1ae   : > { %v3832_v61 = vrot.slane %v10314_v21, %v7885_v51  ;;  %v3839_v34 = vrot.slane %v3811_v57, %v7885_v51  ;;  %v3347_v5 = vcombine.high %v8437_v27, %v8437_v27  ;;  %v4441_v50 = vrot.slane %v4427_v32, %v7885_v51 }
 0x1af   : > { %v4444_v40 = vcombine.low %v8440_v48, %v3346_v56  ;;  %v4446_v30 = vcombine.low %v8445_v42, %v8454_v17  ;;  %v8901_v25 = vrot.slane %v8460_v37, %v7885_v51  ;;  %v3840_v1 = vcombine.low %v3818_v13, %v3825_v4 }
 0x1b0   : > { %7066 = vmatmul.mubr.msk.bf16.gmra.mrb[40].mxu0 %vm4016_vm10, %v3807_v59  ;;  %v3841_v24 = vcombine.low %v3832_v61, %v3839_v34  ;;  %v4443_v54 = vcombine.low %v3347_v5, %v8429_v19  ;;  %v3409_v27 = vcombine.high %v8389_v6, %v8389_v6  ;;  %v4442_v22 = vcombine.low %v4434_v12, %v4441_v50 }
 0x1b1   : > { %7069 = vmatprep.mubr.msk.bf16.mxu0 %vm7340_vm8, %v10288_v38  ;;  %v8910_v48 = vrot.slane %v4444_v40, %v7885_v51  ;;  %v8913_v39 = vrot.slane %v4446_v30, %v7885_v51  ;;  %v3410_v37 = vcombine.high %v8454_v17, %v8454_v17  ;;  %v3848_v58 = vrot.slane %v3840_v1, %v7885_v51 }
 0x1b2   : > { %v3855_v19 = vrot.slane %v3841_v24, %v7885_v51  ;;  %v8920_v35 = vrot.slane %v4443_v54, %v7885_v51  ;;  %v3858_v57 = vcombine.low %v8409_v52, %v3409_v27  ;;  %v3860_v59 = vcombine.low %v8629_v20, %v8641_v16 }
 0x1b3   : > { %v4476_v21 = vcombine.low %v8901_v25, %v8913_v39  ;;  %v3857_v61 = vcombine.low %v3410_v37, %v8389_v6  ;;  %v3881_v32 = vrot.slane %v8432_v3, %v7885_v51  ;;  %v6931_v4 = vcombine.high %v8445_v42, %v8454_v17 }
 0x1b4   : > { %v3856_v13 = vcombine.low %v3848_v58, %v3855_v19  ;;  %v4475_v56 = vcombine.low %v8920_v35, %v8910_v48  ;;  %v3874_v12 = vrot.slane %v3858_v57, %v7885_v51  ;;  %7110 = vmatmul.mubr.msk.bf16.gmra.mrb[16].mxu1 %vm4016_vm10, %v4442_v22  ;;  %v3888_v50 = vrot.slane %v3860_v59, %v7885_v51 }
 0x1b5   : > { %v4490_v34 = vrot.slane %v4476_v21, %v7885_v51  ;;  %v3867_v5 = vrot.slane %v3857_v61, %v7885_v51  ;;  %v4493_v3 = vcombine.low %v8389_v6, %v8409_v52  ;;  %7113 = vmatprep.mubr.msk.bf16.mxu1 %vm7340_vm8, %v10288_v38  ;;  %v6932_v30 = vcombine.high %v8389_v6, %v8409_v52 }
 0x1b6   : > { %v4483_v40 = vrot.slane %v4475_v56, %v7885_v51  ;;  %v4495_v42 = vcombine.low %v8346_v29, %v8629_v20  ;;  %v8949_v17 = vrot.slane %v6931_v4, %v7885_v51  ;;  %v3890_v24 = vcombine.low %v3881_v32, %v3888_v50 }
 0x1b7   : > { %v3889_v1 = vcombine.low %v3867_v5, %v3874_v12  ;;  %v8952_v54 = vrot.slane %v4493_v3, %v7885_v51  ;;  %v6912_v27 = vcombine.high %v8629_v20, %v8641_v16  ;;  %v8958_v37 = vrot.slane %v6932_v30, %v7885_v51 }
 0x1b8   : > { %7070 = vmatmul.mubr.msk.bf16.gmra.mrb[44].mxu0 %vm4016_vm10, %v3856_v13  ;;  %v4491_v22 = vcombine.low %v4483_v40, %v4490_v34  ;;  %v8961_v6 = vrot.slane %v4495_v42, %v7885_v51  ;;  %v3907_v29 = vcombine.low %v8632_v2, %v8644_v36  ;;  %v3904_v58 = vrot.slane %v3890_v24, %v7885_v51 }
 0x1b9   : > { %7073 = vmatprep.mubr.msk.bf16.mxu0 %vm7340_vm8, %v10288_v38  ;;  %v3897_v52 = vrot.slane %v3889_v1, %v7885_v51  ;;  %v4524_v19 = vcombine.low %v8949_v17, %v8952_v54  ;;  %v6913_v57 = vcombine.high %v8632_v2, %v8644_v36  ;;  %v3909_v61 = vcombine.low %v8621_v60, %v8638_v44 }
 0x1ba   : > { %v4525_v21 = vcombine.low %v8958_v37, %v8961_v6  ;;  %v3916_v59 = vrot.slane %v6912_v27, %v7885_v51  ;;  %v3923_v32 = vrot.slane %v3907_v29, %v7885_v51  ;;  %v3471_v4 = vcombine.high %v8629_v20, %v8629_v20 }
 0x1bb   : > { %v3905_v13 = vcombine.low %v3897_v52, %v3904_v58  ;;  %v4532_v56 = vrot.slane %v4524_v19, %v7885_v51  ;;  %v3930_v12 = vrot.slane %v6913_v57, %v7885_v51  ;;  %v3937_v5 = vrot.slane %v3909_v61, %v7885_v51 }
 0x1bc   : > { %v4539_v34 = vrot.slane %v4525_v21, %v7885_v51  ;;  %v3938_v50 = vcombine.low %v3916_v59, %v3923_v32  ;;  %v3472_v3 = vcombine.high %v8632_v2, %v8632_v2  ;;  %7114 = vmatmul.mubr.msk.bf16.gmra.mrb[20].mxu1 %vm4016_vm10, %v4491_v22  ;;  %v3473_v40 = vcombine.high %v8641_v16, %v8641_v16 }
 0x1bd   : > { %v3474_v30 = vcombine.high %v8644_v36, %v8644_v36  ;;  %v4541_v42 = vcombine.low %v8641_v16, %v3471_v4  ;;  %v3540_v20 = vcombine.high %v8638_v44, %v8638_v44  ;;  %7117 = vmatprep.mubr.msk.bf16.mxu1 %vm7340_vm8, %v10288_v38  ;;  %v3939_v24 = vcombine.low %v3930_v12, %v3937_v5 }
 0x1be   : > { %v4540_v1 = vcombine.low %v4532_v56, %v4539_v34  ;;  %v3946_v27 = vrot.slane %v3938_v50, %v7885_v51  ;;  %v4543_v22 = vcombine.low %v8644_v36, %v3472_v3  ;;  %v4542_v29 = vcombine.low %v3473_v40, %v8632_v2  ;;  %v10315_v50 = vld [vmem:[#allocation2_spill] sm:$0xff]  ;;  %v10316_v3 = vld [vmem:[#allocation3_spill] sm:$0xff] }
 0x1bf   : > { %v4544_v52 = vcombine.low %v3474_v30, %v8621_v60  ;;  %v4551_v58 = vrot.slane %v4541_v42, %v7885_v51  ;;  %v3541_v16 = vcombine.high %v8648_v41, %v8648_v41  ;;  %v3953_v19 = vrot.slane %v3939_v24, %v7885_v51 }
 0x1c0   : > { %7074 = vmatmul.mubr.msk.bf16.gmra.mrb[48].mxu0 %vm4016_vm10, %v3905_v13  ;;  %v9007_v57 = vrot.slane %v4543_v22, %v7885_v51  ;;  %v3542_v21 = vcombine.high %v8651_v63, %v8651_v63  ;;  %v3955_v36 = vcombine.low %v8651_v63, %v3540_v20  ;;  %v4558_v60 = vrot.slane %v4542_v29, %v7885_v51 }
 0x1c1   : > { %7077 = vmatprep.mubr.msk.bf16.mxu0 %vm7340_vm8, %v10288_v38  ;;  %v9016_v2 = vrot.slane %v4544_v52, %v7885_v51  ;;  %v3957_v61 = vcombine.low %v8663_v43, %v3541_v16  ;;  %v3986_v59 = vrot.slane %v8692_v45, %v7885_v51  ;;  %v3954_v32 = vcombine.low %v3946_v27, %v3953_v19  ;;  %v10318_v52 = vld [vmem:[#allocation4_spill] sm:$0xff] }
 0x1c2   : > { %v3956_v13 = vcombine.low %v3542_v21, %v8648_v41  ;;  %v3965_v56 = vrot.slane %v3955_v36, %v7885_v51  ;;  %v4820_v12 = vcombine.low %v8724_v55, %v8792_v53  ;;  %v4573_v4 = vcombine.low %v4551_v58, %v4558_v60 }
 0x1c3   : > { %v4574_v34 = vcombine.low %v9007_v57, %v9016_v2  ;;  %v3979_v5 = vrot.slane %v3957_v61, %v7885_v51  ;;  %v10317_v40 = vcombine.low %v10315_v50, %v10316_v3  ;;  %v4821_v42 = vcombine.low %v8769_v15, %v8772_v46 }
 0x1c4   : > { %v3972_v45 = vrot.slane %v3956_v13, %v7885_v51  ;;  %v4822_v20 = vcombine.low %v8775_v62, %v8816_v7  ;;  %v4838_v24 = vcombine.low %v8824_v0, %v8812_v47  ;;  %7118 = vmatmul.mubr.msk.bf16.gmra.mrb[24].mxu1 %vm4016_vm10, %v4540_v1  ;;  %v4581_v27 = vrot.slane %v4573_v4, %v7885_v51 }
 0x1c5   : > { %v9032_v30 = vrot.slane %v10317_v40, %v7885_v51  ;;  %v4588_v22 = vrot.slane %v4574_v34, %v7885_v51  ;;  %v3988_v29 = vcombine.low %v3979_v5, %v3986_v59  ;;  %7121 = vmatprep.mubr.msk.bf16.mxu1 %vm7340_vm8, %v10288_v38  ;;  %v9049_v46 = vrot.slane %v4821_v42, %v7885_v51 }
 0x1c6   : > { %v3987_v15 = vcombine.low %v3965_v56, %v3972_v45  ;;  %v9052_v62 = vrot.slane %v4822_v20, %v7885_v51  ;;  %v4839_v47 = vcombine.low %v8819_v18, %v8856_v9  ;;  %v9058_v1 = vrot.slane %v4838_v24, %v7885_v51 }
 0x1c7   : > { %v4197_v16 = vcombine.low %v10318_v52, %v9032_v30  ;;  %v4589_v7 = vcombine.low %v4581_v27, %v4588_v22  ;;  %v4002_v0 = vrot.slane %v3988_v29, %v7885_v51  ;;  %v4855_v19 = vcombine.low %v8860_v8, %v8863_v26 }
 0x1c8   : > { %7078 = vmatmul.mubr.msk.bf16.gmra.mrb[52].mxu0 %vm4016_vm10, %v3954_v32  ;;  %v3995_v21 = vrot.slane %v3987_v15, %v7885_v51  ;;  %v4837_v36 = vcombine.low %v9049_v46, %v9052_v62  ;;  %v9067_v61 = vrot.slane %v4839_v47, %v7885_v51  ;;  %v4856_v18 = vcombine.low %v8869_v49, %v8920_v35 }
 0x1c9   : > { %7081 = vmatprep.mubr.msk.bf16.mxu0 %vm7340_vm8, %v10288_v38  ;;  %v9074_v9 = vrot.slane %v4855_v19, %v7885_v51  ;;  %v4872_v8 = vcombine.low %v8910_v48, %v8901_v25  ;;  %v4873_v26 = vcombine.low %v8913_v39, %v8949_v17  ;;  %v4889_v59 = vcombine.low %v8952_v54, %v8958_v37 }
 0x1ca   : > { %v4003_v32 = vcombine.low %v3995_v21, %v4002_v0  ;;  %v4854_v13 = vcombine.low %v9058_v1, %v9067_v61  ;;  %v4870_v49 = vrot.slane %v4856_v18, %v7885_v51  ;;  %v4890_v35 = vcombine.low %v8961_v6, %v4551_v58 }
 0x1cb   : > { %v4880_v56 = vrot.slane %v4872_v8, %v7885_v51  ;;  %v4887_v4 = vrot.slane %v4873_v26, %v7885_v51  ;;  %v4897_v25 = vrot.slane %v4889_v59, %v7885_v51  ;;  %v4906_v48 = vcombine.low %v8638_v44, %v8651_v63 }
 0x1cc   : > { %v4871_v39 = vcombine.low %v9074_v9, %v4870_v49  ;;  %v4904_v17 = vrot.slane %v4890_v35, %v7885_v51  ;;  %v4914_v54 = vcombine.low %v4558_v60, %v9007_v57  ;;  %v6949_v37 = vcombine.high %v8638_v44, %v8651_v63  ;;  %7122 = vmatmul.mubr.msk.bf16.gmra.mrb[28].mxu1 %vm4016_vm10, %v4589_v7  ;;  %v10319_v7 = vld [vmem:[#allocation5_spill] sm:$0xff] }
 0x1cd   : > { %v4888_v6 = vcombine.low %v4880_v56, %v4887_v4  ;;  %v4913_v58 = vrot.slane %v4906_v48, %v7885_v51  ;;  %v4932_v34 = vcombine.low %v8648_v41, %v8663_v43  ;;  %v6950_v5 = vcombine.high %v8648_v41, %v8663_v43  ;;  %7129 = vmatprep.mubr.msk.bf16.mxu1 %vm7340_vm8, %v10288_v38 }
 0x1ce   : > { %v4905_v50 = vcombine.low %v4897_v25, %v4904_v17  ;;  %v4922_v57 = vrot.slane %v4914_v54, %v7885_v51  ;;  %v4934_v44 = vcombine.low %v8655_v31, %v8750_v23  ;;  %v4941_v63 = vrot.slane %v6949_v37, %v7885_v51 }
 0x1cf   : > { %v4915_v60 = vcombine.low %v9016_v2, %v4913_v58  ;;  %v4948_v3 = vrot.slane %v4932_v34, %v7885_v51  ;;  %v4955_v40 = vrot.slane %v6950_v5, %v7885_v51  ;;  %v4766_v41 = vrot.slane %v8733_v33, %v7885_v51 }
 0x1d0   : > { %7082 = vmatmul.mubr.msk.bf16.gmra.mrb[56].mxu0 %vm4016_vm10, %v4003_v32  ;;  %v4962_v43 = vrot.slane %v4934_v44, %v7885_v51  ;;  %v4773_v31 = vrot.slane %v4751_v28, %v7885_v51  ;;  %v4780_v2 = vrot.slane %v4752_v14, %v7885_v51  ;;  %v4781_v45 = vcombine.high %v8750_v23, %v8750_v23 }
 0x1d1   : > { %7089 = vmatprep.mubr.msk.bf16.mxu0 %vm7340_vm8, %v10288_v38  ;;  %v4929_v42 = vrot.slane %v4915_v60, %v7885_v51  ;;  %v4963_v20 = vcombine.low %v4941_v63, %v4948_v3  ;;  %v4782_v24 = vcombine.high %v4766_v41, %v4766_v41  ;;  %v10320_v23 = vrot.slane %v10319_v7, %v7885_v51 }
 0x1d2   : > { %v4964_v27 = vcombine.low %v4955_v40, %v4962_v43  ;;  %v4783_v22 = vcombine.high %v4773_v31, %v4773_v31  ;;  %v4784_v29 = vcombine.high %v4780_v2, %v4780_v2  ;;  %v4980_v10 = vcombine.low %v4773_v31, %v4781_v45 }
 0x1d3   : > { %v4930_v28 = vcombine.low %v4922_v57, %v4929_v42  ;;  %v4971_v15 = vrot.slane %v4963_v20, %v7885_v51  ;;  %v4982_v47 = vcombine.low %v4780_v2, %v4782_v24  ;;  %vm5582_vm15 = vcmask 1044484  }
 0x1d4   : > { %v4978_v33 = vrot.slane %v4964_v27, %v7885_v51  ;;  %v4981_v14 = vcombine.low %v4783_v22, %v4766_v41  ;;  %v4983_v0 = vcombine.low %v4784_v29, %v10320_v23  ;;  %v4990_v1 = vrot.slane %v4980_v10, %v7885_v51  ;;  %7130 = vmatmul.mubr.msk.bf16.vlgmr.msra.gmra.mrb[32].mxu1 %vm4016_vm10, %v4820_v12 }
 0x1d5   : > { %v5004_v19 = vrot.slane %v4982_v47, %v7885_v51  ;;  %7133 = vmatprep.mubr.msk.bf16.mxu1 %vm7340_vm8, %v10288_v38  ;;  %vm5584_vm5 = vcmask 1046534   ;;  %vm6741_vm0 = vcmask 130048  }
 0x1d6   : > { %v4979_v21 = vcombine.low %v4971_v15, %v4978_v33  ;;  %v4997_v61 = vrot.slane %v4981_v14, %v7885_v51  ;;  %v5011_v18 = vrot.slane %v4983_v0, %v7885_v51 }
 0x1d8   : > { %7090 = vmatmul.mubr.msk.bf16.vlgmr.msra.gmra.mrb[24].mxu0 %vm4016_vm10, %v4197_v16  ;;  %v5012_v9 = vcombine.low %v4990_v1, %v4997_v61  ;;  %v5013_v8 = vcombine.low %v5004_v19, %v5011_v18 }
 0x1da   : > { %v5020_v55 = vrot.slane %v5012_v9, %v7885_v51  ;;  %v5027_v53 = vrot.slane %v5013_v8, %v7885_v51 }
 0x1dc   : > { %v5028_v12 = vcombine.low %v5020_v55, %v5027_v53  ;;  %7134 = vmatmul.mubr.msk.bf16.gmra.mrb[0].mxu1 %vm4016_vm10, %v4837_v36 }
 0x1dd   : > { %7137 = vmatprep.mubr.msk.bf16.mxu1 %vm7340_vm8, %v10288_v38 }
 0x1e4   : > { %7138 = vmatmul.mubr.msk.bf16.gmra.mrb[4].mxu1 %vm4016_vm10, %v4854_v13 }
 0x1e5   : > { %7141 = vmatprep.mubr.msk.bf16.mxu1 %vm7340_vm8, %v10288_v38 }
 0x1ec   : > { %7142 = vmatmul.mubr.msk.bf16.gmra.mrb[8].mxu1 %vm4016_vm10, %v4871_v39 }
 0x1ed   : > { %7145 = vmatprep.mubr.msk.bf16.mxu1 %vm7340_vm8, %v10288_v38 }
 0x1f4   : > { %7146 = vmatmul.mubr.msk.bf16.gmra.mrb[12].mxu1 %vm4016_vm10, %v4888_v6 }
 0x1f5   : > { %7149 = vmatprep.mubr.msk.bf16.mxu1 %vm7340_vm8, %v10288_v38 }
 0x1fc   : > { %7150 = vmatmul.mubr.msk.bf16.gmra.mrb[16].mxu1 %vm4016_vm10, %v4905_v50 }
 0x1fd   : > { %7153 = vmatprep.mubr.msk.bf16.mxu1 %vm7340_vm8, %v10288_v38 }
 0x204   : > { %7154 = vmatmul.mubr.msk.bf16.gmra.mrb[20].mxu1 %vm4016_vm10, %v4930_v28 }
 0x205   : > { %7157 = vmatprep.mubr.msk.bf16.mxu1 %vm7340_vm8, %v10288_v38 }
 0x20c   : > { %7158 = vmatmul.mubr.msk.bf16.gmra.mrb[24].mxu1 %vm4016_vm10, %v4979_v21 }
 0x20d   : > { %7161 = vmatprep.mubr.msk.bf16.mxu1 %vm7340_vm8, %v10288_v38  ;;  %vm5579_vm8 = vcmask 1040384  }
 0x214   : > { %7162 = vmatmul.mubr.msk.bf16.gmra.mrb[28].mxu1 %vm4016_vm10, %v5028_v12  ;;  %vm5580_vm10 = vcmask 1042434  }
 0x215   : > { %vm5581_vm11 = vmor %vm5579_vm8, %vm5580_vm10 }
 0x216   : > { %vm5583_vm1 = vmor %vm5581_vm11, %vm5582_vm15 }
 0x217   : > { %vm9267_vm4 = vmor %vm5583_vm1, %vm5584_vm5 }
 0x26a   : > { %v4086_v51 = vpop.f32.mrb[28].mxu0 }
 0x26b   : > { %v7055_v30 = vpop.f32.mrb[29].mxu0 }
 0x26c   : > { %v4089_v52 = vpop.f32.mrb[30].mxu0 }
 0x26d   : > { %v7056_v16 = vpop.f32.mrb[31].mxu0 }
 0x272   : > { %v4094_v46 = vpop.f32.mrb[32].mxu0 }
 0x273   : > { %v7059_v62 = vpop.f32.mrb[33].mxu0 }
 0x274   : > { %v9174_v36 = vpop.f32.mrb[34].mxu0 }
 0x275   : > { %v7060_v26 = vpop.f32.mrb[35].mxu0 }
 0x27b   : > { %v9176_v59 = vpop.f32.mrb[36].mxu0 }
 0x27c   : > { %v7063_v32 = vpop.f32.mrb[37].mxu0 }
 0x27d   : > { %v9178_v13 = vpop.f32.mrb[38].mxu0 }
 0x27e   : > { %v7064_v49 = vpop.f32.mrb[39].mxu0 }
 0x283   : > { %v9180_v35 = vpop.f32.mrb[40].mxu0 }
 0x284   : > { %v7067_v38 = vpop.f32.mrb[41].mxu0 }
 0x285   : > { %v9182_v56 = vpop.f32.mrb[42].mxu0 }
 0x286   : > { %v7068_v4 = vpop.f32.mrb[43].mxu0 }
 0x28b   : > { %v9184_v25 = vpop.f32.mrb[44].mxu0 }
 0x28c   : > { %v7071_v48 = vpop.f32.mrb[45].mxu0 }
 0x28d   : > { %v9186_v39 = vpop.f32.mrb[46].mxu0 }
 0x28e   : > { %v7072_v17 = vpop.f32.mrb[47].mxu0 }
 0x293   : > { %v9188_v54 = vpop.f32.mrb[48].mxu0 }
 0x294   : > { %v7075_v37 = vpop.f32.mrb[49].mxu0 }
 0x295   : > { %v9190_v6 = vpop.f32.mrb[50].mxu0 }
 0x296   : > { %v7076_v58 = vpop.f32.mrb[51].mxu0 }
 0x29b   : > { %v9192_v34 = vpop.f32.mrb[52].mxu0 }
 0x29c   : > { %v7079_v5 = vpop.f32.mrb[53].mxu0 }
 0x29d   : > { %v9194_v50 = vpop.f32.mrb[54].mxu0 }
 0x29e   : > { %v7080_v57 = vpop.f32.mrb[55].mxu0 }
 0x2a3   : > { %v9196_v44 = vpop.f32.mrb[56].mxu0 }
 0x2a4   : > { %v7083_v63 = vpop.f32.mrb[57].mxu0 }
 0x2a5   : > { %v9198_v60 = vpop.f32.mrb[58].mxu0 }
 0x2a6   : > { %v7084_v3 = vpop.f32.mrb[59].mxu0 }
 0x2a7   : > { %v5102_v40 = vpop.f32.mrb[32].mxu1 }
 0x2a8   : > { %v7131_v41 = vpop.f32.mrb[33].mxu1 }
 0x2a9   : > { %v5105_v43 = vpop.f32.mrb[34].mxu1 }
 0x2aa   : > { %v7132_v31 = vpop.f32.mrb[35].mxu1 }
 0x2ab   : > { %v4663_v2 = vpop.f32.mrb[24].mxu0 }
 0x2ac   : > { %v7169_v45 = vadd.f32 %v5102_v40, %v4663_v2  ;;  %v7091_v42 = vpop.f32.mrb[25].mxu0 }
 0x2ad   : > { %v4666_v20 = vpop.f32.mrb[26].mxu0 }
 0x2ae   : > { %v5209_v24 = vcombine.high %v7169_v45, %v7169_v45  ;;  %v9201_v27 = vrot.slane %v7169_v45, %v7433_v11  ;;  %v7170_v22 = vadd.f32 %v5105_v43, %v4666_v20  ;;  %v7092_v29 = vpop.f32.mrb[27].mxu0 }
 0x2af   : > { %v5110_v28 = vpop.f32.mrb[0].mxu1 }
 0x2b0   : > { %v9204_v10 = vrot.slane %v5209_v24, %v7433_v11  ;;  %v9208_v15 = vcombine.high %v9201_v27, %v9201_v27  ;;  %v7171_v47 = vadd.f32 %v5110_v28, %v4086_v51  ;;  %v7135_v33 = vpop.f32.mrb[1].mxu1  ;;  %v9215_v0 = vrot.slane %v7170_v22, %v7433_v11 }
 0x2b1   : > { %v5113_v14 = vpop.f32.mrb[2].mxu1  ;;  %v5226_v19 = vcombine.high %v7170_v22, %v7170_v22  ;;  %v6962_v17 = vrot.slane %v9201_v27, 9 }
 0x2b2   : > { %6042 = vrot.lane.b32.xlu0 %v9208_v15, %s7342_s20  ;;  %6044 = vrot.lane.b32.xlu1 %v9204_v10, %s7342_s20  ;;  %v7172_v7 = vadd.f32 %v5113_v14, %v4089_v52  ;;  %v7136_v23 = vpop.f32.mrb[3].mxu1  ;;  %v9219_v1 = vcombine.high %v9204_v10, %v9204_v10  ;;  %v5243_v21 = vcombine.high %v7171_v47, %v7171_v47  ;;  %v5588_v32 = vrot.slane %v9208_v15, 7 }
 0x2b3   : > { %v9226_v61 = vrot.slane %v7171_v47, %v7433_v11  ;;  %v9230_v9 = vcombine.high %v9215_v0, %v9215_v0  ;;  %v9242_v30 = vrot.slane %v5226_v19, %v7433_v11  ;;  %v5591_v49 = vrot.slane %v9204_v10, 7 }
 0x2b4   : > { %v9245_v52 = vrot.slane %v5243_v21, %v7433_v11  ;;  %v9252_v16 = vrot.slane %v7172_v7, %v7433_v11  ;;  %v5260_v37 = vcombine.high %v7172_v7, %v7172_v7  ;;  %v5589_v5 = vsel %vm9267_vm4, %v6962_v17, %v5588_v32 }
 0x2b5   : > { %v5593_v57 = vrot.slane %v5591_v49, 2  ;;  %v5594_v63 = vrot.slane %v9219_v1, 7  ;;  %v9290_v40 = vcombine.high %v9242_v30, %v9242_v30  ;;  %v5590_v24 = vrot.slane %v5588_v32, 2 }
 0x2b6   : > { %6046 = vrot.lane.b32.xlu0 %v9219_v1, %s7342_s20  ;;  %6048 = vrot.lane.b32.xlu1 %v9215_v0, %s7342_s20  ;;  %v9256_v62 = vcombine.high %v9245_v52, %v9245_v52  ;;  %v9277_v58 = vcombine.high %v9252_v16, %v9252_v16  ;;  %v5597_v22 = vrot.slane %v9215_v0, 7  ;;  %v5600_v29 = vrot.slane %v9230_v9, 7 }
 0x2b7   : > { %v5118_v18 = vpop.f32.mrb[4].mxu1  ;;  %v5595_v31 = vsel %vm9267_vm4, %v5593_v57, %v5594_v63  ;;  %v5592_v33 = vsel %vm9267_vm4, %v5590_v24, %v5591_v49  ;;  %v5613_v21 = vrot.slane %v9245_v52, 7 }
 0x2b8   : > { %v9232_v8 = vadd.f32 %v5118_v18, %v4094_v46  ;;  %v7139_v55 = vpop.f32.mrb[5].mxu1  ;;  %v5602_v23 = vrot.slane %v5600_v29, 2  ;;  %v5599_v19 = vrot.slane %v5597_v22, 2 }
 0x2b9   : > { %v5121_v53 = vpop.f32.mrb[6].mxu1  ;;  %v5615_v49 = vrot.slane %v5613_v21, 2 }
 0x2ba   : > { %6056 = vrot.lane.b32.xlu1 %v9226_v61, %s7342_s20  ;;  %6050 = vrot.lane.b32.xlu0 %v9230_v9, %s7342_s20  ;;  %v9239_v12 = vadd.f32 %v5121_v53, %v9174_v36  ;;  %v7140_v51 = vpop.f32.mrb[7].mxu1  ;;  %v5601_v32 = vsel %vm9267_vm4, %v5599_v19, %v5600_v29  ;;  %v5609_v29 = vrot.slane %v9226_v61, 7 }
 0x2bb   : > { %v5603_v51 = vrot.slane %v9242_v30, 7 }
 0x2be   : > { %6058 = vrot.lane.b32.xlu0 %v9245_v52, %s7342_s20  ;;  %6052 = vrot.lane.b32.xlu1 %v9242_v30, %s7342_s20 }
 0x2bf   : > { %v5126_v46 = vpop.f32.mrb[8].mxu1 }
 0x2c0   : > { %v9259_v36 = vadd.f32 %v5126_v46, %v9176_v59  ;;  %v7143_v26 = vpop.f32.mrb[9].mxu1 }
 0x2c1   : > { %v5129_v38 = vpop.f32.mrb[10].mxu1  ;;  %v5604_v26 = vsel %vm9267_vm4, %v5602_v23, %v5603_v51 }
 0x2c2   : > { %6062 = vrot.lane.b32.xlu0 %v9252_v16, %s7342_s20  ;;  %6060 = vrot.lane.b32.xlu1 %v9256_v62, %s7342_s20  ;;  %v9272_v48 = vadd.f32 %v5129_v38, %v9178_v13  ;;  %v7144_v59 = vpop.f32.mrb[11].mxu1  ;;  %v9286_v13 = vrot.slane %v5260_v37, %v7433_v11  ;;  %v5616_v38 = vrot.slane %v9256_v62, 7  ;;  %v5622_v37 = vrot.slane %v9277_v58, 7 }
 0x2c4   : > { %v9305_v20 = vcombine.high %v9286_v13, %v9286_v13 }
 0x2c6   : > { %5786 = vrot.lane.b32.xlu0 %v5589_v5, %s7343_s21  ;;  %6064 = vrot.lane.b32.xlu1 %v9277_v58, %s7342_s20 }
 0x2c7   : > { %v5134_v3 = vpop.f32.mrb[12].mxu1 }
 0x2c8   : > { %v9293_v41 = vadd.f32 %v5134_v3, %v9180_v35  ;;  %v7147_v43 = vpop.f32.mrb[13].mxu1  ;;  %v5596_v35 = vrot.slane %v5594_v63, 2  ;;  %v5617_v63 = vsel %vm9267_vm4, %v5615_v49, %v5616_v38  ;;  %v5605_v3 = vrot.slane %v5603_v51, 2 }
 0x2c9   : > { %v5137_v2 = vpop.f32.mrb[14].mxu1  ;;  %v5606_v43 = vrot.slane %v9290_v40, 7 }
 0x2ca   : > { %5790 = vrot.lane.b32.xlu1 %v5595_v31, %s7343_s21  ;;  %6054 = vrot.lane.b32.xlu0 %v9290_v40, %s7342_s20  ;;  %v9301_v45 = vadd.f32 %v5137_v2, %v9182_v56  ;;  %v7148_v42 = vpop.f32.mrb[15].mxu1  ;;  %v9315_v56 = vcombine.high %v9226_v61, %v9226_v61  ;;  %v5598_v47 = vsel %vm9267_vm4, %v5596_v35, %v5597_v22  ;;  %v5625_v22 = vrot.slane %v9286_v13, 7 }
 0x2cb   : > { %v5607_v35 = vsel %vm9267_vm4, %v5605_v3, %v5606_v43  ;;  %v5608_v24 = vrot.slane %v5606_v43, 2 }
 0x2cc   : > { %v6963_v46 = vrot.slane %v9315_v56, 9  ;;  %v5627_v19 = vrot.slane %v5625_v22, 2 }
 0x2cd   : > { %v5610_v23 = vsel %vm9267_vm4, %v5608_v24, %v5609_v29  ;;  %v9436_v24 = vrot.slane %v9259_v36, %v7433_v11 }
 0x2ce   : > { %6068 = vrot.lane.b32.xlu1 %v9305_v20, %s7342_s20  ;;  %6066 = vrot.lane.b32.xlu0 %v9286_v13, %s7342_s20  ;;  %v5614_v59 = vsel %vm9267_vm4, %v6963_v46, %v5613_v21  ;;  %v5618_v21 = vrot.slane %v5616_v38, 2  ;;  %v5624_v46 = vrot.slane %v5622_v37, 2 }
 0x2cf   : > { %v5142_v28 = vpop.f32.mrb[16].mxu1  ;;  %10325 = vst [vmem:[#allocation4_spill] sm:$0xff] %v9436_v24 }
 0x2d0   : > { %v9322_v14 = vadd.f32 %v5142_v28, %v9184_v25  ;;  %v7151_v7 = vpop.f32.mrb[17].mxu1  ;;  %v5619_v25 = vrot.slane %v9252_v16, 7 }
 0x2d1   : > { %v5145_v18 = vpop.f32.mrb[18].mxu1 }
 0x2d2   : > { %5792 = vrot.lane.b32.xlu1 %v5598_v47, %s7343_s21  ;;  %5788 = vrot.lane.b32.xlu0 %v5592_v33, %s7343_s21  ;;  %v9328_v55 = vadd.f32 %v5145_v18, %v9186_v39  ;;  %v7152_v53 = vpop.f32.mrb[19].mxu1  ;;  %v5621_v17 = vrot.slane %v5619_v25, 2  ;;  %v5628_v47 = vrot.slane %v9305_v20, 7  ;;  %v5620_v51 = vsel %vm9267_vm4, %v5618_v21, %v5619_v25 }
 0x2d4   : > { %v5630_v25 = vrot.slane %v5628_v47, 2 }
 0x2d6   : > { %5796 = vrot.lane.b32.xlu1 %v5604_v26, %s7343_s21  ;;  %5794 = vrot.lane.b32.xlu0 %v5601_v32, %s7343_s21  ;;  %v5277_v26 = vcombine.high %v9232_v8, %v9232_v8 }
 0x2d7   : > { %v5150_v39 = vpop.f32.mrb[20].mxu1 }
 0x2d8   : > { %v9344_v5 = vadd.f32 %v5150_v39, %v9188_v54  ;;  %v7155_v57 = vpop.f32.mrb[21].mxu1  ;;  %v5623_v54 = vsel %vm9267_vm4, %v5621_v17, %v5622_v37  ;;  %v5626_v39 = vsel %vm9267_vm4, %v5624_v46, %v5625_v22 }
 0x2d9   : > { %v5153_v31 = vpop.f32.mrb[22].mxu1  ;;  %v9400_v57 = vrot.slane %v5277_v26, %v7433_v11 }
 0x2da   : > { %5804 = vrot.lane.b32.xlu1 %v5617_v63, %s7343_s21  ;;  %5802 = vrot.lane.b32.xlu0 %v5614_v59, %s7343_s21  ;;  %v9352_v2 = vadd.f32 %v5153_v31, %v9190_v6  ;;  %v7156_v42 = vpop.f32.mrb[23].mxu1  ;;  %v9364_v6 = vrot.slane %v9232_v8, %v7433_v11  ;;  %v9406_v63 = vrot.slane %v9239_v12, %v7433_v11 }
 0x2db   : > { %v9418_v43 = vcombine.high %v9400_v57, %v9400_v57 }
 0x2dc   : > { %v5631_v59 = vrot.slane %v9364_v6, 7 }
 0x2de   : > { %5808 = vrot.lane.b32.xlu1 %v5623_v54, %s7343_s21  ;;  %5798 = vrot.lane.b32.xlu0 %v5607_v35, %s7343_s21  ;;  %v5632_v3 = vsel %vm9267_vm4, %v5630_v25, %v5631_v59  ;;  %v5633_v42 = vrot.slane %v5631_v59, 2  ;;  %v5638_v35 = vrot.slane %v9418_v43, 7  ;;  %v5328_v25 = vcombine.high %v9272_v48, %v9272_v48 }
 0x2df   : > { %v5158_v28 = vpop.f32.mrb[24].mxu1  ;;  %v9475_v59 = vrot.slane %v9272_v48, %v7433_v11 }
 0x2e0   : > { %v9368_v33 = vadd.f32 %v5158_v28, %v9192_v34  ;;  %v7159_v7 = vpop.f32.mrb[25].mxu1  ;;  %v5629_v34 = vsel %vm9267_vm4, %v5627_v19, %v5628_v47  ;;  %v5640_v29 = vrot.slane %v5638_v35, 2  ;;  %v5641_v28 = vrot.slane %v9406_v63, 7 }
 0x2e1   : > { %v5161_v18 = vpop.f32.mrb[26].mxu1  ;;  %v6964_v7 = vrot.slane %v9400_v57, 9  ;;  %10326 = vst [vmem:[#allocation5_spill] sm:$0xff] %v9475_v59 }
 0x2e2   : > { %5800 = vrot.lane.b32.xlu1 %v5610_v23, %s7343_s21  ;;  %6070 = vrot.lane.b32.xlu0 %v9364_v6, %s7342_s20  ;;  %v9376_v61 = vadd.f32 %v5161_v18, %v9194_v50  ;;  %v7160_v53 = vpop.f32.mrb[27].mxu1  ;;  %v5292_v50 = vcombine.high %v9364_v6, %v9364_v6  ;;  %v5642_v19 = vsel %vm9267_vm4, %v5640_v29, %v5641_v28 }
 0x2e3   : > { %v5639_v21 = vsel %vm9267_vm4, %v6964_v7, %v5638_v35  ;;  %v5643_v53 = vrot.slane %v5641_v28, 2  ;;  %v5663_v35 = vrot.slane %v9475_v59, 7 }
 0x2e4   : > { %v5634_v31 = vrot.slane %v5292_v50, 7 }
 0x2e6   : > { %5812 = vrot.lane.b32.xlu1 %v5629_v34, %s7343_s21  ;;  %5806 = vrot.lane.b32.xlu0 %v5620_v51, %s7343_s21  ;;  %v5635_v54 = vsel %vm9267_vm4, %v5633_v42, %v5634_v31  ;;  %v5311_v34 = vcombine.high %v9259_v36, %v9259_v36  ;;  %v5653_v36 = vrot.slane %v9436_v24, 7 }
 0x2e7   : > { %v5166_v32 = vpop.f32.mrb[28].mxu1 }
 0x2e8   : > { %v9389_v49 = vadd.f32 %v5166_v32, %v9196_v44  ;;  %v7163_v38 = vpop.f32.mrb[29].mxu1  ;;  %v5294_v44 = vcombine.high %v9239_v12, %v9239_v12  ;;  %v9426_v12 = vcombine.high %v9406_v63, %v9406_v63 }
 0x2e9   : > { %v5169_v17 = vpop.f32.mrb[30].mxu1 }
 0x2ea   : > { %10323 = vst [vmem:[#allocation2_spill] sm:$0xff] %v9389_v49  ;;  %6072 = vrot.lane.b32.xlu1 %v5292_v50, %s7342_s20  ;;  %5810 = vrot.lane.b32.xlu0 %v5626_v39, %s7343_s21  ;;  %v9397_v8 = vadd.f32 %v5169_v17, %v9198_v60  ;;  %v7164_v37 = vpop.f32.mrb[31].mxu1  ;;  %v9414_v60 = vrot.slane %v5294_v44, %v7433_v11  ;;  %v5644_v47 = vrot.slane %v9426_v12, 7 }
 0x2eb   : > { %v5325_v50 = vrot.slane %v5311_v34, %v7433_v11  ;;  %v9479_v17 = vcombine.high %v9436_v24, %v9436_v24  ;;  %v9487_v44 = vrot.slane %v5328_v25, %v7433_v11  ;;  %v5362_v25 = vcombine.high %v9301_v45, %v9301_v45 }
 0x2ec   : > { %10324 = vst [vmem:[#allocation3_spill] sm:$0xff] %v9397_v8  ;;  %v9440_v22 = vcombine.high %v9414_v60, %v9414_v60  ;;  %v5647_v23 = vrot.slane %v9414_v60, 7  ;;  %v5646_v18 = vrot.slane %v5644_v47, 2  ;;  %v5645_v46 = vsel %vm9267_vm4, %v5643_v53, %v5644_v47 }
 0x2ed   : > { %10327 = vst [vmem:[#allocation6_spill] sm:$0xff] %v9479_v17  ;;  %10328 = vst [vmem:[#allocation7_spill] sm:$0xff] %v9487_v44  ;;  %v5656_v48 = vrot.slane %v9479_v17, 7  ;;  %v9500_v31 = vcombine.high %v9487_v44, %v9487_v44  ;;  %v9503_v29 = vcombine.high %v5325_v50, %v5325_v50  ;;  %v5659_v28 = vrot.slane %v5325_v50, 7 }
 0x2ee   : > { %6076 = vrot.lane.b32.xlu1 %v9406_v63, %s7342_s20  ;;  %5814 = vrot.lane.b32.xlu0 %v5632_v3, %s7343_s21  ;;  %v5648_v51 = vsel %vm9267_vm4, %v5646_v18, %v5647_v23  ;;  %v5649_v26 = vrot.slane %v5647_v23, 2  ;;  %v5650_v32 = vrot.slane %v9440_v22, 7  ;;  %v9491_v3 = vcombine.high %v9475_v59, %v9475_v59 }
 0x2ef   : > { %10330 = vst [vmem:[#allocation9_spill] sm:$0xff] %v9500_v31  ;;  %v5658_v42 = vrot.slane %v5656_v48, 2  ;;  %10331 = vst [vmem:[#allocation10_spill] sm:$0xff] %v9503_v29  ;;  %v5669_v7 = vrot.slane %v9487_v44, 7  ;;  %v6965_v18 = vrot.slane %v9503_v29, 9 }
 0x2f0   : > { %v5651_v38 = vsel %vm9267_vm4, %v5649_v26, %v5650_v32  ;;  %v5652_v39 = vrot.slane %v5650_v32, 2  ;;  %10329 = vst [vmem:[#allocation8_spill] sm:$0xff] %v9491_v3  ;;  %v5666_v47 = vrot.slane %v9491_v3, 7  ;;  %v5345_v26 = vcombine.high %v9293_v41, %v9293_v41 }
 0x2f1   : > { %v5660_v23 = vsel %vm9267_vm4, %v5658_v42, %v5659_v28  ;;  %v5664_v34 = vsel %vm9267_vm4, %v6965_v18, %v5663_v35  ;;  %v9529_v32 = vrot.slane %v9293_v41, %v7433_v11  ;;  %v9562_v28 = vrot.slane %v9301_v45, %v7433_v11 }
 0x2f2   : > { %6080 = vrot.lane.b32.xlu1 %v9414_v60, %s7342_s20  ;;  %6074 = vrot.lane.b32.xlu0 %v9418_v43, %s7342_s20  ;;  %v5654_v37 = vsel %vm9267_vm4, %v5652_v39, %v5653_v36  ;;  %v9537_v39 = vrot.slane %v5345_v26, %v7433_v11 }
 0x2f3   : > { %10332 = vst [vmem:[#allocation11_spill] sm:$0xff] %v9529_v32  ;;  %10335 = vst [vmem:[#allocation14_spill] sm:$0xff] %v9562_v28 }
 0x2f4   : > { %10333 = vst [vmem:[#allocation12_spill] sm:$0xff] %v9537_v39  ;;  %v5361_v42 = vcombine.high %v9537_v39, %v9537_v39 }
 0x2f6   : > { %5816 = vrot.lane.b32.xlu1 %v5635_v54, %s7343_s21  ;;  %6078 = vrot.lane.b32.xlu0 %v9426_v12, %s7342_s20  ;;  %v5655_v54 = vrot.slane %v5653_v36, 2  ;;  %v9541_v36 = vcombine.high %v9529_v32, %v9529_v32 }
 0x2f8   : > { %10334 = vst [vmem:[#allocation13_spill] sm:$0xff] %v9541_v36  ;;  %v5678_v18 = vrot.slane %v9541_v36, 7 }
 0x2fa   : > { %6084 = vrot.lane.b32.xlu1 %v9436_v24, %s7342_s20  ;;  %6082 = vrot.lane.b32.xlu0 %v9440_v22, %s7342_s20 }
 0x2fe   : > { %5820 = vrot.lane.b32.xlu1 %v5642_v19, %s7343_s21  ;;  %5818 = vrot.lane.b32.xlu0 %v5639_v21, %s7343_s21  ;;  %v5657_v19 = vsel %vm9267_vm4, %v5655_v54, %v5656_v48  ;;  %v5665_v21 = vrot.slane %v5663_v35, 2  ;;  %v5675_v35 = vrot.slane %v9529_v32, 7 }
 0x300   : > { %v5667_v53 = vsel %vm9267_vm4, %v5665_v21, %v5666_v47  ;;  %v5677_v21 = vrot.slane %v5675_v35, 2 }
 0x302   : > { %5824 = vrot.lane.b32.xlu1 %v5648_v51, %s7343_s21  ;;  %5822 = vrot.lane.b32.xlu0 %v5645_v46, %s7343_s21  ;;  %v5671_v51 = vrot.slane %v5669_v7, 2  ;;  %v5672_v46 = vrot.slane %v9500_v31, 7  ;;  %v5679_v26 = vsel %vm9267_vm4, %v5677_v21, %v5678_v18 }
 0x304   : > { %v5674_v54 = vrot.slane %v5672_v46, 2 }
 0x306   : > { %6088 = vrot.lane.b32.xlu1 %v5325_v50, %s7342_s20  ;;  %5826 = vrot.lane.b32.xlu0 %v5651_v38, %s7343_s21  ;;  %v5673_v50 = vsel %vm9267_vm4, %v5671_v51, %v5672_v46  ;;  %v5668_v38 = vrot.slane %v5666_v47, 2  ;;  %v9565_v47 = vrot.slane %v5362_v25, %v7433_v11  ;;  %v9584_v51 = vcombine.high %v9562_v28, %v9562_v28 }
 0x307   : > { %v5684_v46 = vrot.slane %v5361_v42, 7 }
 0x308   : > { %v5670_v41 = vsel %vm9267_vm4, %v5668_v38, %v5669_v7  ;;  %10336 = vst [vmem:[#allocation15_spill] sm:$0xff] %v9565_v47  ;;  %10337 = vst [vmem:[#allocation16_spill] sm:$0xff] %v9584_v51  ;;  %v9597_v25 = vcombine.high %v9565_v47, %v9565_v47 }
 0x30a   : > { %5828 = vrot.lane.b32.xlu1 %v5654_v37, %s7343_s21  ;;  %6086 = vrot.lane.b32.xlu0 %v9479_v17, %s7342_s20  ;;  %10338 = vst [vmem:[#allocation17_spill] sm:$0xff] %v9597_v25 }
 0x30e   : > { %6092 = vrot.lane.b32.xlu1 %v9491_v3, %s7342_s20  ;;  %6090 = vrot.lane.b32.xlu0 %v9475_v59, %s7342_s20 }
 0x312   : > { %6096 = vrot.lane.b32.xlu1 %v9500_v31, %s7342_s20  ;;  %6094 = vrot.lane.b32.xlu0 %v9487_v44, %s7342_s20  ;;  %v5694_v31 = vrot.slane %v9597_v25, 7 }
 0x316   : > { %5832 = vrot.lane.b32.xlu1 %v5660_v23, %s7343_s21  ;;  %5830 = vrot.lane.b32.xlu0 %v5657_v19, %s7343_s21  ;;  %v5676_v19 = vsel %vm9267_vm4, %v5674_v54, %v5675_v35  ;;  %v5680_v54 = vrot.slane %v5678_v18, 2  ;;  %v5688_v35 = vrot.slane %v9584_v51, 7  ;;  %v5691_v18 = vrot.slane %v9565_v47, 7 }
 0x31a   : > { %5836 = vrot.lane.b32.xlu1 %v5667_v53, %s7343_s21  ;;  %5834 = vrot.lane.b32.xlu0 %v5664_v34, %s7343_s21  ;;  %v5681_v53 = vrot.slane %v9537_v39, 7 }
 0x31e   : > { %5840 = vrot.lane.b32.xlu1 %v5673_v50, %s7343_s21  ;;  %6098 = vrot.lane.b32.xlu0 %v9529_v32, %s7342_s20  ;;  %v5683_v50 = vrot.slane %v5681_v53, 2 }
 0x322   : > { %6100 = vrot.lane.b32.xlu1 %v9541_v36, %s7342_s20  ;;  %5838 = vrot.lane.b32.xlu0 %v5670_v41, %s7343_s21  ;;  %v5682_v36 = vsel %vm9267_vm4, %v5680_v54, %v5681_v53 }
 0x324   : > { %v9550_v37 = vpop.permute.xlu0 %6042  ;;  %v9552_v48 = vpop.permute.xlu1 %6044 }
 0x326   : > { %6104 = vrot.lane.b32.xlu1 %v5361_v42, %s7342_s20  ;;  %6102 = vrot.lane.b32.xlu0 %v9537_v39, %s7342_s20  ;;  %v5685_v42 = vsel %vm9267_vm4, %v5683_v50, %v5684_v46  ;;  %v5690_v46 = vrot.slane %v5688_v35, 2  ;;  %v6966_v50 = vrot.slane %v9562_v28, 9 }
 0x328   : > { %v9567_v7 = vpop.permute.xlu0 %6046  ;;  %v9569_v23 = vpop.permute.xlu1 %6048  ;;  %v5692_v53 = vsel %vm9267_vm4, %v5690_v46, %v5691_v18  ;;  %v5689_v54 = vsel %vm9267_vm4, %v6966_v50, %v5688_v35  ;;  %v6970_v46 = vld [vmem:[%s10222_s6] ss:$0 sm:$0xff]  ;;  %v5396_v50 = vcombine.high %v9328_v55, %v9328_v55 }
 0x32a   : > { %6108 = vrot.lane.b32.xlu1 %v9565_v47, %s7342_s20  ;;  %5842 = vrot.lane.b32.xlu0 %v5676_v19, %s7343_s21  ;;  %v9607_v19 = vrot.slane %v9322_v14, %v7433_v11  ;;  %v5693_v47 = vrot.slane %v5691_v18, 2  ;;  %v6304_v18 = vcombine.high %v6970_v46, %v6970_v46 }
 0x32c   : > { %v9578_v45 = vpop.permute.xlu1 %6056  ;;  %v9580_v34 = vpop.permute.xlu0 %6050  ;;  %10339 = vst [vmem:[#allocation18_spill] sm:$0xff] %v9607_v19  ;;  %v5695_v35 = vsel %vm9267_vm4, %v5693_v47, %v5694_v31  ;;  %v9657_v47 = vcombine.high %v9607_v19, %v9607_v19  ;;  %v5697_v32 = vrot.slane %v9607_v19, 7 }
 0x32e   : > { %5844 = vrot.lane.b32.xlu1 %v5679_v26, %s7343_s21  ;;  %6106 = vrot.lane.b32.xlu0 %v9584_v51, %s7342_s20  ;;  %10341 = vst [vmem:[#allocation20_spill] sm:$0xff] %v9657_v47 }
 0x330   : > { %v9591_v38 = vpop.permute.xlu0 %6058  ;;  %v9593_v41 = vpop.permute.xlu1 %6052 }
 0x332   : > { %5848 = vrot.lane.b32.xlu1 %v5685_v42, %s7343_s21  ;;  %6110 = vrot.lane.b32.xlu0 %v9597_v25, %s7342_s20  ;;  %v5379_v42 = vcombine.high %v9322_v14, %v9322_v14  ;;  %v5696_v25 = vrot.slane %v5694_v31, 2  ;;  %v9676_v31 = vrot.slane %v5396_v50, %v7433_v11  ;;  %v5700_v50 = vrot.slane %v9657_v47, 7 }
 0x334   : > { %v9609_v21 = vpop.permute.xlu0 %6062  ;;  %v9611_v26 = vpop.permute.xlu1 %6060 }
 0x336   : > { %6112 = vrot.lane.b32.xlu1 %v9607_v19, %s7342_s20  ;;  %5846 = vrot.lane.b32.xlu0 %v5682_v36, %s7343_s21  ;;  %v9632_v36 = vrot.slane %v5379_v42, %v7433_v11  ;;  %v9649_v42 = vrot.slane %v9328_v55, %v7433_v11  ;;  %v9669_v55 = vrot.slane %v6304_v18, %v7433_v11 }
 0x338   : > { %v5787_v51 = vpop.permute.xlu0 %5786  ;;  %v9622_v39 = vpop.permute.xlu1 %6064  ;;  %10340 = vst [vmem:[#allocation19_spill] sm:$0xff] %v9632_v36  ;;  %v9690_v18 = vcombine.high %v9632_v36, %v9632_v36 }
 0x339   : > { %v5978_v3 = vadd.f32 %v5787_v51, %v9201_v27 }
 0x33a   : > { %5852 = vrot.lane.b32.xlu1 %v5692_v53, %s7343_s21  ;;  %5850 = vrot.lane.b32.xlu0 %v5689_v54, %s7343_s21  ;;  %10342 = vst [vmem:[#allocation21_spill] sm:$0xff] %v9690_v18 }
 0x33b   : > { %v6234_v19 = vadd.f32 %v9550_v37, %v5978_v3  ;;  %v9705_v3 = vcombine.high %v9676_v31, %v9676_v31  ;;  %v5702_v37 = vrot.slane %v5700_v50, 2 }
 0x33c   : > { %v5791_v14 = vpop.permute.xlu1 %5790  ;;  %v9634_v28 = vpop.permute.xlu0 %6054 }
 0x33d   : > { %v5980_v8 = vadd.f32 %v5791_v14, %v9204_v10  ;;  %v9684_v10 = vcombine.high %v9669_v55, %v9669_v55 }
 0x33e   : > { %6116 = vrot.lane.b32.xlu1 %v9632_v36, %s7342_s20  ;;  %5854 = vrot.lane.b32.xlu0 %v5695_v35, %s7343_s21  ;;  %v9661_v35 = vrot.slane %v6970_v46, %v7433_v11  ;;  %v5698_v46 = vsel %vm9267_vm4, %v5696_v25, %v5697_v32 }
 0x33f   : > { %v6236_v44 = vadd.f32 %v9567_v7, %v5980_v8  ;;  %v5699_v7 = vrot.slane %v5697_v32, 2 }
 0x340   : > { %v9651_v53 = vpop.permute.xlu1 %6068  ;;  %v9653_v54 = vpop.permute.xlu0 %6066  ;;  %v9680_v27 = vcombine.high %v9661_v35, %v9661_v35 }
 0x342   : > { %6120 = vrot.lane.b32.xlu1 %v9649_v42, %s7342_s20  ;;  %6114 = vrot.lane.b32.xlu0 %v9657_v47, %s7342_s20 }
 0x344   : > { %v5793_v51 = vpop.permute.xlu1 %5792  ;;  %v5789_v14 = vpop.permute.xlu0 %5788 }
 0x345   : > { %v5981_v29 = vadd.f32 %v5793_v51, %v9219_v1  ;;  %v5979_v59 = vadd.f32 %v5789_v14, %v9208_v15  ;;  %v5703_v15 = vrot.slane %v9632_v36, 7  ;;  %v5706_v51 = vrot.slane %v9690_v18, 7 }
 0x346   : > { %5856 = vrot.lane.b32.xlu1 %v5698_v46, %s7343_s21  ;;  %6118 = vrot.lane.b32.xlu0 %v9690_v18, %s7342_s20  ;;  %v6325_v14 = vadd.f32 %v9661_v35, %v6234_v19  ;;  %v5713_v19 = vrot.slane %v9676_v31, 7  ;;  %v5701_v18 = vsel %vm9267_vm4, %v5699_v7, %v5700_v50  ;;  %v5716_v50 = vrot.slane %v9705_v3, 7 }
 0x347   : > { %v6237_v25 = vadd.f32 %v9569_v23, %v5981_v29  ;;  %v6235_v49 = vadd.f32 %v9552_v48, %v5979_v59  ;;  %v6327_v29 = vadd.f32 %v9669_v55, %v6236_v44  ;;  %v9721_v23 = vcombine.high %v9649_v42, %v9649_v42 }
 0x348   : > { %v5797_v1 = vpop.permute.xlu1 %5796  ;;  %v5795_v8 = vpop.permute.xlu0 %5794  ;;  %v5705_v47 = vrot.slane %v5703_v15, 2 }
 0x349   : > { %v6328_v59 = vadd.f32 %v9684_v10, %v6237_v25  ;;  %v6326_v48 = vadd.f32 %v9680_v27, %v6235_v49  ;;  %v5983_v44 = vadd.f32 %v5797_v1, %v9230_v9  ;;  %v5982_v25 = vadd.f32 %v5795_v8, %v9215_v0 }
 0x34a   : > { %6124 = vrot.lane.b32.xlu1 %v9705_v3, %s7342_s20  ;;  %6122 = vrot.lane.b32.xlu0 %v9676_v31, %s7342_s20  ;;  %v5709_v9 = vrot.slane %v9649_v42, 7  ;;  %v6967_v1 = vrot.slane %v9721_v23, 9  ;;  %v5707_v42 = vsel %vm9267_vm4, %v5705_v47, %v5706_v51 }
 0x34b   : > { %v6454_v32 = vcombine.low %v6327_v29, %v6328_v59  ;;  %v6453_v46 = vcombine.low %v6325_v14, %v6326_v48  ;;  %v5704_v29 = vsel %vm9267_vm4, %v5702_v37, %v5703_v15  ;;  %v5708_v14 = vrot.slane %v5706_v51, 2 }
 0x34c   : > { %v5805_v49 = vpop.permute.xlu1 %5804  ;;  %v5803_v36 = vpop.permute.xlu0 %5802  ;;  %v6239_v8 = vadd.f32 %v9593_v41, %v5983_v44  ;;  %v6238_v37 = vadd.f32 %v9580_v34, %v5982_v25 }
 0x34d   : > { %v6468_v24 = vrot.slane %v6454_v32, %v7433_v11  ;;  %v6461_v17 = vrot.slane %v6453_v46, %v7433_v11  ;;  %v5987_v15 = vadd.f32 %v5805_v49, %v9245_v52  ;;  %v5986_v7 = vadd.f32 %v5803_v36, %v9315_v56 }
 0x34e   : > { %5860 = vrot.lane.b32.xlu1 %v5704_v29, %s7343_s21  ;;  %5858 = vrot.lane.b32.xlu0 %v5701_v18, %s7343_s21  ;;  %v5715_v18 = vrot.slane %v5713_v19, 2  ;;  %v5413_v52 = vcombine.high %v9344_v5, %v9344_v5  ;;  %v9760_v56 = vrot.slane %v9344_v5, %v7433_v11  ;;  %v6330_v34 = vadd.f32 %v9680_v27, %v6239_v8 }
 0x34f   : > { %v6469_v0 = vcombine.low %v6461_v17, %v6468_v24  ;;  %v5710_v17 = vsel %vm9267_vm4, %v5708_v14, %v5709_v9  ;;  %v6329_v41 = vadd.f32 %v9661_v35, %v6238_v37  ;;  %v6243_v36 = vadd.f32 %v9611_v26, %v5987_v15 }
 0x350   : > { %v5809_v59 = vpop.permute.xlu1 %5808  ;;  %v5799_v48 = vpop.permute.xlu0 %5798  ;;  %v6242_v47 = vadd.f32 %v9591_v38, %v5986_v7  ;;  %v9780_v38 = vrot.slane %v5413_v52, %v7433_v11  ;;  %v9787_v29 = vcombine.high %v9760_v56, %v9760_v56  ;;  %v9800_v37 = vrot.slane %v9352_v2, %v7433_v11 }
 0x351   : > { %6742 = vst.msk [vmem:[%s9736_s12] sm:$0xff] %vm6741_vm0, %v6469_v0  ;;  %v5984_v24 = vadd.f32 %v5799_v48, %v9242_v30  ;;  %v5714_v30 = vsel %vm9267_vm4, %v6967_v1, %v5713_v19  ;;  %v5989_v46 = vadd.f32 %v5809_v59, %v9252_v16  ;;  %v5717_v19 = vsel %vm9267_vm4, %v5715_v18, %v5716_v50 }
 0x352   : > { %5864 = vrot.lane.b32.xlu1 %v5710_v17, %s7343_s21  ;;  %5862 = vrot.lane.b32.xlu0 %v5707_v42, %s7343_s21  ;;  %v6470_v25 = vcombine.low %v6329_v41, %v6330_v34  ;;  %v6334_v16 = vadd.f32 %v9680_v27, %v6243_v36  ;;  %v5719_v59 = vrot.slane %v9760_v56, 7  ;;  %v5430_v42 = vcombine.high %v9352_v2, %v9352_v2 }
 0x353   : > { %v6240_v44 = vadd.f32 %v9634_v28, %v5984_v24  ;;  %v6333_v28 = vadd.f32 %v9661_v35, %v6242_v47  ;;  %v6245_v14 = vadd.f32 %v9622_v39, %v5989_v46  ;;  %v5445_v41 = vcombine.high %v9800_v37, %v9800_v37 }
 0x354   : > { %v5801_v51 = vpop.permute.xlu1 %5800  ;;  %v9768_v32 = vpop.permute.xlu0 %6070  ;;  %v6478_v39 = vrot.slane %v6470_v25, %v7433_v11  ;;  %v5722_v36 = vrot.slane %v9787_v29, 7  ;;  %v5718_v47 = vrot.slane %v5716_v50, 2 }
 0x355   : > { %v5985_v5 = vadd.f32 %v5801_v51, %v9290_v40  ;;  %v6331_v0 = vadd.f32 %v9669_v55, %v6240_v44  ;;  %v6487_v48 = vcombine.low %v6333_v28, %v6334_v16  ;;  %v6336_v24 = vadd.f32 %v9684_v10, %v6245_v14 }
 0x356   : > { %5868 = vrot.lane.b32.xlu1 %v5717_v19, %s7343_s21  ;;  %5866 = vrot.lane.b32.xlu0 %v5714_v30, %s7343_s21  ;;  %v5725_v51 = vrot.slane %v9780_v38, 7  ;;  %v5720_v28 = vsel %vm9267_vm4, %v5718_v47, %v5719_v59  ;;  %v9881_v47 = vrot.slane %v9368_v33, %v7433_v11 }
 0x357   : > { %v6241_v26 = vadd.f32 %v9578_v45, %v5985_v5  ;;  %v6495_v46 = vrot.slane %v6487_v48, %v7433_v11  ;;  %v5721_v5 = vrot.slane %v5719_v59, 2 }
 0x358   : > { %v5813_v40 = vpop.permute.xlu1 %5812  ;;  %v5807_v49 = vpop.permute.xlu0 %5806 }
 0x359   : > { %v6332_v9 = vadd.f32 %v9684_v10, %v6241_v26  ;;  %v5988_v1 = vadd.f32 %v5807_v49, %v9256_v62  ;;  %v9805_v62 = vcombine.high %v9780_v38, %v9780_v38  ;;  %v5991_v19 = vadd.f32 %v5813_v40, %v9286_v13 }
 0x35a   : > { %6128 = vrot.lane.b32.xlu1 %v9787_v29, %s7342_s20  ;;  %6126 = vrot.lane.b32.xlu0 %v9760_v56, %s7342_s20  ;;  %v9835_v26 = vrot.slane %v5430_v42, %v7433_v11  ;;  %v5727_v49 = vrot.slane %v5725_v51, 2  ;;  %v5723_v13 = vsel %vm9267_vm4, %v5721_v5, %v5722_v36  ;;  %v5731_v40 = vrot.slane %v9800_v37, 7 }
 0x35b   : > { %v6471_v45 = vcombine.low %v6331_v0, %v6332_v9  ;;  %v6244_v8 = vadd.f32 %v9609_v21, %v5988_v1  ;;  %v6247_v9 = vadd.f32 %v9651_v53, %v5991_v19  ;;  %v5734_v1 = vrot.slane %v5445_v41, 7 }
 0x35c   : > { %v6073_v15 = vpop.permute.xlu1 %6072  ;;  %v5811_v7 = vpop.permute.xlu0 %5810 }
 0x35d   : > { %v6485_v21 = vrot.slane %v6471_v45, %v7433_v11  ;;  %v6335_v17 = vadd.f32 %v9669_v55, %v6244_v8  ;;  %v5990_v44 = vadd.f32 %v5811_v7, %v9277_v58  ;;  %v5728_v58 = vrot.slane %v9805_v62, 7 }
 0x35e   : > { %6132 = vrot.lane.b32.xlu1 %v9805_v62, %s7342_s20  ;;  %6130 = vrot.lane.b32.xlu0 %v9780_v38, %s7342_s20  ;;  %v6338_v53 = vadd.f32 %v9680_v27, %v6247_v9 }
 0x35f   : > { %v6486_v18 = vcombine.low %v6478_v39, %v6485_v21  ;;  %v6488_v52 = vcombine.low %v6335_v17, %v6336_v24  ;;  %v6246_v14 = vadd.f32 %v9653_v54, %v5990_v44  ;;  %v5729_v39 = vsel %vm9267_vm4, %v5727_v49, %v5728_v58 }
 0x360   : > { %v9817_v30 = vpop.permute.xlu1 %6076  ;;  %v5815_v34 = vpop.permute.xlu0 %5814  ;;  %v5724_v54 = vrot.slane %v5722_v36, 2  ;;  %v5733_v24 = vrot.slane %v5731_v40, 2  ;;  %v5447_v36 = vcombine.high %v9368_v33, %v9368_v33  ;;  %v6968_v33 = vrot.slane %v9835_v26, 9 }
 0x361   : > { %6743 = vst.msk [vmem:[%s9736_s12 + $0x8] sm:$0xff] %vm6741_vm0, %v6486_v18  ;;  %v6502_v2 = vrot.slane %v6488_v52, %v7433_v11  ;;  %v5992_v0 = vadd.f32 %v5815_v34, %v9305_v20  ;;  %v9856_v20 = vcombine.high %v9835_v26, %v9835_v26  ;;  %v6337_v7 = vadd.f32 %v9661_v35, %v6246_v14 }
 0x362   : > { %6136 = vrot.lane.b32.xlu1 %v5445_v41, %s7342_s20  ;;  %6134 = vrot.lane.b32.xlu0 %v9800_v37, %s7342_s20  ;;  %v5726_v18 = vsel %vm9267_vm4, %v5724_v54, %v5725_v51  ;;  %v5730_v52 = vrot.slane %v5728_v58, 2  ;;  %v5735_v41 = vsel %vm9267_vm4, %v5733_v24, %v5734_v1 }
 0x363   : > { %v6503_v50 = vcombine.low %v6495_v46, %v6502_v2  ;;  %v6248_v59 = vadd.f32 %v9768_v32, %v5992_v0  ;;  %v6504_v32 = vcombine.low %v6337_v7, %v6338_v53  ;;  %v5738_v44 = vrot.slane %v9856_v20, 7 }
 0x364   : > { %v9837_v25 = vpop.permute.xlu1 %6080  ;;  %v6075_v16 = vpop.permute.xlu0 %6074  ;;  %v5732_v2 = vsel %vm9267_vm4, %v5730_v52, %v5731_v40  ;;  %v9896_v0 = vrot.slane %v5447_v36, %v7433_v11 }
 0x365   : > { %6744 = vst.msk [vmem:[%s9736_s12 + $0x10] sm:$0xff] %vm6741_vm0, %v6503_v50  ;;  %v6512_v5 = vrot.slane %v6504_v32, %v7433_v11  ;;  %v5740_v53 = vrot.slane %v5738_v44, 2 }
 0x366   : > { %5872 = vrot.lane.b32.xlu1 %v5723_v13, %s7343_s21  ;;  %5870 = vrot.lane.b32.xlu0 %v5720_v28, %s7343_s21  ;;  %v9929_v52 = vcombine.high %v9896_v0, %v9896_v0 }
 0x368   : > { %v5817_v45 = vpop.permute.xlu1 %5816  ;;  %v6079_v8 = vpop.permute.xlu0 %6078 }
 0x369   : > { %v5993_v48 = vadd.f32 %v5817_v45, %v9364_v6  ;;  %v6339_v6 = vadd.f32 %v9669_v55, %v6248_v59  ;;  %v9916_v59 = vcombine.high %v9881_v47, %v9881_v47 }
 0x36a   : > { %5876 = vrot.lane.b32.xlu1 %v5729_v39, %s7343_s21  ;;  %6138 = vrot.lane.b32.xlu0 %v9856_v20, %s7342_s20  ;;  %v9912_v39 = vrot.slane %v9376_v61, %v7433_v11 }
 0x36b   : > { %v6249_v21 = vadd.f32 %v6073_v15, %v5993_v48 }
 0x36c   : > { %v9865_v17 = vpop.permute.xlu1 %6084  ;;  %v9867_v42 = vpop.permute.xlu0 %6082 }
 0x36d   : > { %v6340_v34 = vadd.f32 %v9684_v10, %v6249_v21 }
 0x36e   : > { %5880 = vrot.lane.b32.xlu1 %v5735_v41, %s7343_s21  ;;  %5874 = vrot.lane.b32.xlu0 %v5726_v18, %s7343_s21  ;;  %v5744_v41 = vrot.slane %v9916_v59, 7 }
 0x36f   : > { %v6505_v15 = vcombine.low %v6339_v6, %v6340_v34 }
 0x370   : > { %v5821_v51 = vpop.permute.xlu1 %5820  ;;  %v5819_v46 = vpop.permute.xlu0 %5818 }
 0x371   : > { %v6519_v19 = vrot.slane %v6505_v15, %v7433_v11  ;;  %v5995_v50 = vadd.f32 %v5821_v51, %v9418_v43  ;;  %v5994_v28 = vadd.f32 %v5819_v46, %v9400_v57  ;;  %v5739_v43 = vsel %vm9267_vm4, %v6968_v33, %v5738_v44 }
 0x372   : > { %6140 = vrot.lane.b32.xlu1 %v9881_v47, %s7342_s20  ;;  %5878 = vrot.lane.b32.xlu0 %v5732_v2, %s7343_s21  ;;  %v9945_v2 = vcombine.high %v9912_v39, %v9912_v39  ;;  %v5746_v44 = vrot.slane %v5744_v41, 2 }
 0x373   : > { %v6520_v49 = vcombine.low %v6512_v5, %v6519_v19  ;;  %v6251_v58 = vadd.f32 %v9817_v30, %v5995_v50  ;;  %v6250_v14 = vadd.f32 %v6075_v16, %v5994_v28  ;;  %v5747_v5 = vrot.slane %v9896_v0, 7 }
 0x374   : > { %v5825_v13 = vpop.permute.xlu1 %5824  ;;  %v5823_v40 = vpop.permute.xlu0 %5822  ;;  %v5750_v50 = vrot.slane %v9929_v52, 7 }
 0x375   : > { %6745 = vst.msk [vmem:[%s9736_s12 + $0x18] sm:$0xff] %vm6741_vm0, %v6520_v49  ;;  %v6342_v57 = vadd.f32 %v9680_v27, %v6251_v58  ;;  %v6341_v9 = vadd.f32 %v9661_v35, %v6250_v14  ;;  %v5997_v1 = vadd.f32 %v5825_v13, %v9426_v12  ;;  %v5996_v45 = vadd.f32 %v5823_v40, %v9406_v63 }
 0x376   : > { %6144 = vrot.lane.b32.xlu1 %v9896_v0, %s7342_s20  ;;  %5882 = vrot.lane.b32.xlu0 %v5739_v43, %s7343_s21  ;;  %v5741_v63 = vrot.slane %v9881_v47, 7  ;;  %v5753_v58 = vrot.slane %v9912_v39, 7  ;;  %v5756_v14 = vrot.slane %v9945_v2, 7  ;;  %v5748_v13 = vsel %vm9267_vm4, %v5746_v44, %v5747_v5 }
 0x377   : > { %v6253_v30 = vadd.f32 %v9837_v25, %v5997_v1  ;;  %v6252_v16 = vadd.f32 %v6079_v8, %v5996_v45  ;;  %v6521_v12 = vcombine.low %v6341_v9, %v6342_v57  ;;  %v5464_v8 = vcombine.high %v9376_v61, %v9376_v61 }
 0x378   : > { %v6089_v54 = vpop.permute.xlu1 %6088  ;;  %v5827_v7 = vpop.permute.xlu0 %5826  ;;  %v5742_v34 = vsel %vm9267_vm4, %v5740_v53, %v5741_v63  ;;  %v5743_v19 = vrot.slane %v5741_v63, 2  ;;  %v5752_v40 = vrot.slane %v5750_v50, 2  ;;  %v5749_v43 = vrot.slane %v5747_v5, 2  ;;  %v10344_v63 = vld [vmem:[#allocation4_spill] sm:$0xff] }
 0x379   : > { %v6344_v48 = vadd.f32 %v9684_v10, %v6253_v30  ;;  %v6343_v24 = vadd.f32 %v9669_v55, %v6252_v16  ;;  %v6529_v32 = vrot.slane %v6521_v12, %v7433_v11  ;;  %v9940_v15 = vrot.slane %v5464_v8, %v7433_v11  ;;  %v10343_v16 = vld [vmem:[#allocation6_spill] sm:$0xff] }
 0x37a   : > { %6148 = vrot.lane.b32.xlu1 %v9912_v39, %s7342_s20  ;;  %6142 = vrot.lane.b32.xlu0 %v9916_v59, %s7342_s20  ;;  %v5998_v28 = vadd.f32 %v5827_v7, %v9414_v60  ;;  %v5745_v60 = vsel %vm9267_vm4, %v5743_v19, %v5744_v41  ;;  %v5758_v45 = vrot.slane %v5756_v14, 2  ;;  %v5755_v30 = vrot.slane %v5753_v58, 2 }
 0x37b   : > { %v6522_v25 = vcombine.low %v6343_v24, %v6344_v48  ;;  %v5754_v48 = vsel %vm9267_vm4, %v5752_v40, %v5753_v58  ;;  %v5759_v53 = vrot.slane %v9940_v15, 7 }
 0x37c   : > { %v5829_v21 = vpop.permute.xlu1 %5828  ;;  %v6087_v18 = vpop.permute.xlu0 %6086  ;;  %v6254_v57 = vadd.f32 %v9867_v42, %v5998_v28  ;;  %v5751_v42 = vsel %vm9267_vm4, %v5749_v43, %v5750_v50  ;;  %v5757_v44 = vsel %vm9267_vm4, %v5755_v30, %v5756_v14  ;;  %v10346_v50 = vld [vmem:[#allocation5_spill] sm:$0xff]  ;;  %v10349_v30 = vld [vmem:[#allocation3_spill] sm:$0xff] }
 0x37d   : > { %v6536_v6 = vrot.slane %v6522_v25, %v7433_v11  ;;  %v5999_v36 = vadd.f32 %v5829_v21, %v9440_v22  ;;  %v10345_v25 = vld [vmem:[#allocation2_spill] sm:$0xff] }
 0x37e   : > { %5884 = vrot.lane.b32.xlu1 %v5742_v34, %s7343_s21  ;;  %6146 = vrot.lane.b32.xlu0 %v9929_v52, %s7342_s20  ;;  %v6345_v24 = vadd.f32 %v9661_v35, %v6254_v57  ;;  %v5481_v8 = vcombine.high %v10345_v25, %v10345_v25 }
 0x37f   : > { %v6537_v61 = vcombine.low %v6529_v32, %v6536_v6  ;;  %v6255_v22 = vadd.f32 %v9865_v17, %v5999_v36  ;;  %v9983_v6 = vrot.slane %v10345_v25, %v7433_v11  ;;  %v5760_v36 = vsel %vm9267_vm4, %v5758_v45, %v5759_v53 }
 0x380   : > { %v6093_v51 = vpop.permute.xlu1 %6092  ;;  %v6091_v46 = vpop.permute.xlu0 %6090  ;;  %v9996_v58 = vrot.slane %v5481_v8, %v7433_v11  ;;  %v10027_v25 = vcombine.high %v9940_v15, %v9940_v15  ;;  %v5498_v8 = vcombine.high %v10349_v30, %v10349_v30 }
 0x381   : > { %6746 = vst.msk [vmem:[%s9736_s12 + $0x20] sm:$0xff] %vm6741_vm0, %v6537_v61  ;;  %v6346_v17 = vadd.f32 %v9680_v27, %v6255_v22  ;;  %v10003_v40 = vcombine.high %v9983_v6, %v9983_v6 }
 0x382   : > { %6152 = vrot.lane.b32.xlu1 %v9940_v15, %s7342_s20  ;;  %6150 = vrot.lane.b32.xlu0 %v9945_v2, %s7342_s20 }
 0x383   : > { %v6538_v34 = vcombine.low %v6345_v24, %v6346_v17  ;;  %v10350_v24 = vld [vmem:[#allocation8_spill] sm:$0xff]  ;;  %v5766_v15 = vrot.slane %v10003_v40, 7 }
 0x384   : > { %v6097_v33 = vpop.permute.xlu1 %6096  ;;  %v9957_v49 = vpop.permute.xlu0 %6094 }
 0x386   : > { %5888 = vrot.lane.b32.xlu1 %v5748_v13, %s7343_s21  ;;  %5886 = vrot.lane.b32.xlu0 %v5745_v60, %s7343_s21  ;;  %v6546_v13 = vrot.slane %v6538_v34, %v7433_v11 }
 0x388   : > { %v5833_v9 = vpop.permute.xlu1 %5832  ;;  %v5831_v1 = vpop.permute.xlu0 %5830 }
 0x389   : > { %v6001_v7 = vadd.f32 %v5833_v9, %v10343_v16  ;;  %v6000_v12 = vadd.f32 %v5831_v1, %v10344_v63  ;;  %v10348_v9 = vld [vmem:[#allocation7_spill] sm:$0xff]  ;;  %v10013_v16 = vrot.slane %v10349_v30, %v7433_v11 }
 0x38a   : > { %5892 = vrot.lane.b32.xlu1 %v5754_v48, %s7343_s21  ;;  %5890 = vrot.lane.b32.xlu0 %v5751_v42, %s7343_s21 }
 0x38b   : > { %v6257_v21 = vadd.f32 %v6089_v54, %v6001_v7  ;;  %v6256_v32 = vadd.f32 %v6087_v18, %v6000_v12  ;;  %v10347_v18 = vld [vmem:[#allocation10_spill] sm:$0xff]  ;;  %v10017_v12 = vcombine.high %v9996_v58, %v9996_v58 }
 0x38c   : > { %v5837_v41 = vpop.permute.xlu1 %5836  ;;  %v5835_v61 = vpop.permute.xlu0 %5834 }
 0x38d   : > { %v6348_v5 = vadd.f32 %v9684_v10, %v6257_v21  ;;  %v6347_v19 = vadd.f32 %v9669_v55, %v6256_v32  ;;  %v6003_v54 = vadd.f32 %v5837_v41, %v10346_v50  ;;  %v6002_v28 = vadd.f32 %v5835_v61, %v10347_v18 }
 0x38e   : > { %5896 = vrot.lane.b32.xlu1 %v5760_v36, %s7343_s21  ;;  %5894 = vrot.lane.b32.xlu0 %v5757_v44, %s7343_s21  ;;  %v5769_v41 = vrot.slane %v9996_v58, 7 }
 0x38f   : > { %v6539_v22 = vcombine.low %v6347_v19, %v6348_v5  ;;  %v6259_v57 = vadd.f32 %v6093_v51, %v6003_v54  ;;  %v6258_v17 = vadd.f32 %v6091_v46, %v6002_v28  ;;  %v5763_v51 = vrot.slane %v9983_v6, 7 }
 0x390   : > { %v5841_v14 = vpop.permute.xlu1 %5840  ;;  %v9999_v60 = vpop.permute.xlu0 %6098  ;;  %v10050_v19 = vrot.slane %v5498_v8, %v7433_v11 }
 0x391   : > { %v6553_v43 = vrot.slane %v6539_v22, %v7433_v11  ;;  %v6005_v1 = vadd.f32 %v5841_v14, %v10348_v9  ;;  %v6350_v46 = vadd.f32 %v9680_v27, %v6259_v57  ;;  %v6349_v48 = vadd.f32 %v9661_v35, %v6258_v17 }
 0x392   : > { %6156 = vrot.lane.b32.xlu1 %v10003_v40, %s7342_s20  ;;  %6154 = vrot.lane.b32.xlu0 %v9983_v6, %s7342_s20  ;;  %v5765_v5 = vrot.slane %v5763_v51, 2  ;;  %v5771_v22 = vrot.slane %v5769_v41, 2  ;;  %v5775_v14 = vrot.slane %v10013_v16, 7  ;;  %v5768_v9 = vrot.slane %v5766_v15, 2 }
 0x393   : > { %v6554_v45 = vcombine.low %v6546_v13, %v6553_v43  ;;  %v6261_v42 = vadd.f32 %v6097_v33, %v6005_v1  ;;  %v10038_v33 = vcombine.high %v10013_v16, %v10013_v16  ;;  %v6555_v61 = vcombine.low %v6349_v48, %v6350_v46 }
 0x394   : > { %v6101_v7 = vpop.permute.xlu1 %6100  ;;  %v5839_v63 = vpop.permute.xlu0 %5838  ;;  %v5772_v13 = vrot.slane %v10017_v12, 7  ;;  %v5767_v17 = vsel %vm9267_vm4, %v5765_v5, %v5766_v15  ;;  %v5514_v48 = vcombine.high %v10050_v19, %v10050_v19  ;;  %v5770_v8 = vsel %vm9267_vm4, %v5768_v9, %v5769_v41  ;;  %v10352_v15 = vld [vmem:[#allocation9_spill] sm:$0xff] }
 0x395   : > { %6747 = vst.msk [vmem:[%s9736_s12 + $0x28] sm:$0xff] %vm6741_vm0, %v6554_v45  ;;  %v6004_v53 = vadd.f32 %v5839_v63, %v10350_v24  ;;  %v6352_v36 = vadd.f32 %v9684_v10, %v6261_v42  ;;  %v6563_v43 = vrot.slane %v6555_v61, %v7433_v11  ;;  %v5777_v63 = vrot.slane %v5775_v14, 2  ;;  %v10351_v42 = vld [vmem:[#allocation11_spill] sm:$0xff] }
 0x396   : > { %6160 = vrot.lane.b32.xlu1 %v10017_v12, %s7342_s20  ;;  %6158 = vrot.lane.b32.xlu0 %v9996_v58, %s7342_s20  ;;  %v5774_v46 = vrot.slane %v5772_v13, 2 }
 0x397   : > { %v6260_v21 = vadd.f32 %v9957_v49, %v6004_v53  ;;  %v6969_v49 = vrot.slane %v10027_v25, 9  ;;  %v5773_v53 = vsel %vm9267_vm4, %v5771_v22, %v5772_v13  ;;  %v10353_v22 = vld [vmem:[#allocation12_spill] sm:$0xff] }
 0x398   : > { %v6105_v32 = vpop.permute.xlu1 %6104  ;;  %v6103_v34 = vpop.permute.xlu0 %6102  ;;  %v5776_v5 = vsel %vm9267_vm4, %v5774_v46, %v5775_v14 }
 0x399   : > { %v6351_v44 = vadd.f32 %v9669_v55, %v6260_v21  ;;  %v5764_v28 = vsel %vm9267_vm4, %v6969_v49, %v5763_v51  ;;  %v5778_v51 = vrot.slane %v10038_v33, 7  ;;  %v5781_v21 = vrot.slane %v10050_v19, 7 }
 0x39a   : > { %6164 = vrot.lane.b32.xlu1 %v10038_v33, %s7342_s20  ;;  %6162 = vrot.lane.b32.xlu0 %v10013_v16, %s7342_s20  ;;  %v5784_v49 = vrot.slane %v5514_v48, 7 }
 0x39b   : > { %v6556_v50 = vcombine.low %v6351_v44, %v6352_v36  ;;  %v5779_v41 = vsel %vm9267_vm4, %v5777_v63, %v5778_v51 }
 0x39c   : > { %v10052_v54 = vpop.permute.xlu1 %6108  ;;  %v5843_v18 = vpop.permute.xlu0 %5842 }
 0x39d   : > { %v6570_v57 = vrot.slane %v6556_v50, %v7433_v11  ;;  %v6006_v61 = vadd.f32 %v5843_v18, %v10352_v15  ;;  %v5780_v50 = vrot.slane %v5778_v51, 2 }
 0x39e   : > { %5900 = vrot.lane.b32.xlu1 %v5767_v17, %s7343_s21  ;;  %5898 = vrot.lane.b32.xlu0 %v5764_v28, %s7343_s21 }
 0x39f   : > { %v6571_v1 = vcombine.low %v6563_v43, %v6570_v57  ;;  %v5783_v43 = vrot.slane %v5781_v21, 2  ;;  %v6262_v18 = vadd.f32 %v9999_v60, %v6006_v61  ;;  %v5782_v14 = vsel %vm9267_vm4, %v5780_v50, %v5781_v21  ;;  %v10355_v61 = vld [vmem:[#allocation16_spill] sm:$0xff] }
 0x3a0   : > { %v5845_v45 = vpop.permute.xlu1 %5844  ;;  %v6107_v30 = vpop.permute.xlu0 %6106 }
 0x3a1   : > { %6748 = vst.msk [vmem:[%s9736_s12 + $0x30] sm:$0xff] %vm6741_vm0, %v6571_v1  ;;  %v6007_v24 = vadd.f32 %v5845_v45, %v10351_v42  ;;  %v10354_v1 = vld [vmem:[#allocation13_spill] sm:$0xff]  ;;  %v5785_v63 = vsel %vm9267_vm4, %v5783_v43, %v5784_v49  ;;  %v6353_v51 = vadd.f32 %v9661_v35, %v6262_v18 }
 0x3a2   : > { %5904 = vrot.lane.b32.xlu1 %v5773_v53, %s7343_s21  ;;  %5902 = vrot.lane.b32.xlu0 %v5770_v8, %s7343_s21 }
 0x3a3   : > { %v6263_v28 = vadd.f32 %v6101_v7, %v6007_v24 }
 0x3a4   : > { %v5849_v36 = vpop.permute.xlu1 %5848  ;;  %v6111_v44 = vpop.permute.xlu0 %6110 }
 0x3a5   : > { %v6009_v13 = vadd.f32 %v5849_v36, %v10353_v22  ;;  %v6354_v9 = vadd.f32 %v9680_v27, %v6263_v28 }
 0x3a6   : > { %5908 = vrot.lane.b32.xlu1 %v5779_v41, %s7343_s21  ;;  %5906 = vrot.lane.b32.xlu0 %v5776_v5, %s7343_s21  ;;  %v10356_v5 = vld [vmem:[#allocation14_spill] sm:$0xff]  ;;  %v10357_v41 = vld [vmem:[#allocation15_spill] sm:$0xff] }
 0x3a7   : > { %v6265_v7 = vadd.f32 %v6105_v32, %v6009_v13  ;;  %v6572_v24 = vcombine.low %v6353_v51, %v6354_v9 }
 0x3a8   : > { %v6113_v57 = vpop.permute.xlu1 %6112  ;;  %v5847_v17 = vpop.permute.xlu0 %5846 }
 0x3a9   : > { %v6008_v45 = vadd.f32 %v5847_v17, %v10354_v1  ;;  %v6356_v53 = vadd.f32 %v9684_v10, %v6265_v7  ;;  %v6580_v15 = vrot.slane %v6572_v24, %v7433_v11  ;;  %v10358_v1 = vld [vmem:[#allocation17_spill] sm:$0xff] }
 0x3aa   : > { %5912 = vrot.lane.b32.xlu1 %v5785_v63, %s7343_s21  ;;  %5910 = vrot.lane.b32.xlu0 %v5782_v14, %s7343_s21 }
 0x3ab   : > { %v6264_v60 = vadd.f32 %v6103_v34, %v6008_v45 }
 0x3ac   : > { %v5853_v46 = vpop.permute.xlu1 %5852  ;;  %v5851_v42 = vpop.permute.xlu0 %5850 }
 0x3ad   : > { %v6355_v32 = vadd.f32 %v9669_v55, %v6264_v60  ;;  %v6011_v36 = vadd.f32 %v5853_v46, %v10355_v61  ;;  %v6010_v49 = vadd.f32 %v5851_v42, %v10356_v5 }
 0x3ae   : > { %6168 = vrot.lane.b32.xlu1 %v5514_v48, %s7342_s20  ;;  %6166 = vrot.lane.b32.xlu0 %v10050_v19, %s7342_s20 }
 0x3af   : > { %v6573_v4 = vcombine.low %v6355_v32, %v6356_v53  ;;  %v6267_v48 = vadd.f32 %v10052_v54, %v6011_v36  ;;  %v6266_v13 = vadd.f32 %v6107_v30, %v6010_v49 }
 0x3b0   : > { %v6117_v8 = vpop.permute.xlu1 %6116  ;;  %v5855_v21 = vpop.permute.xlu0 %5854 }
 0x3b1   : > { %v6587_v34 = vrot.slane %v6573_v4, %v7433_v11  ;;  %v6012_v43 = vadd.f32 %v5855_v21, %v10357_v41  ;;  %v6358_v14 = vadd.f32 %v9680_v27, %v6267_v48  ;;  %v6357_v9 = vadd.f32 %v9661_v35, %v6266_v13  ;;  %v10359_v21 = vld [vmem:[#allocation20_spill] sm:$0xff]  ;;  %v10361_v13 = vld [vmem:[#allocation21_spill] sm:$0xff] }
 0x3b3   : > { %v6588_v50 = vcombine.low %v6580_v15, %v6587_v34  ;;  %v6268_v7 = vadd.f32 %v6111_v44, %v6012_v43  ;;  %v6589_v46 = vcombine.low %v6357_v9, %v6358_v14  ;;  %v10360_v15 = vld [vmem:[#allocation18_spill] sm:$0xff]  ;;  %v10362_v43 = vld [vmem:[#allocation19_spill] sm:$0xff] }
 0x3b4   : > { %v6121_v28 = vpop.permute.xlu1 %6120  ;;  %v6115_v22 = vpop.permute.xlu0 %6114 }
 0x3b5   : > { %6749 = vst.msk [vmem:[%s9736_s12 + $0x38] sm:$0xff] %vm6741_vm0, %v6588_v50  ;;  %v6359_v42 = vadd.f32 %v9669_v55, %v6268_v7  ;;  %v6597_v32 = vrot.slane %v6589_v46, %v7433_v11 }
 0x3b8   : > { %v5857_v18 = vpop.permute.xlu1 %5856  ;;  %v6119_v17 = vpop.permute.xlu0 %6118 }
 0x3b9   : > { %v6013_v45 = vadd.f32 %v5857_v18, %v10358_v1 }
 0x3bb   : > { %v6269_v63 = vadd.f32 %v6113_v57, %v6013_v45 }
 0x3bc   : > { %v6125_v51 = vpop.permute.xlu1 %6124  ;;  %v6123_v60 = vpop.permute.xlu0 %6122 }
 0x3bd   : > { %v6360_v54 = vadd.f32 %v9684_v10, %v6269_v63 }
 0x3bf   : > { %v6590_v30 = vcombine.low %v6359_v42, %v6360_v54 }
 0x3c0   : > { %v5861_v24 = vpop.permute.xlu1 %5860  ;;  %v5859_v53 = vpop.permute.xlu0 %5858 }
 0x3c1   : > { %v6604_v4 = vrot.slane %v6590_v30, %v7433_v11  ;;  %v6015_v44 = vadd.f32 %v5861_v24, %v10359_v21  ;;  %v6014_v34 = vadd.f32 %v5859_v53, %v10360_v15 }
 0x3c3   : > { %v6605_v57 = vcombine.low %v6597_v32, %v6604_v4  ;;  %v6271_v61 = vadd.f32 %v6117_v8, %v6015_v44  ;;  %v6270_v36 = vadd.f32 %v6115_v22, %v6014_v34 }
 0x3c4   : > { %v5865_v5 = vpop.permute.xlu1 %5864  ;;  %v5863_v49 = vpop.permute.xlu0 %5862 }
 0x3c5   : > { %6750 = vst.msk [vmem:[%s9736_s12 + $0x40] sm:$0xff] %vm6741_vm0, %v6605_v57  ;;  %v6362_v50 = vadd.f32 %v9680_v27, %v6271_v61  ;;  %v6361_v48 = vadd.f32 %v9661_v35, %v6270_v36  ;;  %v6017_v41 = vadd.f32 %v5865_v5, %v10361_v13  ;;  %v6016_v18 = vadd.f32 %v5863_v49, %v10362_v43 }
 0x3c7   : > { %v6273_v14 = vadd.f32 %v6121_v28, %v6017_v41  ;;  %v6272_v9 = vadd.f32 %v6119_v17, %v6016_v18  ;;  %v6606_v45 = vcombine.low %v6361_v48, %v6362_v50 }
 0x3c8   : > { %v5869_v7 = vpop.permute.xlu1 %5868  ;;  %v5867_v1 = vpop.permute.xlu0 %5866 }
 0x3c9   : > { %v6364_v8 = vadd.f32 %v9684_v10, %v6273_v14  ;;  %v6363_v22 = vadd.f32 %v9669_v55, %v6272_v9  ;;  %v6614_v54 = vrot.slane %v6606_v45, %v7433_v11  ;;  %v6019_v28 = vadd.f32 %v5869_v7, %v9676_v31 }
 0x3ca   : > { %v6018_v17 = vadd.f32 %v5867_v1, %v9721_v23 }
 0x3cb   : > { %v6607_v63 = vcombine.low %v6363_v22, %v6364_v8  ;;  %v6275_v44 = vadd.f32 %v6125_v51, %v6019_v28 }
 0x3cc   : > { %v6129_v46 = vpop.permute.xlu1 %6128  ;;  %v6127_v42 = vpop.permute.xlu0 %6126  ;;  %v6274_v15 = vadd.f32 %v6123_v60, %v6018_v17 }
 0x3cd   : > { %v6621_v30 = vrot.slane %v6607_v63, %v7433_v11  ;;  %v6366_v61 = vadd.f32 %v9680_v27, %v6275_v44 }
 0x3ce   : > { %v6365_v36 = vadd.f32 %v9661_v35, %v6274_v15 }
 0x3cf   : > { %v6622_v24 = vcombine.low %v6614_v54, %v6621_v30 }
 0x3d0   : > { %v6133_v53 = vpop.permute.xlu1 %6132  ;;  %v6131_v32 = vpop.permute.xlu0 %6130  ;;  %v6623_v41 = vcombine.low %v6365_v36, %v6366_v61 }
 0x3d1   : > { %6751 = vst.msk [vmem:[%s9736_s12 + $0x48] sm:$0xff] %vm6741_vm0, %v6622_v24 }
 0x3d2   : > { %v6631_v9 = vrot.slane %v6623_v41, %v7433_v11 }
 0x3d4   : > { %v6137_v4 = vpop.permute.xlu1 %6136  ;;  %v6135_v21 = vpop.permute.xlu0 %6134 }
 0x3d8   : > { %v5873_v34 = vpop.permute.xlu1 %5872  ;;  %v5871_v57 = vpop.permute.xlu0 %5870 }
 0x3d9   : > { %v6021_v5 = vadd.f32 %v5873_v34, %v9760_v56  ;;  %v6020_v49 = vadd.f32 %v5871_v57, %v9705_v3 }
 0x3db   : > { %v6277_v50 = vadd.f32 %v6129_v46, %v6021_v5  ;;  %v6276_v48 = vadd.f32 %v6127_v42, %v6020_v49 }
 0x3dc   : > { %v5877_v13 = vpop.permute.xlu1 %5876  ;;  %v6139_v31 = vpop.permute.xlu0 %6138 }
 0x3dd   : > { %v6368_v23 = vadd.f32 %v9684_v10, %v6277_v50  ;;  %v6367_v51 = vadd.f32 %v9669_v55, %v6276_v48  ;;  %v6023_v43 = vadd.f32 %v5877_v13, %v9780_v38 }
 0x3df   : > { %v6624_v60 = vcombine.low %v6367_v51, %v6368_v23  ;;  %v6279_v45 = vadd.f32 %v6133_v53, %v6023_v43 }
 0x3e0   : > { %v5881_v18 = vpop.permute.xlu1 %5880  ;;  %v5875_v14 = vpop.permute.xlu0 %5874 }
 0x3e1   : > { %v6638_v56 = vrot.slane %v6624_v60, %v7433_v11  ;;  %v6025_v3 = vadd.f32 %v5881_v18, %v9800_v37  ;;  %v6022_v7 = vadd.f32 %v5875_v14, %v9787_v29  ;;  %v6370_v54 = vadd.f32 %v9680_v27, %v6279_v45 }
 0x3e3   : > { %v6639_v1 = vcombine.low %v6631_v9, %v6638_v56  ;;  %v6278_v8 = vadd.f32 %v6131_v32, %v6022_v7  ;;  %v6281_v46 = vadd.f32 %v6137_v4, %v6025_v3 }
 0x3e4   : > { %v6141_v22 = vpop.permute.xlu1 %6140  ;;  %v5879_v63 = vpop.permute.xlu0 %5878 }
 0x3e5   : > { %6752 = vst.msk [vmem:[%s9736_s12 + $0x50] sm:$0xff] %vm6741_vm0, %v6639_v1  ;;  %v6369_v38 = vadd.f32 %v9661_v35, %v6278_v8  ;;  %v6024_v42 = vadd.f32 %v5879_v63, %v9805_v62  ;;  %v6372_v29 = vadd.f32 %v9684_v10, %v6281_v46 }
 0x3e7   : > { %v6280_v30 = vadd.f32 %v6135_v21, %v6024_v42  ;;  %v6640_v28 = vcombine.low %v6369_v38, %v6370_v54 }
 0x3e8   : > { %v6145_v24 = vpop.permute.xlu1 %6144  ;;  %v5883_v37 = vpop.permute.xlu0 %5882 }
 0x3e9   : > { %v6371_v53 = vadd.f32 %v9669_v55, %v6280_v30  ;;  %v6648_v4 = vrot.slane %v6640_v28, %v7433_v11  ;;  %v6026_v61 = vadd.f32 %v5883_v37, %v9835_v26 }
 0x3eb   : > { %v6641_v32 = vcombine.low %v6371_v53, %v6372_v29  ;;  %v6282_v50 = vadd.f32 %v6139_v31, %v6026_v61 }
 0x3ec   : > { %v6149_v17 = vpop.permute.xlu1 %6148  ;;  %v6143_v44 = vpop.permute.xlu0 %6142 }
 0x3ed   : > { %v6655_v15 = vrot.slane %v6641_v32, %v7433_v11  ;;  %v6373_v60 = vadd.f32 %v9661_v35, %v6282_v50 }
 0x3ef   : > { %v6656_v34 = vcombine.low %v6648_v4, %v6655_v15 }
 0x3f0   : > { %v5885_v62 = vpop.permute.xlu1 %5884  ;;  %v6147_v57 = vpop.permute.xlu0 %6146 }
 0x3f1   : > { %6753 = vst.msk [vmem:[%s9736_s12 + $0x58] sm:$0xff] %vm6741_vm0, %v6656_v34  ;;  %v6027_v21 = vadd.f32 %v5885_v62, %v9856_v20 }
 0x3f3   : > { %v6283_v36 = vadd.f32 %v6141_v22, %v6027_v21 }
 0x3f4   : > { %v6153_v5 = vpop.permute.xlu1 %6152  ;;  %v6151_v49 = vpop.permute.xlu0 %6150 }
 0x3f5   : > { %v6374_v48 = vadd.f32 %v9680_v27, %v6283_v36 }
 0x3f7   : > { %v6657_v14 = vcombine.low %v6373_v60, %v6374_v48 }
 0x3f8   : > { %v5889_v13 = vpop.permute.xlu1 %5888  ;;  %v5887_v41 = vpop.permute.xlu0 %5886 }
 0x3f9   : > { %v6029_v23 = vadd.f32 %v5889_v13, %v9916_v59  ;;  %v6028_v51 = vadd.f32 %v5887_v41, %v9881_v47  ;;  %v6665_v8 = vrot.slane %v6657_v14, %v7433_v11 }
 0x3fb   : > { %v6285_v43 = vadd.f32 %v6145_v24, %v6029_v23  ;;  %v6284_v18 = vadd.f32 %v6143_v44, %v6028_v51 }
 0x3fc   : > { %v5893_v20 = vpop.permute.xlu1 %5892  ;;  %v5891_v9 = vpop.permute.xlu0 %5890 }
 0x3fd   : > { %v6376_v26 = vadd.f32 %v9684_v10, %v6285_v43  ;;  %v6375_v56 = vadd.f32 %v9669_v55, %v6284_v18  ;;  %v6031_v31 = vadd.f32 %v5893_v20, %v9929_v52  ;;  %v6030_v3 = vadd.f32 %v5891_v9, %v9896_v0 }
 0x3ff   : > { %v6658_v7 = vcombine.low %v6375_v56, %v6376_v26  ;;  %v6287_v59 = vadd.f32 %v6149_v17, %v6031_v31  ;;  %v6286_v1 = vadd.f32 %v6147_v57, %v6030_v3 }
 0x400   : > { %v5897_v47 = vpop.permute.xlu1 %5896  ;;  %v5895_v45 = vpop.permute.xlu0 %5894 }
 0x401   : > { %v6672_v22 = vrot.slane %v6658_v7, %v7433_v11  ;;  %v6033_v63 = vadd.f32 %v5897_v47, %v9945_v2  ;;  %v6378_v46 = vadd.f32 %v9680_v27, %v6287_v59  ;;  %v6377_v38 = vadd.f32 %v9661_v35, %v6286_v1 }
 0x402   : > { %v6032_v52 = vadd.f32 %v5895_v45, %v9912_v39 }
 0x403   : > { %v6673_v42 = vcombine.low %v6665_v8, %v6672_v22  ;;  %v6289_v0 = vadd.f32 %v6153_v5, %v6033_v63  ;;  %v6674_v29 = vcombine.low %v6377_v38, %v6378_v46 }
 0x404   : > { %v6288_v54 = vadd.f32 %v6151_v49, %v6032_v52  ;;  %v6157_v30 = vpop.permute.xlu1 %6156  ;;  %v6155_v24 = vpop.permute.xlu0 %6154 }
 0x405   : > { %6754 = vst.msk [vmem:[%s9736_s12 + $0x60] sm:$0xff] %vm6741_vm0, %v6673_v42  ;;  %v6380_v37 = vadd.f32 %v9684_v10, %v6289_v0  ;;  %v6682_v17 = vrot.slane %v6674_v29, %v7433_v11 }
 0x406   : > { %v6379_v28 = vadd.f32 %v9669_v55, %v6288_v54 }
 0x408   : > { %v6675_v2 = vcombine.low %v6379_v28, %v6380_v37  ;;  %v6161_v53 = vpop.permute.xlu1 %6160  ;;  %v6159_v32 = vpop.permute.xlu0 %6158 }
 0x40a   : > { %v6689_v39 = vrot.slane %v6675_v2, %v7433_v11 }
 0x40c   : > { %v6690_v44 = vcombine.low %v6682_v17, %v6689_v39  ;;  %v6165_v4 = vpop.permute.xlu1 %6164  ;;  %v6163_v15 = vpop.permute.xlu0 %6162 }
 0x40e   : > { %6755 = vst.msk [vmem:[%s9736_s12 + $0x68] sm:$0xff] %vm6741_vm0, %v6690_v44 }
 0x410   : > { %v5901_v34 = vpop.permute.xlu1 %5900  ;;  %v5899_v62 = vpop.permute.xlu0 %5898 }
 0x411   : > { %v6035_v57 = vadd.f32 %v5901_v34, %v9983_v6  ;;  %v6034_v21 = vadd.f32 %v5899_v62, %v10027_v25 }
 0x413   : > { %v6291_v61 = vadd.f32 %v6157_v30, %v6035_v57  ;;  %v6290_v36 = vadd.f32 %v6155_v24, %v6034_v21 }
 0x414   : > { %v5905_v5 = vpop.permute.xlu1 %5904  ;;  %v5903_v49 = vpop.permute.xlu0 %5902 }
 0x415   : > { %v6382_v50 = vadd.f32 %v9680_v27, %v6291_v61  ;;  %v6381_v48 = vadd.f32 %v9661_v35, %v6290_v36  ;;  %v6037_v13 = vadd.f32 %v5905_v5, %v9996_v58  ;;  %v6036_v41 = vadd.f32 %v5903_v49, %v10003_v40 }
 0x417   : > { %v6293_v23 = vadd.f32 %v6161_v53, %v6037_v13  ;;  %v6292_v51 = vadd.f32 %v6159_v32, %v6036_v41  ;;  %v6691_v18 = vcombine.low %v6381_v48, %v6382_v50 }
 0x418   : > { %v5909_v60 = vpop.permute.xlu1 %5908  ;;  %v5907_v43 = vpop.permute.xlu0 %5906 }
 0x419   : > { %v6384_v6 = vadd.f32 %v9684_v10, %v6293_v23  ;;  %v6383_v25 = vadd.f32 %v9669_v55, %v6292_v51  ;;  %v6039_v14 = vadd.f32 %v5909_v60, %v10013_v16  ;;  %v6038_v20 = vadd.f32 %v5907_v43, %v10017_v12 }
 0x41a   : > { %v6699_v40 = vrot.slane %v6691_v18, %v7433_v11 }
 0x41b   : > { %v6692_v9 = vcombine.low %v6383_v25, %v6384_v6  ;;  %v6295_v26 = vadd.f32 %v6165_v4, %v6039_v14  ;;  %v6294_v56 = vadd.f32 %v6163_v15, %v6038_v20 }
 0x41c   : > { %v5913_v58 = vpop.permute.xlu1 %5912  ;;  %v5911_v31 = vpop.permute.xlu0 %5910 }
 0x41d   : > { %v6706_v3 = vrot.slane %v6692_v9, %v7433_v11  ;;  %v6386_v7 = vadd.f32 %v9680_v27, %v6295_v26  ;;  %v6385_v1 = vadd.f32 %v9661_v35, %v6294_v56  ;;  %v6041_v16 = vadd.f32 %v5913_v58, %v10050_v19 }
 0x41e   : > { %v6040_v47 = vadd.f32 %v5911_v31, %v10038_v33 }
 0x41f   : > { %v6707_v59 = vcombine.low %v6699_v40, %v6706_v3  ;;  %v6708_v63 = vcombine.low %v6385_v1, %v6386_v7 }
 0x420   : > { %v6169_v12 = vpop.permute.xlu1 %6168  ;;  %v6167_v45 = vpop.permute.xlu0 %6166 }
 0x421   : > { %6756 = vst.msk [vmem:[%s9736_s12 + $0x70] sm:$0xff] %vm6741_vm0, %v6707_v59  ;;  %v6297_v8 = vadd.f32 %v6169_v12, %v6041_v16  ;;  %v6296_v22 = vadd.f32 %v6167_v45, %v6040_v47  ;;  %v6716_v52 = vrot.slane %v6708_v63, %v7433_v11 }
 0x423   : > { %v6388_v46 = vadd.f32 %v9684_v10, %v6297_v8  ;;  %v6387_v38 = vadd.f32 %v9669_v55, %v6296_v22 }
 0x425   : > { %v6709_v27 = vcombine.low %v6387_v38, %v6388_v46 }
 0x427   : > { %v6723_v35 = vrot.slane %v6709_v27, %v7433_v11 }
 0x429   : > { %v6724_v42 = vcombine.low %v6716_v52, %v6723_v35 }
 0x42b   : > { %6757 = vst.msk [vmem:[%s9736_s12 + $0x78] sm:$0xff] %vm6741_vm0, %v6724_v42 }
 0x42c PF: > { %s17_s28 = sadd.s32 1, %s7336_s28   ;;  %s10363_s24 = smov %s7328_s26 }
 0x42d   : > { %p14_p8 = scmp.ge.s32.totalorder %s17_s28, 6   ;;  %s10364_s25 = smov %s7332_s27 }
 0x42e   : > { %s10365_s26 = smov %s10368_s29  ;;  %s10366_s27 = smov %s10372_s30 }
 0x42f   :  { %16 = sbr.rel (!%p14_p8) target bundleno = 3 (0x3), region = 80 }

</bundles_post_ra>
